<compile_context>
chip_gen: v5e
topology: v5e:2x2
jax: 0.10.0
libtpu: 0.0.40
codegen_flags: <defaults>
</compile_context>

<pallas_src>
import functools

import numpy as np
import jax
import jax.numpy as jnp
from jax import lax
from jax.experimental import pallas as pl
from jax.experimental.pallas import tpu as pltpu


# small synthetic sizes consistent with the module's forward
C_IN = 4        # input channels
C_FEAT = 32     # backbone feature channels (stands in for 2048)
C_AGG = 16      # ConvAP out_channels (stands in for 512)
S1, S2 = 2, 2   # ConvAP adaptive-pool output spatial size


# ----------------------------- Pallas kernel -------------------------------


def _conv3x3_fold(pad_ref, w_ref, b_ref, h, w, residual=None):
    """3x3 conv (stride 1, pad 1) from a zero-haloed VMEM buffer.

    The 9 taps are folded into the contraction dim: build the (h*w, 9*cin)
    patch matrix in VMEM and do ONE bf16 MXU dot against the (9*cin, cout)
    weight, accumulating in f32.  Bias (+residual) + ReLU epilogue in f32.
    """
    xv = pad_ref[...]                                   # (h+2, w+2, cin) bf16
    cin = xv.shape[-1]
    taps = [xv[dy:dy + h, dx:dx + w, :] for dy in range(3) for dx in range(3)]
    patch = jnp.concatenate(taps, axis=-1).reshape(h * w, 9 * cin)   # bf16
    acc = jnp.dot(patch, w_ref[...], preferred_element_type=jnp.float32)
    acc = acc + b_ref[...]                              # f32 bias
    if residual is not None:
        acc = acc + residual                            # f32 residual add
    return jnp.maximum(acc, 0.0)                        # fused ReLU, (h*w, cout) f32


def _store_padded(pad_ref, val_hwc, h, w):
    """Write an (h, w, c) activation into the interior of a zero-halo VMEM
    buffer (padding never touches HBM)."""
    pad_ref[1:h + 1, 1:w + 1, :] = val_hwc.astype(pad_ref.dtype)


def _vpr_fused_kernel(x_ref, ws_ref, bs_ref, w1_ref, b1_ref, w2_ref, b2_ref,
                      wa_ref, ba_ref, o_ref, pad_x, pad_f, *, h, w, s1, s2):
    """Full VPR forward for one image: 3 fused convs + residual -> adaptive
    avg-pool -> 1x1 conv -> L2 norm.  Everything stays in VMEM."""
    # Zero halos every grid step (tiny buffers; keeps the halo correct even if
    # the batch axis is sharded across TensorCores).
    pad_x[...] = jnp.zeros_like(pad_x)
    pad_f[...] = jnp.zeros_like(pad_f)

    cf = pad_f.shape[-1]

    # ---- backbone: stem conv + one residual block (BN folded) -------------
    _store_padded(pad_x, x_ref[0], h, w)
    y = _conv3x3_fold(pad_x, ws_ref, bs_ref, h, w)            # (h*w, cf) f32

    _store_padded(pad_f, y.reshape(h, w, cf), h, w)
    z = _conv3x3_fold(pad_f, w1_ref, b1_ref, h, w)

    _store_padded(pad_f, z.reshape(h, w, cf), h, w)           # halo still zero
    z = _conv3x3_fold(pad_f, w2_ref, b2_ref, h, w, residual=y)

    # ---- aggregator: ConvAP, algebraically reordered (pool -> 1x1 conv),
    #      fused into the same kernel -------------------------------------
    # TODO(synk): assumes H % S1 == 0 and W % S2 == 0 (PyTorch
    # AdaptiveAvgPool2d also supports uneven windows for non-divisible sizes).
    z = z.reshape(h, w, cf)
    wh, ww = h // s1, w // s2
    inv_area = 1.0 / float(wh * ww)
    cells = []
    for i in range(s1):
        for j in range(s2):
            win = z[i * wh:(i + 1) * wh, j * ww:(j + 1) * ww, :]
            win = win.reshape(wh * ww, cf)
            cells.append(jnp.sum(win, axis=0, keepdims=True) * inv_area)
    pooled = jnp.concatenate(cells, axis=0)                   # (s1*s2, cf) f32

    # un-expanded 1x1-conv weight (block-diagonal formulation)
    d = jnp.dot(pooled, wa_ref[...], preferred_element_type=jnp.float32)
    d = d + ba_ref[...]                                       # (s1*s2, c_agg)

    # F.normalize(p=2, dim=1, eps=1e-12) over the whole descriptor; the norm
    # is permutation-invariant so the flatten-order reorder happens outside.
    ss = jnp.sum(d * d, axis=-1, keepdims=True)
    ss = jnp.sum(ss, axis=0, keepdims=True)
    d = d * lax.rsqrt(jnp.maximum(ss, 1e-24))
    o_ref[...] = d.reshape(1, s1 * s2, -1)


# ------------------------------ kernel wrapper ------------------------------


def vpr_forward(x_nchw, p):
    """VPRModel.forward: backbone -> ConvAP aggregator. Input NCHW (PyTorch)."""
    x = jnp.transpose(x_nchw, (0, 2, 3, 1)).astype(jnp.bfloat16)   # -> NHWC bf16
    n, h, w, cin = x.shape
    cf = p["b1_w"].shape[1]
    c_agg = p["agg_w"].shape[1]
    kk = S1 * S2

    kern = functools.partial(_vpr_fused_kernel, h=h, w=w, s1=S1, s2=S2)
    out = pl.pallas_call(
        kern,
        out_shape=jax.ShapeDtypeStruct((n, kk, c_agg), jnp.float32),
        grid=(n,),
        in_specs=[
            pl.BlockSpec((1, h, w, cin), lambda b: (b, 0, 0, 0)),      # image
            pl.BlockSpec(p["stem_w"].shape, lambda b: (0, 0)),         # stem W
            pl.BlockSpec(p["stem_b"].shape, lambda b: (0, 0)),
            pl.BlockSpec(p["b1_w"].shape, lambda b: (0, 0)),           # block W1
            pl.BlockSpec(p["b1_b"].shape, lambda b: (0, 0)),
            pl.BlockSpec(p["b2_w"].shape, lambda b: (0, 0)),           # block W2
            pl.BlockSpec(p["b2_b"].shape, lambda b: (0, 0)),
            pl.BlockSpec(p["agg_w"].shape, lambda b: (0, 0)),          # ConvAP W
            pl.BlockSpec(p["agg_b"].shape, lambda b: (0, 0)),
        ],
        out_specs=pl.BlockSpec((1, kk, c_agg), lambda b: (b, 0, 0)),
        scratch_shapes=[
            pltpu.VMEM((h + 2, w + 2, cin), jnp.bfloat16),   # padded input
            pltpu.VMEM((h + 2, w + 2, cf), jnp.bfloat16),    # padded activation (reused)
        ],
        compiler_params=pltpu.CompilerParams(
            dimension_semantics=("parallel",)),
    )(x, p["stem_w"], p["stem_b"], p["b1_w"], p["b1_b"],
      p["b2_w"], p["b2_b"], p["agg_w"], p["agg_b"])

    # (N, cell, channel) -> PyTorch flatten order (N, C_AGG*S1*S2).
    # Tiny (2 x 4 x 16) metadata-level permutation, done once outside.
    return jnp.transpose(out, (0, 2, 1)).reshape(n, c_agg * kk)


# ------------------------------- params / ref -------------------------------


def fold_bn(w, gamma, beta, mean, var, eps=1e-5):
    """Fold BatchNorm (inference) into conv weight/bias. w: (Cout,Cin,kh,kw)."""
    s = gamma / jnp.sqrt(var + eps)
    return w * s[:, None, None, None], beta - mean * s


def conv_w_to_folded_taps(w):
    """(Cout,Cin,3,3) -> (9*Cin, Cout); contraction index = (dy*3+dx)*Cin + c."""
    cout, cin = w.shape[0], w.shape[1]
    return jnp.transpose(w, (2, 3, 1, 0)).reshape(9 * cin, cout)


def conv_bn_folded(key, cin, cout, ksize=3):
    kw, kg, kb, km, kv = jax.random.split(key, 5)
    w = jax.random.normal(kw, (cout, cin, ksize, ksize), jnp.float32)
    w = w * (1.0 / np.sqrt(cin * ksize * ksize))
    gamma = 1.0 + 0.1 * jax.random.normal(kg, (cout,), jnp.float32)
    beta = 0.1 * jax.random.normal(kb, (cout,), jnp.float32)
    mean = 0.1 * jax.random.normal(km, (cout,), jnp.float32)
    var = 1.0 + 0.1 * jax.random.uniform(kv, (cout,), jnp.float32)
    return fold_bn(w, gamma, beta, mean, var)


def init_params(key):
    """Returns (kernel params, full-precision reference params)."""
    k = jax.random.split(key, 4)
    p, rp = {}, {}
    for name, kk_, cin in (("stem", k[0], C_IN),
                           ("b1", k[1], C_FEAT),
                           ("b2", k[2], C_FEAT)):
        w, b = conv_bn_folded(kk_, cin, C_FEAT)
        p[name + "_w"] = conv_w_to_folded_taps(w).astype(jnp.bfloat16)
        p[name + "_b"] = b.reshape(1, C_FEAT).astype(jnp.float32)
        rp[name + "_w"], rp[name + "_b"] = w, b

    kw, kb = jax.random.split(k[3])
    w = jax.random.normal(kw, (C_AGG, C_FEAT, 1, 1), jnp.float32) / np.sqrt(C_FEAT)
    b = 0.01 * jax.random.normal(kb, (C_AGG,), jnp.float32)
    p["agg_w"] = jnp.transpose(w[:, :, 0, 0]).astype(jnp.float32)   # (C_FEAT, C_AGG)
    p["agg_b"] = b.reshape(1, C_AGG).astype(jnp.float32)
    rp["agg_w"], rp["agg_b"] = w, b
    return p, rp


def vpr_forward_ref(x_nchw, rp):
    """Pure-JAX f32 reference of the same forward (for a tolerance check)."""
    def conv(x, w, b):
        y = lax.conv_general_dilated(
            x, w, window_strides=(1, 1), padding="SAME",
            dimension_numbers=("NCHW", "OIHW", "NCHW"),
            precision=lax.Precision.HIGHEST)
        return y + b[None, :, None, None]

    y = jax.nn.relu(conv(x_nchw, rp["stem_w"], rp["stem_b"]))
    z = jax.nn.relu(conv(y, rp["b1_w"], rp["b1_b"]))
    z = jax.nn.relu(conv(z, rp["b2_w"], rp["b2_b"]) + y)
    a = conv(z, rp["agg_w"], rp["agg_b"])                  # 1x1 conv (bias)
    n, c, h, w = a.shape
    a = a.reshape(n, c, S1, h // S1, S2, w // S2).mean(axis=(3, 5))
    a = a.reshape(n, -1)                                   # flatten(1)
    nrm = jnp.maximum(jnp.linalg.norm(a, axis=1, keepdims=True), 1e-12)
    return a / nrm                                         # L2 normalize


if __name__ == "__main__":
    N, H, W = 2, 16, 16
    x = jax.random.normal(jax.random.PRNGKey(0), (N, C_IN, H, W), jnp.float32)
    params, ref_params = init_params(jax.random.PRNGKey(1))

    out = jax.jit(vpr_forward)(x, params)
    out = jax.block_until_ready(out)

    assert out.shape == (N, C_AGG * S1 * S2), out.shape
    assert bool(jnp.all(jnp.isfinite(out)))
    norms = jnp.linalg.norm(out, axis=1)
    assert bool(jnp.all(jnp.abs(norms - 1.0) < 1e-3)), norms

    # tolerance check vs the pure-JAX f32 reference (bf16 MXU operands drift)
    ref = vpr_forward_ref(x, ref_params)
    max_err = float(jnp.max(jnp.abs(out - ref)))
    assert max_err < 3e-2, max_err

    print("KERNEL_OK")
</pallas_src>

<mosaic_0001>
module attributes {stable_mosaic.version = 11 : i64} {
  func.func @_vpr_fused_kernel(%arg0: i32, %arg1: memref<1x16x16x4xbf16, #tpu.memory_space<vmem>>, %arg2: memref<36x32xbf16, #tpu.memory_space<vmem>>, %arg3: memref<1x32xf32, #tpu.memory_space<vmem>>, %arg4: memref<288x32xbf16, #tpu.memory_space<vmem>>, %arg5: memref<1x32xf32, #tpu.memory_space<vmem>>, %arg6: memref<288x32xbf16, #tpu.memory_space<vmem>>, %arg7: memref<1x32xf32, #tpu.memory_space<vmem>>, %arg8: memref<32x16xf32, #tpu.memory_space<vmem>>, %arg9: memref<1x16xf32, #tpu.memory_space<vmem>>, %arg10: memref<1x4x16xf32, #tpu.memory_space<vmem>>, %arg11: memref<18x18x4xbf16, #tpu.memory_space<vmem>>, %arg12: memref<18x18x32xbf16, #tpu.memory_space<vmem>>) attributes {dimension_semantics = [#tpu.dimension_semantics<parallel>], iteration_bounds = array<i64: 2>, scalar_prefetch = 0 : i64, scratch_operands = 2 : i64, tpu.core_type = #tpu.core_type<tc>, window_params = [{transform_indices = @transform_0, window_bounds = array<i64: 1, 16, 16, 4>}, {pipeline_mode = #tpu.pipeline_mode<synchronous>, transform_indices = @transform_1, window_bounds = array<i64: 36, 32>}, {pipeline_mode = #tpu.pipeline_mode<synchronous>, transform_indices = @transform_2, window_bounds = array<i64: 1, 32>}, {pipeline_mode = #tpu.pipeline_mode<synchronous>, transform_indices = @transform_3, window_bounds = array<i64: 288, 32>}, {pipeline_mode = #tpu.pipeline_mode<synchronous>, transform_indices = @transform_4, window_bounds = array<i64: 1, 32>}, {pipeline_mode = #tpu.pipeline_mode<synchronous>, transform_indices = @transform_5, window_bounds = array<i64: 288, 32>}, {pipeline_mode = #tpu.pipeline_mode<synchronous>, transform_indices = @transform_6, window_bounds = array<i64: 1, 32>}, {pipeline_mode = #tpu.pipeline_mode<synchronous>, transform_indices = @transform_7, window_bounds = array<i64: 32, 16>}, {pipeline_mode = #tpu.pipeline_mode<synchronous>, transform_indices = @transform_8, window_bounds = array<i64: 1, 16>}, {transform_indices = @transform_9, window_bounds = array<i64: 1, 4, 16>}]} {
    %cst = arith.constant 0.000000e+00 : bf16
    %0 = vector.broadcast %cst : bf16 to vector<18x18x4xbf16>
    %c0 = arith.constant 0 : index
    %c0_0 = arith.constant 0 : index
    %c0_1 = arith.constant 0 : index
    %1 = vector.load %arg11[%c0, %c0_0, %c0_1] : memref<18x18x4xbf16, #tpu.memory_space<vmem>>, vector<18x18x4xbf16>
    tpu.vector_store %arg11[%c0, %c0_0, %c0_1], %0 {strides = array<i32>} : memref<18x18x4xbf16, #tpu.memory_space<vmem>>, vector<18x18x4xbf16>,
    %cst_2 = arith.constant 0.000000e+00 : bf16
    %2 = vector.broadcast %cst_2 : bf16 to vector<18x18x32xbf16>
    %c0_3 = arith.constant 0 : index
    %c0_4 = arith.constant 0 : index
    %c0_5 = arith.constant 0 : index
    %3 = vector.load %arg12[%c0_3, %c0_4, %c0_5] : memref<18x18x32xbf16, #tpu.memory_space<vmem>>, vector<18x18x32xbf16>
    tpu.vector_store %arg12[%c0_3, %c0_4, %c0_5], %2 {strides = array<i32>} : memref<18x18x32xbf16, #tpu.memory_space<vmem>>, vector<18x18x32xbf16>,
    %c0_6 = arith.constant 0 : index
    %c0_7 = arith.constant 0 : index
    %c0_8 = arith.constant 0 : index
    %c0_9 = arith.constant 0 : index
    %4 = vector.load %arg1[%c0_6, %c0_7, %c0_8, %c0_9] : memref<1x16x16x4xbf16, #tpu.memory_space<vmem>>, vector<1x16x16x4xbf16>
    %5 = vector.shape_cast %4 : vector<1x16x16x4xbf16> to vector<16x16x4xbf16>
    %c1 = arith.constant 1 : index
    %c1_10 = arith.constant 1 : index
    %c0_11 = arith.constant 0 : index
    %6 = vector.load %arg11[%c1, %c1_10, %c0_11] : memref<18x18x4xbf16, #tpu.memory_space<vmem>>, vector<16x16x4xbf16>
    tpu.vector_store %arg11[%c1, %c1_10, %c0_11], %5 {strides = array<i32>} : memref<18x18x4xbf16, #tpu.memory_space<vmem>>, vector<16x16x4xbf16>,
    %c0_12 = arith.constant 0 : index
    %c0_13 = arith.constant 0 : index
    %c0_14 = arith.constant 0 : index
    %7 = vector.load %arg11[%c0_12, %c0_13, %c0_14] : memref<18x18x4xbf16, #tpu.memory_space<vmem>>, vector<18x18x4xbf16>
    %8 = vector.extract_strided_slice %7 {offsets = [0, 0, 0], sizes = [16, 16, 4], strides = [1, 1, 1]} : vector<18x18x4xbf16> to vector<16x16x4xbf16>
    %9 = vector.extract_strided_slice %7 {offsets = [0, 1, 0], sizes = [16, 16, 4], strides = [1, 1, 1]} : vector<18x18x4xbf16> to vector<16x16x4xbf16>
    %10 = vector.extract_strided_slice %7 {offsets = [0, 2, 0], sizes = [16, 16, 4], strides = [1, 1, 1]} : vector<18x18x4xbf16> to vector<16x16x4xbf16>
    %11 = vector.extract_strided_slice %7 {offsets = [1, 0, 0], sizes = [16, 16, 4], strides = [1, 1, 1]} : vector<18x18x4xbf16> to vector<16x16x4xbf16>
    %12 = vector.extract_strided_slice %7 {offsets = [1, 1, 0], sizes = [16, 16, 4], strides = [1, 1, 1]} : vector<18x18x4xbf16> to vector<16x16x4xbf16>
    %13 = vector.extract_strided_slice %7 {offsets = [1, 2, 0], sizes = [16, 16, 4], strides = [1, 1, 1]} : vector<18x18x4xbf16> to vector<16x16x4xbf16>
    %14 = vector.extract_strided_slice %7 {offsets = [2, 0, 0], sizes = [16, 16, 4], strides = [1, 1, 1]} : vector<18x18x4xbf16> to vector<16x16x4xbf16>
    %15 = vector.extract_strided_slice %7 {offsets = [2, 1, 0], sizes = [16, 16, 4], strides = [1, 1, 1]} : vector<18x18x4xbf16> to vector<16x16x4xbf16>
    %16 = vector.extract_strided_slice %7 {offsets = [2, 2, 0], sizes = [16, 16, 4], strides = [1, 1, 1]} : vector<18x18x4xbf16> to vector<16x16x4xbf16>
    %17 = tpu.concatenate %8, %9, %10, %11, %12, %13, %14, %15, %16 in 2 : vector<16x16x4xbf16>, vector<16x16x4xbf16>, vector<16x16x4xbf16>, vector<16x16x4xbf16>, vector<16x16x4xbf16>, vector<16x16x4xbf16>, vector<16x16x4xbf16>, vector<16x16x4xbf16>, vector<16x16x4xbf16> -> vector<16x16x36xbf16>
    %18 = vector.shape_cast %17 : vector<16x16x36xbf16> to vector<256x36xbf16>
    %c0_15 = arith.constant 0 : index
    %c0_16 = arith.constant 0 : index
    %19 = vector.load %arg2[%c0_15, %c0_16] : memref<36x32xbf16, #tpu.memory_space<vmem>>, vector<36x32xbf16>
    %cst_17 = arith.constant dense<0.000000e+00> : vector<256x32xf32>
    %20 = tpu.matmul %18, %19, %cst_17 {dimension_numbers = #tpu.dot_dimension_numbers<[1], [0], [0], [1], [0, 0, 1, 1], [], []>} : vector<256x36xbf16>, vector<36x32xbf16>, vector<256x32xf32> -> vector<256x32xf32>
    %c0_18 = arith.constant 0 : index
    %c0_19 = arith.constant 0 : index
    %21 = vector.load %arg3[%c0_18, %c0_19] : memref<1x32xf32, #tpu.memory_space<vmem>>, vector<1x32xf32>
    %22 = vector.broadcast %21 : vector<1x32xf32> to vector<256x32xf32>
    %23 = arith.addf %20, %22 : vector<256x32xf32>
    %cst_20 = arith.constant 0.000000e+00 : f32
    %24 = vector.broadcast %cst_20 : f32 to vector<256x32xf32>
    %25 = arith.maximumf %23, %24 : vector<256x32xf32>
    %26 = vector.shape_cast %25 : vector<256x32xf32> to vector<16x16x32xf32>
    %27 = arith.truncf %26 : vector<16x16x32xf32> to vector<16x16x32xbf16>
    %c1_21 = arith.constant 1 : index
    %c1_22 = arith.constant 1 : index
    %c0_23 = arith.constant 0 : index
    %28 = vector.load %arg12[%c1_21, %c1_22, %c0_23] : memref<18x18x32xbf16, #tpu.memory_space<vmem>>, vector<16x16x32xbf16>
    tpu.vector_store %arg12[%c1_21, %c1_22, %c0_23], %27 {strides = array<i32>} : memref<18x18x32xbf16, #tpu.memory_space<vmem>>, vector<16x16x32xbf16>,
    %c0_24 = arith.constant 0 : index
    %c0_25 = arith.constant 0 : index
    %c0_26 = arith.constant 0 : index
    %29 = vector.load %arg12[%c0_24, %c0_25, %c0_26] : memref<18x18x32xbf16, #tpu.memory_space<vmem>>, vector<18x18x32xbf16>
    %30 = vector.extract_strided_slice %29 {offsets = [0, 0, 0], sizes = [16, 16, 32], strides = [1, 1, 1]} : vector<18x18x32xbf16> to vector<16x16x32xbf16>
    %31 = vector.extract_strided_slice %29 {offsets = [0, 1, 0], sizes = [16, 16, 32], strides = [1, 1, 1]} : vector<18x18x32xbf16> to vector<16x16x32xbf16>
    %32 = vector.extract_strided_slice %29 {offsets = [0, 2, 0], sizes = [16, 16, 32], strides = [1, 1, 1]} : vector<18x18x32xbf16> to vector<16x16x32xbf16>
    %33 = vector.extract_strided_slice %29 {offsets = [1, 0, 0], sizes = [16, 16, 32], strides = [1, 1, 1]} : vector<18x18x32xbf16> to vector<16x16x32xbf16>
    %34 = vector.extract_strided_slice %29 {offsets = [1, 1, 0], sizes = [16, 16, 32], strides = [1, 1, 1]} : vector<18x18x32xbf16> to vector<16x16x32xbf16>
    %35 = vector.extract_strided_slice %29 {offsets = [1, 2, 0], sizes = [16, 16, 32], strides = [1, 1, 1]} : vector<18x18x32xbf16> to vector<16x16x32xbf16>
    %36 = vector.extract_strided_slice %29 {offsets = [2, 0, 0], sizes = [16, 16, 32], strides = [1, 1, 1]} : vector<18x18x32xbf16> to vector<16x16x32xbf16>
    %37 = vector.extract_strided_slice %29 {offsets = [2, 1, 0], sizes = [16, 16, 32], strides = [1, 1, 1]} : vector<18x18x32xbf16> to vector<16x16x32xbf16>
    %38 = vector.extract_strided_slice %29 {offsets = [2, 2, 0], sizes = [16, 16, 32], strides = [1, 1, 1]} : vector<18x18x32xbf16> to vector<16x16x32xbf16>
    %39 = tpu.concatenate %30, %31, %32, %33, %34, %35, %36, %37, %38 in 2 : vector<16x16x32xbf16>, vector<16x16x32xbf16>, vector<16x16x32xbf16>, vector<16x16x32xbf16>, vector<16x16x32xbf16>, vector<16x16x32xbf16>, vector<16x16x32xbf16>, vector<16x16x32xbf16>, vector<16x16x32xbf16> -> vector<16x16x288xbf16>
    %40 = vector.shape_cast %39 : vector<16x16x288xbf16> to vector<256x288xbf16>
    %c0_27 = arith.constant 0 : index
    %c0_28 = arith.constant 0 : index
    %41 = vector.load %arg4[%c0_27, %c0_28] : memref<288x32xbf16, #tpu.memory_space<vmem>>, vector<288x32xbf16>
    %cst_29 = arith.constant dense<0.000000e+00> : vector<256x32xf32>
    %42 = tpu.matmul %40, %41, %cst_29 {dimension_numbers = #tpu.dot_dimension_numbers<[1], [0], [0], [1], [0, 0, 1, 1], [], []>} : vector<256x288xbf16>, vector<288x32xbf16>, vector<256x32xf32> -> vector<256x32xf32>
    %c0_30 = arith.constant 0 : index
    %c0_31 = arith.constant 0 : index
    %43 = vector.load %arg5[%c0_30, %c0_31] : memref<1x32xf32, #tpu.memory_space<vmem>>, vector<1x32xf32>
    %44 = vector.broadcast %43 : vector<1x32xf32> to vector<256x32xf32>
    %45 = arith.addf %42, %44 : vector<256x32xf32>
    %cst_32 = arith.constant 0.000000e+00 : f32
    %46 = vector.broadcast %cst_32 : f32 to vector<256x32xf32>
    %47 = arith.maximumf %45, %46 : vector<256x32xf32>
    %48 = vector.shape_cast %47 : vector<256x32xf32> to vector<16x16x32xf32>
    %49 = arith.truncf %48 : vector<16x16x32xf32> to vector<16x16x32xbf16>
    %c1_33 = arith.constant 1 : index
    %c1_34 = arith.constant 1 : index
    %c0_35 = arith.constant 0 : index
    %50 = vector.load %arg12[%c1_33, %c1_34, %c0_35] : memref<18x18x32xbf16, #tpu.memory_space<vmem>>, vector<16x16x32xbf16>
    tpu.vector_store %arg12[%c1_33, %c1_34, %c0_35], %49 {strides = array<i32>} : memref<18x18x32xbf16, #tpu.memory_space<vmem>>, vector<16x16x32xbf16>,
    %c0_36 = arith.constant 0 : index
    %c0_37 = arith.constant 0 : index
    %c0_38 = arith.constant 0 : index
    %51 = vector.load %arg12[%c0_36, %c0_37, %c0_38] : memref<18x18x32xbf16, #tpu.memory_space<vmem>>, vector<18x18x32xbf16>
    %52 = vector.extract_strided_slice %51 {offsets = [0, 0, 0], sizes = [16, 16, 32], strides = [1, 1, 1]} : vector<18x18x32xbf16> to vector<16x16x32xbf16>
    %53 = vector.extract_strided_slice %51 {offsets = [0, 1, 0], sizes = [16, 16, 32], strides = [1, 1, 1]} : vector<18x18x32xbf16> to vector<16x16x32xbf16>
    %54 = vector.extract_strided_slice %51 {offsets = [0, 2, 0], sizes = [16, 16, 32], strides = [1, 1, 1]} : vector<18x18x32xbf16> to vector<16x16x32xbf16>
    %55 = vector.extract_strided_slice %51 {offsets = [1, 0, 0], sizes = [16, 16, 32], strides = [1, 1, 1]} : vector<18x18x32xbf16> to vector<16x16x32xbf16>
    %56 = vector.extract_strided_slice %51 {offsets = [1, 1, 0], sizes = [16, 16, 32], strides = [1, 1, 1]} : vector<18x18x32xbf16> to vector<16x16x32xbf16>
    %57 = vector.extract_strided_slice %51 {offsets = [1, 2, 0], sizes = [16, 16, 32], strides = [1, 1, 1]} : vector<18x18x32xbf16> to vector<16x16x32xbf16>
    %58 = vector.extract_strided_slice %51 {offsets = [2, 0, 0], sizes = [16, 16, 32], strides = [1, 1, 1]} : vector<18x18x32xbf16> to vector<16x16x32xbf16>
    %59 = vector.extract_strided_slice %51 {offsets = [2, 1, 0], sizes = [16, 16, 32], strides = [1, 1, 1]} : vector<18x18x32xbf16> to vector<16x16x32xbf16>
    %60 = vector.extract_strided_slice %51 {offsets = [2, 2, 0], sizes = [16, 16, 32], strides = [1, 1, 1]} : vector<18x18x32xbf16> to vector<16x16x32xbf16>
    %61 = tpu.concatenate %52, %53, %54, %55, %56, %57, %58, %59, %60 in 2 : vector<16x16x32xbf16>, vector<16x16x32xbf16>, vector<16x16x32xbf16>, vector<16x16x32xbf16>, vector<16x16x32xbf16>, vector<16x16x32xbf16>, vector<16x16x32xbf16>, vector<16x16x32xbf16>, vector<16x16x32xbf16> -> vector<16x16x288xbf16>
    %62 = vector.shape_cast %61 : vector<16x16x288xbf16> to vector<256x288xbf16>
    %c0_39 = arith.constant 0 : index
    %c0_40 = arith.constant 0 : index
    %63 = vector.load %arg6[%c0_39, %c0_40] : memref<288x32xbf16, #tpu.memory_space<vmem>>, vector<288x32xbf16>
    %cst_41 = arith.constant dense<0.000000e+00> : vector<256x32xf32>
    %64 = tpu.matmul %62, %63, %cst_41 {dimension_numbers = #tpu.dot_dimension_numbers<[1], [0], [0], [1], [0, 0, 1, 1], [], []>} : vector<256x288xbf16>, vector<288x32xbf16>, vector<256x32xf32> -> vector<256x32xf32>
    %c0_42 = arith.constant 0 : index
    %c0_43 = arith.constant 0 : index
    %65 = vector.load %arg7[%c0_42, %c0_43] : memref<1x32xf32, #tpu.memory_space<vmem>>, vector<1x32xf32>
    %66 = vector.broadcast %65 : vector<1x32xf32> to vector<256x32xf32>
    %67 = arith.addf %64, %66 : vector<256x32xf32>
    %68 = arith.addf %67, %25 : vector<256x32xf32>
    %cst_44 = arith.constant 0.000000e+00 : f32
    %69 = vector.broadcast %cst_44 : f32 to vector<256x32xf32>
    %70 = arith.maximumf %68, %69 : vector<256x32xf32>
    %71 = vector.shape_cast %70 : vector<256x32xf32> to vector<16x16x32xf32>
    %72 = vector.extract_strided_slice %71 {offsets = [0, 0, 0], sizes = [8, 8, 32], strides = [1, 1, 1]} : vector<16x16x32xf32> to vector<8x8x32xf32>
    %73 = vector.shape_cast %72 : vector<8x8x32xf32> to vector<64x32xf32>
    %cst_45 = arith.constant dense<0.000000e+00> : vector<32xf32>
    %74 = vector.multi_reduction <add>, %73, %cst_45 [0] : vector<64x32xf32> to vector<32xf32>
    %75 = vector.shape_cast %74 : vector<32xf32> to vector<1x32xf32>
    %cst_46 = arith.constant 1.562500e-02 : f32
    %76 = vector.broadcast %cst_46 : f32 to vector<1x32xf32>
    %77 = arith.mulf %75, %76 : vector<1x32xf32>
    %78 = vector.extract_strided_slice %71 {offsets = [0, 8, 0], sizes = [8, 8, 32], strides = [1, 1, 1]} : vector<16x16x32xf32> to vector<8x8x32xf32>
    %79 = vector.shape_cast %78 : vector<8x8x32xf32> to vector<64x32xf32>
    %cst_47 = arith.constant dense<0.000000e+00> : vector<32xf32>
    %80 = vector.multi_reduction <add>, %79, %cst_47 [0] : vector<64x32xf32> to vector<32xf32>
    %81 = vector.shape_cast %80 : vector<32xf32> to vector<1x32xf32>
    %cst_48 = arith.constant 1.562500e-02 : f32
    %82 = vector.broadcast %cst_48 : f32 to vector<1x32xf32>
    %83 = arith.mulf %81, %82 : vector<1x32xf32>
    %84 = vector.extract_strided_slice %71 {offsets = [8, 0, 0], sizes = [8, 8, 32], strides = [1, 1, 1]} : vector<16x16x32xf32> to vector<8x8x32xf32>
    %85 = vector.shape_cast %84 : vector<8x8x32xf32> to vector<64x32xf32>
    %cst_49 = arith.constant dense<0.000000e+00> : vector<32xf32>
    %86 = vector.multi_reduction <add>, %85, %cst_49 [0] : vector<64x32xf32> to vector<32xf32>
    %87 = vector.shape_cast %86 : vector<32xf32> to vector<1x32xf32>
    %cst_50 = arith.constant 1.562500e-02 : f32
    %88 = vector.broadcast %cst_50 : f32 to vector<1x32xf32>
    %89 = arith.mulf %87, %88 : vector<1x32xf32>
    %90 = vector.extract_strided_slice %71 {offsets = [8, 8, 0], sizes = [8, 8, 32], strides = [1, 1, 1]} : vector<16x16x32xf32> to vector<8x8x32xf32>
    %91 = vector.shape_cast %90 : vector<8x8x32xf32> to vector<64x32xf32>
    %cst_51 = arith.constant dense<0.000000e+00> : vector<32xf32>
    %92 = vector.multi_reduction <add>, %91, %cst_51 [0] : vector<64x32xf32> to vector<32xf32>
    %93 = vector.shape_cast %92 : vector<32xf32> to vector<1x32xf32>
    %cst_52 = arith.constant 1.562500e-02 : f32
    %94 = vector.broadcast %cst_52 : f32 to vector<1x32xf32>
    %95 = arith.mulf %93, %94 : vector<1x32xf32>
    %96 = tpu.concatenate %77, %83, %89, %95 in 0 : vector<1x32xf32>, vector<1x32xf32>, vector<1x32xf32>, vector<1x32xf32> -> vector<4x32xf32>
    %c0_53 = arith.constant 0 : index
    %c0_54 = arith.constant 0 : index
    %97 = vector.load %arg8[%c0_53, %c0_54] : memref<32x16xf32, #tpu.memory_space<vmem>>, vector<32x16xf32>
    %cst_55 = arith.constant dense<0.000000e+00> : vector<4x16xf32>
    %98 = tpu.matmul %96, %97, %cst_55 {dimension_numbers = #tpu.dot_dimension_numbers<[1], [0], [0], [1], [0, 0, 1, 1], [], []>} : vector<4x32xf32>, vector<32x16xf32>, vector<4x16xf32> -> vector<4x16xf32>
    %c0_56 = arith.constant 0 : index
    %c0_57 = arith.constant 0 : index
    %99 = vector.load %arg9[%c0_56, %c0_57] : memref<1x16xf32, #tpu.memory_space<vmem>>, vector<1x16xf32>
    %100 = vector.broadcast %99 : vector<1x16xf32> to vector<4x16xf32>
    %101 = arith.addf %98, %100 : vector<4x16xf32>
    %102 = arith.mulf %101, %101 : vector<4x16xf32>
    %cst_58 = arith.constant dense<0.000000e+00> : vector<4xf32>
    %103 = vector.multi_reduction <add>, %102, %cst_58 [1] : vector<4x16xf32> to vector<4xf32>
    %104 = vector.shape_cast %103 : vector<4xf32> to vector<4x1xf32>
    %cst_59 = arith.constant dense<0.000000e+00> : vector<1xf32>
    %105 = vector.multi_reduction <add>, %104, %cst_59 [0] : vector<4x1xf32> to vector<1xf32>
    %106 = vector.shape_cast %105 : vector<1xf32> to vector<1x1xf32>
    %cst_60 = arith.constant 1.000000e-24 : f32
    %107 = vector.broadcast %cst_60 : f32 to vector<1x1xf32>
    %108 = arith.maximumf %106, %107 : vector<1x1xf32>
    %109 = math.rsqrt %108 : vector<1x1xf32>
    %110 = vector.broadcast %109 : vector<1x1xf32> to vector<4x16xf32>
    %111 = arith.mulf %101, %110 : vector<4x16xf32>
    %112 = vector.shape_cast %111 : vector<4x16xf32> to vector<1x4x16xf32>
    %c0_61 = arith.constant 0 : index
    %c0_62 = arith.constant 0 : index
    %c0_63 = arith.constant 0 : index
    %113 = vector.load %arg10[%c0_61, %c0_62, %c0_63] : memref<1x4x16xf32, #tpu.memory_space<vmem>>, vector<1x4x16xf32>
    tpu.vector_store %arg10[%c0_61, %c0_62, %c0_63], %112 {strides = array<i32>} : memref<1x4x16xf32, #tpu.memory_space<vmem>>, vector<1x4x16xf32>,
    return
  }
  func.func @transform_0(%arg0: i32) -> (i32, i32, i32, i32) {
    %c0_i32 = arith.constant 0 : i32
    %c0_i32_0 = arith.constant 0 : i32
    %c0_i32_1 = arith.constant 0 : i32
    %c0_i32_2 = arith.constant 0 : i32
    return %arg0, %c0_i32, %c0_i32_0, %c0_i32_1 : i32, i32, i32, i32
  }
  func.func @transform_1(%arg0: i32) -> (i32, i32) {
    %c0_i32 = arith.constant 0 : i32
    %c0_i32_0 = arith.constant 0 : i32
    %c0_i32_1 = arith.constant 0 : i32
    return %c0_i32, %c0_i32_0 : i32, i32
  }
  func.func @transform_2(%arg0: i32) -> (i32, i32) {
    %c0_i32 = arith.constant 0 : i32
    %c0_i32_0 = arith.constant 0 : i32
    %c0_i32_1 = arith.constant 0 : i32
    return %c0_i32, %c0_i32_0 : i32, i32
  }
  func.func @transform_3(%arg0: i32) -> (i32, i32) {
    %c0_i32 = arith.constant 0 : i32
    %c0_i32_0 = arith.constant 0 : i32
    %c0_i32_1 = arith.constant 0 : i32
    return %c0_i32, %c0_i32_0 : i32, i32
  }
  func.func @transform_4(%arg0: i32) -> (i32, i32) {
    %c0_i32 = arith.constant 0 : i32
    %c0_i32_0 = arith.constant 0 : i32
    %c0_i32_1 = arith.constant 0 : i32
    return %c0_i32, %c0_i32_0 : i32, i32
  }
  func.func @transform_5(%arg0: i32) -> (i32, i32) {
    %c0_i32 = arith.constant 0 : i32
    %c0_i32_0 = arith.constant 0 : i32
    %c0_i32_1 = arith.constant 0 : i32
    return %c0_i32, %c0_i32_0 : i32, i32
  }
  func.func @transform_6(%arg0: i32) -> (i32, i32) {
    %c0_i32 = arith.constant 0 : i32
    %c0_i32_0 = arith.constant 0 : i32
    %c0_i32_1 = arith.constant 0 : i32
    return %c0_i32, %c0_i32_0 : i32, i32
  }
  func.func @transform_7(%arg0: i32) -> (i32, i32) {
    %c0_i32 = arith.constant 0 : i32
    %c0_i32_0 = arith.constant 0 : i32
    %c0_i32_1 = arith.constant 0 : i32
    return %c0_i32, %c0_i32_0 : i32, i32
  }
  func.func @transform_8(%arg0: i32) -> (i32, i32) {
    %c0_i32 = arith.constant 0 : i32
    %c0_i32_0 = arith.constant 0 : i32
    %c0_i32_1 = arith.constant 0 : i32
    return %c0_i32, %c0_i32_0 : i32, i32
  }
  func.func @transform_9(%arg0: i32) -> (i32, i32, i32) {
    %c0_i32 = arith.constant 0 : i32
    %c0_i32_0 = arith.constant 0 : i32
    %c0_i32_1 = arith.constant 0 : i32
    return %arg0, %c0_i32, %c0_i32_0 : i32, i32, i32
  }
}

</mosaic_0001>

<bundles_post_ra>
// kernel: vpr_forward.1
= control target key start
LH: loop header
LB: loop body
LE: loop exit
PB: predicated region body
PF: predicated region fallthrough
CT: control target
= control target key end

     0   :  { %s6688_s30 = smov 0   ;;  %s9796_s0 = inlined_call_operand.vmem [shape: bf16[2,16,16,4], index: 0, kind: input, shape index: {}]   ;;  %s9797_s1 = inlined_call_operand.vmem [shape: bf16[36,32], index: 1, kind: input, shape index: {}]   ;;  %s9798_s2 = inlined_call_operand.vmem [shape: f32[1,32], index: 2, kind: input, shape index: {}]   ;;  %s9799_s3 = inlined_call_operand.vmem [shape: bf16[288,32], index: 3, kind: input, shape index: {}]   ;;  %s9800_s4 = inlined_call_operand.vmem [shape: f32[1,32], index: 4, kind: input, shape index: {}]   ;;  %s9801_s5 = inlined_call_operand.vmem [shape: bf16[288,32], index: 5, kind: input, shape index: {}]   ;;  %s9802_s6 = inlined_call_operand.vmem [shape: f32[1,32], index: 6, kind: input, shape index: {}]   ;;  %s9803_s7 = inlined_call_operand.vmem [shape: f32[32,16], index: 7, kind: input, shape index: {}]   ;;  %s9804_s8 = inlined_call_operand.vmem [shape: f32[1,16], index: 8, kind: input, shape index: {}]   ;;  %s9805_s9 = inlined_call_operand.vmem [shape: f32[2,4,16], index: 9, kind: output, shape index: {}]  }
   0x1 LB: > { %s6049_s10 = sadd.s32 4294967295, %s6625_s30   ;;  %p6053_p0 = scmp.ge.s32.totalorder %s6625_s30, 1  ;;  %s6625_s30 = sphi %s6688_s30, %s19_s30  }
   0x2   : > { %p287_p1 = scmp.lt.s32.totalorder %s6625_s30, 3 }
   0x4   : > { %p288_p2 = pnand %p6053_p0, %p287_p1 }
   0x6   : > { %291 = sbr.rel (%p288_p2) target bundleno = 2100 (0x834), region = 56 }
   0xb   : > { %vm332_vm0 = vcmask 27648   ;;  %vm335_vm1 = vcmask 24576   ;;  %v6627_v0 = vmov 0   ;;  %vm1324_vm2 = vcmask 1046528   ;;  %s6628_s11 = smov 8   ;;  %p322_p3 = scmp.lt.s32.totalorder %s6049_s10, 1 }
   0xc   : > { %333 = vst.msk [vmem:[#allocation2] sm:$0xf] %vm332_vm0, %v6627_v0  ;;  %vm1099_vm3 = vsmask.f32 7424  ;;  %s6629_s12 = smov 4   ;;  %v9850_v28 = vmov 0 }
   0xd   : > { %334 = vst.msk [vmem:[#allocation2 + $0x4] sm:$0xf] %vm332_vm0, %v6627_v0  ;;  %s9982_s10 = smov (!%p322_p3, %s6049_s10), 1  ;;  %vm9809_vm4 = vsmask.f32 7938  ;;  %vm9808_vm9 = vcmask 257024  }
   0xe   : > { %336 = vst.msk [vmem:[#allocation2 + $0x8] sm:$0x1] %vm335_vm1, %v6627_v0  ;;  %s6476_s13 = sshll.u32 %s9982_s10, 7  ;;  %vm9807_vm5 = vsmask.f32 256  ;;  %vm6822_vm7 = vmand %vm332_vm0, %vm9809_vm4  ;;  %s6630_s17 = smov 12  }
   0xf   : > { %337 = vst.msk [vmem:[#allocation2 + $0xc] sm:$0xf] %vm332_vm0, %v6627_v0  ;;  %s6783_s16 = scalar_lea.vmem %s9796_s0, %s6476_s13  ;;  %vm477_vm6 = vsmask.f32 4368  ;;  %vm6923_vm10 = vmand %vm335_vm1, %vm9807_vm5  ;;  %s6631_s18 = smov 24   ;;  %vm9806_vm11 = vcmask 1041408  }
  0x10   : > { %338 = vst.msk [vmem:[#allocation2 + $0x10] sm:$0xf] %vm332_vm0, %v6627_v0  ;;  %v444_v15 = vld [vmem:[%s6783_s16] sm:$0xf]  ;;  %v445_v16 = vld [vmem:[%s6783_s16 + $0x4] sm:$0xf]  ;;  %vm6829_vm8 = vmor %vm9807_vm5, %vm477_vm6 }
  0x11   : > { %339 = vst.msk [vmem:[#allocation2 + $0x14] sm:$0x1] %vm335_vm1, %v6627_v0  ;;  %v480_v17 = vshrl.u32 %v444_v15, 16  ;;  %v488_v18 = vshrl.u32 %v445_v16, 16  ;;  %v483_v20 = vshll.u32 %v444_v15, 16  ;;  %v491_v22 = vshll.u32 %v445_v16, 16 }
  0x12   : > { %340 = vst.msk [vmem:[#allocation2 + $0x18] sm:$0xf] %vm332_vm0, %v6627_v0  ;;  %v9851_v28 = vsel %vm6829_vm8, 4294967295, %v9850_v28  ;;  %v446_v32 = vld [vmem:[%s6783_s16 + $0x8] sm:$0xf]  ;;  %s6632_s19 = smov 32  }
  0x13   : > { %341 = vst.msk [vmem:[#allocation2 + $0x1c] sm:$0xf] %vm332_vm0, %v6627_v0  ;;  %v482_v19 = vrot.slane %v480_v17, 7  ;;  %v6809_v21 = vrot.slane %v488_v18, 7  ;;  %v447_v33 = vld [vmem:[%s6783_s16 + $0xc] sm:$0xf] }
  0x14   : > { %v6712_v1 = vld [vmem:[#allocation2] sm:$0xff]  ;;  %342 = vst.msk [vmem:[#allocation2 + $0x20] sm:$0x1] %vm335_vm1, %v6627_v0  ;;  %v497_v34 = vshrl.u32 %v446_v32, 16  ;;  %v505_v35 = vshrl.u32 %v447_v33, 16  ;;  %v500_v38 = vshll.u32 %v446_v32, 16 }
  0x15   : > { %v919_v2 = vld [vmem:[#allocation2 + $0x8] sm:$0x1]  ;;  %343 = vst.msk [vmem:[#allocation2 + $0x24] sm:$0xf] %vm332_vm0, %v6627_v0  ;;  %v1103_v4 = vshll.u32 %v6712_v1, 16  ;;  %v1325_v6 = vrot.slane %v6712_v1, 1  ;;  %v485_v23 = vor.u32 %v483_v20, %v482_v19  ;;  %v493_v25 = vor.u32 %v491_v22, %v6809_v21 }
  0x16   : > { %v1067_v3 = vunpack.c.l.b16 %v919_v2  ;;  %344 = vst.msk [vmem:[#allocation2 + $0x28] sm:$0xf] %vm332_vm0, %v6627_v0  ;;  %v1101_v8 = vshrl.u32 %v6712_v1, 16  ;;  %v486_v24 = vrot.slane %v482_v19, 4  ;;  %v803_v27 = vld [vmem:[#allocation2 + $0xc] sm:$0xf] }
  0x17   : > { %345 = vst.msk [vmem:[#allocation2 + $0x2c] sm:$0x1] %vm335_vm1, %v6627_v0  ;;  %v1105_v9 = vrot.slane %v1103_v4, 1  ;;  %v804_v29 = vsel %vm6822_vm7, %v485_v23, %v803_v27  ;;  %v449_v36 = vld [vmem:[%s6783_s16 + $0x14] sm:$0xf]  ;;  %v499_v37 = vrot.slane %v497_v34, 7 }
  0x18   : > { %v1083_v5 = vpack.c.b16 %v1067_v3, %v1067_v3  ;;  %346 = vst.msk [vmem:[#allocation2 + $0x30] sm:$0xf] %vm332_vm0, %v6627_v0  ;;  %v494_v30 = vsel %vm6829_vm8, %v486_v24, %v493_v25  ;;  %v507_v39 = vrot.slane %v505_v35, 7  ;;  %v508_v40 = vshll.u32 %v447_v33, 16  ;;  %v448_v41 = vld [vmem:[%s6783_s16 + $0x10] sm:$0xf] }
  0x19   : > { %347 = vst.msk [vmem:[#allocation2 + $0x34] sm:$0xf] %vm332_vm0, %v6627_v0  ;;  %v1106_v12 = vor.u32 %v1105_v9, %v1101_v8  ;;  %v514_v42 = vshrl.u32 %v448_v41, 16  ;;  %v522_v43 = vshrl.u32 %v449_v36, 16  ;;  %v502_v44 = vor.u32 %v500_v38, %v499_v37  ;;  %v812_v49 = vld [vmem:[#allocation2 + $0x18] sm:$0xf] }
  0x1a   : > { %v1326_v7 = vrot.slane %v1083_v5, 1  ;;  %348 = vst.msk [vmem:[#allocation2 + $0x38] sm:$0x1] %vm335_vm1, %v6627_v0  ;;  %v1108_v10 = vshll.u32 %v1083_v5, 16  ;;  %v517_v46 = vshll.u32 %v448_v41, 16  ;;  %v503_v47 = vrot.slane %v499_v37, 4 }
  0x1b   : > { %349 = vst.msk [vmem:[#allocation2 + $0x3c] sm:$0xf] %vm332_vm0, %v6627_v0  ;;  %v516_v45 = vrot.slane %v514_v42, 7  ;;  %v510_v48 = vor.u32 %v508_v40, %v507_v39  ;;  %v525_v50 = vshll.u32 %v449_v36, 16  ;;  %v495_v51 = vrot.slane %v6809_v21, 4  ;;  %s6633_s20 = smov 20  }
  0x1c   : > { %v1327_v11 = vsel %vm1324_vm2, %v1325_v6, %v1326_v7  ;;  %350 = vst.msk [vmem:[#allocation2 + $0x40] sm:$0xf] %vm332_vm0, %v6627_v0  ;;  %v1110_v13 = vrot.slane %v1108_v10, 1  ;;  %v524_v52 = vrot.slane %v522_v43, 7  ;;  %v809_v54 = vld [vmem:[#allocation2 + $0x14] sm:$0x1]  ;;  %v813_v56 = vsel %vm6822_vm7, %v502_v44, %v812_v49 }
  0x1d   : > { %1373 = vrot.lane.b32.xlu0 %v1327_v11, %s6628_s11  ;;  %351 = vst.msk [vmem:[#allocation2 + $0x44] sm:$0x1] %vm335_vm1, %v6627_v0  ;;  %v512_v55 = vrot.slane %v507_v39, 4  ;;  %v816_v57 = vld [vmem:[#allocation2 + $0x20] sm:$0x1]  ;;  %v519_v58 = vor.u32 %v517_v46, %v516_v45  ;;  %v511_v59 = vsel %vm6829_vm8, %v503_v47, %v510_v48  ;;  %v520_v60 = vrot.slane %v516_v45, 4 }
  0x1e   : > { %352 = vst.msk [vmem:[#allocation2 + $0x48] sm:$0xf] %vm332_vm0, %v6627_v0  ;;  %v1111_v14 = vsel %vm1099_vm3, %v1106_v12, %v1110_v13  ;;  %v527_v61 = vor.u32 %v525_v50, %v524_v52  ;;  %v819_v62 = vld [vmem:[#allocation2 + $0x24] sm:$0xf]  ;;  %v810_v63 = vsel %vm6923_vm10, %v495_v51, %v809_v54  ;;  %v529_v2 = vrot.slane %v524_v52, 4  ;;  %s6634_s21 = smov 28  }
  0x1f   : > { %353 = vst.msk [vmem:[#allocation2 + $0x4c] sm:$0xf] %vm332_vm0, %v6627_v0  ;;  %v817_v3 = vsel %vm6923_vm10, %v512_v55, %v816_v57  ;;  %v823_v4 = vld [vmem:[#allocation2 + $0x2c] sm:$0x1]  ;;  %v820_v5 = vsel %vm6822_vm7, %v519_v58, %v819_v62  ;;  %v451_v8 = vld [vmem:[%s6783_s16 + $0x1c] sm:$0xf] }
  0x20   : > { %354 = vst.msk [vmem:[#allocation2 + $0x50] sm:$0x1] %vm335_vm1, %v6627_v0  ;;  %v528_v6 = vsel %vm6829_vm8, %v520_v60, %v527_v61  ;;  %v824_v7 = vsel %vm6923_vm10, %v529_v2, %v823_v4  ;;  %v450_v11 = vld [vmem:[%s6783_s16 + $0x18] sm:$0xf]  ;;  %v539_v12 = vshrl.u32 %v451_v8, 16  ;;  %v542_v27 = vshll.u32 %v451_v8, 16 }
  0x21   : > { %355 = vst.msk [vmem:[#allocation2 + $0x54] sm:$0xf] %vm332_vm0, %v6627_v0  ;;  %v534_v21 = vshll.u32 %v450_v11, 16  ;;  %v826_v37 = vld [vmem:[#allocation2 + $0x30] sm:$0xf]  ;;  %s6635_s22 = smov 16  }
  0x22   : > { %356 = vst.msk [vmem:[#allocation2 + $0x58] sm:$0xf] %vm332_vm0, %v6627_v0  ;;  %v541_v22 = vrot.slane %v539_v12, 7  ;;  %v830_v45 = vld [vmem:[#allocation2 + $0x38] sm:$0x1]  ;;  %vm1643_vm12 = vcmask 31744  }
  0x23   : > { %357 = vst.msk [vmem:[#allocation2 + $0x5c] sm:$0x1] %vm335_vm1, %v6627_v0  ;;  %v453_v57 = vld [vmem:[%s6783_s16 + $0x24] sm:$0xf]  ;;  %vm1676_vm13 = vcmask 64512   ;;  %vm1709_vm14 = vcmask 97280  }
  0x24   : > { %358 = vst.msk [vmem:[#allocation2 + $0x60] sm:$0xf] %vm332_vm0, %v6627_v0  ;;  %v546_v38 = vrot.slane %v541_v22, 4  ;;  %v544_v42 = vor.u32 %v542_v27, %v541_v22  ;;  %v556_v60 = vshrl.u32 %v453_v57, 16  ;;  %v837_v12 = vld [vmem:[#allocation2 + $0x44] sm:$0x1] }
  0x25   : > { %359 = vst.msk [vmem:[#allocation2 + $0x64] sm:$0xf] %vm332_vm0, %v6627_v0  ;;  %1292 = vrot.lane.b32.xlu0 %v1111_v14, %s6629_s12  ;;  %v531_v14 = vshrl.u32 %v450_v11, 16  ;;  %vm1742_vm15 = vcmask 130048   ;;  %vm1808_vm6 = vcmask 195584   ;;  %vm1874_vm5 = vcmask 261120  }
  0x26   : > { %360 = vst.msk [vmem:[#allocation2 + $0x68] sm:$0x1] %vm335_vm1, %v6627_v0  ;;  %v831_v52 = vsel %vm6923_vm10, %v546_v38, %v830_v45  ;;  %vm391_vm4 = vcmask 253952   ;;  %s6056_s26 = sshll.u32 %s9982_s10, 2 }
  0x27   : > { %361 = vst.msk [vmem:[#allocation2 + $0x6c] sm:$0xf] %vm332_vm0, %v6627_v0  ;;  %v533_v20 = vrot.slane %v531_v14, 7  ;;  %v833_v14 = vld [vmem:[#allocation2 + $0x3c] sm:$0xf]  ;;  %s330_s29 = scalar_lea.vmem %s9805_s9, %s6056_s26 }
  0x28   : > { %362 = vst.msk [vmem:[#allocation2 + $0x70] sm:$0xf] %vm332_vm0, %v6627_v0 }
  0x29   : > { %363 = vst.msk [vmem:[#allocation2 + $0x74] sm:$0x1] %vm335_vm1, %v6627_v0  ;;  %v536_v33 = vor.u32 %v534_v21, %v533_v20  ;;  %v537_v36 = vrot.slane %v533_v20, 4 }
  0x2a   : > { %364 = vst.msk [vmem:[#allocation2 + $0x78] sm:$0xf] %vm332_vm0, %v6627_v0 }
  0x2b   : > { %365 = vst.msk [vmem:[#allocation2 + $0x7c] sm:$0xf] %vm332_vm0, %v6627_v0  ;;  %v827_v44 = vsel %vm6822_vm7, %v536_v33, %v826_v37  ;;  %v545_v49 = vsel %vm6829_vm8, %v537_v36, %v544_v42 }
  0x2c   : > { %366 = vst.msk [vmem:[#allocation2 + $0x80] sm:$0x1] %vm335_vm1, %v6627_v0 }
  0x2d   : > { %367 = vst.msk [vmem:[#allocation2 + $0x84] sm:$0xf] %vm332_vm0, %v6627_v0 }
  0x2e   : > { %368 = vst.msk [vmem:[#allocation2 + $0x88] sm:$0xf] %vm332_vm0, %v6627_v0 }
  0x2f   : > { %369 = vst.msk [vmem:[#allocation2 + $0x8c] sm:$0x1] %vm335_vm1, %v6627_v0 }
  0x30   : > { %370 = vst.msk [vmem:[#allocation2 + $0x90] sm:$0xf] %vm332_vm0, %v6627_v0 }
  0x31   : > { %371 = vst.msk [vmem:[#allocation2 + $0x94] sm:$0xf] %vm332_vm0, %v6627_v0 }
  0x32   : > { %372 = vst.msk [vmem:[#allocation2 + $0x98] sm:$0x1] %vm335_vm1, %v6627_v0 }
  0x33   : > { %373 = vst.msk [vmem:[#allocation2 + $0x9c] sm:$0xf] %vm332_vm0, %v6627_v0 }
  0x34   : > { %374 = vst.msk [vmem:[#allocation2 + $0xa0] sm:$0xf] %vm332_vm0, %v6627_v0 }
  0x35   : > { %375 = vst.msk [vmem:[#allocation2 + $0xa4] sm:$0x1] %vm335_vm1, %v6627_v0 }
  0x36   : > { %376 = vst.msk [vmem:[#allocation2 + $0xa8] sm:$0xf] %vm332_vm0, %v6627_v0 }
  0x37   : > { %377 = vst.msk [vmem:[#allocation2 + $0xac] sm:$0xf] %vm332_vm0, %v6627_v0 }
  0x38   : > { %378 = vst.msk [vmem:[#allocation2 + $0xb0] sm:$0x1] %vm335_vm1, %v6627_v0 }
  0x39   : > { %379 = vst.msk [vmem:[#allocation2 + $0xb4] sm:$0xf] %vm332_vm0, %v6627_v0 }
  0x3a   : > { %380 = vst.msk [vmem:[#allocation2 + $0xb8] sm:$0xf] %vm332_vm0, %v6627_v0 }
  0x3b   : > { %381 = vst.msk [vmem:[#allocation2 + $0xbc] sm:$0x1] %vm335_vm1, %v6627_v0 }
  0x3c   : > { %382 = vst.msk [vmem:[#allocation2 + $0xc0] sm:$0xf] %vm332_vm0, %v6627_v0 }
  0x3d   : > { %383 = vst.msk [vmem:[#allocation2 + $0xc4] sm:$0xf] %vm332_vm0, %v6627_v0 }
  0x3e   : > { %9852 = vst [vmem:[#allocation4_spill] sm:$0xff] %v9851_v28 }
  0x3f   : > { %384 = vst.msk [vmem:[#allocation2 + $0xc8] sm:$0x1] %vm335_vm1, %v6627_v0 }
  0x40   : > { %385 = vst.msk [vmem:[#allocation2 + $0xcc] sm:$0xf] %vm332_vm0, %v6627_v0 }
  0x41   : > { %386 = vst.msk [vmem:[#allocation2 + $0xd0] sm:$0xf] %vm332_vm0, %v6627_v0 }
  0x42   : > { %387 = vst.msk [vmem:[#allocation2 + $0xd4] sm:$0x1] %vm335_vm1, %v6627_v0  ;;  %vm1775_vm1 = vcmask 162816  }
  0x43   : > { %805 = vst [vmem:[#allocation2 + $0xc] sm:$0xf] %v804_v29 }
  0x44   : > { %806 = vst.msk [vmem:[#allocation2 + $0x10] sm:$0xf] %vm332_vm0, %v494_v30 }
  0x45   : > { %389 = vst.msk [vmem:[#allocation3] sm:$0xf] %vm9808_vm9, %v6627_v0 }
  0x46   : > { %390 = vst.msk [vmem:[#allocation3 + $0x4] sm:$0xf] %vm9808_vm9, %v6627_v0 }
  0x47   : > { %393 = vst.msk [vmem:[#allocation3 + $0xc] sm:$0xf] %vm9808_vm9, %v6627_v0 }
  0x48   : > { %394 = vst.msk [vmem:[#allocation3 + $0x10] sm:$0xf] %vm9808_vm9, %v6627_v0 }
  0x49   : > { %396 = vst.msk [vmem:[#allocation3 + $0x18] sm:$0xf] %vm9808_vm9, %v6627_v0 }
  0x4a   : > { %397 = vst.msk [vmem:[#allocation3 + $0x1c] sm:$0xf] %vm9808_vm9, %v6627_v0 }
  0x4b   : > { %v6858_v31 = vld [vmem:[#allocation2 + $0xc] sm:$0xff]  ;;  %399 = vst.msk [vmem:[#allocation3 + $0x24] sm:$0xf] %vm9808_vm9, %v6627_v0 }
  0x4c   : > { %400 = vst.msk [vmem:[#allocation3 + $0x28] sm:$0xf] %vm9808_vm9, %v6627_v0  ;;  %1410 = vrot.lane.b32.xlu1 %v6858_v31, %s6630_s17  ;;  %v1115_v10 = vshll.u32 %v6858_v31, 16  ;;  %v1328_v16 = vrot.slane %v6858_v31, 1  ;;  %v1113_v24 = vshrl.u32 %v6858_v31, 16 }
  0x4d   : > { %402 = vst.msk [vmem:[#allocation3 + $0x30] sm:$0xf] %vm9808_vm9, %v6627_v0 }
  0x4e   : > { %403 = vst.msk [vmem:[#allocation3 + $0x34] sm:$0xf] %vm9808_vm9, %v6627_v0  ;;  %v1117_v25 = vrot.slane %v1115_v10, 1 }
  0x4f   : > { %405 = vst.msk [vmem:[#allocation3 + $0x3c] sm:$0xf] %vm9808_vm9, %v6627_v0 }
  0x50   : > { %406 = vst.msk [vmem:[#allocation3 + $0x40] sm:$0xf] %vm9808_vm9, %v6627_v0  ;;  %v1118_v50 = vor.u32 %v1117_v25, %v1113_v24 }
  0x51   : > { %408 = vst.msk [vmem:[#allocation3 + $0x48] sm:$0xf] %vm9808_vm9, %v6627_v0 }
  0x52   : > { %409 = vst.msk [vmem:[#allocation3 + $0x4c] sm:$0xf] %vm9808_vm9, %v6627_v0 }
  0x53   : > { %411 = vst.msk [vmem:[#allocation3 + $0x54] sm:$0xf] %vm9808_vm9, %v6627_v0 }
  0x54   : > { %412 = vst.msk [vmem:[#allocation3 + $0x58] sm:$0xf] %vm9808_vm9, %v6627_v0 }
  0x55   : > { %414 = vst.msk [vmem:[#allocation3 + $0x60] sm:$0xf] %vm9808_vm9, %v6627_v0 }
  0x56   : > { %415 = vst.msk [vmem:[#allocation3 + $0x64] sm:$0xf] %vm9808_vm9, %v6627_v0 }
  0x57   : > { %417 = vst.msk [vmem:[#allocation3 + $0x6c] sm:$0xf] %vm9808_vm9, %v6627_v0 }
  0x58   : > { %418 = vst.msk [vmem:[#allocation3 + $0x70] sm:$0xf] %vm9808_vm9, %v6627_v0 }
  0x59   : > { %420 = vst.msk [vmem:[#allocation3 + $0x78] sm:$0xf] %vm9808_vm9, %v6627_v0 }
  0x5a   : > { %421 = vst.msk [vmem:[#allocation3 + $0x7c] sm:$0xf] %vm9808_vm9, %v6627_v0 }
  0x5b   : > { %423 = vst.msk [vmem:[#allocation3 + $0x84] sm:$0xf] %vm9808_vm9, %v6627_v0 }
  0x5c   : > { %424 = vst.msk [vmem:[#allocation3 + $0x88] sm:$0xf] %vm9808_vm9, %v6627_v0 }
  0x5d   : > { %426 = vst.msk [vmem:[#allocation3 + $0x90] sm:$0xf] %vm9808_vm9, %v6627_v0 }
  0x5e   : > { %427 = vst.msk [vmem:[#allocation3 + $0x94] sm:$0xf] %vm9808_vm9, %v6627_v0 }
  0x5f   : > { %429 = vst.msk [vmem:[#allocation3 + $0x9c] sm:$0xf] %vm9808_vm9, %v6627_v0 }
  0x60   : > { %430 = vst.msk [vmem:[#allocation3 + $0xa0] sm:$0xf] %vm9808_vm9, %v6627_v0 }
  0x61   : > { %432 = vst.msk [vmem:[#allocation3 + $0xa8] sm:$0xf] %vm9808_vm9, %v6627_v0 }
  0x62   : > { %433 = vst.msk [vmem:[#allocation3 + $0xac] sm:$0xf] %vm9808_vm9, %v6627_v0 }
  0x63   : > { %435 = vst.msk [vmem:[#allocation3 + $0xb4] sm:$0xf] %vm9808_vm9, %v6627_v0 }
  0x64   : > { %436 = vst.msk [vmem:[#allocation3 + $0xb8] sm:$0xf] %vm9808_vm9, %v6627_v0 }
  0x65   : > { %438 = vst.msk [vmem:[#allocation3 + $0xc0] sm:$0xf] %vm9808_vm9, %v6627_v0 }
  0x66   : > { %439 = vst.msk [vmem:[#allocation3 + $0xc4] sm:$0xf] %vm9808_vm9, %v6627_v0 }
  0x67   : > { %441 = vst.msk [vmem:[#allocation3 + $0xcc] sm:$0xf] %vm9808_vm9, %v6627_v0 }
  0x68   : > { %442 = vst.msk [vmem:[#allocation3 + $0xd0] sm:$0xf] %vm9808_vm9, %v6627_v0  ;;  %vm1931_vm9 = vcmask 293888  }
  0x69   : > { %814 = vst [vmem:[#allocation2 + $0x18] sm:$0xf] %v813_v56 }
  0x6a   : > { %815 = vst.msk [vmem:[#allocation2 + $0x1c] sm:$0xf] %vm332_vm0, %v511_v59  ;;  %v452_v59 = vld [vmem:[%s6783_s16 + $0x20] sm:$0xf] }
  0x6b   : > { %811 = vst [vmem:[#allocation2 + $0x14] sm:$0x1] %v810_v63  ;;  %v548_v62 = vshrl.u32 %v452_v59, 16  ;;  %v558_v63 = vrot.slane %v556_v60, 7  ;;  %v551_v4 = vshll.u32 %v452_v59, 16 }
  0x6c   : > { %818 = vst [vmem:[#allocation2 + $0x20] sm:$0x1] %v817_v3 }
  0x6d   : > { %821 = vst [vmem:[#allocation2 + $0x24] sm:$0xf] %v820_v5  ;;  %v550_v3 = vrot.slane %v548_v62, 7  ;;  %v559_v5 = vshll.u32 %v453_v57, 16 }
  0x6e   : > { %822 = vst.msk [vmem:[#allocation2 + $0x28] sm:$0xf] %vm332_vm0, %v528_v6 }
  0x6f   : > { %825 = vst [vmem:[#allocation2 + $0x2c] sm:$0x1] %v824_v7  ;;  %v563_v7 = vrot.slane %v558_v63, 4  ;;  %v553_v8 = vor.u32 %v551_v4, %v550_v3  ;;  %v554_v10 = vrot.slane %v550_v3, 4  ;;  %v561_v11 = vor.u32 %v559_v5, %v558_v63 }
  0x70   : > { %828 = vst [vmem:[#allocation2 + $0x30] sm:$0xf] %v827_v44 }
  0x71   : > { %v6950_v9 = vld [vmem:[#allocation2 + $0x18] sm:$0xff]  ;;  %829 = vst.msk [vmem:[#allocation2 + $0x34] sm:$0xf] %vm332_vm0, %v545_v49 }
  0x72   : > { %v922_v13 = vld [vmem:[#allocation2 + $0x14] sm:$0x1]  ;;  %1412 = vrot.lane.b32.xlu1 %v6950_v9, %s6630_s17  ;;  %1529 = vrot.lane.b32.xlu2 %v6950_v9, %s6631_s18  ;;  %v1127_v18 = vshll.u32 %v6950_v9, 16  ;;  %v1331_v30 = vrot.slane %v6950_v9, 1  ;;  %v1125_v32 = vshrl.u32 %v6950_v9, 16 }
  0x73   : > { %v1068_v15 = vunpack.c.l.b16 %v922_v13  ;;  %v925_v17 = vld [vmem:[#allocation2 + $0x20] sm:$0x1]  ;;  %832 = vst [vmem:[#allocation2 + $0x38] sm:$0x1] %v831_v52 }
  0x74   : > { %v1069_v19 = vunpack.c.l.b16 %v925_v17  ;;  %v1129_v35 = vrot.slane %v1127_v18, 1  ;;  %v562_v18 = vsel %vm6829_vm8, %v554_v10, %v561_v11  ;;  %v456_v10 = vld [vmem:[%s6783_s16 + $0x30] sm:$0xf]  ;;  %395 = vst.msk [vmem:[#allocation3 + $0x14] sm:$0x1] %vm391_vm4, %v6627_v0 }
  0x75   : > { %v1084_v23 = vpack.c.b16 %v1068_v15, %v1068_v15  ;;  %v6985_v61 = vld [vmem:[#allocation2 + $0x24] sm:$0xff]  ;;  %v838_v15 = vsel %vm6923_vm10, %v563_v7, %v837_v12  ;;  %836 = vst.msk [vmem:[#allocation2 + $0x40] sm:$0xf] %vm332_vm0, %v562_v18  ;;  %v582_v12 = vshrl.u32 %v456_v10, 16 }
  0x76   : > { %v1085_v29 = vpack.c.b16 %v1069_v19, %v1069_v19  ;;  %v1130_v47 = vor.u32 %v1129_v35, %v1125_v32  ;;  %v928_v56 = vld [vmem:[#allocation2 + $0x2c] sm:$0x1]  ;;  %v1139_v2 = vshll.u32 %v6985_v61, 16  ;;  %v1137_v13 = vshrl.u32 %v6985_v61, 16  ;;  %839 = vst [vmem:[#allocation2 + $0x44] sm:$0x1] %v838_v15 }
  0x77   : > { %v1329_v34 = vrot.slane %v1084_v23, 1  ;;  %v1120_v41 = vshll.u32 %v1084_v23, 16  ;;  %v1070_v58 = vunpack.c.l.b16 %v928_v56  ;;  %v834_v19 = vsel %vm6822_vm7, %v553_v8, %v833_v14  ;;  %v840_v56 = vld [vmem:[#allocation2 + $0x48] sm:$0xf]  ;;  %v457_v8 = vld [vmem:[%s6783_s16 + $0x34] sm:$0xf] }
  0x78   : > { %v1332_v39 = vrot.slane %v1085_v29, 1  ;;  %v1132_v40 = vshll.u32 %v1085_v29, 16  ;;  %v1334_v20 = vrot.slane %v6985_v61, 1  ;;  %835 = vst [vmem:[#allocation2 + $0x3c] sm:$0xf] %v834_v19  ;;  %v7003_v27 = vld [vmem:[#allocation2 + $0x30] sm:$0xff] }
  0x79   : > { %v1330_v43 = vsel %vm1324_vm2, %v1328_v16, %v1329_v34  ;;  %v1122_v51 = vrot.slane %v1120_v41, 1  ;;  %v1086_v6 = vpack.c.b16 %v1070_v58, %v1070_v58  ;;  %v1141_v16 = vrot.slane %v1139_v2, 1  ;;  %v454_v41 = vld [vmem:[%s6783_s16 + $0x28] sm:$0xf]  ;;  %392 = vst.msk [vmem:[#allocation3 + $0x8] sm:$0x1] %vm391_vm4, %v6627_v0 }
  0x7a   : > { %1375 = vrot.lane.b32.xlu0 %v1330_v43, %s6628_s11  ;;  %v6968_v46 = vsel %vm1324_vm2, %v1331_v30, %v1332_v39  ;;  %v1134_v48 = vrot.slane %v1132_v40, 1  ;;  %1492 = vrot.lane.b32.xlu2 %v1330_v43, %s6633_s20  ;;  %v931_v22 = vld [vmem:[#allocation2 + $0x38] sm:$0x1]  ;;  %v1151_v33 = vshll.u32 %v7003_v27, 16  ;;  %v1149_v34 = vshrl.u32 %v7003_v27, 16 }
  0x7b   : > { %1611 = vrot.lane.b32.xlu1 %v6968_v46, %s6632_s19  ;;  %v1123_v55 = vsel %vm1099_vm3, %v1118_v50, %v1122_v51  ;;  %v1144_v17 = vshll.u32 %v1086_v6, 16  ;;  %v1335_v21 = vrot.slane %v1086_v6, 1  ;;  %v1142_v23 = vor.u32 %v1141_v16, %v1137_v13  ;;  %v455_v39 = vld [vmem:[%s6783_s16 + $0x2c] sm:$0xf]  ;;  %v844_v50 = vld [vmem:[#allocation2 + $0x50] sm:$0x1] }
  0x7c   : > { %v1135_v54 = vsel %vm1099_vm3, %v1130_v47, %v1134_v48  ;;  %v1071_v29 = vunpack.c.l.b16 %v931_v22  ;;  %v1153_v35 = vrot.slane %v1151_v33, 1  ;;  %v573_v40 = vshrl.u32 %v455_v39, 16  ;;  %398 = vst.msk [vmem:[#allocation3 + $0x20] sm:$0x1] %vm391_vm4, %v6627_v0 }
  0x7d   : > { %v1146_v24 = vrot.slane %v1144_v17, 1  ;;  %v1336_v25 = vsel %vm1324_vm2, %v1334_v20, %v1335_v21  ;;  %v565_v44 = vshrl.u32 %v454_v41, 16  ;;  %v568_v48 = vshll.u32 %v454_v41, 16  ;;  %v934_v51 = vld [vmem:[#allocation2 + $0x44] sm:$0x1] }
  0x7e   : > { %v1087_v32 = vpack.c.b16 %v1071_v29, %v1071_v29  ;;  %v1154_v37 = vor.u32 %v1153_v35, %v1149_v34  ;;  %v575_v42 = vrot.slane %v573_v40, 7  ;;  %v576_v49 = vshll.u32 %v455_v39, 16  ;;  %v458_v39 = vld [vmem:[%s6783_s16 + $0x38] sm:$0xf]  ;;  %401 = vst.msk [vmem:[#allocation3 + $0x2c] sm:$0x1] %vm391_vm4, %v6627_v0 }
  0x7f   : > { %v1147_v30 = vsel %vm1099_vm3, %v1142_v23, %v1146_v24  ;;  %v567_v47 = vrot.slane %v565_v44, 7  ;;  %v1337_v57 = vrot.slane %v7003_v27, 1  ;;  %v7033_v62 = vld [vmem:[#allocation2 + $0x3c] sm:$0xff]  ;;  %v1072_v63 = vunpack.c.l.b16 %v934_v51  ;;  %404 = vst.msk [vmem:[#allocation3 + $0x38] sm:$0x1] %vm391_vm4, %v6627_v0 }
  0x80   : > { %v1156_v36 = vshll.u32 %v1087_v32, 16  ;;  %v580_v45 = vrot.slane %v575_v42, 4  ;;  %v1338_v58 = vrot.slane %v1087_v32, 1  ;;  %v1163_v4 = vshll.u32 %v7033_v62, 16  ;;  %407 = vst.msk [vmem:[#allocation3 + $0x44] sm:$0x1] %vm391_vm4, %v6627_v0 }
  0x81   : > { %v570_v52 = vor.u32 %v568_v48, %v567_v47  ;;  %v1088_v3 = vpack.c.b16 %v1072_v63, %v1072_v63  ;;  %v1161_v5 = vshrl.u32 %v7033_v62, 16  ;;  %v590_v11 = vshrl.u32 %v457_v8, 16  ;;  %410 = vst.msk [vmem:[#allocation3 + $0x50] sm:$0x1] %vm391_vm4, %v6627_v0 }
  0x82   : > { %1576 = vrot.lane.b32.xlu0 %v1135_v54, %s6634_s21  ;;  %1294 = vrot.lane.b32.xlu2 %v1123_v55, %s6629_s12  ;;  %v1158_v38 = vrot.slane %v1156_v36, 1  ;;  %v1339_v2 = vsel %vm1324_vm2, %v1337_v57, %v1338_v58  ;;  %v1165_v6 = vrot.slane %v1163_v4, 1  ;;  %v1340_v15 = vrot.slane %v7033_v62, 1  ;;  %413 = vst.msk [vmem:[#allocation3 + $0x5c] sm:$0x1] %vm391_vm4, %v6627_v0 }
  0x83   : > { %1457 = vrot.lane.b32.xlu1 %v1123_v55, %s6635_s22  ;;  %v578_v55 = vor.u32 %v576_v49, %v575_v42  ;;  %v841_v60 = vsel %vm6822_vm7, %v570_v52, %v840_v56  ;;  %v1168_v7 = vshll.u32 %v1088_v3, 16  ;;  %v592_v16 = vrot.slane %v590_v11, 7  ;;  %416 = vst.msk [vmem:[#allocation3 + $0x68] sm:$0x1] %vm391_vm4, %v6627_v0 }
  0x84   : > { %v7019_v43 = vsel %vm1099_vm3, %v1154_v37, %v1158_v38  ;;  %842 = vst [vmem:[#allocation2 + $0x48] sm:$0xf] %v841_v60  ;;  %v1166_v13 = vor.u32 %v1165_v6, %v1161_v5  ;;  %v1341_v17 = vrot.slane %v1088_v3, 1  ;;  %v584_v18 = vrot.slane %v582_v12, 7  ;;  %v459_v37 = vld [vmem:[%s6783_s16 + $0x3c] sm:$0xf] }
  0x85   : > { %v1170_v14 = vrot.slane %v1168_v7, 1  ;;  %v585_v19 = vshll.u32 %v456_v10, 16  ;;  %v593_v20 = vshll.u32 %v457_v8, 16  ;;  %v597_v21 = vrot.slane %v592_v16, 4  ;;  %v1911_v12 = vld [vmem:[%s9797_s1 + $0x10] sm:$0x3] }
  0x86   : > { %v588_v23 = vrot.slane %v584_v18, 4  ;;  %v7054_v33 = vsel %vm1324_vm2, %v1340_v15, %v1341_v17  ;;  %v607_v40 = vshrl.u32 %v459_v37, 16  ;;  %v599_v42 = vshrl.u32 %v458_v39, 16  ;;  %419 = vst.msk [vmem:[#allocation3 + $0x74] sm:$0x1] %vm391_vm4, %v6627_v0 }
  0x87   : > { %v587_v22 = vor.u32 %v585_v19, %v584_v18  ;;  %v595_v24 = vor.u32 %v593_v20, %v592_v16  ;;  %v1171_v29 = vsel %vm1099_vm3, %v1166_v13, %v1170_v14  ;;  %v602_v48 = vshll.u32 %v458_v39, 16  ;;  %v6496_v20 = vld [vmem:[%s9797_s1 + $0x8] sm:$0xff]  ;;  %422 = vst.msk [vmem:[#allocation3 + $0x80] sm:$0x1] %vm391_vm4, %v6627_v0 }
  0x88   : > { %v609_v44 = vrot.slane %v607_v40, 7  ;;  %v610_v49 = vshll.u32 %v459_v37, 16  ;;  %v1925_v13 = vunpack.c.l.b16 %v1911_v12  ;;  %v460_v37 = vld [vmem:[%s6783_s16 + $0x40] sm:$0xf]  ;;  %425 = vst.msk [vmem:[#allocation3 + $0x8c] sm:$0x1] %vm391_vm4, %v6627_v0 }
  0x89   : > { %v596_v34 = vsel %vm6829_vm8, %v588_v23, %v595_v24  ;;  %v616_v39 = vshrl.u32 %v460_v37, 16  ;;  %428 = vst.msk [vmem:[#allocation3 + $0x98] sm:$0x1] %vm391_vm4, %v6627_v0 }
  0x8a   : > { %1494 = vrot.lane.b32.xlu0 %v6968_v46, %s6633_s20  ;;  %1459 = vrot.lane.b32.xlu2 %v1135_v54, %s6635_s22  ;;  %850 = vst.msk [vmem:[#allocation2 + $0x58] sm:$0xf] %vm332_vm0, %v596_v34  ;;  %v1928_v15 = vpack.c.b16 %v1925_v13, %v1925_v13  ;;  %v461_v34 = vld [vmem:[%s6783_s16 + $0x44] sm:$0xf] }
  0x8b   : > { %1531 = vrot.lane.b32.xlu1 %v6985_v61, %s6631_s18  ;;  %431 = vst.msk [vmem:[#allocation3 + $0xa4] sm:$0x1] %vm391_vm4, %v6627_v0 }
  0x8c   : > { %v1966_v19 = vsel %vm9806_vm11, %v1928_v15, 0  ;;  %vm1841_vm11 = vcmask 228352   ;;  %434 = vst.msk [vmem:[#allocation3 + $0xb0] sm:$0x1] %vm391_vm4, %v6627_v0 }
  0x8d   : > { %1973 = vmatpush.bf16.msra.mxu0 %v1966_v19  ;;  %6569 = vmatpush.bf16.msra.mxu2 %v1966_v19  ;;  %437 = vst.msk [vmem:[#allocation3 + $0xbc] sm:$0x1] %vm391_vm4, %v6627_v0 }
  0x8e   : > { %440 = vst.msk [vmem:[#allocation3 + $0xc8] sm:$0x1] %vm391_vm4, %v6627_v0 }
  0x8f   : > { %443 = vst.msk [vmem:[#allocation3 + $0xd4] sm:$0x1] %vm391_vm4, %v6627_v0 }
  0x91   : > { %1974 = vmatpush.bf16.msra.mxu0 %v6496_v20  ;;  %6570 = vmatpush.bf16.msra.mxu2 %v6496_v20  ;;  %v462_v20 = vld [vmem:[%s6783_s16 + $0x48] sm:$0xf] }
  0x92   : > { %1613 = vrot.lane.b32.xlu0 %v1336_v25, %s6632_s19  ;;  %1578 = vrot.lane.b32.xlu2 %v1147_v30, %s6634_s21 }
  0x93   : > { %1296 = vrot.lane.b32.xlu1 %v1135_v54, %s6629_s12  ;;  %v571_v54 = vrot.slane %v567_v47, 4  ;;  %v601_v47 = vrot.slane %v599_v42, 7 }
  0x95   : > { %v579_v59 = vsel %vm6829_vm8, %v571_v54, %v578_v55  ;;  %v604_v51 = vor.u32 %v602_v48, %v601_v47  ;;  %v605_v52 = vrot.slane %v601_v47, 4  ;;  %v612_v54 = vor.u32 %v610_v49, %v609_v44  ;;  %v858_v55 = vld [vmem:[#allocation2 + $0x68] sm:$0x1]  ;;  %v865_v49 = vld [vmem:[#allocation2 + $0x74] sm:$0x1] }
  0x96   : > { %843 = vst.msk [vmem:[#allocation2 + $0x4c] sm:$0xf] %vm332_vm0, %v579_v59  ;;  %v627_v47 = vshll.u32 %v461_v34, 16 }
  0x97   : > { %v613_v60 = vsel %vm6829_vm8, %v605_v52, %v612_v54 }
  0x98   : > { %857 = vst.msk [vmem:[#allocation2 + $0x64] sm:$0xf] %vm332_vm0, %v613_v60 }
  0x9a   : > { %1414 = vrot.lane.b32.xlu0 %v6985_v61, %s6630_s17  ;;  %1377 = vrot.lane.b32.xlu2 %v6968_v46, %s6628_s11  ;;  %v845_v46 = vsel %vm6923_vm10, %v580_v45, %v844_v50 }
  0x9b   : > { %1461 = vrot.lane.b32.xlu1 %v1147_v30, %s6635_s22  ;;  %846 = vst [vmem:[#allocation2 + $0x50] sm:$0x1] %v845_v46  ;;  %v614_v46 = vrot.slane %v609_v44, 4  ;;  %v618_v44 = vrot.slane %v616_v39, 7 }
  0x9d   : > { %v7073_v41 = vld [vmem:[#allocation2 + $0x48] sm:$0xff]  ;;  %v859_v57 = vsel %vm6923_vm10, %v614_v46, %v858_v55  ;;  %v622_v46 = vrot.slane %v618_v44, 4 }
  0x9e   : > { %v1175_v45 = vshll.u32 %v7073_v41, 16  ;;  %v1173_v56 = vshrl.u32 %v7073_v41, 16  ;;  %860 = vst [vmem:[#allocation2 + $0x68] sm:$0x1] %v859_v57  ;;  %v861_v57 = vld [vmem:[#allocation2 + $0x6c] sm:$0xf] }
  0xa0   : > { %v1177_v58 = vrot.slane %v1175_v45, 1  ;;  %v619_v45 = vshll.u32 %v460_v37, 16 }
  0xa2   : > { %1533 = vrot.lane.b32.xlu0 %v7003_v27, %s6631_s18  ;;  %1496 = vrot.lane.b32.xlu2 %v1336_v25, %s6633_s20  ;;  %v937_v36 = vld [vmem:[#allocation2 + $0x50] sm:$0x1]  ;;  %v1178_v6 = vor.u32 %v1177_v58, %v1173_v56 }
  0xa3   : > { %1580 = vrot.lane.b32.xlu1 %v7019_v43, %s6634_s21  ;;  %v1073_v38 = vunpack.c.l.b16 %v937_v36  ;;  %v624_v36 = vshrl.u32 %v461_v34, 16  ;;  %v636_v34 = vshll.u32 %v462_v20, 16 }
  0xa5   : > { %v1089_v50 = vpack.c.b16 %v1073_v38, %v1073_v38  ;;  %v626_v40 = vrot.slane %v624_v36, 7 }
  0xa7   : > { %v1180_v59 = vshll.u32 %v1089_v50, 16  ;;  %v1344_v3 = vrot.slane %v1089_v50, 1  ;;  %v631_v48 = vrot.slane %v626_v40, 4  ;;  %v621_v50 = vor.u32 %v619_v45, %v618_v44 }
  0xa9   : > { %v1182_v7 = vrot.slane %v1180_v59, 1  ;;  %v866_v52 = vsel %vm6923_vm10, %v631_v48, %v865_v49  ;;  %v868_v49 = vld [vmem:[#allocation2 + $0x78] sm:$0xf] }
  0xaa   : > { %1298 = vrot.lane.b32.xlu0 %v1147_v30, %s6629_s12  ;;  %1615 = vrot.lane.b32.xlu2 %v1339_v2, %s6632_s19  ;;  %v847_v30 = vld [vmem:[#allocation2 + $0x54] sm:$0xf]  ;;  %867 = vst [vmem:[#allocation2 + $0x74] sm:$0x1] %v866_v52 }
  0xab   : > { %1379 = vrot.lane.b32.xlu1 %v1336_v25, %s6628_s11  ;;  %v851_v25 = vld [vmem:[#allocation2 + $0x5c] sm:$0x1]  ;;  %v848_v35 = vsel %vm6822_vm7, %v587_v22, %v847_v30  ;;  %v1183_v14 = vsel %vm1099_vm3, %v1178_v6, %v1182_v7 }
  0xac   : > { %v852_v32 = vsel %vm6923_vm10, %v597_v21, %v851_v25  ;;  %849 = vst [vmem:[#allocation2 + $0x54] sm:$0xf] %v848_v35  ;;  %v7112_v21 = vpop.permute.xlu0 %1373 }
  0xad   : > { %853 = vst [vmem:[#allocation2 + $0x5c] sm:$0x1] %v852_v32  ;;  %v6495_v32 = vld [vmem:[%s9797_s1] sm:$0xff] }
  0xae   : > { %1975 = vmatpush.bf16.msra.mxu0 %v6495_v32  ;;  %6571 = vmatpush.bf16.msra.mxu2 %v6495_v32 }
  0xb2   : > { %1463 = vrot.lane.b32.xlu0 %v7019_v43, %s6635_s22  ;;  %1416 = vrot.lane.b32.xlu2 %v7003_v27, %s6630_s17 }
  0xb3   : > { %1498 = vrot.lane.b32.xlu1 %v1339_v2, %s6633_s20  ;;  %v7095_v10 = vld [vmem:[#allocation2 + $0x54] sm:$0xff] }
  0xb4   : > { %v940_v5 = vld [vmem:[#allocation2 + $0x5c] sm:$0x1]  ;;  %v1187_v17 = vshll.u32 %v7095_v10, 16  ;;  %v1185_v22 = vshrl.u32 %v7095_v10, 16  ;;  %v1293_v42 = vpop.permute.xlu0 %1292  ;;  %v1346_v58 = vrot.slane %v7095_v10, 1 }
  0xb5   : > { %v1074_v11 = vunpack.c.l.b16 %v940_v5  ;;  %v1645_v6 = vsel %vm1643_vm12, %v6712_v1, %v1293_v42 }
  0xb6   : > { %v1189_v23 = vrot.slane %v1187_v17, 1 }
  0xb7   : > { %v1090_v16 = vpack.c.b16 %v1074_v11, %v1074_v11 }
  0xb9   : > { %v1192_v24 = vshll.u32 %v1090_v16, 16  ;;  %v1347_v59 = vrot.slane %v1090_v16, 1  ;;  %v1678_v16 = vsel %vm1676_vm13, %v1645_v6, %v7112_v21  ;;  %v465_v6 = vld [vmem:[%s6783_s16 + $0x54] sm:$0xf] }
  0xba   : > { %1582 = vrot.lane.b32.xlu0 %v1171_v29, %s6634_s21  ;;  %1535 = vrot.lane.b32.xlu2 %v7033_v62, %s6631_s18 }
  0xbb   : > { %1617 = vrot.lane.b32.xlu1 %v7054_v33, %s6632_s19  ;;  %v1194_v30 = vrot.slane %v1192_v24, 1  ;;  %v7155_v5 = vsel %vm1324_vm2, %v1346_v58, %v1347_v59 }
  0xbe   : > { %v7118_v25 = vpop.permute.xlu1 %1410 }
  0xbf   : > { %v1711_v1 = vsel %vm1709_vm14, %v1678_v16, %v7118_v25 }
  0xc2   : > { %1381 = vrot.lane.b32.xlu0 %v1339_v2, %s6628_s11  ;;  %1300 = vrot.lane.b32.xlu2 %v7019_v43, %s6629_s12  ;;  %v854_v43 = vld [vmem:[#allocation2 + $0x60] sm:$0xf]  ;;  %v1343_v2 = vrot.slane %v7073_v41, 1 }
  0xc3   : > { %1418 = vrot.lane.b32.xlu1 %v7033_v62, %s6630_s17  ;;  %v855_v63 = vsel %vm6822_vm7, %v604_v51, %v854_v43  ;;  %v629_v51 = vor.u32 %v627_v47, %v626_v40  ;;  %v872_v47 = vld [vmem:[#allocation2 + $0x80] sm:$0x1] }
  0xc4   : > { %856 = vst [vmem:[#allocation2 + $0x60] sm:$0xf] %v855_v63  ;;  %v7093_v8 = vsel %vm1324_vm2, %v1343_v2, %v1344_v3  ;;  %v862_v63 = vsel %vm6822_vm7, %v621_v50, %v861_v57 }
  0xc5   : > { %v630_v60 = vsel %vm6829_vm8, %v622_v46, %v629_v51  ;;  %863 = vst [vmem:[#allocation2 + $0x6c] sm:$0xf] %v862_v63  ;;  %v946_v63 = vld [vmem:[#allocation2 + $0x74] sm:$0x1] }
  0xc6   : > { %864 = vst.msk [vmem:[#allocation2 + $0x70] sm:$0xf] %vm332_vm0, %v630_v60 }
  0xca   : > { %1500 = vrot.lane.b32.xlu0 %v7054_v33, %s6633_s20  ;;  %1465 = vrot.lane.b32.xlu2 %v1171_v29, %s6635_s22 }
  0xcb   : > { %1537 = vrot.lane.b32.xlu1 %v7073_v41, %s6631_s18  ;;  %v7144_v56 = vld [vmem:[#allocation2 + $0x60] sm:$0xff] }
  0xcc   : > { %v7090_v4 = vpop.permute.xlu2 %1529  ;;  %v1199_v3 = vshll.u32 %v7144_v56, 16  ;;  %v1197_v12 = vshrl.u32 %v7144_v56, 16  ;;  %v1349_v21 = vrot.slane %v7144_v56, 1 }
  0xcd   : > { %v7226_v16 = vld [vmem:[#allocation2 + $0x6c] sm:$0xff] }
  0xce   : > { %v1201_v13 = vrot.slane %v1199_v3, 1  ;;  %v1076_v3 = vunpack.c.l.b16 %v946_v63 }
  0xd0   : > { %v1202_v17 = vor.u32 %v1201_v13, %v1197_v12  ;;  %v658_v12 = vshrl.u32 %v465_v6, 16 }
  0xd2   : > { %1619 = vrot.lane.b32.xlu0 %v7093_v8, %s6632_s19  ;;  %1584 = vrot.lane.b32.xlu2 %v1183_v14, %s6634_s21 }
  0xd3   : > { %1302 = vrot.lane.b32.xlu1 %v1171_v29, %s6629_s12  ;;  %v1190_v29 = vor.u32 %v1189_v23, %v1185_v22  ;;  %v633_v23 = vshrl.u32 %v462_v20, 16 }
  0xd4   : > { %v7106_v18 = vpop.permute.xlu2 %1492 }
  0xd5   : > { %v7130_v38 = vsel %vm1099_vm3, %v1190_v29, %v1194_v30  ;;  %v635_v32 = vrot.slane %v633_v23, 7  ;;  %v661_v23 = vshll.u32 %v465_v6, 16 }
  0xd7   : > { %v638_v42 = vor.u32 %v636_v34, %v635_v32  ;;  %v639_v44 = vrot.slane %v635_v32, 4  ;;  %v875_v34 = vld [vmem:[#allocation2 + $0x84] sm:$0xf] }
  0xda   : > { %1420 = vrot.lane.b32.xlu0 %v7073_v41, %s6630_s17  ;;  %1383 = vrot.lane.b32.xlu2 %v7054_v33, %s6628_s11  ;;  %v943_v33 = vld [vmem:[#allocation2 + $0x68] sm:$0x1] }
  0xdb   : > { %1467 = vrot.lane.b32.xlu1 %v1183_v14, %s6635_s22  ;;  %v1075_v43 = vunpack.c.l.b16 %v943_v33 }
  0xdc   : > { %v7126_v35 = vpop.permute.xlu2 %1294 }
  0xdd   : > { %v1091_v2 = vpack.c.b16 %v1075_v43, %v1075_v43  ;;  %v869_v43 = vsel %vm6822_vm7, %v638_v42, %v868_v49 }
  0xde   : > { %870 = vst [vmem:[#allocation2 + $0x78] sm:$0xf] %v869_v43 }
  0xdf   : > { %v1350_v30 = vrot.slane %v1091_v2, 1 }
  0xe1   : > { %v7190_v46 = vsel %vm1324_vm2, %v1349_v21, %v1350_v30  ;;  %v879_v30 = vld [vmem:[#allocation2 + $0x8c] sm:$0x1] }
  0xe2   : > { %1539 = vrot.lane.b32.xlu0 %v7095_v10, %s6631_s18  ;;  %1502 = vrot.lane.b32.xlu2 %v7093_v8, %s6633_s20 }
  0xe3   : > { %1586 = vrot.lane.b32.xlu1 %v7130_v38, %s6634_s21 }
  0xe4   : > { %v7140_v54 = vpop.permute.xlu1 %1412  ;;  %v7142_v55 = vpop.permute.xlu2 %1459 }
  0xea   : > { %1304 = vrot.lane.b32.xlu0 %v1183_v14, %s6629_s12  ;;  %1621 = vrot.lane.b32.xlu2 %v7155_v5, %s6632_s19  ;;  %v1204_v14 = vshll.u32 %v1091_v2, 16 }
  0xeb   : > { %1385 = vrot.lane.b32.xlu1 %v7093_v8, %s6628_s11  ;;  %v463_v8 = vld [vmem:[%s6783_s16 + $0x4c] sm:$0xf] }
  0xec   : > { %v1376_v7 = vpop.permute.xlu0 %1375  ;;  %v7164_v15 = vpop.permute.xlu2 %1578  ;;  %v1206_v19 = vrot.slane %v1204_v14, 1  ;;  %v641_v22 = vshrl.u32 %v463_v8, 16  ;;  %v644_v25 = vshll.u32 %v463_v8, 16  ;;  %v660_v8 = vrot.slane %v658_v12, 7 }
  0xed   : > { %v1612_v11 = vpop.permute.xlu1 %1611 }
  0xee   : > { %v643_v24 = vrot.slane %v641_v22, 7  ;;  %v7180_v36 = vsel %vm1099_vm3, %v1202_v17, %v1206_v19  ;;  %v1092_v17 = vpack.c.b16 %v1076_v3, %v1076_v3  ;;  %v665_v21 = vrot.slane %v660_v8, 4 }
  0xef   : > { %v663_v32 = vor.u32 %v661_v23, %v660_v8  ;;  %v467_v8 = vld [vmem:[%s6783_s16 + $0x5c] sm:$0xf] }
  0xf0   : > { %v648_v40 = vrot.slane %v643_v24, 4  ;;  %v646_v45 = vor.u32 %v644_v25, %v643_v24  ;;  %v880_v25 = vsel %vm6923_vm10, %v665_v21, %v879_v30 }
  0xf1   : > { %881 = vst [vmem:[#allocation2 + $0x8c] sm:$0x1] %v880_v25 }
  0xf2   : > { %1469 = vrot.lane.b32.xlu0 %v7130_v38, %s6635_s22  ;;  %1422 = vrot.lane.b32.xlu2 %v7095_v10, %s6630_s17  ;;  %v873_v50 = vsel %vm6923_vm10, %v648_v40, %v872_v47  ;;  %v647_v52 = vsel %vm6829_vm8, %v639_v44, %v646_v45  ;;  %v1353_v40 = vrot.slane %v1092_v17, 1  ;;  %v1216_v44 = vshll.u32 %v1092_v17, 16 }
  0xf3   : > { %1504 = vrot.lane.b32.xlu1 %v7155_v5, %s6633_s20  ;;  %874 = vst [vmem:[#allocation2 + $0x80] sm:$0x1] %v873_v50 }
  0xf4   : > { %v1577_v29 = vpop.permute.xlu0 %1576  ;;  %v7182_v39 = vpop.permute.xlu2 %1377  ;;  %871 = vst.msk [vmem:[#allocation2 + $0x7c] sm:$0xf] %vm332_vm0, %v647_v52 }
  0xf5   : > { %v1458_v37 = vpop.permute.xlu1 %1457 }
  0xf6   : > { %v1744_v33 = vsel %vm1742_vm15, %v1711_v1, %v1458_v37  ;;  %v1211_v1 = vshll.u32 %v7226_v16, 16  ;;  %v1352_v37 = vrot.slane %v7226_v16, 1 }
  0xf7   : > { %v1777_v48 = vsel %vm1775_vm1, %v1744_v33, %v7106_v18  ;;  %v1647_v18 = vsel %vm1643_vm12, %v6858_v31, %v7126_v35 }
  0xf8   : > { %v1810_v51 = vsel %vm1808_vm6, %v1777_v48, %v7090_v4  ;;  %v1680_v58 = vsel %vm1676_vm13, %v1647_v18, %v1376_v7  ;;  %v1213_v42 = vrot.slane %v1211_v1, 1  ;;  %v7254_v43 = vsel %vm1324_vm2, %v1352_v37, %v1353_v40  ;;  %v466_v1 = vld [vmem:[%s6783_s16 + $0x58] sm:$0xf] }
  0xf9   : > { %v1843_v57 = vsel %vm1841_vm11, %v1810_v51, %v1577_v29  ;;  %v1713_v60 = vsel %vm1709_vm14, %v1680_v58, %v7140_v54  ;;  %v670_v30 = vshll.u32 %v466_v1, 16 }
  0xfa   : > { %1588 = vrot.lane.b32.xlu0 %v7180_v36, %s6634_s21  ;;  %v1876_v4 = vsel %vm1874_vm5, %v1843_v57, %v1612_v11  ;;  %1541 = vrot.lane.b32.xlu2 %v7144_v56, %s6631_s18  ;;  %v1746_v2 = vsel %vm1742_vm15, %v1713_v60, %v7142_v55  ;;  %v464_v11 = vld [vmem:[%s6783_s16 + $0x50] sm:$0xf]  ;;  %v949_v51 = vld [vmem:[#allocation2 + $0x80] sm:$0x1]  ;;  %v1218_v57 = vrot.slane %v1216_v44, 1 }
  0xfb   : > { %1623 = vrot.lane.b32.xlu1 %v7190_v46, %s6632_s19  ;;  %6137 = vmatmul.msk.bf16.vlgmr.msra.gmra.mxu0 %vm1931_vm9, %v1876_v4  ;;  %v650_v54 = vshrl.u32 %v464_v11, 16  ;;  %v653_v20 = vshll.u32 %v464_v11, 16  ;;  %v7257_v58 = vld [vmem:[#allocation2 + $0x78] sm:$0xff]  ;;  %v882_v44 = vld [vmem:[#allocation2 + $0x90] sm:$0xf] }
  0xfc   : > { %v1495_v31 = vpop.permute.xlu0 %1494  ;;  %v1497_v59 = vpop.permute.xlu2 %1496 }
  0xfd   : > { %v1532_v35 = vpop.permute.xlu1 %1531  ;;  %v1779_v7 = vsel %vm1775_vm1, %v1746_v2, %v1495_v31  ;;  %v652_v19 = vrot.slane %v650_v54, 7  ;;  %v1223_v2 = vshll.u32 %v7257_v58, 16 }
  0xfe   : > { %v1812_v13 = vsel %vm1808_vm6, %v1779_v7, %v1532_v35 }
  0xff   : > { %v1845_v22 = vsel %vm1841_vm11, %v1812_v13, %v7164_v15  ;;  %v655_v24 = vor.u32 %v653_v20, %v652_v19  ;;  %v656_v29 = vrot.slane %v652_v19, 4  ;;  %v1225_v12 = vrot.slane %v1223_v2, 1 }
 0x101   : > { %v876_v33 = vsel %vm6822_vm7, %v655_v24, %v875_v34  ;;  %v664_v45 = vsel %vm6829_vm8, %v656_v29, %v663_v32  ;;  %v667_v24 = vshrl.u32 %v466_v1, 16  ;;  %v886_v32 = vld [vmem:[#allocation2 + $0x98] sm:$0x1] }
 0x102   : > { %1387 = vrot.lane.b32.xlu0 %v7155_v5, %s6628_s11  ;;  %1306 = vrot.lane.b32.xlu2 %v7130_v38, %s6629_s12  ;;  %877 = vst [vmem:[#allocation2 + $0x84] sm:$0xf] %v876_v33 }
 0x103   : > { %1424 = vrot.lane.b32.xlu1 %v7144_v56, %s6630_s17  ;;  %878 = vst.msk [vmem:[#allocation2 + $0x88] sm:$0xf] %vm332_vm0, %v664_v45 }
 0x104   : > { %v1614_v14 = vpop.permute.xlu0 %1613  ;;  %v1616_v5 = vpop.permute.xlu2 %1615 }
 0x105   : > { %v1297_v55 = vpop.permute.xlu1 %1296  ;;  %v1878_v15 = vsel %vm1874_vm5, %v1845_v22, %v1614_v14  ;;  %v675_v22 = vshrl.u32 %v467_v8, 16 }
 0x106   : > { %v1649_v38 = vsel %vm1643_vm12, %v6950_v9, %v1297_v55  ;;  %v1209_v9 = vshrl.u32 %v7226_v16, 16 }
 0x107   : > { %v1682_v47 = vsel %vm1676_vm13, %v1649_v38, %v7182_v39  ;;  %v1077_v39 = vunpack.c.l.b16 %v949_v51  ;;  %v677_v23 = vrot.slane %v675_v22, 7  ;;  %v678_v38 = vshll.u32 %v467_v8, 16 }
 0x108   : > { %v1214_v18 = vor.u32 %v1213_v42, %v1209_v9 }
 0x109   : > { %v1093_v63 = vpack.c.b16 %v1077_v39, %v1077_v39  ;;  %v682_v29 = vrot.slane %v677_v23, 4  ;;  %v680_v33 = vor.u32 %v678_v38, %v677_v23  ;;  %v893_v38 = vld [vmem:[#allocation2 + $0xa4] sm:$0x1] }
 0x10a   : > { %1506 = vrot.lane.b32.xlu0 %v7190_v46, %s6633_s20  ;;  %1471 = vrot.lane.b32.xlu2 %v7180_v36, %s6635_s22  ;;  %v1219_v35 = vsel %vm1099_vm3, %v1214_v18, %v1218_v57 }
 0x10b   : > { %1543 = vrot.lane.b32.xlu1 %v7226_v16, %s6631_s18  ;;  %6138 = vmatmul.msk.bf16.gmra.mxu0 %vm1931_vm9, %v1878_v15  ;;  %v887_v34 = vsel %vm6923_vm10, %v682_v29, %v886_v32  ;;  %v952_v15 = vld [vmem:[#allocation2 + $0x8c] sm:$0x1]  ;;  %v1356_v51 = vrot.slane %v1093_v63, 1 }
 0x10c   : > { %v1415_v48 = vpop.permute.xlu0 %1414  ;;  %v1417_v50 = vpop.permute.xlu2 %1416  ;;  %888 = vst [vmem:[#allocation2 + $0x98] sm:$0x1] %v887_v34  ;;  %v1078_v18 = vunpack.c.l.b16 %v952_v15 }
 0x10d   : > { %v1462_v49 = vpop.permute.xlu1 %1461  ;;  %v1715_v52 = vsel %vm1709_vm14, %v1682_v47, %v1415_v48 }
 0x10e   : > { %v1748_v4 = vsel %vm1742_vm15, %v1715_v52, %v1462_v49  ;;  %v7303_v52 = vld [vmem:[#allocation2 + $0x84] sm:$0xff]  ;;  %v1094_v39 = vpack.c.b16 %v1078_v18, %v1078_v18 }
 0x10f   : > { %v1781_v31 = vsel %vm1775_vm1, %v1748_v4, %v1497_v59  ;;  %v1221_v59 = vshrl.u32 %v7257_v58, 16  ;;  %v470_v18 = vld [vmem:[%s6783_s16 + $0x68] sm:$0xf] }
 0x111   : > { %v1226_v54 = vor.u32 %v1225_v12, %v1221_v59  ;;  %v468_v59 = vld [vmem:[%s6783_s16 + $0x60] sm:$0xf] }
 0x112   : > { %1625 = vrot.lane.b32.xlu0 %v7254_v43, %s6632_s19  ;;  %1590 = vrot.lane.b32.xlu2 %v1219_v35, %s6634_s21  ;;  %v687_v1 = vshll.u32 %v468_v59, 16 }
 0x113   : > { %1308 = vrot.lane.b32.xlu1 %v7180_v36, %s6629_s12  ;;  %v1228_v36 = vshll.u32 %v1093_v63, 16 }
 0x114   : > { %v1534_v60 = vpop.permute.xlu0 %1533  ;;  %v1536_v6 = vpop.permute.xlu2 %1535 }
 0x115   : > { %v1581_v3 = vpop.permute.xlu1 %1580  ;;  %v1814_v7 = vsel %vm1808_vm6, %v1781_v31, %v1534_v60  ;;  %v1230_v55 = vrot.slane %v1228_v36, 1  ;;  %v1235_v31 = vshll.u32 %v7303_v52, 16 }
 0x116   : > { %v1847_v11 = vsel %vm1841_vm11, %v1814_v7, %v1581_v3 }
 0x117   : > { %v1880_v13 = vsel %vm1874_vm5, %v1847_v11, %v1616_v5  ;;  %v7283_v21 = vsel %vm1099_vm3, %v1226_v54, %v1230_v55  ;;  %v1237_v7 = vrot.slane %v1235_v31, 1  ;;  %v469_v11 = vld [vmem:[%s6783_s16 + $0x64] sm:$0xf]  ;;  %v1358_v55 = vrot.slane %v7303_v52, 1 }
 0x118   : > { %v692_v12 = vshrl.u32 %v469_v11, 16  ;;  %v695_v23 = vshll.u32 %v469_v11, 16  ;;  %v701_v31 = vshrl.u32 %v470_v18, 16 }
 0x11a   : > { %1426 = vrot.lane.b32.xlu0 %v7226_v16, %s6630_s17  ;;  %1389 = vrot.lane.b32.xlu2 %v7190_v46, %s6628_s11  ;;  %v669_v46 = vrot.slane %v667_v24, 7  ;;  %v694_v8 = vrot.slane %v692_v12, 7 }
 0x11b   : > { %1473 = vrot.lane.b32.xlu1 %v1219_v35, %s6635_s22  ;;  %6139 = vmatmul.msk.bf16.gmra.mxu0 %vm1931_vm9, %v1880_v13  ;;  %v684_v13 = vshrl.u32 %v468_v59, 16 }
 0x11c   : > { %v1299_v14 = vpop.permute.xlu0 %1298  ;;  %v1301_v20 = vpop.permute.xlu2 %1300  ;;  %v672_v37 = vor.u32 %v670_v30, %v669_v46  ;;  %v673_v40 = vrot.slane %v669_v46, 4  ;;  %v697_v30 = vor.u32 %v695_v23, %v694_v8 }
 0x11d   : > { %v1651_v17 = vsel %vm1643_vm12, %v6985_v61, %v1299_v14  ;;  %v1380_v19 = vpop.permute.xlu1 %1379  ;;  %v1653_v36 = vsel %vm1643_vm12, %v7003_v27, %v1301_v20  ;;  %v686_v22 = vrot.slane %v684_v13, 7  ;;  %v699_v20 = vrot.slane %v694_v8, 4  ;;  %v900_v13 = vld [vmem:[#allocation2 + $0xb0] sm:$0x1] }
 0x11e   : > { %v1684_v5 = vsel %vm1676_vm13, %v1651_v17, %v1380_v19  ;;  %v681_v47 = vsel %vm6829_vm8, %v673_v40, %v680_v33  ;;  %v883_v48 = vsel %vm6822_vm7, %v672_v37, %v882_v44  ;;  %v1359_v19 = vrot.slane %v1094_v39, 1 }
 0x11f   : > { %v1717_v61 = vsel %vm1709_vm14, %v1684_v5, %v1417_v50  ;;  %v1355_v50 = vrot.slane %v7257_v58, 1  ;;  %884 = vst [vmem:[#allocation2 + $0x90] sm:$0xf] %v883_v48  ;;  %v689_v29 = vor.u32 %v687_v1, %v686_v22  ;;  %v690_v46 = vrot.slane %v686_v22, 4 }
 0x120   : > { %885 = vst.msk [vmem:[#allocation2 + $0x94] sm:$0xf] %vm332_vm0, %v681_v47  ;;  %v894_v34 = vsel %vm6923_vm10, %v699_v20, %v893_v38  ;;  %v7335_v15 = vsel %vm1324_vm2, %v1358_v55, %v1359_v19 }
 0x121   : > { %v1357_v4 = vsel %vm1324_vm2, %v1355_v50, %v1356_v51  ;;  %v698_v37 = vsel %vm6829_vm8, %v690_v46, %v697_v30  ;;  %895 = vst [vmem:[#allocation2 + $0xa4] sm:$0x1] %v894_v34 }
 0x122   : > { %1545 = vrot.lane.b32.xlu0 %v7257_v58, %s6631_s18  ;;  %1508 = vrot.lane.b32.xlu2 %v7254_v43, %s6633_s20  ;;  %892 = vst.msk [vmem:[#allocation2 + $0xa0] sm:$0xf] %vm332_vm0, %v698_v37 }
 0x123   : > { %1592 = vrot.lane.b32.xlu1 %v7283_v21, %s6634_s21 }
 0x124   : > { %v1464_v25 = vpop.permute.xlu0 %1463  ;;  %v7294_v42 = vpop.permute.xlu2 %1465 }
 0x125   : > { %v1499_v9 = vpop.permute.xlu1 %1498  ;;  %v1750_v45 = vsel %vm1742_vm15, %v1717_v61, %v1464_v25  ;;  %v889_v61 = vld [vmem:[#allocation2 + $0x9c] sm:$0xf] }
 0x126   : > { %v1783_v49 = vsel %vm1775_vm1, %v1750_v45, %v1499_v9  ;;  %v890_v40 = vsel %vm6822_vm7, %v689_v29, %v889_v61 }
 0x127   : > { %v1816_v57 = vsel %vm1808_vm6, %v1783_v49, %v1536_v6  ;;  %v1233_v6 = vshrl.u32 %v7303_v52, 16  ;;  %891 = vst [vmem:[#allocation2 + $0x9c] sm:$0xf] %v890_v40  ;;  %v955_v49 = vld [vmem:[#allocation2 + $0x98] sm:$0x1] }
 0x128   : > { %v1079_v51 = vunpack.c.l.b16 %v955_v49  ;;  %v958_v46 = vld [vmem:[#allocation2 + $0xa4] sm:$0x1] }
 0x129   : > { %v1238_v14 = vor.u32 %v1237_v7, %v1233_v6  ;;  %v703_v6 = vrot.slane %v701_v31, 7  ;;  %v704_v7 = vshll.u32 %v470_v18, 16  ;;  %v1080_v37 = vunpack.c.l.b16 %v958_v46 }
 0x12a   : > { %1310 = vrot.lane.b32.xlu0 %v1219_v35, %s6629_s12  ;;  %1627 = vrot.lane.b32.xlu2 %v1357_v4, %s6632_s19 }
 0x12b   : > { %1391 = vrot.lane.b32.xlu1 %v7254_v43, %s6628_s11  ;;  %v1240_v43 = vshll.u32 %v1094_v39, 16  ;;  %v706_v12 = vor.u32 %v704_v7, %v703_v6 }
 0x12c   : > { %v1583_v60 = vpop.permute.xlu0 %1582  ;;  %v1585_v3 = vpop.permute.xlu2 %1584 }
 0x12d   : > { %v1849_v63 = vsel %vm1841_vm11, %v1816_v57, %v1583_v60  ;;  %v1618_v2 = vpop.permute.xlu1 %1617  ;;  %v1242_v54 = vrot.slane %v1240_v43, 1 }
 0x12e   : > { %v1882_v35 = vsel %vm1874_vm5, %v1849_v63, %v1618_v2  ;;  %v7361_v2 = vld [vmem:[#allocation2 + $0x90] sm:$0xff] }
 0x12f   : > { %6140 = vmatmul.msk.bf16.gmra.mxu0 %vm1931_vm9, %v1882_v35  ;;  %v7329_v32 = vsel %vm1099_vm3, %v1238_v14, %v1242_v54  ;;  %v1247_v43 = vshll.u32 %v7361_v2, 16  ;;  %v896_v54 = vld [vmem:[#allocation2 + $0xa8] sm:$0xf]  ;;  %v1361_v8 = vrot.slane %v7361_v2, 1  ;;  %v1245_v19 = vshrl.u32 %v7361_v2, 16 }
 0x130   : > { %v897_v22 = vsel %vm6822_vm7, %v706_v12, %v896_v54 }
 0x131   : > { %v1249_v1 = vrot.slane %v1247_v43, 1  ;;  %898 = vst [vmem:[#allocation2 + $0xa8] sm:$0xf] %v897_v22 }
 0x132   : > { %1475 = vrot.lane.b32.xlu0 %v7283_v21, %s6635_s22  ;;  %1428 = vrot.lane.b32.xlu2 %v7257_v58, %s6630_s17 }
 0x133   : > { %1510 = vrot.lane.b32.xlu1 %v1357_v4, %s6633_s20  ;;  %v1250_v61 = vor.u32 %v1249_v1, %v1245_v19 }
 0x134   : > { %v1382_v17 = vpop.permute.xlu0 %1381  ;;  %v1384_v27 = vpop.permute.xlu2 %1383 }
 0x135   : > { %v1686_v5 = vsel %vm1676_vm13, %v1653_v36, %v1382_v17  ;;  %v1419_v24 = vpop.permute.xlu1 %1418  ;;  %v707_v36 = vrot.slane %v703_v6, 4 }
 0x136   : > { %v1719_v25 = vsel %vm1709_vm14, %v1686_v5, %v1419_v24 }
 0x137   : > { %v1752_v33 = vsel %vm1742_vm15, %v1719_v25, %v7294_v42  ;;  %v471_v42 = vld [vmem:[%s6783_s16 + $0x6c] sm:$0xf]  ;;  %v7388_v25 = vld [vmem:[#allocation2 + $0x9c] sm:$0xff] }
 0x138   : > { %v709_v57 = vshrl.u32 %v471_v42, 16  ;;  %v712_v11 = vshll.u32 %v471_v42, 16  ;;  %v1364_v19 = vrot.slane %v7388_v25, 1 }
 0x13a   : > { %1594 = vrot.lane.b32.xlu0 %v7329_v32, %s6634_s21  ;;  %1547 = vrot.lane.b32.xlu2 %v7303_v52, %s6631_s18  ;;  %v711_v35 = vrot.slane %v709_v57, 7 }
 0x13b   : > { %1629 = vrot.lane.b32.xlu1 %v7335_v15, %s6632_s19 }
 0x13c   : > { %v1501_v9 = vpop.permute.xlu0 %1500  ;;  %v1503_v45 = vpop.permute.xlu2 %1502  ;;  %v716_v59 = vrot.slane %v711_v35, 4  ;;  %v714_v14 = vor.u32 %v712_v11, %v711_v35 }
 0x13d   : > { %v1538_v44 = vpop.permute.xlu1 %1537  ;;  %v1785_v47 = vsel %vm1775_vm1, %v1752_v33, %v1501_v9 }
 0x13e   : > { %v1818_v48 = vsel %vm1808_vm6, %v1785_v47, %v1538_v44  ;;  %v901_v55 = vsel %vm6923_vm10, %v716_v59, %v900_v13  ;;  %v715_v5 = vsel %vm6829_vm8, %v707_v36, %v714_v14  ;;  %v1096_v44 = vpack.c.b16 %v1080_v37, %v1080_v37 }
 0x13f   : > { %v1851_v50 = vsel %vm1841_vm11, %v1818_v48, %v1585_v3  ;;  %v1095_v3 = vpack.c.b16 %v1079_v51, %v1079_v51  ;;  %902 = vst [vmem:[#allocation2 + $0xb0] sm:$0x1] %v901_v55  ;;  %v1259_v47 = vshll.u32 %v7388_v25, 16 }
 0x140   : > { %899 = vst.msk [vmem:[#allocation2 + $0xac] sm:$0xf] %vm332_vm0, %v715_v5  ;;  %v1264_v18 = vshll.u32 %v1096_v44, 16  ;;  %v1365_v22 = vrot.slane %v1096_v44, 1 }
 0x141   : > { %v1362_v17 = vrot.slane %v1095_v3, 1  ;;  %v1252_v23 = vshll.u32 %v1095_v3, 16  ;;  %v1261_v42 = vrot.slane %v1259_v47, 1  ;;  %v474_v47 = vld [vmem:[%s6783_s16 + $0x78] sm:$0xf] }
 0x142   : > { %1393 = vrot.lane.b32.xlu0 %v1357_v4, %s6628_s11  ;;  %1312 = vrot.lane.b32.xlu2 %v7283_v21, %s6629_s12  ;;  %v1266_v31 = vrot.slane %v1264_v18, 1 }
 0x143   : > { %1430 = vrot.lane.b32.xlu1 %v7303_v52, %s6630_s17  ;;  %v7385_v30 = vsel %vm1324_vm2, %v1361_v8, %v1362_v17  ;;  %v1254_v34 = vrot.slane %v1252_v23, 1  ;;  %v472_v8 = vld [vmem:[%s6783_s16 + $0x70] sm:$0xf] }
 0x144   : > { %v1620_v39 = vpop.permute.xlu0 %1619  ;;  %v1622_v4 = vpop.permute.xlu2 %1621 }
 0x145   : > { %v1884_v60 = vsel %vm1874_vm5, %v1851_v50, %v1620_v39  ;;  %v1303_v63 = vpop.permute.xlu1 %1302  ;;  %v1255_v33 = vsel %vm1099_vm3, %v1250_v61, %v1254_v34 }
 0x146   : > { %6141 = vmatmul.msk.bf16.gmra.mxu0 %vm1931_vm9, %v1884_v60  ;;  %v1655_v21 = vsel %vm1643_vm12, %v7033_v62, %v1303_v63  ;;  %v7409_v60 = vld [vmem:[%s6783_s16 + $0x74] sm:$0xf]  ;;  %v961_v59 = vld [vmem:[#allocation2 + $0xb0] sm:$0x1] }
 0x147   : > { %v1688_v62 = vsel %vm1676_vm13, %v1655_v21, %v1384_v27  ;;  %v726_v35 = vshrl.u32 %v7409_v60, 16  ;;  %v7431_v14 = vld [vmem:[#allocation2 + $0xa8] sm:$0xff]  ;;  %v1081_v54 = vunpack.c.l.b16 %v961_v59 }
 0x148   : > { %v1271_v5 = vshll.u32 %v7431_v14, 16  ;;  %v1269_v61 = vshrl.u32 %v7431_v14, 16 }
 0x149   : > { %v7414_v6 = vrot.slane %v726_v35, 7  ;;  %v7446_v23 = vpack.c.b16 %v1081_v54, %v1081_v54  ;;  %v914_v54 = vld [vmem:[#allocation2 + $0xc8] sm:$0x1] }
 0x14a   : > { %1512 = vrot.lane.b32.xlu0 %v7335_v15, %s6633_s20  ;;  %1477 = vrot.lane.b32.xlu2 %v7329_v32, %s6635_s22  ;;  %v1273_v34 = vrot.slane %v1271_v5, 1 }
 0x14b   : > { %1549 = vrot.lane.b32.xlu1 %v7361_v2, %s6631_s18  ;;  %v733_v11 = vrot.slane %v7414_v6, 4  ;;  %v1276_v37 = vshll.u32 %v7446_v23, 16 }
 0x14c   : > { %v1421_v24 = vpop.permute.xlu0 %1420  ;;  %v1423_v29 = vpop.permute.xlu2 %1422 }
 0x14d   : > { %v1468_v20 = vpop.permute.xlu1 %1467  ;;  %v1721_v27 = vsel %vm1709_vm14, %v1688_v62, %v1421_v24  ;;  %v718_v62 = vshrl.u32 %v472_v8, 16  ;;  %v7454_v24 = vsel %vm1324_vm2, %v1364_v19, %v1365_v22 }
 0x14e   : > { %v1754_v38 = vsel %vm1742_vm15, %v1721_v27, %v1468_v20 }
 0x14f   : > { %v1787_v40 = vsel %vm1775_vm1, %v1754_v38, %v1503_v45  ;;  %v720_v27 = vrot.slane %v718_v62, 7 }
 0x151   : > { %v724_v18 = vrot.slane %v720_v27, 4 }
 0x152   : > { %1631 = vrot.lane.b32.xlu0 %v7385_v30, %s6632_s19  ;;  %1596 = vrot.lane.b32.xlu2 %v1255_v33, %s6634_s21 }
 0x153   : > { %1314 = vrot.lane.b32.xlu1 %v7329_v32, %s6629_s12  ;;  %v1257_v32 = vshrl.u32 %v7388_v25, 16 }
 0x154   : > { %v1540_v9 = vpop.permute.xlu0 %1539  ;;  %v1542_v51 = vpop.permute.xlu2 %1541 }
 0x155   : > { %v1820_v48 = vsel %vm1808_vm6, %v1787_v40, %v1540_v9  ;;  %v1587_v49 = vpop.permute.xlu1 %1586  ;;  %v1262_v39 = vor.u32 %v1261_v42, %v1257_v32  ;;  %v475_v9 = vld [vmem:[%s6783_s16 + $0x7c] sm:$0xf]  ;;  %v735_v32 = vshrl.u32 %v474_v47, 16  ;;  %v1367_v42 = vrot.slane %v7431_v14, 1 }
 0x156   : > { %v1853_v50 = vsel %vm1841_vm11, %v1820_v48, %v1587_v49  ;;  %v743_v48 = vshrl.u32 %v475_v9, 16 }
 0x157   : > { %v1886_v45 = vsel %vm1874_vm5, %v1853_v50, %v1622_v4  ;;  %v7418_v43 = vsel %vm1099_vm3, %v1262_v39, %v1266_v31  ;;  %v1274_v50 = vor.u32 %v1273_v34, %v1269_v61  ;;  %v1368_v31 = vrot.slane %v7446_v23, 1 }
 0x158   : > { %6142 = vmatmul.msk.bf16.gmra.mxu0 %vm1931_vm9, %v1886_v45  ;;  %v903_v45 = vld [vmem:[#allocation2 + $0xb4] sm:$0xf]  ;;  %v745_v39 = vrot.slane %v743_v48, 7 }
 0x159   : > { %v7522_v19 = vsel %vm1324_vm2, %v1367_v42, %v1368_v31 }
 0x15a   : > { %1432 = vrot.lane.b32.xlu0 %v7361_v2, %s6630_s17  ;;  %1395 = vrot.lane.b32.xlu2 %v7335_v15, %s6628_s11  ;;  %v907_v15 = vld [vmem:[#allocation2 + $0xbc] sm:$0x1] }
 0x15b   : > { %1479 = vrot.lane.b32.xlu1 %v1255_v33, %s6635_s22  ;;  %v908_v21 = vsel %vm6923_vm10, %v733_v11, %v907_v15 }
 0x15c   : > { %v1305_v57 = vpop.permute.xlu0 %1304  ;;  %v1307_v3 = vpop.permute.xlu2 %1306  ;;  %909 = vst [vmem:[#allocation2 + $0xbc] sm:$0x1] %v908_v21  ;;  %v750_v21 = vrot.slane %v745_v39, 4 }
 0x15d   : > { %v1657_v63 = vsel %vm1643_vm12, %v7073_v41, %v1305_v57  ;;  %v1386_v4 = vpop.permute.xlu1 %1385  ;;  %v1659_v49 = vsel %vm1643_vm12, %v7095_v10, %v1307_v3 }
 0x15e   : > { %v1690_v7 = vsel %vm1676_vm13, %v1657_v63, %v1386_v4  ;;  %v738_v63 = vshll.u32 %v474_v47, 16  ;;  %v746_v4 = vshll.u32 %v475_v9, 16  ;;  %v915_v23 = vsel %vm6923_vm10, %v750_v21, %v914_v54 }
 0x15f   : > { %v1723_v41 = vsel %vm1709_vm14, %v1690_v7, %v1423_v29  ;;  %916 = vst [vmem:[#allocation2 + $0xc8] sm:$0x1] %v915_v23  ;;  %v9858_v9 = vmov 0 }
 0x160   : > { %v748_v59 = vor.u32 %v746_v4, %v745_v39 }
 0x162   : > { %1551 = vrot.lane.b32.xlu0 %v7388_v25, %s6631_s18  ;;  %1514 = vrot.lane.b32.xlu2 %v7385_v30, %s6633_s20 }
 0x163   : > { %1598 = vrot.lane.b32.xlu1 %v7418_v43, %s6634_s21 }
 0x164   : > { %v1470_v12 = vpop.permute.xlu0 %1469  ;;  %v7433_v55 = vpop.permute.xlu2 %1471 }
 0x165   : > { %v1505_v36 = vpop.permute.xlu1 %1504  ;;  %v1756_v13 = vsel %vm1742_vm15, %v1723_v41, %v1470_v12 }
 0x166   : > { %v1789_v17 = vsel %vm1775_vm1, %v1756_v13, %v1505_v36  ;;  %v910_v13 = vld [vmem:[#allocation2 + $0xc0] sm:$0xf] }
 0x167   : > { %v1822_v1 = vsel %vm1808_vm6, %v1789_v17, %v1542_v51  ;;  %v1278_v51 = vrot.slane %v1276_v37, 1 }
 0x169   : > { %v7514_v12 = vsel %vm1099_vm3, %v1274_v50, %v1278_v51 }
 0x16a   : > { %1316 = vrot.lane.b32.xlu0 %v1255_v33, %s6629_s12  ;;  %1633 = vrot.lane.b32.xlu2 %v7454_v24, %s6632_s19  ;;  %v729_v33 = vshll.u32 %v7409_v60, 16  ;;  %v737_v60 = vrot.slane %v735_v32, 7 }
 0x16b   : > { %1397 = vrot.lane.b32.xlu1 %v7385_v30, %s6628_s11  ;;  %v721_v30 = vshll.u32 %v472_v8, 16 }
 0x16c   : > { %v1589_v20 = vpop.permute.xlu0 %1588  ;;  %v7468_v40 = vpop.permute.xlu2 %1590  ;;  %v731_v57 = vor.u32 %v729_v33, %v7414_v6  ;;  %v7503_v6 = vld [vmem:[%s9798_s2] ss:$0 sm:$0xff]  ;;  %v740_v15 = vor.u32 %v738_v63, %v737_v60  ;;  %v741_v41 = vrot.slane %v737_v60, 4 }
 0x16d   : > { %v1855_v29 = vsel %vm1841_vm11, %v1822_v1, %v1589_v20  ;;  %v1624_v46 = vpop.permute.xlu1 %1623  ;;  %v723_v44 = vor.u32 %v721_v30, %v720_v27 }
 0x16e   : > { %v1888_v38 = vsel %vm1874_vm5, %v1855_v29, %v1624_v46  ;;  %v732_v36 = vsel %vm6829_vm8, %v724_v18, %v731_v57  ;;  %v911_v22 = vsel %vm6822_vm7, %v740_v15, %v910_v13  ;;  %v749_v1 = vsel %vm6829_vm8, %v741_v41, %v748_v59  ;;  %v964_v29 = vld [vmem:[#allocation2 + $0xbc] sm:$0x1]  ;;  %v2450_v15 = vld [vmem:[#allocation3 + $0x14] sm:$0x1] }
 0x16f   : > { %6143 = vmatmul.msk.bf16.gmra.mxu0 %vm1931_vm9, %v1888_v38  ;;  %v904_v7 = vsel %vm6822_vm7, %v723_v44, %v903_v45  ;;  %906 = vst.msk [vmem:[#allocation2 + $0xb8] sm:$0xf] %vm332_vm0, %v732_v36  ;;  %v1082_v61 = vunpack.c.l.b16 %v964_v29  ;;  %vm9857_vm7 = vcmask 257024   ;;  %v2444_v44 = vld [vmem:[#allocation3 + $0xc] sm:$0xf] }
 0x170   : > { %905 = vst [vmem:[#allocation2 + $0xb4] sm:$0xf] %v904_v7  ;;  %v9863_v7 = vmov 0 }
 0x171   : > { %912 = vst [vmem:[#allocation2 + $0xc0] sm:$0xf] %v911_v22  ;;  %v1098_v45 = vpack.c.b16 %v1082_v61, %v1082_v61 }
 0x172   : > { %1481 = vrot.lane.b32.xlu0 %v7418_v43, %s6635_s22  ;;  %1434 = vrot.lane.b32.xlu2 %v7388_v25, %s6630_s17  ;;  %913 = vst.msk [vmem:[#allocation2 + $0xc4] sm:$0xf] %vm332_vm0, %v749_v1  ;;  %vm9856_vm0 = vsmask.f32 7938 }
 0x173   : > { %1516 = vrot.lane.b32.xlu1 %v7454_v24, %s6633_s20  ;;  %vm7554_vm10 = vmand %vm9857_vm7, %vm9856_vm0  ;;  %v1371_v31 = vrot.slane %v1098_v45, 1  ;;  %vm9862_vm0 = vsmask.f32 256 }
 0x174   : > { %v1388_v10 = vpop.permute.xlu0 %1387  ;;  %v7511_v11 = vpop.permute.xlu2 %1389  ;;  %v9859_v9 = vsel %vm7554_vm10, 4294967295, %v9858_v9  ;;  %vm7584_vm7 = vmand %vm391_vm4, %vm9862_vm0  ;;  %vm9867_vm4 = vcmask 257024  }
 0x175   : > { %v1692_v35 = vsel %vm1676_vm13, %v1659_v49, %v1388_v10  ;;  %v1425_v3 = vpop.permute.xlu1 %1424  ;;  %9860 = vst [vmem:[#allocation6_spill] sm:$0xff] %v9859_v9  ;;  %v9864_v7 = vsel %vm7584_vm7, 4294967295, %v9863_v7  ;;  %vm9870_vm0 = vmmov %vm9867_vm4 }
 0x176   : > { %v1725_v8 = vsel %vm1709_vm14, %v1692_v35, %v1425_v3  ;;  %v1288_v35 = vshll.u32 %v1098_v45, 16  ;;  %9865 = vst [vmem:[#allocation8_spill] sm:$0xff] %v9864_v7 }
 0x177   : > { %v1758_v0 = vsel %vm1742_vm15, %v1725_v8, %v7433_v55  ;;  %v7566_v51 = vld [vmem:[#allocation2 + $0xb4] sm:$0xff] }
 0x178   : > { %v1977_v17 = vpop.f32.mrf.mxu0  ;;  %v1283_v57 = vshll.u32 %v7566_v51, 16  ;;  %v1281_v41 = vshrl.u32 %v7566_v51, 16 }
 0x179   : > { %v1978_v62 = vadd.f32 %v7503_v6, %v1977_v17 }
 0x17a   : > { %1600 = vrot.lane.b32.xlu0 %v7514_v12, %s6634_s21  ;;  %1553 = vrot.lane.b32.xlu2 %v7431_v14, %s6631_s18  ;;  %v1285_v59 = vrot.slane %v1283_v57, 1 }
 0x17b   : > { %v7538_v5 = vmax.f32 %v1978_v62, 0.0  ;;  %1635 = vrot.lane.b32.xlu1 %v7522_v19, %s6632_s19 }
 0x17c   : > { %v1507_v26 = vpop.permute.xlu0 %1506  ;;  %v7548_v46 = vpop.permute.xlu2 %1508 }
 0x17d   : > { %9855 = vst [vmem:[#allocation5_spill] sm:$0xff] %v7538_v5  ;;  %v2089_v20 = vpack.c.bf16 %v7538_v5, %v7538_v5  ;;  %v1544_v53 = vpop.permute.xlu1 %1543  ;;  %v1791_v55 = vsel %vm1775_vm1, %v1758_v0, %v1507_v26  ;;  %v1290_v0 = vrot.slane %v1288_v35, 1 }
 0x17e   : > { %v1824_v30 = vsel %vm1808_vm6, %v1791_v55, %v1544_v53  ;;  %v1286_v55 = vor.u32 %v1285_v59, %v1281_v41 }
 0x17f   : > { %v2122_v27 = vshrl.u32 %v2089_v20, 16  ;;  %v2125_v37 = vshll.u32 %v2089_v20, 16  ;;  %v1857_v47 = vsel %vm1841_vm11, %v1824_v30, %v7468_v40  ;;  %v7614_v30 = vld [vmem:[#allocation2 + $0xc0] sm:$0xff] }
 0x180   : > { %v1979_v38 = vpop.f32.mrf.mxu0 }
 0x181   : > { %v2124_v34 = vrot.slane %v2122_v27, 7  ;;  %v1980_v33 = vadd.f32 %v7503_v6, %v1979_v38 }
 0x182   : > { %1399 = vrot.lane.b32.xlu0 %v7454_v24, %s6628_s11  ;;  %1318 = vrot.lane.b32.xlu2 %v7418_v43, %s6629_s12 }
 0x183   : > { %v2127_v48 = vor.u32 %v2125_v37, %v2124_v34  ;;  %v7562_v49 = vmax.f32 %v1980_v33, 0.0  ;;  %1436 = vrot.lane.b32.xlu1 %v7431_v14, %s6630_s17  ;;  %v2128_v3 = vrot.slane %v2124_v34, 4  ;;  %v2453_v33 = vld [vmem:[#allocation3 + $0x18] sm:$0xf] }
 0x184   : > { %v1626_v50 = vpop.permute.xlu0 %1625  ;;  %v7576_v18 = vpop.permute.xlu2 %1627 }
 0x185   : > { %9861 = vst [vmem:[#allocation7_spill] sm:$0xff] %v7562_v49  ;;  %v2445_v32 = vsel %vm7554_vm10, %v2127_v48, %v2444_v44  ;;  %v2090_v24 = vpack.c.bf16 %v7562_v49, %v7562_v49  ;;  %v1890_v40 = vsel %vm1874_vm5, %v1857_v47, %v1626_v50  ;;  %v1309_v42 = vpop.permute.xlu1 %1308  ;;  %v7626_v50 = vsel %vm1099_vm3, %v1286_v55, %v1290_v0 }
 0x186   : > { %2446 = vst [vmem:[#allocation3 + $0xc] sm:$0xf] %v2445_v32  ;;  %6144 = vmatmul.msk.bf16.gmra.mxu0 %vm1931_vm9, %v1890_v40  ;;  %v1661_v43 = vsel %vm1643_vm12, %v7144_v56, %v1309_v42  ;;  %v1370_v56 = vrot.slane %v7566_v51, 1 }
 0x187   : > { %v2130_v39 = vshrl.u32 %v2090_v24, 16  ;;  %v2133_v63 = vshll.u32 %v2090_v24, 16  ;;  %v1694_v13 = vsel %vm1676_vm13, %v1661_v43, %v7511_v11  ;;  %v967_v11 = vld [vmem:[#allocation2 + $0xc8] sm:$0x1]  ;;  %v1448_v24 = vshll.u32 %v7614_v30, 16 }
 0x188   : > { %v1982_v10 = vpop.f32.mrf.mxu0  ;;  %v7611_v53 = vsel %vm1324_vm2, %v1370_v56, %v1371_v31  ;;  %v1443_v38 = vunpack.c.l.b16 %v967_v11  ;;  %v2457_v56 = vld [vmem:[#allocation3 + $0x20] sm:$0x1] }
 0x189   : > { %v2132_v60 = vrot.slane %v2130_v39, 7  ;;  %v1983_v4 = vadd.f32 %v7503_v6, %v1982_v10 }
 0x18a   : > { %1518 = vrot.lane.b32.xlu0 %v7522_v19, %s6633_s20  ;;  %1483 = vrot.lane.b32.xlu2 %v7514_v12, %s6635_s22  ;;  %v7628_v32 = vpack.c.b16 %v1443_v38, %v1443_v38 }
 0x18b   : > { %v2135_v21 = vor.u32 %v2133_v63, %v2132_v60  ;;  %v2137_v36 = vrot.slane %v2132_v60, 4  ;;  %v7594_v54 = vmax.f32 %v1983_v4, 0.0  ;;  %1555 = vrot.lane.b32.xlu1 %v7566_v51, %s6631_s18  ;;  %v1446_v60 = vshrl.u32 %v7614_v30, 16 }
 0x18c   : > { %v1427_v8 = vpop.permute.xlu0 %1426  ;;  %v7608_v26 = vpop.permute.xlu2 %1428  ;;  %v1450_v63 = vrot.slane %v1448_v24, 1  ;;  %v1453_v4 = vshll.u32 %v7628_v32, 16 }
 0x18d   : > { %9866 = vst [vmem:[#allocation9_spill] sm:$0xff] %v7594_v54  ;;  %v2136_v17 = vsel %vm6829_vm8, %v2128_v3, %v2135_v21  ;;  %v2451_v22 = vsel %vm7584_vm7, %v2137_v36, %v2450_v15  ;;  %v2091_v62 = vpack.c.bf16 %v7594_v54, %v7594_v54  ;;  %v1474_v1 = vpop.permute.xlu1 %1473  ;;  %v1727_v23 = vsel %vm1709_vm14, %v1694_v13, %v1427_v8 }
 0x18e   : > { %2447 = vst.msk [vmem:[#allocation3 + $0x10] sm:$0xf] %vm9867_vm4, %v2136_v17  ;;  %v1760_v29 = vsel %vm1742_vm15, %v1727_v23, %v1474_v1  ;;  %v1451_v13 = vor.u32 %v1450_v63, %v1446_v60  ;;  %v1455_v8 = vrot.slane %v1453_v4, 1  ;;  %v2464_v63 = vld [vmem:[#allocation3 + $0x2c] sm:$0x1]  ;;  %vm9872_vm4 = vmmov %vm9870_vm0 }
 0x18f   : > { %2452 = vst [vmem:[#allocation3 + $0x14] sm:$0x1] %v2451_v22  ;;  %v2139_v20 = vshrl.u32 %v2091_v62, 16  ;;  %v2142_v34 = vshll.u32 %v2091_v62, 16  ;;  %v1793_v44 = vsel %vm1775_vm1, %v1760_v29, %v7548_v46 }
 0x190   : > { %v1984_v27 = vpop.f32.mrf.mxu0  ;;  %v1456_v29 = vsel %vm1099_vm3, %v1451_v13, %v1455_v8 }
 0x191   : > { %v2141_v61 = vrot.slane %v2139_v20, 7  ;;  %v1985_v37 = vadd.f32 %v7503_v6, %v1984_v27 }
 0x192   : > { %1637 = vrot.lane.b32.xlu0 %v7611_v53, %s6632_s19  ;;  %1602 = vrot.lane.b32.xlu2 %v7626_v50, %s6634_s21 }
 0x193   : > { %v2144_v47 = vor.u32 %v2142_v34, %v2141_v61  ;;  %v7621_v48 = vmax.f32 %v1985_v37, 0.0  ;;  %1320 = vrot.lane.b32.xlu1 %v7514_v12, %s6629_s12  ;;  %v2145_v41 = vrot.slane %v2141_v61, 4  ;;  %v2460_v61 = vld [vmem:[#allocation3 + $0x24] sm:$0xf] }
 0x194   : > { %v1546_v45 = vpop.permute.xlu0 %1545  ;;  %v7639_v39 = vpop.permute.xlu2 %1547 }
 0x195   : > { %9868 = vst [vmem:[#allocation10_spill] sm:$0xff] %v7621_v48  ;;  %v2454_v46 = vsel %vm7554_vm10, %v2144_v47, %v2453_v33  ;;  %v1826_v40 = vsel %vm1808_vm6, %v1793_v44, %v1546_v45  ;;  %v2092_v42 = vpack.c.bf16 %v7621_v48, %v7621_v48  ;;  %v1593_v12 = vpop.permute.xlu1 %1592  ;;  %v970_v33 = vld [vmem:[#allocation2 + $0xd4] sm:$0x1] }
 0x196   : > { %2455 = vst [vmem:[#allocation3 + $0x18] sm:$0xf] %v2454_v46  ;;  %v1859_v57 = vsel %vm1841_vm11, %v1826_v40, %v1593_v12  ;;  %v1562_v40 = vunpack.c.l.b16 %v970_v33 }
 0x197   : > { %v2147_v43 = vshrl.u32 %v2092_v42, 16  ;;  %v1892_v10 = vsel %vm1874_vm5, %v1859_v57, %v7576_v18  ;;  %v2150_v3 = vshll.u32 %v2092_v42, 16 }
 0x198   : > { %v1987_v31 = vpop.f32.mrf.mxu0  ;;  %6145 = vmatmul.msk.bf16.gmra.mxu0 %vm1931_vm9, %v1892_v10  ;;  %v1490_v10 = vrot.slane %v7628_v32, 1 }
 0x199   : > { %v2149_v35 = vrot.slane %v2147_v43, 7  ;;  %v1988_v15 = vadd.f32 %v7503_v6, %v1987_v31  ;;  %v1489_v43 = vrot.slane %v7614_v30, 1 }
 0x19a   : > { %1438 = vrot.lane.b32.xlu0 %v7566_v51, %s6630_s17  ;;  %1401 = vrot.lane.b32.xlu2 %v7522_v19, %s6628_s11 }
 0x19b   : > { %v2152_v59 = vor.u32 %v2150_v3, %v2149_v35  ;;  %v2154_v21 = vrot.slane %v2149_v35, 4  ;;  %v7649_v18 = vmax.f32 %v1988_v15, 0.0  ;;  %1485 = vrot.lane.b32.xlu1 %v7626_v50, %s6635_s22  ;;  %v1563_v35 = vpack.c.b16 %v1562_v40, %v1562_v40 }
 0x19c   : > { %v1311_v36 = vpop.permute.xlu0 %1310  ;;  %v1313_v23 = vpop.permute.xlu2 %1312  ;;  %v1491_v32 = vsel %vm1324_vm2, %v1489_v43, %v1490_v10 }
 0x19d   : > { %9869 = vst [vmem:[#allocation11_spill] sm:$0xff] %v7649_v18  ;;  %v2153_v17 = vsel %vm6829_vm8, %v2145_v41, %v2152_v59  ;;  %v2458_v22 = vsel %vm7584_vm7, %v2154_v21, %v2457_v56  ;;  %v1663_v62 = vsel %vm1643_vm12, %v7226_v16, %v1311_v36  ;;  %v2093_v1 = vpack.c.bf16 %v7649_v18, %v7649_v18  ;;  %v1392_v11 = vpop.permute.xlu1 %1391 }
 0x19e   : > { %2456 = vst.msk [vmem:[#allocation3 + $0x1c] sm:$0xf] %vm9870_vm0, %v2153_v17  ;;  %v1696_v19 = vsel %vm1676_vm13, %v1663_v62, %v1392_v11  ;;  %v1572_v11 = vshll.u32 %v1563_v35, 16 }
 0x19f   : > { %2459 = vst [vmem:[#allocation3 + $0x20] sm:$0x1] %v2458_v22  ;;  %v2156_v0 = vshrl.u32 %v2093_v1, 16  ;;  %v2159_v27 = vshll.u32 %v2093_v1, 16  ;;  %v1729_v34 = vsel %vm1709_vm14, %v1696_v19, %v7608_v26  ;;  %v7681_v26 = vld [vmem:[#allocation2 + $0xcc] sm:$0xff]  ;;  %v1665_v19 = vsel %vm1643_vm12, %v7257_v58, %v1313_v23 }
 0x1a0   : > { %v1989_v20 = vpop.f32.mrf.mxu0  ;;  %v1567_v3 = vshll.u32 %v7681_v26, 16  ;;  %v1565_v62 = vshrl.u32 %v7681_v26, 16  ;;  %v2467_v23 = vld [vmem:[#allocation3 + $0x30] sm:$0xf] }
 0x1a1   : > { %v2158_v55 = vrot.slane %v2156_v0, 7  ;;  %v1990_v38 = vadd.f32 %v7503_v6, %v1989_v20 }
 0x1a2   : > { %1557 = vrot.lane.b32.xlu0 %v7614_v30, %s6631_s18  ;;  %1520 = vrot.lane.b32.xlu2 %v7611_v53, %s6633_s20  ;;  %v1569_v1 = vrot.slane %v1567_v3, 1  ;;  %v2471_v3 = vld [vmem:[#allocation3 + $0x38] sm:$0x1] }
 0x1a3   : > { %v2161_v16 = vor.u32 %v2159_v27, %v2158_v55  ;;  %v7671_v37 = vmax.f32 %v1990_v38, 0.0  ;;  %1604 = vrot.lane.b32.xlu1 %v1456_v29, %s6634_s21  ;;  %v2162_v15 = vrot.slane %v2158_v55, 4  ;;  %v1574_v27 = vrot.slane %v1572_v11, 1 }
 0x1a4   : > { %v1476_v44 = vpop.permute.xlu0 %1475  ;;  %v7683_v42 = vpop.permute.xlu2 %1477  ;;  %v1570_v55 = vor.u32 %v1569_v1, %v1565_v62 }
 0x1a5   : > { %9871 = vst [vmem:[#allocation12_spill] sm:$0xff] %v7671_v37  ;;  %v2461_v47 = vsel %vm7554_vm10, %v2161_v16, %v2460_v61  ;;  %v2094_v45 = vpack.c.bf16 %v7671_v37, %v7671_v37  ;;  %v1511_v24 = vpop.permute.xlu1 %1510  ;;  %v1762_v46 = vsel %vm1742_vm15, %v1729_v34, %v1476_v44  ;;  %v1608_v16 = vrot.slane %v7681_v26, 1 }
 0x1a6   : > { %2462 = vst [vmem:[#allocation3 + $0x24] sm:$0xf] %v2461_v47  ;;  %v1795_v57 = vsel %vm1775_vm1, %v1762_v46, %v1511_v24  ;;  %v1609_v34 = vrot.slane %v1563_v35, 1  ;;  %v1575_v40 = vsel %vm1099_vm3, %v1570_v55, %v1574_v27 }
 0x1a7   : > { %v2164_v12 = vshrl.u32 %v2094_v45, 16  ;;  %v2167_v60 = vshll.u32 %v2094_v45, 16  ;;  %v1828_v4 = vsel %vm1808_vm6, %v1795_v57, %v7639_v39 }
 0x1a8   : > { %v1610_v57 = vsel %vm1324_vm2, %v1608_v16, %v1609_v34 }
 0x1a9   : > { %v2166_v31 = vrot.slane %v2164_v12, 7 }
 0x1aa   : > { %1322 = vrot.lane.b32.xlu0 %v7626_v50, %s6629_s12  ;;  %1639 = vrot.lane.b32.xlu2 %v1491_v32, %s6632_s19 }
 0x1ab   : > { %v2169_v56 = vor.u32 %v2167_v60, %v2166_v31  ;;  %v2171_v41 = vrot.slane %v2166_v31, 4  ;;  %1403 = vrot.lane.b32.xlu1 %v7611_v53, %s6628_s11 }
 0x1ac   : > { %v1595_v59 = vpop.permute.xlu0 %1594  ;;  %v1992_v21 = vpop.f32.mrf.mxu0 }
 0x1ad   : > { %v2170_v50 = vsel %vm6829_vm8, %v2162_v15, %v2169_v56  ;;  %v2465_v39 = vsel %vm7584_vm7, %v2171_v41, %v2464_v63  ;;  %v1861_v36 = vsel %vm1841_vm11, %v1828_v4, %v1595_v59  ;;  %v1993_v13 = vadd.f32 %v7503_v6, %v1992_v21  ;;  %v1630_v8 = vpop.permute.xlu1 %1629  ;;  %v1597_v17 = vpop.permute.xlu2 %1596 }
 0x1ae   : > { %2463 = vst.msk [vmem:[#allocation3 + $0x28] sm:$0xf] %vm9872_vm4, %v2170_v50  ;;  %v1894_v53 = vsel %vm1874_vm5, %v1861_v36, %v1630_v8  ;;  %vm9878_vm4 = vmmov %vm9870_vm0 }
 0x1af   : > { %2466 = vst [vmem:[#allocation3 + $0x2c] sm:$0x1] %v2465_v39  ;;  %v7705_v22 = vmax.f32 %v1993_v13, 0.0  ;;  %6146 = vmatmul.msk.bf16.gmra.mxu0 %vm1931_vm9, %v1894_v53  ;;  %v6531_v53 = vld [vmem:[%s9799_s3 + $0x80] sm:$0xff] }
 0x1b1   : > { %9873 = vst [vmem:[#allocation13_spill] sm:$0xff] %v7705_v22  ;;  %v2095_v0 = vpack.c.bf16 %v7705_v22, %v7705_v22 }
 0x1b2   : > { %1487 = vrot.lane.b32.xlu0 %v1456_v29, %s6635_s22  ;;  %1440 = vrot.lane.b32.xlu2 %v7614_v30, %s6630_s17 }
 0x1b3   : > { %v2173_v20 = vshrl.u32 %v2095_v0, 16  ;;  %1522 = vrot.lane.b32.xlu1 %v1491_v32, %s6633_s20  ;;  %v2176_v44 = vshll.u32 %v2095_v0, 16  ;;  %s6637_s20 = smov 96  }
 0x1b4   : > { %v1394_v38 = vpop.permute.xlu0 %1393  ;;  %v1994_v61 = vpop.f32.mrf.mxu0 }
 0x1b5   : > { %v2175_v33 = vrot.slane %v2173_v20, 7  ;;  %v1698_v29 = vsel %vm1676_vm13, %v1665_v19, %v1394_v38  ;;  %v1995_v47 = vadd.f32 %v7503_v6, %v1994_v61  ;;  %v1431_v58 = vpop.permute.xlu1 %1430  ;;  %v1396_v45 = vpop.permute.xlu2 %1395 }
 0x1b6   : > { %v1731_v12 = vsel %vm1709_vm14, %v1698_v29, %v1431_v58 }
 0x1b7   : > { %v2178_v24 = vor.u32 %v2176_v44, %v2175_v33  ;;  %v7720_v46 = vmax.f32 %v1995_v47, 0.0  ;;  %v1764_v31 = vsel %vm1742_vm15, %v1731_v12, %v7683_v42  ;;  %v2179_v41 = vrot.slane %v2175_v33, 4  ;;  %v6532_v42 = vld [vmem:[%s9799_s3 + $0x88] sm:$0xff]  ;;  %v2474_v33 = vld [vmem:[#allocation3 + $0x3c] sm:$0xf] }
 0x1b8   : > { %6580 = vmatpush.bf16.msra.mxu3 %v6532_v42 }
 0x1b9   : > { %9874 = vst [vmem:[#allocation14_spill] sm:$0xff] %v7720_v46  ;;  %v2468_v30 = vsel %vm7554_vm10, %v2178_v24, %v2467_v23  ;;  %v2096_v43 = vpack.c.bf16 %v7720_v46, %v7720_v46 }
 0x1ba   : > { %2469 = vst [vmem:[#allocation3 + $0x30] sm:$0xf] %v2468_v30  ;;  %1606 = vrot.lane.b32.xlu0 %v1575_v40, %s6634_s21  ;;  %1559 = vrot.lane.b32.xlu2 %v7681_v26, %s6631_s18  ;;  %s6636_s18 = smov 64  }
 0x1bb   : > { %v2181_v10 = vshrl.u32 %v2096_v43, 16  ;;  %1641 = vrot.lane.b32.xlu1 %v1610_v57, %s6632_s19  ;;  %v2184_v4 = vshll.u32 %v2096_v43, 16 }
 0x1bc   : > { %v1513_v60 = vpop.permute.xlu0 %1512  ;;  %6581 = vmatpush.bf16.msra.mxu3 %v6531_v53 }
 0x1bd   : > { %v2183_v63 = vrot.slane %v2181_v10, 7  ;;  %v1550_v35 = vpop.permute.xlu1 %1549  ;;  %v1797_v15 = vsel %vm1775_vm1, %v1764_v31, %v1513_v60  ;;  %v1515_v56 = vpop.permute.xlu2 %1514  ;;  %v2478_v31 = vld [vmem:[#allocation3 + $0x44] sm:$0x1] }
 0x1be   : > { %v1830_v21 = vsel %vm1808_vm6, %v1797_v15, %v1550_v35 }
 0x1bf   : > { %v2186_v32 = vor.u32 %v2184_v4, %v2183_v63  ;;  %v2188_v59 = vrot.slane %v2183_v63, 4  ;;  %v1863_v39 = vsel %vm1841_vm11, %v1830_v21, %v1597_v17 }
 0x1c1   : > { %v2187_v50 = vsel %vm6829_vm8, %v2179_v41, %v2186_v32  ;;  %v2472_v26 = vsel %vm7584_vm7, %v2188_v59, %v2471_v3 }
 0x1c2   : > { %2470 = vst.msk [vmem:[#allocation3 + $0x34] sm:$0xf] %vm9870_vm0, %v2187_v50 }
 0x1c3   : > { %2473 = vst [vmem:[#allocation3 + $0x38] sm:$0x1] %v2472_v26  ;;  %v1997_v36 = vpop.f32.mrf.mxu0 }
 0x1c4   : > { %v1998_v13 = vadd.f32 %v7503_v6, %v1997_v36  ;;  %v1632_v8 = vpop.permute.xlu0 %1631 }
 0x1c5   : > { %v1896_v62 = vsel %vm1874_vm5, %v1863_v39, %v1632_v8  ;;  %v1315_v1 = vpop.permute.xlu1 %1314  ;;  %v1634_v0 = vpop.permute.xlu2 %1633 }
 0x1c6   : > { %v7751_v11 = vmax.f32 %v1998_v13, 0.0  ;;  %6147 = vmatmul.msk.bf16.gmra.mxu0 %vm1931_vm9, %v1896_v62  ;;  %v1667_v19 = vsel %vm1643_vm12, %v7303_v52, %v1315_v1 }
 0x1c7   : > { %v1700_v55 = vsel %vm1676_vm13, %v1667_v19, %v1396_v45 }
 0x1c8   : > { %9875 = vst [vmem:[#allocation15_spill] sm:$0xff] %v7751_v11  ;;  %v2097_v17 = vpack.c.bf16 %v7751_v11, %v7751_v11 }
 0x1ca   : > { %v2190_v20 = vshrl.u32 %v2097_v17, 16  ;;  %v2193_v61 = vshll.u32 %v2097_v17, 16 }
 0x1cb   : > { %v1999_v27 = vpop.f32.mrf.mxu0 }
 0x1cc   : > { %v2192_v38 = vrot.slane %v2190_v20, 7  ;;  %v2000_v16 = vadd.f32 %v7503_v6, %v1999_v27  ;;  %v1433_v34 = vpop.permute.xlu0 %1432 }
 0x1cd   : > { %v1480_v44 = vpop.permute.xlu1 %1479  ;;  %v1733_v58 = vsel %vm1709_vm14, %v1700_v55, %v1433_v34  ;;  %v1435_v23 = vpop.permute.xlu2 %1434 }
 0x1ce   : > { %v2195_v29 = vor.u32 %v2193_v61, %v2192_v38  ;;  %v7760_v47 = vmax.f32 %v2000_v16, 0.0  ;;  %v1766_v24 = vsel %vm1742_vm15, %v1733_v58, %v1480_v44  ;;  %v2196_v10 = vrot.slane %v2192_v38, 4 }
 0x1cf   : > { %v1799_v12 = vsel %vm1775_vm1, %v1766_v24, %v1515_v56 }
 0x1d0   : > { %9876 = vst [vmem:[#allocation16_spill] sm:$0xff] %v7760_v47  ;;  %v2475_v52 = vsel %vm7554_vm10, %v2195_v29, %v2474_v33  ;;  %v2098_v45 = vpack.c.bf16 %v7760_v47, %v7760_v47 }
 0x1d1   : > { %2476 = vst [vmem:[#allocation3 + $0x3c] sm:$0xf] %v2475_v52 }
 0x1d2   : > { %v2198_v40 = vshrl.u32 %v2098_v45, 16  ;;  %v2201_v30 = vshll.u32 %v2098_v45, 16 }
 0x1d4   : > { %v2200_v57 = vrot.slane %v2198_v40, 7  ;;  %v1552_v43 = vpop.permute.xlu0 %1551 }
 0x1d5   : > { %v1832_v60 = vsel %vm1808_vm6, %v1799_v12, %v1552_v43  ;;  %v2002_v63 = vpop.f32.mrf.mxu0  ;;  %v1599_v4 = vpop.permute.xlu1 %1598 }
 0x1d6   : > { %v2203_v35 = vor.u32 %v2201_v30, %v2200_v57  ;;  %v2205_v3 = vrot.slane %v2200_v57, 4  ;;  %v2003_v15 = vadd.f32 %v7503_v6, %v2002_v63  ;;  %v1865_v41 = vsel %vm1841_vm11, %v1832_v60, %v1599_v4  ;;  %v1554_v32 = vpop.permute.xlu2 %1553  ;;  %v2485_v57 = vld [vmem:[#allocation3 + $0x50] sm:$0x1] }
 0x1d7   : > { %v1898_v59 = vsel %vm1874_vm5, %v1865_v41, %v1634_v0  ;;  %v2481_v0 = vld [vmem:[#allocation3 + $0x48] sm:$0xf] }
 0x1d8   : > { %v2204_v56 = vsel %vm6829_vm8, %v2196_v10, %v2203_v35  ;;  %v2479_v21 = vsel %vm7584_vm7, %v2205_v3, %v2478_v31  ;;  %v7777_v42 = vmax.f32 %v2003_v15, 0.0  ;;  %6148 = vmatmul.msk.bf16.gmra.mxu0 %vm1931_vm9, %v1898_v59 }
 0x1d9   : > { %2477 = vst.msk [vmem:[#allocation3 + $0x40] sm:$0xf] %vm9878_vm4, %v2204_v56  ;;  %vm9882_vm4 = vmmov %vm9870_vm0 }
 0x1da   : > { %9877 = vst [vmem:[#allocation17_spill] sm:$0xff] %v7777_v42  ;;  %v2099_v50 = vpack.c.bf16 %v7777_v42, %v7777_v42 }
 0x1db   : > { %2480 = vst [vmem:[#allocation3 + $0x44] sm:$0x1] %v2479_v21 }
 0x1dc   : > { %v2207_v26 = vshrl.u32 %v2099_v50, 16  ;;  %v1317_v39 = vpop.permute.xlu0 %1316  ;;  %v2210_v62 = vshll.u32 %v2099_v50, 16 }
 0x1dd   : > { %v1669_v36 = vsel %vm1643_vm12, %v7361_v2, %v1317_v39  ;;  %v2004_v13 = vpop.f32.mrf.mxu0  ;;  %v1398_v8 = vpop.permute.xlu1 %1397 }
 0x1de   : > { %v2209_v53 = vrot.slane %v2207_v26, 7  ;;  %v2005_v1 = vadd.f32 %v7503_v6, %v2004_v13  ;;  %v1319_v17 = vpop.permute.xlu2 %1318  ;;  %v1702_v55 = vsel %vm1676_vm13, %v1669_v36, %v1398_v8 }
 0x1df   : > { %v1735_v34 = vsel %vm1709_vm14, %v1702_v55, %v1435_v23 }
 0x1e0   : > { %v2212_v19 = vor.u32 %v2210_v62, %v2209_v53  ;;  %v7786_v20 = vmax.f32 %v2005_v1, 0.0  ;;  %v6502_v27 = vld [vmem:[#allocation3 + $0x3c] sm:$0xff]  ;;  %v2213_v43 = vrot.slane %v2209_v53, 4 }
 0x1e1   : > { %v2979_v58 = vrot.slane %v6502_v27, 1  ;;  %v8241_v48 = vld [vmem:[#allocation3 + $0x3c] sm:$0xff] }
 0x1e2   : > { %9879 = vst [vmem:[#allocation18_spill] sm:$0xff] %v7786_v20  ;;  %v2575_v38 = vld [vmem:[#allocation3 + $0x44] sm:$0x1]  ;;  %v2482_v61 = vsel %vm7554_vm10, %v2212_v19, %v2481_v0  ;;  %v2100_v2 = vpack.c.bf16 %v7786_v20, %v7786_v20 }
 0x1e3   : > { %v2713_v16 = vunpack.c.l.b16 %v2575_v38  ;;  %2483 = vst [vmem:[#allocation3 + $0x48] sm:$0xf] %v2482_v61  ;;  %v2488_v61 = vld [vmem:[#allocation3 + $0x54] sm:$0xf] }
 0x1e4   : > { %v2215_v33 = vshrl.u32 %v2100_v2, 16  ;;  %v1482_v44 = vpop.permute.xlu0 %1481  ;;  %v2218_v45 = vshll.u32 %v2100_v2, 16 }
 0x1e5   : > { %v7794_v29 = vpack.c.b16 %v2713_v16, %v2713_v16  ;;  %v1517_v24 = vpop.permute.xlu1 %1516  ;;  %v1768_v40 = vsel %vm1742_vm15, %v1735_v34, %v1482_v44 }
 0x1e6   : > { %v2217_v52 = vrot.slane %v2215_v33, 7  ;;  %v1801_v30 = vsel %vm1775_vm1, %v1768_v40, %v1517_v24  ;;  %v1484_v60 = vpop.permute.xlu2 %1483 }
 0x1e7   : > { %v2980_v12 = vrot.slane %v7794_v29, 1  ;;  %v1834_v35 = vsel %vm1808_vm6, %v1801_v30, %v1554_v32  ;;  %v1671_v32 = vsel %vm1643_vm12, %v7388_v25, %v1319_v17 }
 0x1e8   : > { %v2220_v10 = vor.u32 %v2218_v45, %v2217_v52  ;;  %v2222_v31 = vrot.slane %v2217_v52, 4 }
 0x1e9   : > { %v7800_v23 = vsel %vm1324_vm2, %v2979_v58, %v2980_v12 }
 0x1ea   : > { %6300 = vmatmul.msk.bf16.vlgmr.msra.gmra.mxu3 %vm1874_vm5, %v7800_v23  ;;  %v2221_v63 = vsel %vm6829_vm8, %v2213_v43, %v2220_v10  ;;  %v2486_v4 = vsel %vm7584_vm7, %v2222_v31, %v2485_v57  ;;  %v2492_v43 = vld [vmem:[#allocation3 + $0x5c] sm:$0x1] }
 0x1eb   : > { %2484 = vst.msk [vmem:[#allocation3 + $0x4c] sm:$0xf] %vm9870_vm0, %v2221_v63 }
 0x1ec   : > { %2487 = vst [vmem:[#allocation3 + $0x50] sm:$0x1] %v2486_v4  ;;  %v1601_v3 = vpop.permute.xlu0 %1600  ;;  %v2007_v15 = vpop.f32.mrf.mxu0 }
 0x1ed   : > { %v1867_v41 = vsel %vm1841_vm11, %v1834_v35, %v1601_v3  ;;  %v2008_v59 = vadd.f32 %v7503_v6, %v2007_v15  ;;  %v1636_v56 = vpop.permute.xlu1 %1635 }
 0x1ee   : > { %v1900_v21 = vsel %vm1874_vm5, %v1867_v41, %v1636_v56  ;;  %v1603_v13 = vpop.permute.xlu2 %1602 }
 0x1ef   : > { %v7813_v50 = vmax.f32 %v2008_v59, 0.0  ;;  %6149 = vmatmul.msk.bf16.gmra.mxu0 %vm1931_vm9, %v1900_v21 }
 0x1f1   : > { %9880 = vst [vmem:[#allocation19_spill] sm:$0xff] %v7813_v50  ;;  %v2101_v26 = vpack.c.bf16 %v7813_v50, %v7813_v50 }
 0x1f2   : > { %v6503_v62 = vld [vmem:[#allocation3 + $0x48] sm:$0xff] }
 0x1f3   : > { %v2224_v39 = vshrl.u32 %v2101_v26, 16  ;;  %v2578_v36 = vld [vmem:[#allocation3 + $0x50] sm:$0x1]  ;;  %v2227_v19 = vshll.u32 %v2101_v26, 16  ;;  %v2982_v17 = vrot.slane %v6503_v62, 1  ;;  %v8258_v49 = vld [vmem:[#allocation3 + $0x48] sm:$0xff] }
 0x1f4   : > { %v1400_v8 = vpop.permute.xlu0 %1399  ;;  %v2009_v53 = vpop.f32.mrf.mxu0  ;;  %v2714_v1 = vunpack.c.l.b16 %v2578_v36 }
 0x1f5   : > { %v2226_v0 = vrot.slane %v2224_v39, 7  ;;  %v1704_v55 = vsel %vm1676_vm13, %v1671_v32, %v1400_v8  ;;  %v2010_v27 = vadd.f32 %v7503_v6, %v2009_v53  ;;  %v1437_v38 = vpop.permute.xlu1 %1436 }
 0x1f6   : > { %v7822_v2 = vpack.c.b16 %v2714_v1, %v2714_v1  ;;  %v1737_v25 = vsel %vm1709_vm14, %v1704_v55, %v1437_v38  ;;  %v1402_v31 = vpop.permute.xlu2 %1401 }
 0x1f7   : > { %v2229_v16 = vor.u32 %v2227_v19, %v2226_v0  ;;  %v7824_v34 = vmax.f32 %v2010_v27, 0.0  ;;  %v1770_v45 = vsel %vm1742_vm15, %v1737_v25, %v1484_v60  ;;  %v2230_v63 = vrot.slane %v2226_v0, 4  ;;  %v2495_v25 = vld [vmem:[#allocation3 + $0x60] sm:$0xf] }
 0x1f8   : > { %v2983_v33 = vrot.slane %v7822_v2, 1 }
 0x1f9   : > { %9881 = vst [vmem:[#allocation20_spill] sm:$0xff] %v7824_v34  ;;  %v2489_v44 = vsel %vm7554_vm10, %v2229_v16, %v2488_v61  ;;  %v2102_v58 = vpack.c.bf16 %v7824_v34, %v7824_v34 }
 0x1fa   : > { %2490 = vst [vmem:[#allocation3 + $0x54] sm:$0xf] %v2489_v44  ;;  %v7833_v24 = vsel %vm1324_vm2, %v2982_v17, %v2983_v33 }
 0x1fb   : > { %v2232_v52 = vshrl.u32 %v2102_v58, 16  ;;  %6301 = vmatmul.msk.bf16.gmra.mxu3 %vm1874_vm5, %v7833_v24  ;;  %v2235_v57 = vshll.u32 %v2102_v58, 16 }
 0x1fc   : > { %v1519_v40 = vpop.permute.xlu0 %1518 }
 0x1fd   : > { %v2234_v12 = vrot.slane %v2232_v52, 7  ;;  %v1556_v30 = vpop.permute.xlu1 %1555  ;;  %v1803_v10 = vsel %vm1775_vm1, %v1770_v45, %v1519_v40 }
 0x1fe   : > { %v1836_v3 = vsel %vm1808_vm6, %v1803_v10, %v1556_v30  ;;  %v1521_v53 = vpop.permute.xlu2 %1520 }
 0x1ff   : > { %v2237_v4 = vor.u32 %v2235_v57, %v2234_v12  ;;  %v2239_v35 = vrot.slane %v2234_v12, 4  ;;  %v1869_v41 = vsel %vm1841_vm11, %v1836_v3, %v1603_v13 }
 0x201   : > { %v2238_v15 = vsel %vm6829_vm8, %v2230_v63, %v2237_v4  ;;  %v2493_v60 = vsel %vm7584_vm7, %v2239_v35, %v2492_v43 }
 0x202   : > { %2491 = vst.msk [vmem:[#allocation3 + $0x58] sm:$0xf] %vm9882_vm4, %v2238_v15  ;;  %v2499_v15 = vld [vmem:[#allocation3 + $0x68] sm:$0x1]  ;;  %vm3250_vm4 = vcmask 523264  }
 0x203   : > { %2494 = vst [vmem:[#allocation3 + $0x5c] sm:$0x1] %v2493_v60  ;;  %v2012_v59 = vpop.f32.mrf.mxu0 }
 0x204   : > { %v2013_v56 = vadd.f32 %v7503_v6, %v2012_v59  ;;  %v1638_v21 = vpop.permute.xlu0 %1637 }
 0x205   : > { %v1902_v26 = vsel %vm1874_vm5, %v1869_v41, %v1638_v21  ;;  %v1321_v32 = vpop.permute.xlu1 %1320 }
 0x206   : > { %v7848_v39 = vmax.f32 %v2013_v56, 0.0  ;;  %6150 = vmatmul.msk.bf16.vlgmr.msra.gmra.mxu2 %vm1931_vm9, %v1902_v26  ;;  %v1673_v8 = vsel %vm1643_vm12, %v7431_v14, %v1321_v32 }
 0x207   : > { %v1706_v1 = vsel %vm1676_vm13, %v1673_v8, %v1402_v31  ;;  %v1640_v31 = vpop.permute.xlu2 %1639 }
 0x208   : > { %9883 = vst [vmem:[#allocation21_spill] sm:$0xff] %v7848_v39  ;;  %v2103_v36 = vpack.c.bf16 %v7848_v39, %v7848_v39 }
 0x209   : > { %v7856_v19 = vld [vmem:[#allocation3 + $0x54] sm:$0xff] }
 0x20a   : > { %v2241_v13 = vshrl.u32 %v2103_v36, 16  ;;  %v2581_v62 = vld [vmem:[#allocation3 + $0x5c] sm:$0x1]  ;;  %v2244_v38 = vshll.u32 %v2103_v36, 16  ;;  %v2985_v45 = vrot.slane %v7856_v19, 1 }
 0x20b   : > { %v2014_v0 = vpop.f32.mrf.mxu0  ;;  %v2715_v55 = vunpack.c.l.b16 %v2581_v62 }
 0x20c   : > { %v2243_v27 = vrot.slane %v2241_v13, 7  ;;  %v2015_v61 = vadd.f32 %v7503_v6, %v2014_v0  ;;  %v1439_v16 = vpop.permute.xlu0 %1438 }
 0x20d   : > { %v1486_v17 = vpop.permute.xlu1 %1485  ;;  %v7859_v33 = vpack.c.b16 %v2715_v55, %v2715_v55  ;;  %v1739_v58 = vsel %vm1709_vm14, %v1706_v1, %v1439_v16 }
 0x20e   : > { %v2246_v44 = vor.u32 %v2244_v38, %v2243_v27  ;;  %v7861_v14 = vmax.f32 %v2015_v61, 0.0  ;;  %v1772_v52 = vsel %vm1742_vm15, %v1739_v58, %v1486_v17  ;;  %v2247_v3 = vrot.slane %v2243_v27, 4 }
 0x20f   : > { %v2986_v40 = vrot.slane %v7859_v33, 1  ;;  %v1805_v10 = vsel %vm1775_vm1, %v1772_v52, %v1521_v53  ;;  %v1441_v55 = vpop.permute.xlu2 %1440 }
 0x210   : > { %9884 = vst [vmem:[#allocation22_spill] sm:$0xff] %v7861_v14  ;;  %v2496_v12 = vsel %vm7554_vm10, %v2246_v44, %v2495_v25  ;;  %v2104_v57 = vpack.c.bf16 %v7861_v14, %v7861_v14  ;;  %v2502_v44 = vld [vmem:[#allocation3 + $0x6c] sm:$0xf] }
 0x211   : > { %2497 = vst [vmem:[#allocation3 + $0x60] sm:$0xf] %v2496_v12  ;;  %v7872_v30 = vsel %vm1324_vm2, %v2985_v45, %v2986_v40 }
 0x212   : > { %v2249_v43 = vshrl.u32 %v2104_v57, 16  ;;  %6302 = vmatmul.msk.bf16.gmra.mxu3 %vm1874_vm5, %v7872_v30  ;;  %v2252_v4 = vshll.u32 %v2104_v57, 16 }
 0x214   : > { %v2251_v63 = vrot.slane %v2249_v43, 7  ;;  %v1558_v35 = vpop.permute.xlu0 %1557 }
 0x215   : > { %v1838_v60 = vsel %vm1808_vm6, %v1805_v10, %v1558_v35  ;;  %v2017_v41 = vpop.f32.mrf.mxu0  ;;  %v1605_v59 = vpop.permute.xlu1 %1604 }
 0x216   : > { %v2254_v56 = vor.u32 %v2252_v4, %v2251_v63  ;;  %v2256_v21 = vrot.slane %v2251_v63, 4  ;;  %v2018_v26 = vadd.f32 %v7503_v6, %v2017_v41  ;;  %v1871_v32 = vsel %vm1841_vm11, %v1838_v60, %v1605_v59 }
 0x217   : > { %v1904_v36 = vsel %vm1874_vm5, %v1871_v32, %v1640_v31 }
 0x218   : > { %v2255_v8 = vsel %vm6829_vm8, %v2247_v3, %v2254_v56  ;;  %v2500_v53 = vsel %vm7584_vm7, %v2256_v21, %v2499_v15  ;;  %v7885_v13 = vmax.f32 %v2018_v26, 0.0  ;;  %6151 = vmatmul.msk.bf16.gmra.mxu2 %vm1931_vm9, %v1904_v36  ;;  %v2506_v56 = vld [vmem:[#allocation3 + $0x74] sm:$0x1]  ;;  %v1560_v26 = vpop.permute.xlu2 %1559 }
 0x219   : > { %2498 = vst.msk [vmem:[#allocation3 + $0x64] sm:$0xf] %vm9870_vm0, %v2255_v8 }
 0x21a   : > { %9885 = vst [vmem:[#allocation23_spill] sm:$0xff] %v7885_v13  ;;  %v2105_v62 = vpack.c.bf16 %v7885_v13, %v7885_v13 }
 0x21b   : > { %2501 = vst [vmem:[#allocation3 + $0x68] sm:$0x1] %v2500_v53 }
 0x21c   : > { %v2258_v1 = vshrl.u32 %v2105_v62, 16  ;;  %v1323_v0 = vpop.permute.xlu0 %1322  ;;  %v2261_v25 = vshll.u32 %v2105_v62, 16 }
 0x21d   : > { %v1675_v27 = vsel %vm1643_vm12, %v7566_v51, %v1323_v0  ;;  %v2019_v38 = vpop.f32.mrf.mxu0  ;;  %v1404_v61 = vpop.permute.xlu1 %1403  ;;  %vm9887_vm12 = vmmov %vm9870_vm0 }
 0x21e   : > { %v2260_v16 = vrot.slane %v2258_v1, 7  ;;  %v2020_v17 = vadd.f32 %v7503_v6, %v2019_v38  ;;  %v1708_v45 = vsel %vm1676_vm13, %v1675_v27, %v1404_v61  ;;  %vm9896_vm13 = vmmov %vm9870_vm0 }
 0x21f   : > { %v1741_v10 = vsel %vm1709_vm14, %v1708_v45, %v1441_v55  ;;  %vm9899_vm14 = vmmov %vm9870_vm0 }
 0x220   : > { %v2263_v58 = vor.u32 %v2261_v25, %v2260_v16  ;;  %v7894_v52 = vmax.f32 %v2020_v17, 0.0  ;;  %v7897_v40 = vld [vmem:[#allocation3 + $0x60] sm:$0xff]  ;;  %v2264_v32 = vrot.slane %v2260_v16, 4 }
 0x221   : > { %v2988_v35 = vrot.slane %v7897_v40, 1 }
 0x222   : > { %9886 = vst [vmem:[#allocation24_spill] sm:$0xff] %v7894_v52  ;;  %v2584_v12 = vld [vmem:[#allocation3 + $0x68] sm:$0x1]  ;;  %v2503_v57 = vsel %vm7554_vm10, %v2263_v58, %v2502_v44  ;;  %v2106_v51 = vpack.c.bf16 %v7894_v52, %v7894_v52 }
 0x223   : > { %v2716_v43 = vunpack.c.l.b16 %v2584_v12  ;;  %2504 = vst [vmem:[#allocation3 + $0x6c] sm:$0xf] %v2503_v57 }
 0x224   : > { %v2266_v31 = vshrl.u32 %v2106_v51, 16  ;;  %v1488_v63 = vpop.permute.xlu0 %1487  ;;  %v2269_v60 = vshll.u32 %v2106_v51, 16 }
 0x225   : > { %v7904_v4 = vpack.c.b16 %v2716_v43, %v2716_v43  ;;  %v1523_v3 = vpop.permute.xlu1 %1522  ;;  %v1774_v41 = vsel %vm1742_vm15, %v1741_v10, %v1488_v63  ;;  %v2509_v63 = vld [vmem:[#allocation3 + $0x78] sm:$0xf]  ;;  %vm9903_vm15 = vmmov %vm9870_vm0 }
 0x226   : > { %v2268_v15 = vrot.slane %v2266_v31, 7  ;;  %v1807_v21 = vsel %vm1775_vm1, %v1774_v41, %v1523_v3  ;;  %vm9905_vm1 = vmmov %vm9870_vm0 }
 0x227   : > { %v2989_v59 = vrot.slane %v7904_v4, 1  ;;  %v1840_v0 = vsel %vm1808_vm6, %v1807_v21, %v1560_v26  ;;  %vm9908_vm6 = vmmov %vm9870_vm0  ;;  %v2844_v5 = vshll.u32 %v7904_v4, 16  ;;  %v6528_v4 = vld [vmem:[%s9799_s3 + $0x68] sm:$0xff] }
 0x228   : > { %v2271_v36 = vor.u32 %v2269_v60, %v2268_v15  ;;  %v2273_v8 = vrot.slane %v2268_v15, 4 }
 0x229   : > { %v7911_v53 = vsel %vm1324_vm2, %v2988_v35, %v2989_v59 }
 0x22a   : > { %6303 = vmatmul.msk.bf16.gmra.mxu3 %vm1874_vm5, %v7911_v53  ;;  %v2272_v62 = vsel %vm6829_vm8, %v2264_v32, %v2271_v36  ;;  %v2507_v1 = vsel %vm7584_vm7, %v2273_v8, %v2506_v56  ;;  %v2513_v8 = vld [vmem:[#allocation3 + $0x80] sm:$0x1] }
 0x22b   : > { %2505 = vst.msk [vmem:[#allocation3 + $0x70] sm:$0xf] %vm9887_vm12, %v2272_v62  ;;  %vm9923_vm12 = vmmov %vm9905_vm1 }
 0x22c   : > { %2508 = vst [vmem:[#allocation3 + $0x74] sm:$0x1] %v2507_v1  ;;  %v1607_v55 = vpop.permute.xlu0 %1606  ;;  %v2022_v27 = vpop.f32.mrf.mxu0 }
 0x22d   : > { %v1873_v38 = vsel %vm1841_vm11, %v1840_v0, %v1607_v55  ;;  %v2023_v61 = vadd.f32 %v7503_v6, %v2022_v27  ;;  %v1642_v16 = vpop.permute.xlu1 %1641  ;;  %v7934_v6 = vld [vmem:[%s9798_s2] ss:$0 sm:$0xff]  ;;  %vm9894_vm11 = vmmov %vm9870_vm0 }
 0x22e   : > { %v1906_v25 = vsel %vm1874_vm5, %v1873_v38, %v1642_v16 }
 0x22f   : > { %v7924_v17 = vmax.f32 %v2023_v61, 0.0  ;;  %6152 = vmatmul.msk.bf16.gmra.mxu2 %vm1931_vm9, %v1906_v25  ;;  %vm9890_vm9 = vmmov %vm9870_vm0  ;;  %vm3283_vm0 = vcmask 785408  }
 0x231   : > { %9888 = vst [vmem:[#allocation25_spill] sm:$0xff] %v7924_v17  ;;  %v2107_v44 = vpack.c.bf16 %v7924_v17, %v7924_v17 }
 0x232   : > { %v7929_v57 = vld [vmem:[#allocation3 + $0x6c] sm:$0xff] }
 0x233   : > { %v2275_v58 = vshrl.u32 %v2107_v44, 16  ;;  %v2587_v45 = vld [vmem:[#allocation3 + $0x74] sm:$0x1]  ;;  %v2278_v10 = vshll.u32 %v2107_v44, 16  ;;  %v2991_v60 = vrot.slane %v7929_v57, 1 }
 0x234   : > { %v2024_v12 = vpop.f32.mrf.mxu0  ;;  %v2717_v51 = vunpack.c.l.b16 %v2587_v45 }
 0x235   : > { %v2277_v43 = vrot.slane %v2275_v58, 7  ;;  %v2025_v31 = vadd.f32 %v7934_v6, %v2024_v12 }
 0x236   : > { %v7937_v35 = vpack.c.b16 %v2717_v51, %v2717_v51 }
 0x237   : > { %v2280_v3 = vor.u32 %v2278_v10, %v2277_v43  ;;  %v7939_v15 = vmax.f32 %v2025_v31, 0.0  ;;  %v2281_v62 = vrot.slane %v2277_v43, 4 }
 0x238   : > { %v2992_v41 = vrot.slane %v7937_v35, 1 }
 0x239   : > { %9889 = vst [vmem:[#allocation26_spill] sm:$0xff] %v7939_v15  ;;  %v2510_v59 = vsel %vm7554_vm10, %v2280_v3, %v2509_v63  ;;  %v2108_v56 = vpack.c.bf16 %v7939_v15, %v7939_v15  ;;  %v2516_v63 = vld [vmem:[#allocation3 + $0x84] sm:$0xf] }
 0x23a   : > { %2511 = vst [vmem:[#allocation3 + $0x78] sm:$0xf] %v2510_v59  ;;  %v7948_v21 = vsel %vm1324_vm2, %v2991_v60, %v2992_v41 }
 0x23b   : > { %v2283_v26 = vshrl.u32 %v2108_v56, 16  ;;  %6304 = vmatmul.msk.bf16.gmra.mxu3 %vm1874_vm5, %v7948_v21  ;;  %v2286_v36 = vshll.u32 %v2108_v56, 16 }
 0x23d   : > { %v2285_v32 = vrot.slane %v2283_v26, 7 }
 0x23f   : > { %v2288_v1 = vor.u32 %v2286_v36, %v2285_v32  ;;  %v2290_v0 = vrot.slane %v2285_v32, 4 }
 0x241   : > { %v2289_v55 = vsel %vm6829_vm8, %v2281_v62, %v2288_v1  ;;  %v2514_v27 = vsel %vm7584_vm7, %v2290_v0, %v2513_v8  ;;  %v2520_v0 = vld [vmem:[#allocation3 + $0x8c] sm:$0x1] }
 0x242   : > { %2512 = vst.msk [vmem:[#allocation3 + $0x7c] sm:$0xf] %vm9890_vm9, %v2289_v55  ;;  %vm9924_vm9 = vmmov %vm9905_vm1 }
 0x243   : > { %2515 = vst [vmem:[#allocation3 + $0x80] sm:$0x1] %v2514_v27  ;;  %v2027_v38 = vpop.f32.mrf.mxu0 }
 0x244   : > { %v2028_v61 = vadd.f32 %v7934_v6, %v2027_v38 }
 0x246   : > { %v7958_v16 = vmax.f32 %v2028_v61, 0.0 }
 0x248   : > { %9891 = vst [vmem:[#allocation27_spill] sm:$0xff] %v7958_v16  ;;  %v2109_v25 = vpack.c.bf16 %v7958_v16, %v7958_v16 }
 0x249   : > { %v7962_v12 = vld [vmem:[#allocation3 + $0x78] sm:$0xff] }
 0x24a   : > { %v2292_v44 = vshrl.u32 %v2109_v25, 16  ;;  %v2590_v58 = vld [vmem:[#allocation3 + $0x80] sm:$0x1]  ;;  %v2295_v10 = vshll.u32 %v2109_v25, 16  ;;  %v2994_v59 = vrot.slane %v7962_v12, 1 }
 0x24b   : > { %v2029_v45 = vpop.f32.mrf.mxu0  ;;  %v2718_v51 = vunpack.c.l.b16 %v2590_v58 }
 0x24c   : > { %v2294_v43 = vrot.slane %v2292_v44, 7  ;;  %v2030_v31 = vadd.f32 %v7934_v6, %v2029_v45 }
 0x24d   : > { %v7965_v3 = vpack.c.b16 %v2718_v51, %v2718_v51 }
 0x24e   : > { %v2297_v60 = vor.u32 %v2295_v10, %v2294_v43  ;;  %v7967_v41 = vmax.f32 %v2030_v31, 0.0  ;;  %v2298_v27 = vrot.slane %v2294_v43, 4 }
 0x24f   : > { %v2995_v56 = vrot.slane %v7965_v3, 1 }
 0x250   : > { %9892 = vst [vmem:[#allocation28_spill] sm:$0xff] %v7967_v41  ;;  %v2517_v26 = vsel %vm7554_vm10, %v2297_v60, %v2516_v63  ;;  %v2110_v32 = vpack.c.bf16 %v7967_v41, %v7967_v41 }
 0x251   : > { %2518 = vst [vmem:[#allocation3 + $0x84] sm:$0xf] %v2517_v26  ;;  %v7976_v36 = vsel %vm1324_vm2, %v2994_v59, %v2995_v56  ;;  %v2523_v59 = vld [vmem:[#allocation3 + $0x90] sm:$0xf] }
 0x252   : > { %v2300_v8 = vshrl.u32 %v2110_v32, 16  ;;  %6305 = vmatmul.msk.bf16.gmra.mxu3 %vm1874_vm5, %v7976_v36  ;;  %v2303_v1 = vshll.u32 %v2110_v32, 16 }
 0x254   : > { %v2302_v62 = vrot.slane %v2300_v8, 7 }
 0x255   : > { %v2032_v55 = vpop.f32.mrf.mxu0 }
 0x256   : > { %v2305_v38 = vor.u32 %v2303_v1, %v2302_v62  ;;  %v2307_v61 = vrot.slane %v2302_v62, 4  ;;  %v2033_v25 = vadd.f32 %v7934_v6, %v2032_v55 }
 0x258   : > { %v2306_v44 = vsel %vm6829_vm8, %v2298_v27, %v2305_v38  ;;  %v2521_v58 = vsel %vm7584_vm7, %v2307_v61, %v2520_v0  ;;  %v7985_v45 = vmax.f32 %v2033_v25, 0.0 }
 0x259   : > { %2519 = vst.msk [vmem:[#allocation3 + $0x88] sm:$0xf] %vm9894_vm11, %v2306_v44  ;;  %vm9925_vm11 = vmmov %vm9905_vm1 }
 0x25a   : > { %9893 = vst [vmem:[#allocation29_spill] sm:$0xff] %v7985_v45  ;;  %v2111_v51 = vpack.c.bf16 %v7985_v45, %v7985_v45 }
 0x25b   : > { %2522 = vst [vmem:[#allocation3 + $0x8c] sm:$0x1] %v2521_v58  ;;  %v2527_v58 = vld [vmem:[#allocation3 + $0x98] sm:$0x1] }
 0x25c   : > { %v2309_v10 = vshrl.u32 %v2111_v51, 16  ;;  %v2312_v63 = vshll.u32 %v2111_v51, 16 }
 0x25d   : > { %v2034_v43 = vpop.f32.mrf.mxu0 }
 0x25e   : > { %v2311_v31 = vrot.slane %v2309_v10, 7  ;;  %v2035_v60 = vadd.f32 %v7934_v6, %v2034_v43 }
 0x260   : > { %v2314_v56 = vor.u32 %v2312_v63, %v2311_v31  ;;  %v7991_v26 = vmax.f32 %v2035_v60, 0.0  ;;  %v7997_v1 = vld [vmem:[#allocation3 + $0x84] sm:$0xff]  ;;  %v2315_v51 = vrot.slane %v2311_v31, 4 }
 0x261   : > { %v2997_v25 = vrot.slane %v7997_v1, 1 }
 0x262   : > { %9895 = vst [vmem:[#allocation30_spill] sm:$0xff] %v7991_v26  ;;  %v2593_v32 = vld [vmem:[#allocation3 + $0x8c] sm:$0x1]  ;;  %v2524_v8 = vsel %vm7554_vm10, %v2314_v56, %v2523_v59  ;;  %v2112_v62 = vpack.c.bf16 %v7991_v26, %v7991_v26 }
 0x263   : > { %v2719_v0 = vunpack.c.l.b16 %v2593_v32  ;;  %2525 = vst [vmem:[#allocation3 + $0x90] sm:$0xf] %v2524_v8 }
 0x264   : > { %v2317_v55 = vshrl.u32 %v2112_v62, 16  ;;  %v2320_v61 = vshll.u32 %v2112_v62, 16 }
 0x265   : > { %v7999_v27 = vpack.c.b16 %v2719_v0, %v2719_v0 }
 0x266   : > { %v2319_v38 = vrot.slane %v2317_v55, 7 }
 0x267   : > { %v2998_v44 = vrot.slane %v7999_v27, 1 }
 0x268   : > { %v2322_v10 = vor.u32 %v2320_v61, %v2319_v38  ;;  %v2324_v43 = vrot.slane %v2319_v38, 4 }
 0x269   : > { %v8004_v63 = vsel %vm1324_vm2, %v2997_v25, %v2998_v44 }
 0x26a   : > { %6306 = vmatmul.msk.bf16.gmra.mxu3 %vm1874_vm5, %v8004_v63  ;;  %v2323_v60 = vsel %vm6829_vm8, %v2315_v51, %v2322_v10  ;;  %v2528_v59 = vsel %vm7584_vm7, %v2324_v43, %v2527_v58  ;;  %v2530_v10 = vld [vmem:[#allocation3 + $0x9c] sm:$0xf] }
 0x26b   : > { %2526 = vst.msk [vmem:[#allocation3 + $0x94] sm:$0xf] %vm9896_vm13, %v2323_v60  ;;  %vm9926_vm13 = vmmov %vm9905_vm1 }
 0x26c   : > { %2529 = vst [vmem:[#allocation3 + $0x98] sm:$0x1] %v2528_v59  ;;  %v2037_v56 = vpop.f32.mrf.mxu0 }
 0x26d   : > { %v2038_v31 = vadd.f32 %v7934_v6, %v2037_v56 }
 0x26f   : > { %v8014_v32 = vmax.f32 %v2038_v31, 0.0 }
 0x271   : > { %9897 = vst [vmem:[#allocation31_spill] sm:$0xff] %v8014_v32  ;;  %v2113_v8 = vpack.c.bf16 %v8014_v32, %v8014_v32 }
 0x272   : > { %v8018_v62 = vld [vmem:[#allocation3 + $0x90] sm:$0xff] }
 0x273   : > { %v2326_v0 = vshrl.u32 %v2113_v8, 16  ;;  %v2596_v55 = vld [vmem:[#allocation3 + $0x98] sm:$0x1]  ;;  %v2887_v25 = vshll.u32 %v8018_v62, 16  ;;  %v2329_v58 = vshll.u32 %v2113_v8, 16  ;;  %v2885_v60 = vshrl.u32 %v8018_v62, 16 }
 0x274   : > { %v2039_v38 = vpop.f32.mrf.mxu0  ;;  %v2720_v61 = vunpack.c.l.b16 %v2596_v55  ;;  %v3000_v26 = vrot.slane %v8018_v62, 1 }
 0x275   : > { %v2328_v44 = vrot.slane %v2326_v0, 7  ;;  %v2040_v51 = vadd.f32 %v7934_v6, %v2039_v38  ;;  %v2889_v59 = vrot.slane %v2887_v25, 1 }
 0x276   : > { %v2736_v43 = vpack.c.b16 %v2720_v61, %v2720_v61 }
 0x277   : > { %v2331_v56 = vor.u32 %v2329_v58, %v2328_v44  ;;  %v8023_v31 = vmax.f32 %v2040_v51, 0.0  ;;  %v2890_v45 = vor.u32 %v2889_v59, %v2885_v60 }
 0x278   : > { %v3001_v32 = vrot.slane %v2736_v43, 1  ;;  %v2892_v41 = vshll.u32 %v2736_v43, 16 }
 0x279   : > { %9898 = vst [vmem:[#allocation32_spill] sm:$0xff] %v8023_v31  ;;  %v2531_v55 = vsel %vm7554_vm10, %v2331_v56, %v2530_v10  ;;  %v2114_v8 = vpack.c.bf16 %v8023_v31, %v8023_v31  ;;  %v2534_v10 = vld [vmem:[#allocation3 + $0xa4] sm:$0x1] }
 0x27a   : > { %2532 = vst [vmem:[#allocation3 + $0x9c] sm:$0xf] %v2531_v55  ;;  %v8031_v0 = vsel %vm1324_vm2, %v3000_v26, %v3001_v32  ;;  %v2894_v38 = vrot.slane %v2892_v41, 1  ;;  %v2332_v26 = vrot.slane %v2328_v44, 4 }
 0x27b   : > { %v2334_v61 = vshrl.u32 %v2114_v8, 16  ;;  %3036 = vrot.lane.b32.xlu0 %v8031_v0, %s6636_s18  ;;  %6307 = vmatmul.msk.bf16.gmra.mxu3 %vm1874_vm5, %v8031_v0  ;;  %v2337_v51 = vshll.u32 %v2114_v8, 16 }
 0x27c   : > { %v8038_v25 = vsel %vm1099_vm3, %v2890_v45, %v2894_v38 }
 0x27d   : > { %v2336_v58 = vrot.slane %v2334_v61, 7  ;;  %2956 = vrot.lane.b32.xlu2 %v8038_v25, %s6632_s19 }
 0x27f   : > { %v2339_v32 = vor.u32 %v2337_v51, %v2336_v58  ;;  %v2341_v41 = vrot.slane %v2336_v58, 4 }
 0x281   : > { %v2340_v43 = vsel %vm6829_vm8, %v2332_v26, %v2339_v32  ;;  %v2535_v60 = vsel %vm7584_vm7, %v2341_v41, %v2534_v10 }
 0x282   : > { %2533 = vst.msk [vmem:[#allocation3 + $0xa0] sm:$0xf] %vm9899_vm14, %v2340_v43  ;;  %vm9927_vm14 = vmmov %vm9905_vm1 }
 0x283   : > { %2536 = vst [vmem:[#allocation3 + $0xa4] sm:$0x1] %v2535_v60 }
 0x289   : > { %v2042_v45 = vpop.f32.mrf.mxu2  ;;  %v8047_v59 = vld [vmem:[#allocation3 + $0x9c] sm:$0xff] }
 0x28a   : > { %v2043_v56 = vadd.f32 %v7934_v6, %v2042_v45  ;;  %v2599_v55 = vld [vmem:[#allocation3 + $0xa4] sm:$0x1]  ;;  %3073 = vrot.lane.b32.xlu1 %v8047_v59, %s6637_s20  ;;  %v2899_v8 = vshll.u32 %v8047_v59, 16  ;;  %v2897_v58 = vshrl.u32 %v8047_v59, 16  ;;  %v3003_v26 = vrot.slane %v8047_v59, 1 }
 0x28b   : > { %v2721_v44 = vunpack.c.l.b16 %v2599_v55 }
 0x28c   : > { %v8053_v38 = vmax.f32 %v2043_v56, 0.0  ;;  %v2901_v51 = vrot.slane %v2899_v8, 1  ;;  %v2537_v8 = vld [vmem:[#allocation3 + $0xa8] sm:$0xf] }
 0x28d   : > { %v2737_v61 = vpack.c.b16 %v2721_v44, %v2721_v44 }
 0x28e   : > { %9900 = vst [vmem:[#allocation33_spill] sm:$0xff] %v8053_v38  ;;  %v2115_v10 = vpack.c.bf16 %v8053_v38, %v8053_v38  ;;  %v2902_v41 = vor.u32 %v2901_v51, %v2897_v58 }
 0x28f   : > { %v3004_v32 = vrot.slane %v2737_v61, 1  ;;  %v2904_v43 = vshll.u32 %v2737_v61, 16 }
 0x290   : > { %v2343_v60 = vshrl.u32 %v2115_v10, 16  ;;  %v2346_v16 = vshll.u32 %v2115_v10, 16 }
 0x291   : > { %v2044_v45 = vpop.f32.mrf.mxu2  ;;  %v8060_v55 = vsel %vm1324_vm2, %v3003_v26, %v3004_v32  ;;  %v2906_v31 = vrot.slane %v2904_v43, 1 }
 0x292   : > { %v2345_v56 = vrot.slane %v2343_v60, 7  ;;  %v2045_v44 = vadd.f32 %v7934_v6, %v2044_v45  ;;  %3038 = vrot.lane.b32.xlu0 %v8060_v55, %s6636_s18  ;;  %6308 = vmatmul.msk.bf16.gmra.mxu3 %vm1874_vm5, %v8060_v55  ;;  %v2541_v45 = vld [vmem:[#allocation3 + $0xb0] sm:$0x1] }
 0x293   : > { %v8068_v58 = vsel %vm1099_vm3, %v2902_v41, %v2906_v31 }
 0x294   : > { %v2348_v61 = vor.u32 %v2346_v16, %v2345_v56  ;;  %v8070_v51 = vmax.f32 %v2045_v44, 0.0  ;;  %2958 = vrot.lane.b32.xlu2 %v8068_v58, %s6632_s19  ;;  %v2349_v31 = vrot.slane %v2345_v56, 4 }
 0x296   : > { %9901 = vst [vmem:[#allocation34_spill] sm:$0xff] %v8070_v51  ;;  %v2538_v10 = vsel %vm7554_vm10, %v2348_v61, %v2537_v8  ;;  %v2116_v26 = vpack.c.bf16 %v8070_v51, %v8070_v51 }
 0x297   : > { %2539 = vst [vmem:[#allocation3 + $0xa8] sm:$0xf] %v2538_v10 }
 0x298   : > { %v2351_v32 = vshrl.u32 %v2116_v26, 16  ;;  %v2354_v60 = vshll.u32 %v2116_v26, 16 }
 0x29a   : > { %v2353_v43 = vrot.slane %v2351_v32, 7 }
 0x29b   : > { %v2047_v38 = vpop.f32.mrf.mxu2 }
 0x29c   : > { %v2356_v41 = vor.u32 %v2354_v60, %v2353_v43  ;;  %v2358_v16 = vrot.slane %v2353_v43, 4  ;;  %v2048_v44 = vadd.f32 %v7934_v6, %v2047_v38  ;;  %v2544_v60 = vld [vmem:[#allocation3 + $0xb4] sm:$0xf] }
 0x29e   : > { %v2357_v15 = vsel %vm6829_vm8, %v2349_v31, %v2356_v41  ;;  %v2542_v8 = vsel %vm7584_vm7, %v2358_v16, %v2541_v45  ;;  %v8083_v61 = vmax.f32 %v2048_v44, 0.0 }
 0x29f   : > { %2540 = vst.msk [vmem:[#allocation3 + $0xac] sm:$0xf] %vm9903_vm15, %v2357_v15  ;;  %vm9928_vm15 = vmmov %vm9905_vm1 }
 0x2a0   : > { %9902 = vst [vmem:[#allocation35_spill] sm:$0xff] %v8083_v61  ;;  %v2117_v10 = vpack.c.bf16 %v8083_v61, %v8083_v61 }
 0x2a1   : > { %2543 = vst [vmem:[#allocation3 + $0xb0] sm:$0x1] %v2542_v8 }
 0x2a2   : > { %v2360_v26 = vshrl.u32 %v2117_v10, 16  ;;  %v2363_v43 = vshll.u32 %v2117_v10, 16 }
 0x2a3   : > { %v2049_v56 = vpop.f32.mrf.mxu2 }
 0x2a4   : > { %v2362_v32 = vrot.slane %v2360_v26, 7  ;;  %v2050_v38 = vadd.f32 %v7934_v6, %v2049_v56 }
 0x2a6   : > { %v2365_v51 = vor.u32 %v2363_v43, %v2362_v32  ;;  %v8089_v31 = vmax.f32 %v2050_v38, 0.0  ;;  %v8091_v41 = vld [vmem:[#allocation3 + $0xa8] sm:$0xff]  ;;  %v2366_v17 = vrot.slane %v2362_v32, 4 }
 0x2a7   : > { %3075 = vrot.lane.b32.xlu1 %v8091_v41, %s6637_s20  ;;  %v2911_v8 = vshll.u32 %v8091_v41, 16  ;;  %v3006_v56 = vrot.slane %v8091_v41, 1  ;;  %v2909_v43 = vshrl.u32 %v8091_v41, 16 }
 0x2a8   : > { %9904 = vst [vmem:[#allocation36_spill] sm:$0xff] %v8089_v31  ;;  %v2602_v45 = vld [vmem:[#allocation3 + $0xb0] sm:$0x1]  ;;  %v2545_v15 = vsel %vm7554_vm10, %v2365_v51, %v2544_v60  ;;  %v2118_v16 = vpack.c.bf16 %v8089_v31, %v8089_v31  ;;  %v2548_v31 = vld [vmem:[#allocation3 + $0xbc] sm:$0x1] }
 0x2a9   : > { %v2722_v44 = vunpack.c.l.b16 %v2602_v45  ;;  %2546 = vst [vmem:[#allocation3 + $0xb4] sm:$0xf] %v2545_v15  ;;  %v2913_v38 = vrot.slane %v2911_v8, 1 }
 0x2aa   : > { %v2368_v10 = vshrl.u32 %v2118_v16, 16  ;;  %v2371_v52 = vshll.u32 %v2118_v16, 16 }
 0x2ab   : > { %v2738_v26 = vpack.c.b16 %v2722_v44, %v2722_v44  ;;  %v2914_v13 = vor.u32 %v2913_v38, %v2909_v43 }
 0x2ac   : > { %v2370_v61 = vrot.slane %v2368_v10, 7 }
 0x2ad   : > { %v3007_v51 = vrot.slane %v2738_v26, 1  ;;  %v2916_v60 = vshll.u32 %v2738_v26, 16 }
 0x2ae   : > { %v2373_v14 = vor.u32 %v2371_v52, %v2370_v61  ;;  %v2375_v39 = vrot.slane %v2370_v61, 4 }
 0x2af   : > { %v8103_v45 = vsel %vm1324_vm2, %v3006_v56, %v3007_v51  ;;  %v2918_v15 = vrot.slane %v2916_v60, 1  ;;  %v2563_v56 = vld [vmem:[#allocation3 + $0x14] sm:$0x1]  ;;  %v2551_v60 = vld [vmem:[#allocation3 + $0xc0] sm:$0xf] }
 0x2b0   : > { %3040 = vrot.lane.b32.xlu0 %v8103_v45, %s6636_s18  ;;  %6309 = vmatmul.msk.bf16.gmra.mxu3 %vm1874_vm5, %v8103_v45  ;;  %v2374_v16 = vsel %vm6829_vm8, %v2366_v17, %v2373_v14  ;;  %v2549_v32 = vsel %vm7584_vm7, %v2375_v39, %v2548_v31 }
 0x2b1   : > { %v8114_v44 = vsel %vm1099_vm3, %v2914_v13, %v2918_v15  ;;  %2547 = vst.msk [vmem:[#allocation3 + $0xb8] sm:$0xf] %vm9905_vm1, %v2374_v16 }
 0x2b2   : > { %2960 = vrot.lane.b32.xlu2 %v8114_v44, %s6632_s19  ;;  %2550 = vst [vmem:[#allocation3 + $0xbc] sm:$0x1] %v2549_v32  ;;  %v2052_v52 = vpop.f32.mrf.mxu2 }
 0x2b3   : > { %v2053_v61 = vadd.f32 %v7934_v6, %v2052_v52 }
 0x2b5   : > { %v8120_v8 = vmax.f32 %v2053_v61, 0.0 }
 0x2b7   : > { %9906 = vst [vmem:[#allocation37_spill] sm:$0xff] %v8120_v8  ;;  %v2119_v14 = vpack.c.bf16 %v8120_v8, %v8120_v8  ;;  %v2709_v8 = vunpack.c.l.b16 %v2563_v56 }
 0x2b8   : > { %v8124_v17 = vld [vmem:[#allocation3 + $0xb4] sm:$0xff] }
 0x2b9   : > { %v2377_v39 = vshrl.u32 %v2119_v14, 16  ;;  %v2605_v31 = vld [vmem:[#allocation3 + $0xbc] sm:$0x1]  ;;  %3077 = vrot.lane.b32.xlu1 %v8124_v17, %s6637_s20  ;;  %v2923_v26 = vshll.u32 %v8124_v17, 16  ;;  %v2380_v38 = vshll.u32 %v2119_v14, 16  ;;  %v2921_v16 = vshrl.u32 %v8124_v17, 16 }
 0x2ba   : > { %v2054_v13 = vpop.f32.mrf.mxu2  ;;  %v2723_v10 = vunpack.c.l.b16 %v2605_v31  ;;  %v3009_v34 = vrot.slane %v8124_v17, 1 }
 0x2bb   : > { %v2379_v43 = vrot.slane %v2377_v39, 7  ;;  %v2055_v51 = vadd.f32 %v7934_v6, %v2054_v13  ;;  %v2925_v32 = vrot.slane %v2923_v26, 1  ;;  %v6522_v26 = vld [vmem:[%s9799_s3 + $0x38] sm:$0xff] }
 0x2bc   : > { %v2739_v15 = vpack.c.b16 %v2723_v10, %v2723_v10  ;;  %6572 = vmatpush.bf16.msrb.mxu2 %v6522_v26  ;;  %3656 = vmatpush.bf16.msra.mxu1 %v6522_v26 }
 0x2bd   : > { %v2382_v52 = vor.u32 %v2380_v38, %v2379_v43  ;;  %v8131_v61 = vmax.f32 %v2055_v51, 0.0  ;;  %v2926_v31 = vor.u32 %v2925_v32, %v2921_v16  ;;  %v8151_v38 = vpack.c.b16 %v2709_v8, %v2709_v8 }
 0x2be   : > { %v3010_v50 = vrot.slane %v2739_v15, 1  ;;  %v2928_v20 = vshll.u32 %v2739_v15, 16  ;;  %v8158_v15 = vld [vmem:[#allocation3 + $0xc] sm:$0xff]  ;;  %v2383_v16 = vrot.slane %v2379_v43, 4 }
 0x2bf   : > { %9907 = vst [vmem:[#allocation38_spill] sm:$0xff] %v8131_v61  ;;  %v2552_v39 = vsel %vm7554_vm10, %v2382_v52, %v2551_v60  ;;  %v2120_v6 = vpack.c.bf16 %v8131_v61, %v8131_v61  ;;  %v2555_v60 = vld [vmem:[#allocation3 + $0xc8] sm:$0x1]  ;;  %v2968_v8 = vrot.slane %v8151_v38, 1  ;;  %v2755_v28 = vshll.u32 %v8158_v15, 16 }
 0x2c0   : > { %2553 = vst [vmem:[#allocation3 + $0xc0] sm:$0xf] %v2552_v39  ;;  %v8139_v14 = vsel %vm1324_vm2, %v3009_v34, %v3010_v50  ;;  %v2930_v13 = vrot.slane %v2928_v20, 1  ;;  %v2566_v20 = vld [vmem:[#allocation3 + $0x20] sm:$0x1]  ;;  %v6521_v34 = vld [vmem:[%s9799_s3 + $0x30] sm:$0xff] }
 0x2c1   : > { %v2385_v10 = vshrl.u32 %v2120_v6, 16  ;;  %3042 = vrot.lane.b32.xlu0 %v8139_v14, %s6636_s18  ;;  %6310 = vmatmul.msk.bf16.gmra.mxu3 %vm1874_vm5, %v8139_v14  ;;  %v2388_v50 = vshll.u32 %v2120_v6, 16 }
 0x2c2   : > { %v8149_v56 = vsel %vm1099_vm3, %v2926_v31, %v2930_v13  ;;  %v2710_v31 = vunpack.c.l.b16 %v2566_v20  ;;  %v8165_v13 = vld [vmem:[#allocation3 + $0x18] sm:$0xff]  ;;  %6573 = vmatpush.bf16.msrb.mxu2 %v6521_v34  ;;  %3657 = vmatpush.bf16.msra.mxu1 %v6521_v34  ;;  %v6520_v20 = vld [vmem:[%s9799_s3 + $0x28] sm:$0xff] }
 0x2c3   : > { %v2387_v51 = vrot.slane %v2385_v10, 7  ;;  %2962 = vrot.lane.b32.xlu2 %v8149_v56, %s6632_s19  ;;  %v2967_v10 = vrot.slane %v8158_v15, 1  ;;  %v2765_v61 = vshrl.u32 %v8165_v13, 16 }
 0x2c4   : > { %v2726_v26 = vpack.c.b16 %v2710_v31, %v2710_v31 }
 0x2c5   : > { %v2390_v32 = vor.u32 %v2388_v50, %v2387_v51  ;;  %v2392_v52 = vrot.slane %v2387_v51, 4  ;;  %v8172_v43 = vsel %vm1324_vm2, %v2967_v10, %v2968_v8  ;;  %v2569_v51 = vld [vmem:[#allocation3 + $0x2c] sm:$0x1]  ;;  %v2767_v50 = vshll.u32 %v8165_v13, 16 }
 0x2c6   : > { %v2711_v34 = vunpack.c.l.b16 %v2569_v51  ;;  %6574 = vmatpush.bf16.msrb.mxu2 %v6520_v20  ;;  %3658 = vmatpush.bf16.msra.mxu1 %v6520_v20  ;;  %v2970_v8 = vrot.slane %v8165_v13, 1 }
 0x2c7   : > { %v2391_v39 = vsel %vm6829_vm8, %v2383_v16, %v2390_v32  ;;  %v2556_v6 = vsel %vm7584_vm7, %v2392_v52, %v2555_v60  ;;  %v2971_v60 = vrot.slane %v2726_v26, 1  ;;  %v6519_v16 = vld [vmem:[%s9799_s3 + $0x20] sm:$0xff] }
 0x2c8   : > { %2554 = vst.msk [vmem:[#allocation3 + $0xc4] sm:$0xf] %vm9908_vm6, %v2391_v39  ;;  %v8183_v32 = vld [vmem:[#allocation3 + $0x24] sm:$0xff]  ;;  %v2769_v39 = vrot.slane %v2767_v50, 1  ;;  %v2727_v20 = vpack.c.b16 %v2711_v34, %v2711_v34  ;;  %vm9929_vm6 = vmmov %vm9905_vm1 }
 0x2c9   : > { %2557 = vst [vmem:[#allocation3 + $0xc8] sm:$0x1] %v2556_v6  ;;  %3136 = vrot.lane.b32.xlu0 %v8165_v13, %s6636_s18  ;;  %v2772_v6 = vshll.u32 %v2726_v26, 16  ;;  %v8193_v51 = vsel %vm1324_vm2, %v2970_v8, %v2971_v60  ;;  %v2572_v26 = vld [vmem:[#allocation3 + $0x38] sm:$0x1]  ;;  %v2779_v11 = vshll.u32 %v8183_v32, 16 }
 0x2ca   : > { %6575 = vmatpush.bf16.msrb.mxu2 %v6519_v16  ;;  %3659 = vmatpush.bf16.msra.mxu1 %v6519_v16  ;;  %v2770_v42 = vor.u32 %v2769_v39, %v2765_v61  ;;  %v6518_v60 = vld [vmem:[%s9799_s3 + $0x18] sm:$0xff]  ;;  %v2712_v16 = vunpack.c.l.b16 %v2572_v26  ;;  %v8212_v39 = vld [vmem:[#allocation3 + $0x30] sm:$0xff]  ;;  %v2784_v22 = vshll.u32 %v2727_v20, 16 }
 0x2cb   : > { %3099 = vrot.lane.b32.xlu2 %v8172_v43, %s6632_s19  ;;  %v2774_v47 = vrot.slane %v2772_v6, 1  ;;  %v2973_v6 = vrot.slane %v8183_v32, 1  ;;  %v2781_v26 = vrot.slane %v2779_v11, 1 }
 0x2cd   : > { %v8218_v46 = vsel %vm1099_vm3, %v2770_v42, %v2774_v47  ;;  %v6516_v47 = vld [vmem:[%s9799_s3 + $0x8] sm:$0xff]  ;;  %v2786_v42 = vrot.slane %v2784_v22, 1 }
 0x2ce   : > { %6576 = vmatpush.bf16.msrb.mxu2 %v6518_v60  ;;  %3660 = vmatpush.bf16.msra.mxu1 %v6518_v60 }
 0x2cf   : > { %v8185_v52 = vld [vmem:[#allocation3 + $0xc0] sm:$0xff] }
 0x2d0   : > { %v2608_v31 = vld [vmem:[#allocation3 + $0xc8] sm:$0x1]  ;;  %3079 = vrot.lane.b32.xlu1 %v8185_v52, %s6637_s20  ;;  %v3096_v34 = vrot.slane %v8185_v52, 1 }
 0x2d1   : > { %3138 = vrot.lane.b32.xlu0 %v8183_v32, %s6636_s18  ;;  %v3082_v10 = vunpack.c.l.b16 %v2608_v31  ;;  %v2974_v31 = vrot.slane %v2727_v20, 1  ;;  %v2791_v20 = vshll.u32 %v8212_v39, 16 }
 0x2d3   : > { %3101 = vrot.lane.b32.xlu2 %v8193_v51, %s6632_s19  ;;  %v8198_v50 = vpack.c.b16 %v3082_v10, %v3082_v10  ;;  %v6517_v10 = vld [vmem:[%s9799_s3 + $0x10] sm:$0xff]  ;;  %v8225_v60 = vsel %vm1324_vm2, %v2973_v6, %v2974_v31  ;;  %v6515_v31 = vld [vmem:[%s9799_s3] sm:$0xff] }
 0x2d4   : > { %6577 = vmatpush.bf16.msrb.mxu2 %v6517_v10  ;;  %3661 = vmatpush.bf16.msra.mxu1 %v6517_v10  ;;  %v2793_v10 = vrot.slane %v2791_v20, 1  ;;  %v2808_v20 = vshll.u32 %v7794_v29, 16 }
 0x2d5   : > { %v3097_v8 = vrot.slane %v8198_v50, 1 }
 0x2d7   : > { %v8210_v61 = vsel %vm1324_vm2, %v3096_v34, %v3097_v8  ;;  %v2728_v34 = vpack.c.b16 %v2712_v16, %v2712_v16  ;;  %v2777_v8 = vshrl.u32 %v8183_v32, 16  ;;  %v2976_v16 = vrot.slane %v8212_v39, 1 }
 0x2d8   : > { %6311 = vmatmul.msk.bf16.gmra.mxu3 %vm1874_vm5, %v8210_v61  ;;  %3183 = vrot.lane.b32.xlu1 %v8218_v46, %s6637_s20 }
 0x2d9   : > { %3140 = vrot.lane.b32.xlu0 %v8212_v39, %s6636_s18  ;;  %v2782_v11 = vor.u32 %v2781_v26, %v2777_v8  ;;  %v2977_v37 = vrot.slane %v2728_v34, 1  ;;  %6578 = vmatpush.bf16.msrb.mxu2 %v6516_v47  ;;  %v2796_v18 = vshll.u32 %v2728_v34, 16  ;;  %v2789_v26 = vshrl.u32 %v8212_v39, 16 }
 0x2da   : > { %3662 = vmatpush.bf16.msra.mxu1 %v6516_v47  ;;  %v2803_v47 = vshll.u32 %v8241_v48, 16 }
 0x2db   : > { %3103 = vrot.lane.b32.xlu2 %v8225_v60, %s6632_s19  ;;  %v8239_v6 = vsel %vm1099_vm3, %v2782_v11, %v2786_v42  ;;  %v8248_v22 = vsel %vm1324_vm2, %v2976_v16, %v2977_v37  ;;  %v2794_v8 = vor.u32 %v2793_v10, %v2789_v26  ;;  %v2798_v34 = vrot.slane %v2796_v18, 1 }
 0x2dc   : > { %v2805_v42 = vrot.slane %v2803_v47, 1  ;;  %v2801_v37 = vshrl.u32 %v8241_v48, 16  ;;  %v2815_v16 = vshll.u32 %v8258_v49, 16  ;;  %v2820_v26 = vshll.u32 %v7822_v2, 16 }
 0x2dd   : > { %6579 = vmatpush.bf16.msrb.mxu2 %v6515_v31  ;;  %v8255_v11 = vsel %vm1099_vm3, %v2794_v8, %v2798_v34  ;;  %v2813_v8 = vshrl.u32 %v8258_v49, 16 }
 0x2de   : > { %3663 = vmatpush.bf16.msra.mxu1 %v6515_v31  ;;  %v2806_v18 = vor.u32 %v2805_v42, %v2801_v37  ;;  %v2810_v31 = vrot.slane %v2808_v20, 1  ;;  %v2817_v29 = vrot.slane %v2815_v16, 1  ;;  %v2822_v47 = vrot.slane %v2820_v26, 1  ;;  %v6530_v20 = vld [vmem:[%s9799_s3 + $0x78] sm:$0xff] }
 0x2df   : > { %v2827_v42 = vshll.u32 %v7856_v19, 16 }
 0x2e0   : > { %3185 = vrot.lane.b32.xlu1 %v8239_v6, %s6637_s20  ;;  %v8269_v10 = vsel %vm1099_vm3, %v2806_v18, %v2810_v31  ;;  %v2818_v34 = vor.u32 %v2817_v29, %v2813_v8  ;;  %v2832_v18 = vshll.u32 %v7859_v33, 16  ;;  %v2957_v31 = vpop.permute.xlu2 %2956  ;;  %v2825_v29 = vshrl.u32 %v7856_v19, 16 }
 0x2e1   : > { %3142 = vrot.lane.b32.xlu0 %v8241_v48, %s6636_s18  ;;  %3745 = vmatpush.bf16.msra.mxu2 %v6530_v20  ;;  %v2829_v37 = vrot.slane %v2827_v42, 1  ;;  %v3243_v26 = vsel %vm1874_vm5, %v8018_v62, %v2957_v31 }
 0x2e2   : > { %v8284_v2 = vsel %vm1099_vm3, %v2818_v34, %v2822_v47  ;;  %v2834_v33 = vrot.slane %v2832_v18, 1  ;;  %v2839_v34 = vshll.u32 %v7897_v40, 16  ;;  %v6529_v18 = vld [vmem:[%s9799_s3 + $0x70] sm:$0xff] }
 0x2e3   : > { %3105 = vrot.lane.b32.xlu2 %v8248_v22, %s6632_s19  ;;  %v2830_v8 = vor.u32 %v2829_v37, %v2825_v29  ;;  %v2837_v37 = vshrl.u32 %v7897_v40, 16  ;;  %v2851_v29 = vshll.u32 %v7929_v57, 16 }
 0x2e5   : > { %v8300_v54 = vsel %vm1099_vm3, %v2830_v8, %v2834_v33  ;;  %3746 = vmatpush.bf16.msra.mxu2 %v6529_v18  ;;  %v2856_v8 = vshll.u32 %v7937_v35, 16 }
 0x2e8   : > { %3187 = vrot.lane.b32.xlu1 %v8255_v11, %s6637_s20 }
 0x2e9   : > { %3144 = vrot.lane.b32.xlu0 %v8258_v49, %s6636_s18  ;;  %3747 = vmatpush.bf16.msra.mxu2 %v6528_v4 }
 0x2eb   : > { %3107 = vrot.lane.b32.xlu2 %v7800_v23, %s6632_s19 }
 0x2ed   : > { %v3037_v16 = vpop.permute.xlu0 %3036 }
 0x2ee   : > { %v3276_v47 = vsel %vm3250_vm4, %v3243_v26, %v3037_v16  ;;  %v2846_v16 = vrot.slane %v2844_v5, 1  ;;  %v2849_v5 = vshrl.u32 %v7929_v57, 16 }
 0x2f0   : > { %3189 = vrot.lane.b32.xlu1 %v8269_v10, %s6637_s20 }
 0x2f1   : > { %3146 = vrot.lane.b32.xlu0 %v7856_v19, %s6636_s18  ;;  %v2841_v19 = vrot.slane %v2839_v34, 1  ;;  %v2858_v34 = vrot.slane %v2856_v8, 1 }
 0x2f3   : > { %3109 = vrot.lane.b32.xlu2 %v7833_v24, %s6632_s19  ;;  %v2842_v31 = vor.u32 %v2841_v19, %v2837_v37  ;;  %v2868_v19 = vshll.u32 %v7965_v3, 16  ;;  %v6527_v37 = vld [vmem:[%s9799_s3 + $0x60] sm:$0xff] }
 0x2f4   : > { %3748 = vmatpush.bf16.msra.mxu2 %v6527_v37  ;;  %v6524_v37 = vld [vmem:[%s9799_s3 + $0x48] sm:$0xff] }
 0x2f5   : > { %v8318_v26 = vsel %vm1099_vm3, %v2842_v31, %v2846_v16  ;;  %v2870_v31 = vrot.slane %v2868_v19, 1  ;;  %v2875_v16 = vshll.u32 %v7997_v1, 16  ;;  %v6525_v19 = vld [vmem:[%s9799_s3 + $0x50] sm:$0xff] }
 0x2f8   : > { %3191 = vrot.lane.b32.xlu1 %v8284_v2, %s6637_s20 }
 0x2f9   : > { %3148 = vrot.lane.b32.xlu0 %v7897_v40, %s6636_s18  ;;  %v2853_v40 = vrot.slane %v2851_v29, 1 }
 0x2fb   : > { %3111 = vrot.lane.b32.xlu2 %v7872_v30, %s6632_s19  ;;  %v2854_v33 = vor.u32 %v2853_v40, %v2849_v5  ;;  %v2877_v40 = vrot.slane %v2875_v16, 1 }
 0x2fc   : > { %v3074_v42 = vpop.permute.xlu1 %3073 }
 0x2fd   : > { %v3321_v20 = vsel %vm3283_vm0, %v3276_v47, %v3074_v42  ;;  %v2863_v47 = vshll.u32 %v7962_v12, 16  ;;  %v2959_v42 = vpop.permute.xlu2 %2958 }
 0x2fe   : > { %3724 = vmatmul.bf16.vlgmr.msrb.gmra.mxu2 %v3321_v20  ;;  %v8330_v20 = vsel %vm1099_vm3, %v2854_v33, %v2858_v34  ;;  %v3245_v8 = vsel %vm1874_vm5, %v8047_v59, %v2959_v42  ;;  %v2873_v34 = vshrl.u32 %v7997_v1, 16 }
 0x2ff   : > { %v2865_v35 = vrot.slane %v2863_v47, 1  ;;  %v6526_v47 = vld [vmem:[%s9799_s3 + $0x58] sm:$0xff] }
 0x300   : > { %3193 = vrot.lane.b32.xlu1 %v8300_v54, %s6637_s20  ;;  %v2878_v42 = vor.u32 %v2877_v40, %v2873_v34  ;;  %3749 = vmatpush.bf16.msra.mxu2 %v6526_v47  ;;  %v6523_v40 = vld [vmem:[%s9799_s3 + $0x40] sm:$0xff]  ;;  %v2611_v47 = vld [vmem:[#allocation3 + $0xd4] sm:$0x1] }
 0x301   : > { %3150 = vrot.lane.b32.xlu0 %v7929_v57, %s6636_s18  ;;  %v2861_v57 = vshrl.u32 %v7962_v12, 16 }
 0x303   : > { %3113 = vrot.lane.b32.xlu2 %v7911_v53, %s6632_s19  ;;  %v2866_v18 = vor.u32 %v2865_v35, %v2861_v57 }
 0x304   : > { %v3039_v29 = vpop.permute.xlu0 %3038  ;;  %3750 = vmatpush.bf16.msra.mxu2 %v6525_v19  ;;  %v8420_v19 = vld [vmem:[#allocation3 + $0xcc] sm:$0xff] }
 0x305   : > { %v8345_v4 = vsel %vm1099_vm3, %v2866_v18, %v2870_v31  ;;  %v3278_v5 = vsel %vm3250_vm4, %v3245_v8, %v3039_v29  ;;  %v6611_v8 = vld [vmem:[%s9799_s3 + $0x80] sm:$0xff] }
 0x308   : > { %3195 = vrot.lane.b32.xlu1 %v8318_v26, %s6637_s20  ;;  %3751 = vmatpush.bf16.msra.mxu2 %v6524_v37  ;;  %v3169_v37 = vunpack.c.l.b16 %v2611_v47 }
 0x309   : > { %3152 = vrot.lane.b32.xlu0 %v7962_v12, %s6636_s18  ;;  %v2880_v12 = vshll.u32 %v7999_v27, 16 }
 0x30b   : > { %3115 = vrot.lane.b32.xlu2 %v7948_v21, %s6632_s19 }
 0x30c   : > { %v2961_v3 = vpop.permute.xlu2 %2960  ;;  %3752 = vmatpush.bf16.msra.mxu2 %v6523_v40  ;;  %v3085_v40 = vshrl.u32 %v8185_v52, 16 }
 0x310   : > { %3197 = vrot.lane.b32.xlu1 %v8330_v20, %s6637_s20 }
 0x311   : > { %3154 = vrot.lane.b32.xlu0 %v7997_v1, %s6636_s18 }
 0x313   : > { %3117 = vrot.lane.b32.xlu2 %v7976_v36, %s6632_s19 }
 0x318   : > { %3199 = vrot.lane.b32.xlu1 %v8345_v4, %s6637_s20 }
 0x319   : > { %3156 = vrot.lane.b32.xlu0 %v8018_v62, %s6636_s18  ;;  %v3076_v33 = vpop.permute.xlu1 %3075  ;;  %v2882_v62 = vrot.slane %v2880_v12, 1  ;;  %v2560_v12 = vld [vmem:[#allocation3 + $0x8] sm:$0x1] }
 0x31a   : > { %v3324_v27 = vsel %vm3283_vm0, %v3278_v5, %v3076_v33  ;;  %v8408_v5 = vld [vmem:[#allocation3] sm:$0xff]  ;;  %v2708_v33 = vunpack.c.l.b16 %v2560_v12 }
 0x31b   : > { %3119 = vrot.lane.b32.xlu2 %v8004_v63, %s6632_s19  ;;  %3729 = vmatmul.bf16.gmra.mxu2 %v3324_v27  ;;  %v8366_v1 = vsel %vm1099_vm3, %v2878_v42, %v2882_v62  ;;  %v2743_v42 = vshll.u32 %v8408_v5, 16 }
 0x31c   : > { %v2724_v27 = vpack.c.b16 %v2708_v33, %v2708_v33  ;;  %v3174_v33 = vshll.u32 %v8420_v19, 16 }
 0x31d   : > { %v2963_v35 = vpop.permute.xlu2 %2962 }
 0x31e   : > { %v2965_v12 = vrot.slane %v2724_v27, 1 }
 0x320   : > { %3201 = vrot.lane.b32.xlu1 %v8366_v1, %s6637_s20 }
 0x321   : > { %3158 = vrot.lane.b32.xlu0 %v8047_v59, %s6636_s18  ;;  %v3247_v59 = vsel %vm1874_vm5, %v8091_v41, %v2961_v3 }
 0x322   : > { %v3041_v18 = vpop.permute.xlu0 %3040 }
 0x323   : > { %3121 = vrot.lane.b32.xlu2 %v8031_v0, %s6632_s19  ;;  %v3280_v0 = vsel %vm3250_vm4, %v3247_v59, %v3041_v18  ;;  %v2741_v59 = vshrl.u32 %v8408_v5, 16 }
 0x325   : > { %v8374_v57 = vpop.permute.xlu2 %3099 }
 0x328   : > { %3203 = vrot.lane.b32.xlu1 %v8038_v25, %s6637_s20 }
 0x329   : > { %3160 = vrot.lane.b32.xlu0 %v8091_v41, %s6636_s18 }
 0x32b   : > { %3123 = vrot.lane.b32.xlu2 %v8060_v55, %s6632_s19  ;;  %v3078_v31 = vpop.permute.xlu1 %3077  ;;  %v6610_v55 = vld [vmem:[%s9799_s3 + $0x88] sm:$0xff] }
 0x32c   : > { %v3327_v29 = vsel %vm3283_vm0, %v3280_v0, %v3078_v31  ;;  %3840 = vmatpush.bf16.msrb.mxu2 %v6610_v55  ;;  %v2745_v0 = vrot.slane %v2743_v42, 1  ;;  %v2748_v31 = vshll.u32 %v2724_v27, 16  ;;  %v2964_v55 = vrot.slane %v8408_v5, 1 }
 0x32d   : > { %v8388_v16 = vpop.permute.xlu2 %3101  ;;  %3734 = vmatmul.bf16.gmra.mxu2 %v3327_v29  ;;  %v3092_v29 = vshll.u32 %v8198_v50, 16 }
 0x32e   : > { %v2746_v42 = vor.u32 %v2745_v0, %v2741_v59  ;;  %v2750_v7 = vrot.slane %v2748_v31, 1  ;;  %v2757_v59 = vrot.slane %v2755_v28, 1  ;;  %v2760_v0 = vshll.u32 %v8151_v38, 16 }
 0x330   : > { %3205 = vrot.lane.b32.xlu1 %v8068_v58, %s6637_s20  ;;  %3841 = vmatpush.bf16.msrb.mxu2 %v6611_v8  ;;  %v8432_v8 = vpack.c.b16 %v3169_v37, %v3169_v37  ;;  %v2966_v37 = vsel %vm1324_vm2, %v2964_v55, %v2965_v12 }
 0x331   : > { %3162 = vrot.lane.b32.xlu0 %v8124_v17, %s6636_s18 }
 0x332   : > { %v3179_v9 = vshll.u32 %v8432_v8, 16 }
 0x333   : > { %v3043_v41 = vpop.permute.xlu0 %3042  ;;  %3125 = vrot.lane.b32.xlu2 %v8103_v45, %s6632_s19  ;;  %v3087_v45 = vshll.u32 %v8185_v52, 16 }
 0x335   : > { %v8403_v3 = vpop.permute.xlu2 %3103  ;;  %v3089_v18 = vrot.slane %v3087_v45, 1 }
 0x338   : > { %3207 = vrot.lane.b32.xlu1 %v8114_v44, %s6637_s20 }
 0x339   : > { %3164 = vrot.lane.b32.xlu0 %v8185_v52, %s6636_s18  ;;  %v3094_v52 = vrot.slane %v3092_v29, 1  ;;  %v3181_v29 = vrot.slane %v3179_v9, 1 }
 0x33b   : > { %v3137_v34 = vpop.permute.xlu0 %3136  ;;  %3127 = vrot.lane.b32.xlu2 %v8139_v14, %s6632_s19  ;;  %v3249_v14 = vsel %vm1874_vm5, %v8124_v17, %v2963_v35  ;;  %v3090_v35 = vor.u32 %v3089_v18, %v3085_v40  ;;  %v2753_v40 = vshrl.u32 %v8158_v15, 16 }
 0x33c   : > { %v3282_v50 = vsel %vm3250_vm4, %v3249_v14, %v3043_v41  ;;  %v3172_v41 = vshrl.u32 %v8420_v19, 16  ;;  %v3176_v14 = vrot.slane %v3174_v33, 1  ;;  %v2762_v33 = vrot.slane %v2760_v0, 1 }
 0x33d   : > { %v8418_v62 = vpop.permute.xlu2 %3105  ;;  %v8447_v18 = vsel %vm1099_vm3, %v3090_v35, %v3094_v52 }
 0x33e   : > { %v3177_v31 = vor.u32 %v3176_v14, %v3172_v41 }
 0x340   : > { %3209 = vrot.lane.b32.xlu1 %v8149_v56, %s6637_s20  ;;  %v3182_v28 = vsel %vm1099_vm3, %v3177_v31, %v3181_v29 }
 0x341   : > { %3166 = vrot.lane.b32.xlu0 %v8420_v19, %s6636_s18 }
 0x342   : > { %v3080_v17 = vpop.permute.xlu1 %3079 }
 0x343   : > { %v3139_v45 = vpop.permute.xlu0 %3138  ;;  %3129 = vrot.lane.b32.xlu2 %v8210_v61, %s6632_s19  ;;  %v3330_v47 = vsel %vm3283_vm0, %v3282_v50, %v3080_v17  ;;  %v2751_v61 = vsel %vm1099_vm3, %v2746_v42, %v2750_v7  ;;  %v2758_v7 = vor.u32 %v2757_v59, %v2753_v40 }
 0x344   : > { %3739 = vmatmul.bf16.gmra.mxu2 %v3330_v47 }
 0x345   : > { %v8440_v27 = vpop.permute.xlu2 %3107  ;;  %v2763_v38 = vsel %vm1099_vm3, %v2758_v7, %v2762_v33 }
 0x346   : > { %v3334_v9 = vsel %vm1874_vm5, %v2763_v38, %v8374_v57 }
 0x347   : > { %v3381_v17 = vsel %vm3250_vm4, %v3334_v9, %v3137_v34  ;;  %v8544_v9 = vld [vmem:[#allocation3 + $0x54] sm:$0xff] }
 0x348   : > { %3211 = vrot.lane.b32.xlu1 %v8447_v18, %s6637_s20 }
 0x349   : > { %3012 = vrot.lane.b32.xlu0 %v2966_v37, %s6636_s18  ;;  %v3337_v37 = vsel %vm1874_vm5, %v8218_v46, %v8388_v16 }
 0x34a   : > { %v3184_v12 = vpop.permute.xlu1 %3183  ;;  %v3383_v41 = vsel %vm3250_vm4, %v3337_v37, %v3139_v45  ;;  %v3340_v45 = vsel %vm1874_vm5, %v8239_v6, %v8403_v3 }
 0x34b   : > { %v3141_v55 = vpop.permute.xlu0 %3140  ;;  %2932 = vrot.lane.b32.xlu2 %v2751_v61, %s6632_s19  ;;  %v3413_v42 = vsel %vm3283_vm0, %v3381_v17, %v3184_v12 }
 0x34c   : > { %v3385_v31 = vsel %vm3250_vm4, %v3340_v45, %v3141_v55 }
 0x34d   : > { %v8455_v50 = vpop.permute.xlu2 %3109 }
 0x350   : > { %3213 = vrot.lane.b32.xlu1 %v3182_v28, %s6637_s20 }
 0x351   : > { %3014 = vrot.lane.b32.xlu0 %v8172_v43, %s6636_s18 }
 0x352   : > { %v3186_v47 = vpop.permute.xlu1 %3185 }
 0x353   : > { %v3143_v35 = vpop.permute.xlu0 %3142  ;;  %2934 = vrot.lane.b32.xlu2 %v2763_v38, %s6632_s19  ;;  %v3416_v59 = vsel %vm3283_vm0, %v3383_v41, %v3186_v47  ;;  %v8573_v41 = vld [vmem:[#allocation3 + $0x6c] sm:$0xff] }
 0x354   : > { %3753 = vmatmul.bf16.vlgmr.msra.gmra.mxu2 %v3413_v42 }
 0x355   : > { %v8467_v52 = vpop.permute.xlu2 %3111 }
 0x358   : > { %3049 = vrot.lane.b32.xlu1 %v8158_v15, %s6637_s20 }
 0x359   : > { %3016 = vrot.lane.b32.xlu0 %v8193_v51, %s6636_s18 }
 0x35a   : > { %v3188_v57 = vpop.permute.xlu1 %3187 }
 0x35b   : > { %v3145_v43 = vpop.permute.xlu0 %3144  ;;  %2936 = vrot.lane.b32.xlu2 %v8218_v46, %s6632_s19  ;;  %v3419_v7 = vsel %vm3283_vm0, %v3385_v31, %v3188_v57 }
 0x35d   : > { %v8475_v34 = vpop.permute.xlu2 %3113 }
 0x360   : > { %3051 = vrot.lane.b32.xlu1 %v8165_v13, %s6637_s20 }
 0x361   : > { %3018 = vrot.lane.b32.xlu0 %v8225_v60, %s6636_s18 }
 0x362   : > { %v3190_v61 = vpop.permute.xlu1 %3189 }
 0x363   : > { %v8485_v14 = vpop.permute.xlu0 %3146  ;;  %2938 = vrot.lane.b32.xlu2 %v8239_v6, %s6632_s19 }
 0x364   : > { %3758 = vmatmul.bf16.gmra.mxu2 %v3416_v59 }
 0x365   : > { %v8494_v0 = vpop.permute.xlu2 %3115 }
 0x368   : > { %3053 = vrot.lane.b32.xlu1 %v8183_v32, %s6637_s20 }
 0x369   : > { %3020 = vrot.lane.b32.xlu0 %v8248_v22, %s6636_s18 }
 0x36a   : > { %v3192_v16 = vpop.permute.xlu1 %3191 }
 0x36b   : > { %v8496_v46 = vpop.permute.xlu0 %3148  ;;  %2940 = vrot.lane.b32.xlu2 %v8255_v11, %s6632_s19 }
 0x36d   : > { %v8512_v40 = vpop.permute.xlu2 %3117 }
 0x370   : > { %3055 = vrot.lane.b32.xlu1 %v8212_v39, %s6637_s20 }
 0x371   : > { %3022 = vrot.lane.b32.xlu0 %v7800_v23, %s6636_s18 }
 0x372   : > { %v3194_v12 = vpop.permute.xlu1 %3193 }
 0x373   : > { %v8508_v29 = vpop.permute.xlu0 %3150  ;;  %2942 = vrot.lane.b32.xlu2 %v8269_v10, %s6632_s19 }
 0x374   : > { %3763 = vmatmul.bf16.gmra.mxu2 %v3419_v7 }
 0x375   : > { %v8525_v3 = vpop.permute.xlu2 %3119 }
 0x378   : > { %3057 = vrot.lane.b32.xlu1 %v8241_v48, %s6637_s20 }
 0x379   : > { %3024 = vrot.lane.b32.xlu0 %v7833_v24, %s6636_s18  ;;  %v3343_v24 = vsel %vm1874_vm5, %v8255_v11, %v8418_v62 }
 0x37a   : > { %v8523_v6 = vpop.permute.xlu1 %3195  ;;  %v3387_v55 = vsel %vm3250_vm4, %v3343_v24, %v3143_v35  ;;  %v8558_v35 = vld [vmem:[#allocation3 + $0x60] sm:$0xff] }
 0x37b   : > { %v8519_v23 = vpop.permute.xlu0 %3152  ;;  %2944 = vrot.lane.b32.xlu2 %v8284_v2, %s6632_s19  ;;  %v3422_v38 = vsel %vm3283_vm0, %v3387_v55, %v3190_v61 }
 0x380   : > { %3059 = vrot.lane.b32.xlu1 %v8258_v49, %s6637_s20 }
 0x381   : > { %3026 = vrot.lane.b32.xlu0 %v7872_v30, %s6636_s18  ;;  %v3122_v30 = vpop.permute.xlu2 %3121  ;;  %v8554_v17 = vpop.f32.mrf.mxu2 }
 0x382   : > { %v8539_v28 = vpop.permute.xlu1 %3197  ;;  %v3367_v31 = vsel %vm1874_vm5, %v8038_v25, %v3122_v30  ;;  %v8611_v30 = vld [vmem:[#allocation3 + $0x84] sm:$0xff] }
 0x383   : > { %v8535_v33 = vpop.permute.xlu0 %3154  ;;  %2946 = vrot.lane.b32.xlu2 %v8300_v54, %s6632_s19 }
 0x384   : > { %3768 = vmatmul.bf16.gmra.mxu2 %v3422_v38 }
 0x388   : > { %3061 = vrot.lane.b32.xlu1 %v8544_v9, %s6637_s20 }
 0x389   : > { %3028 = vrot.lane.b32.xlu0 %v7911_v53, %s6636_s18  ;;  %v3346_v53 = vsel %vm1874_vm5, %v8269_v10, %v8440_v27  ;;  %v3124_v47 = vpop.permute.xlu2 %3123  ;;  %v8579_v27 = vpop.f32.mrf.mxu2 }
 0x38a   : > { %v8552_v62 = vpop.permute.xlu1 %3199  ;;  %v3389_v42 = vsel %vm3250_vm4, %v3346_v53, %v3145_v43  ;;  %v3370_v10 = vsel %vm1874_vm5, %v8068_v58, %v3124_v47  ;;  %v3349_v58 = vsel %vm1874_vm5, %v8284_v2, %v8455_v50 }
 0x38b   : > { %v8548_v11 = vpop.permute.xlu0 %3156  ;;  %2948 = vrot.lane.b32.xlu2 %v8318_v26, %s6632_s19  ;;  %v3391_v45 = vsel %vm3250_vm4, %v3349_v58, %v8485_v14 }
 0x38c   : > { %v3428_v50 = vsel %vm3283_vm0, %v3391_v45, %v3194_v12 }
 0x390   : > { %3063 = vrot.lane.b32.xlu1 %v8558_v35, %s6637_s20 }
 0x391   : > { %3030 = vrot.lane.b32.xlu0 %v7948_v21, %s6636_s18  ;;  %v3425_v21 = vsel %vm3283_vm0, %v3389_v42, %v3192_v16  ;;  %v3126_v61 = vpop.permute.xlu2 %3125 }
 0x392   : > { %v8568_v37 = vpop.permute.xlu1 %3201  ;;  %v3373_v7 = vsel %vm1874_vm5, %v8114_v44, %v3126_v61 }
 0x393   : > { %v3159_v57 = vpop.permute.xlu0 %3158  ;;  %2950 = vrot.lane.b32.xlu2 %v8330_v20, %s6632_s19 }
 0x394   : > { %3773 = vmatmul.bf16.gmra.mxu2 %v3425_v21 }
 0x398   : > { %3065 = vrot.lane.b32.xlu1 %v8573_v41, %s6637_s20 }
 0x399   : > { %3032 = vrot.lane.b32.xlu0 %v7976_v36, %s6636_s18  ;;  %v8588_v36 = vld [vmem:[#allocation3 + $0x78] sm:$0xff]  ;;  %v3128_v25 = vpop.permute.xlu2 %3127 }
 0x39a   : > { %v8584_v16 = vpop.permute.xlu1 %3203  ;;  %v3376_v44 = vsel %vm1874_vm5, %v8149_v56, %v3128_v25 }
 0x39b   : > { %v3161_v43 = vpop.permute.xlu0 %3160  ;;  %2952 = vrot.lane.b32.xlu2 %v8345_v4, %s6632_s19 }
 0x39c   : > { %v3405_v59 = vsel %vm3250_vm4, %v3370_v10, %v3161_v43  ;;  %v6617_v10 = vld [vmem:[#allocation3 + $0x90] sm:$0xff]  ;;  %v3352_v43 = vsel %vm1874_vm5, %v8300_v54, %v8467_v52 }
 0x39d   : > { %v3393_v56 = vsel %vm3250_vm4, %v3352_v43, %v8496_v46 }
 0x39e   : > { %v8604_v55 = vpop.f32.mrf.mxu2 }
 0x3a0   : > { %3067 = vrot.lane.b32.xlu1 %v8588_v36, %s6637_s20 }
 0x3a1   : > { %3034 = vrot.lane.b32.xlu0 %v8004_v63, %s6636_s18  ;;  %v3403_v63 = vsel %vm3250_vm4, %v3367_v31, %v3159_v57  ;;  %v3130_v21 = vpop.permute.xlu2 %3129  ;;  %v3431_v31 = vsel %vm3283_vm0, %v3393_v56, %v8523_v6 }
 0x3a2   : > { %v3206_v2 = vpop.permute.xlu1 %3205  ;;  %v3379_v61 = vsel %vm1874_vm5, %v8447_v18, %v3130_v21  ;;  %v3355_v18 = vsel %vm1874_vm5, %v8318_v26, %v8475_v34 }
 0x3a3   : > { %v3163_v24 = vpop.permute.xlu0 %3162  ;;  %2954 = vrot.lane.b32.xlu2 %v8366_v1, %s6632_s19  ;;  %v8609_v14 = vsel %vm3283_vm0, %v3403_v63, %v3206_v2  ;;  %v3395_v63 = vsel %vm3250_vm4, %v3355_v18, %v8508_v29 }
 0x3a4   : > { %v3407_v38 = vsel %vm3250_vm4, %v3373_v7, %v3163_v24  ;;  %3778 = vmatmul.bf16.gmra.mxu2 %v3428_v50 }
 0x3a6   : > { %v8621_v12 = vpop.f32.mrf.mxu2 }
 0x3a8   : > { %3069 = vrot.lane.b32.xlu1 %v8611_v30, %s6637_s20 }
 0x3a9   : > { %v2933_v50 = vpop.permute.xlu2 %2932 }
 0x3aa   : > { %v3208_v42 = vpop.permute.xlu1 %3207  ;;  %v3219_v25 = vsel %vm1874_vm5, %v8408_v5, %v2933_v50 }
 0x3ab   : > { %v3165_v53 = vpop.permute.xlu0 %3164  ;;  %v8619_v57 = vsel %vm3283_vm0, %v3405_v59, %v3208_v42 }
 0x3ac   : > { %v3409_v47 = vsel %vm3250_vm4, %v3376_v44, %v3165_v53 }
 0x3b0   : > { %3071 = vrot.lane.b32.xlu1 %v6617_v10, %s6637_s20  ;;  %v8637_v24 = vpop.f32.mrf.mxu2 }
 0x3b1   : > { %v2935_v21 = vpop.permute.xlu2 %2934 }
 0x3b2   : > { %v3210_v45 = vpop.permute.xlu1 %3209 }
 0x3b3   : > { %v3167_v58 = vpop.permute.xlu0 %3166  ;;  %v8635_v7 = vsel %vm3283_vm0, %v3407_v38, %v3210_v45  ;;  %v3434_v38 = vsel %vm3283_vm0, %v3395_v63, %v8539_v28  ;;  %v3358_v28 = vsel %vm1874_vm5, %v8330_v20, %v8494_v0  ;;  %v3361_v0 = vsel %vm1874_vm5, %v8345_v4, %v8512_v40 }
 0x3b4   : > { %v3411_v59 = vsel %vm3250_vm4, %v3379_v61, %v3167_v58  ;;  %3783 = vmatmul.bf16.gmra.mxu2 %v3431_v31  ;;  %v3397_v42 = vsel %vm3250_vm4, %v3358_v28, %v8519_v23  ;;  %v3221_v61 = vsel %vm1874_vm5, %v8158_v15, %v2935_v21  ;;  %v3399_v23 = vsel %vm3250_vm4, %v3361_v0, %v8535_v33 }
 0x3b5   : > { %v3437_v5 = vsel %vm3283_vm0, %v3397_v42, %v8552_v62  ;;  %v3440_v62 = vsel %vm3283_vm0, %v3399_v23, %v8568_v37  ;;  %v3364_v33 = vsel %vm1874_vm5, %v8366_v1, %v8525_v3 }
 0x3b6   : > { %v3401_v37 = vsel %vm3250_vm4, %v3364_v33, %v8548_v11 }
 0x3b8   : > { %v8642_v46 = vpop.f32.mrf.mxu2 }
 0x3b9   : > { %v2937_v45 = vpop.permute.xlu2 %2936 }
 0x3ba   : > { %v3212_v54 = vpop.permute.xlu1 %3211  ;;  %v3223_v18 = vsel %vm1874_vm5, %v8165_v13, %v2937_v45 }
 0x3bb   : > { %v8640_v52 = vsel %vm3283_vm0, %v3409_v47, %v3212_v54  ;;  %v3013_v53 = vpop.permute.xlu0 %3012 }
 0x3bc   : > { %v3252_v26 = vsel %vm3250_vm4, %v3219_v25, %v3013_v53 }
 0x3c1   : > { %v2939_v50 = vpop.permute.xlu2 %2938 }
 0x3c2   : > { %v3214_v6 = vpop.permute.xlu1 %3213 }
 0x3c3   : > { %v8652_v2 = vsel %vm3283_vm0, %v3411_v59, %v3214_v6  ;;  %v3015_v43 = vpop.permute.xlu0 %3014  ;;  %v8689_v6 = vpop.f32.mrf.mxu3 }
 0x3c4   : > { %3788 = vmatmul.bf16.gmra.mxu2 %v3434_v38  ;;  %v3254_v58 = vsel %vm3250_vm4, %v3221_v61, %v3015_v43  ;;  %v3443_v38 = vsel %vm3283_vm0, %v3401_v37, %v8584_v16 }
 0x3c7   : > { %v8656_v44 = vpop.f32.mrf.mxu2 }
 0x3c9   : > { %v2941_v16 = vpop.permute.xlu2 %2940 }
 0x3ca   : > { %v3050_v34 = vpop.permute.xlu1 %3049 }
 0x3cb   : > { %v3285_v29 = vsel %vm3283_vm0, %v3252_v26, %v3050_v34  ;;  %v3017_v31 = vpop.permute.xlu0 %3016  ;;  %v8701_v13 = vpop.f32.mrf.mxu3  ;;  %v3225_v34 = vsel %vm1874_vm5, %v8183_v32, %v2939_v50  ;;  %v3227_v32 = vsel %vm1874_vm5, %v8212_v39, %v2941_v16 }
 0x3cc   : > { %3664 = vmatmul.bf16.vlgmr.msra.gmra.mxu1 %v3285_v29  ;;  %v3256_v63 = vsel %vm3250_vm4, %v3223_v18, %v3017_v31 }
 0x3cf   : > { %v8660_v47 = vpop.f32.mrf.mxu2 }
 0x3d2   : > { %v3052_v56 = vpop.permute.xlu1 %3051 }
 0x3d3   : > { %v3288_v59 = vsel %vm3283_vm0, %v3254_v58, %v3052_v56  ;;  %v3019_v53 = vpop.permute.xlu0 %3018  ;;  %v8709_v3 = vpop.f32.mrf.mxu3 }
 0x3d4   : > { %3793 = vmatmul.bf16.gmra.mxu2 %v3437_v5  ;;  %v3258_v29 = vsel %vm3250_vm4, %v3225_v34, %v3019_v53 }
 0x3d7   : > { %v8669_v10 = vpop.f32.mrf.mxu2 }
 0x3da   : > { %v3054_v54 = vpop.permute.xlu1 %3053 }
 0x3db   : > { %v3291_v4 = vsel %vm3283_vm0, %v3256_v63, %v3054_v54  ;;  %v8716_v42 = vpop.f32.mrf.mxu3  ;;  %v3021_v5 = vpop.permute.xlu0 %3020  ;;  %v3216_v63 = vrot.slane %v8432_v8, 1 }
 0x3dc   : > { %3669 = vmatmul.bf16.gmra.mxu1 %v3288_v59  ;;  %v3260_v43 = vsel %vm3250_vm4, %v3227_v32, %v3021_v5 }
 0x3df   : > { %v8675_v20 = vpop.f32.mrf.mxu2 }
 0x3e2   : > { %v3056_v26 = vpop.permute.xlu1 %3055 }
 0x3e3   : > { %v3294_v1 = vsel %vm3283_vm0, %v3258_v29, %v3056_v26  ;;  %v8724_v58 = vpop.f32.mrf.mxu3  ;;  %v3023_v0 = vpop.permute.xlu0 %3022 }
 0x3e4   : > { %3798 = vmatmul.bf16.gmra.mxu2 %v3440_v62 }
 0x3e7   : > { %v8684_v15 = vpop.f32.mrf.mxu2 }
 0x3ea   : > { %v3058_v21 = vpop.permute.xlu1 %3057 }
 0x3eb   : > { %v3297_v56 = vsel %vm3283_vm0, %v3260_v43, %v3058_v21  ;;  %v8729_v62 = vpop.f32.mrf.mxu3 }
 0x3ec   : > { %3674 = vmatmul.bf16.gmra.mxu1 %v3291_v4 }
 0x3ef   : > { %v8692_v40 = vpop.f32.mrf.mxu2 }
 0x3f2   : > { %v3060_v23 = vpop.permute.xlu1 %3059 }
 0x3f3   : > { %v8737_v18 = vpop.f32.mrf.mxu3 }
 0x3f4   : > { %3803 = vmatmul.bf16.gmra.mxu2 %v3443_v38 }
 0x3f7   : > { %v8703_v25 = vpop.f32.mrf.mxu2 }
 0x3f8   : > { %9909 = vst [vmem:[#allocation39_spill] sm:$0xff] %v8703_v25 }
 0x3fa   : > { %v3062_v38 = vpop.permute.xlu1 %3061 }
 0x3fb   : > { %v8749_v26 = vpop.f32.mrf.mxu3 }
 0x3fc   : > { %3679 = vmatmul.bf16.gmra.mxu1 %v3294_v1 }
 0x3ff   : > { %v8711_v11 = vpop.f32.mrf.mxu2 }
 0x400   : > { %9910 = vst [vmem:[#allocation40_spill] sm:$0xff] %v8711_v11 }
 0x402   : > { %v3064_v16 = vpop.permute.xlu1 %3063 }
 0x404   : > { %3808 = vmatmul.bf16.gmra.mxu2 %v8609_v14  ;;  %v2943_v14 = vpop.permute.xlu2 %2942 }
 0x405   : > { %v3229_v39 = vsel %vm1874_vm5, %v8241_v48, %v2943_v14  ;;  %v3025_v48 = vpop.permute.xlu0 %3024 }
 0x406   : > { %v3262_v45 = vsel %vm3250_vm4, %v3229_v39, %v3023_v0 }
 0x407   : > { %v8714_v28 = vpop.f32.mrf.mxu2  ;;  %v3300_v31 = vsel %vm3283_vm0, %v3262_v45, %v3060_v23 }
 0x40a   : > { %v3066_v23 = vpop.permute.xlu1 %3065 }
 0x40c   : > { %3684 = vmatmul.bf16.gmra.mxu1 %v3297_v56  ;;  %v2945_v33 = vpop.permute.xlu2 %2944 }
 0x40d   : > { %v3231_v50 = vsel %vm1874_vm5, %v8258_v49, %v2945_v33  ;;  %v3027_v1 = vpop.permute.xlu0 %3026 }
 0x40e   : > { %v3264_v53 = vsel %vm3250_vm4, %v3231_v50, %v3025_v48 }
 0x40f   : > { %v8722_v61 = vpop.f32.mrf.mxu2 }
 0x414   : > { %3813 = vmatmul.bf16.gmra.mxu2 %v8619_v57  ;;  %v3215_v57 = vrot.slane %v8420_v19, 1  ;;  %v3303_v19 = vsel %vm3283_vm0, %v3264_v53, %v3062_v38  ;;  %v2947_v34 = vpop.permute.xlu2 %2946  ;;  %v3068_v38 = vpop.permute.xlu1 %3067 }
 0x415   : > { %v3233_v49 = vsel %vm1874_vm5, %v8544_v9, %v2947_v34  ;;  %v3029_v0 = vpop.permute.xlu0 %3028 }
 0x416   : > { %v3217_v4 = vsel %vm1324_vm2, %v3215_v57, %v3216_v63  ;;  %v3266_v5 = vsel %vm3250_vm4, %v3233_v49, %v3027_v1 }
 0x417   : > { %v8727_v59 = vpop.f32.mrf.mxu2  ;;  %6312 = vmatmul.msk.bf16.gmra.mxu3 %vm1874_vm5, %v3217_v4  ;;  %v3306_v21 = vsel %vm3283_vm0, %v3266_v5, %v3064_v16 }
 0x41c   : > { %3689 = vmatmul.bf16.gmra.mxu1 %v3300_v31  ;;  %v2949_v56 = vpop.permute.xlu2 %2948 }
 0x41d   : > { %v3235_v9 = vsel %vm1874_vm5, %v8558_v35, %v2949_v56  ;;  %v3031_v35 = vpop.permute.xlu0 %3030 }
 0x41e   : > { %v3268_v45 = vsel %vm3250_vm4, %v3235_v9, %v3029_v0 }
 0x41f   : > { %v8735_v54 = vpop.f32.mrf.mxu2  ;;  %v3309_v31 = vsel %vm3283_vm0, %v3268_v45, %v3066_v23 }
 0x424   : > { %3818 = vmatmul.bf16.gmra.mxu2 %v8635_v7  ;;  %v8754_v7 = vpop.f32.mrf.mxu3  ;;  %v2951_v4 = vpop.permute.xlu2 %2950 }
 0x425   : > { %v3237_v50 = vsel %vm1874_vm5, %v8573_v41, %v2951_v4  ;;  %v3033_v41 = vpop.permute.xlu0 %3032 }
 0x427   : > { %v8743_v37 = vpop.f32.mrf.mxu2 }
 0x42c   : > { %3694 = vmatmul.bf16.gmra.mxu1 %v3303_v19  ;;  %v8763_v32 = vpop.f32.mrf.mxu3  ;;  %v3270_v19 = vsel %vm3250_vm4, %v3237_v50, %v3031_v35  ;;  %v2953_v49 = vpop.permute.xlu2 %2952  ;;  %v8827_v50 = vld [vmem:[%s9800_s4] ss:$0 sm:$0xff] }
 0x42d   : > { %v3312_v34 = vsel %vm3283_vm0, %v3270_v19, %v3068_v38  ;;  %v3239_v56 = vsel %vm1874_vm5, %v8588_v36, %v2953_v49  ;;  %v3035_v38 = vpop.permute.xlu0 %3034 }
 0x42e   : > { %v3272_v9 = vsel %vm3250_vm4, %v3239_v56, %v3033_v41 }
 0x42f   : > { %v8752_v8 = vpop.f32.mrf.mxu2 }
 0x434   : > { %3823 = vmatmul.bf16.gmra.mxu2 %v8640_v52  ;;  %v8768_v52 = vpop.f32.mrf.mxu3  ;;  %v2955_v35 = vpop.permute.xlu2 %2954 }
 0x437   : > { %v8757_v29 = vpop.f32.mrf.mxu2 }
 0x43c   : > { %3699 = vmatmul.bf16.gmra.mxu1 %v3306_v21  ;;  %v3070_v21 = vpop.permute.xlu1 %3069 }
 0x43d   : > { %v3315_v45 = vsel %vm3283_vm0, %v3272_v9, %v3070_v21 }
 0x43f   : > { %v8765_v43 = vpop.f32.mrf.mxu2 }
 0x444   : > { %3828 = vmatmul.bf16.gmra.mxu2 %v8652_v2  ;;  %v8780_v2 = vpop.f32.mrf.mxu3  ;;  %v3072_v19 = vpop.permute.xlu1 %3071 }
 0x447   : > { %v8770_v14 = vpop.f32.mrf.mxu2 }
 0x449   : > { %v8774_v39 = vpop.f32.mrf.mxu1 }
 0x44c   : > { %3704 = vmatmul.bf16.gmra.mxu1 %v3309_v31  ;;  %v8788_v48 = vpop.f32.mrf.mxu3 }
 0x44f   : > { %v8778_v57 = vpop.f32.mrf.mxu2 }
 0x451   : > { %v8782_v63 = vpop.f32.mrf.mxu1 }
 0x454   : > { %6297 = vmatmul.msk.bf16.vlgmr.msrb.gmra.mxu2 %vm1874_vm5, %v8193_v51  ;;  %v8800_v16 = vpop.f32.mrf.mxu3 }
 0x457   : > { %v8786_v33 = vpop.f32.mrf.mxu2 }
 0x459   : > { %v8792_v53 = vpop.f32.mrf.mxu1 }
 0x45c   : > { %3709 = vmatmul.bf16.gmra.mxu1 %v3312_v34  ;;  %v8810_v23 = vpop.f32.mrf.mxu3  ;;  %v3241_v34 = vsel %vm1874_vm5, %v8611_v30, %v2955_v35 }
 0x45d   : > { %9912 = vst [vmem:[#allocation42_spill] sm:$0xff] %v8810_v23  ;;  %v3274_v41 = vsel %vm3250_vm4, %v3241_v34, %v3035_v38 }
 0x45e   : > { %v3318_v21 = vsel %vm3283_vm0, %v3274_v41, %v3072_v19 }
 0x45f   : > { %v8796_v1 = vpop.f32.mrf.mxu2 }
 0x461   : > { %v8798_v51 = vpop.f32.mrf.mxu1 }
 0x464   : > { %6298 = vmatmul.msk.bf16.gmra.mxu2 %vm1874_vm5, %v8225_v60  ;;  %v8820_v4 = vpop.f32.mrf.mxu3 }
 0x465   : > { %9914 = vst [vmem:[#allocation44_spill] sm:$0xff] %v8820_v4 }
 0x467   : > { %v8804_v5 = vpop.f32.mrf.mxu2 }
 0x469   : > { %v8808_v0 = vpop.f32.mrf.mxu1 }
 0x46a   : > { %9911 = vst [vmem:[#allocation41_spill] sm:$0xff] %v8808_v0  ;;  %v4332_v0 = vld [vmem:[#allocation3 + $0x38] sm:$0x1] }
 0x46c   : > { %3714 = vmatmul.bf16.gmra.mxu1 %v3315_v45  ;;  %v8834_v56 = vpop.f32.mrf.mxu3 }
 0x46d   : > { %9915 = vst [vmem:[#allocation45_spill] sm:$0xff] %v8834_v56 }
 0x46f   : > { %v8814_v31 = vpop.f32.mrf.mxu2 }
 0x471   : > { %v8816_v60 = vpop.f32.mrf.mxu1 }
 0x472   : > { %9913 = vst [vmem:[#allocation43_spill] sm:$0xff] %v8816_v60 }
 0x474   : > { %6299 = vmatmul.msk.bf16.gmra.mxu2 %vm1874_vm5, %v8248_v22  ;;  %v8842_v34 = vpop.f32.mrf.mxu3 }
 0x475   : > { %9917 = vst [vmem:[#allocation47_spill] sm:$0xff] %v8842_v34 }
 0x477   : > { %v8822_v36 = vpop.f32.mrf.mxu2 }
 0x479   : > { %v3680_v49 = vpop.f32.mrf.mxu1 }
 0x47a   : > { %v3681_v22 = vadd.f32 %v8827_v50, %v3680_v49 }
 0x47c   : > { %v3770_v9 = vadd.f32 %v8714_v28, %v3681_v22  ;;  %3719 = vmatmul.bf16.gmra.mxu1 %v3318_v21  ;;  %v4328_v21 = vld [vmem:[#allocation3 + $0x30] sm:$0xf] }
 0x47e   : > { %v3859_v45 = vadd.f32 %v8689_v6, %v3770_v9 }
 0x47f   : > { %v8838_v11 = vpop.f32.mrf.mxu2 }
 0x480   : > { %9916 = vst [vmem:[#allocation46_spill] sm:$0xff] %v8838_v11  ;;  %v3929_v4 = vmax.f32 %v3859_v45, 0.0 }
 0x481   : > { %v3682_v25 = vpop.f32.mrf.mxu1 }
 0x482   : > { %v3961_v60 = vpack.c.bf16 %v3929_v4, %v3929_v4  ;;  %v3683_v30 = vadd.f32 %v8827_v50, %v3682_v25 }
 0x484   : > { %v4039_v35 = vshrl.u32 %v3961_v60, 16  ;;  %v3772_v38 = vadd.f32 %v8722_v61, %v3683_v30  ;;  %v4042_v49 = vshll.u32 %v3961_v60, 16 }
 0x486   : > { %v4041_v19 = vrot.slane %v4039_v35, 7  ;;  %v3861_v41 = vadd.f32 %v8701_v13, %v3772_v38  ;;  %v3903_v35 = vpop.f32.mrf.mxu3 }
 0x487   : > { %v8845_v28 = vpop.f32.mrf.mxu2 }
 0x488   : > { %9918 = vst [vmem:[#allocation48_spill] sm:$0xff] %v8845_v28  ;;  %v4044_v22 = vor.u32 %v4042_v49, %v4041_v19  ;;  %v3930_v6 = vmax.f32 %v3861_v41, 0.0  ;;  %v4045_v49 = vrot.slane %v4041_v19, 4 }
 0x489   : > { %v3685_v9 = vpop.f32.mrf.mxu1 }
 0x48a   : > { %v4329_v4 = vsel %vm7554_vm10, %v4044_v22, %v4328_v21  ;;  %v3962_v56 = vpack.c.bf16 %v3930_v6, %v3930_v6  ;;  %v3686_v25 = vadd.f32 %v8827_v50, %v3685_v9 }
 0x48b   : > { %4330 = vst [vmem:[#allocation3 + $0x30] sm:$0xf] %v4329_v4 }
 0x48c   : > { %v4047_v61 = vshrl.u32 %v3962_v56, 16  ;;  %v3775_v30 = vadd.f32 %v8727_v59, %v3686_v25  ;;  %v4050_v34 = vshll.u32 %v3962_v56, 16 }
 0x48e   : > { %v4049_v60 = vrot.slane %v4047_v61, 7  ;;  %v3864_v13 = vadd.f32 %v8709_v3, %v3775_v30 }
 0x48f   : > { %v8852_v38 = vpop.f32.mrf.mxu2 }
 0x490   : > { %9920 = vst [vmem:[#allocation6_spill] sm:$0xff] %v8852_v38  ;;  %v4052_v41 = vor.u32 %v4050_v34, %v4049_v60  ;;  %v4054_v28 = vrot.slane %v4049_v60, 4  ;;  %v3931_v11 = vmax.f32 %v3864_v13, 0.0  ;;  %v3726_v34 = vadd.f32 %v8827_v50, %v8554_v17 }
 0x491   : > { %v3687_v22 = vpop.f32.mrf.mxu1 }
 0x492   : > { %v4053_v21 = vsel %vm6829_vm8, %v4045_v49, %v4052_v41  ;;  %v4333_v4 = vsel %vm7584_vm7, %v4054_v28, %v4332_v0  ;;  %v3963_v59 = vpack.c.bf16 %v3931_v11, %v3931_v11  ;;  %v3688_v25 = vadd.f32 %v8827_v50, %v3687_v22  ;;  %v3905_v49 = vpop.f32.mrf.mxu3  ;;  %v4335_v28 = vld [vmem:[#allocation3 + $0x3c] sm:$0xf] }
 0x493   : > { %4331 = vst.msk [vmem:[#allocation3 + $0x34] sm:$0xf] %vm9923_vm12, %v4053_v21  ;;  %vm9930_vm12 = vmmov %vm9905_vm1 }
 0x494   : > { %4334 = vst [vmem:[#allocation3 + $0x38] sm:$0x1] %v4333_v4  ;;  %v4056_v3 = vshrl.u32 %v3963_v59, 16  ;;  %v3777_v56 = vadd.f32 %v8735_v54, %v3688_v25  ;;  %v4059_v61 = vshll.u32 %v3963_v59, 16 }
 0x496   : > { %v4058_v19 = vrot.slane %v4056_v3, 7  ;;  %v3866_v30 = vadd.f32 %v8716_v42, %v3777_v56  ;;  %v6558_v42 = vld [vmem:[%s9801_s5 + $0x38] sm:$0xff]  ;;  %v3728_v3 = vadd.f32 %v8827_v50, %v8579_v27 }
 0x497   : > { %v3814_v60 = vpop.f32.mrf.mxu2  ;;  %5515 = vmatpush.bf16.msrb.mxu3 %v6558_v42 }
 0x498   : > { %v3815_v13 = vadd.f32 %v3814_v60, %v3726_v34  ;;  %v4061_v0 = vor.u32 %v4059_v61, %v4058_v19  ;;  %v3932_v11 = vmax.f32 %v3866_v30, 0.0 }
 0x499   : > { %v3690_v22 = vpop.f32.mrf.mxu1 }
 0x49a   : > { %v3904_v41 = vadd.f32 %v3903_v35, %v3815_v13  ;;  %v4336_v21 = vsel %vm7554_vm10, %v4061_v0, %v4335_v28  ;;  %v3964_v4 = vpack.c.bf16 %v3932_v11, %v3932_v11  ;;  %v3691_v54 = vadd.f32 %v8827_v50, %v3690_v22  ;;  %v3908_v0 = vpop.f32.mrf.mxu3 }
 0x49b   : > { %4337 = vst [vmem:[#allocation3 + $0x3c] sm:$0xf] %v4336_v21  ;;  %v4062_v11 = vrot.slane %v4058_v19, 4  ;;  %v4339_v21 = vld [vmem:[#allocation3 + $0x44] sm:$0x1] }
 0x49c   : > { %v3947_v17 = vmax.f32 %v3904_v41, 0.0  ;;  %v4064_v59 = vshrl.u32 %v3964_v4, 16  ;;  %v3780_v25 = vadd.f32 %v8743_v37, %v3691_v54  ;;  %v4067_v34 = vshll.u32 %v3964_v4, 16 }
 0x49e   : > { %v3979_v35 = vpack.c.bf16 %v3947_v17, %v3947_v17  ;;  %v4066_v56 = vrot.slane %v4064_v59, 7  ;;  %v3869_v61 = vadd.f32 %v8724_v58, %v3780_v25  ;;  %v4391_v59 = vld [vmem:[#allocation3 + $0x9c] sm:$0xf] }
 0x49f   : > { %v3816_v30 = vpop.f32.mrf.mxu2 }
 0x4a0   : > { %v4192_v60 = vshrl.u32 %v3979_v35, 16  ;;  %v3817_v13 = vadd.f32 %v3816_v30, %v3728_v3  ;;  %v4069_v28 = vor.u32 %v4067_v34, %v4066_v56  ;;  %v4071_v41 = vrot.slane %v4066_v56, 4 }
 0x4a1   : > { %v3933_v22 = vmax.f32 %v3869_v61, 0.0  ;;  %v4195_v37 = vshll.u32 %v3979_v35, 16  ;;  %v3692_v23 = vpop.f32.mrf.mxu1  ;;  %v3731_v35 = vadd.f32 %v8827_v50, %v8604_v55 }
 0x4a2   : > { %v4194_v38 = vrot.slane %v4192_v60, 7  ;;  %v3906_v54 = vadd.f32 %v3905_v49, %v3817_v13  ;;  %v4070_v27 = vsel %vm6829_vm8, %v4062_v11, %v4069_v28  ;;  %v4340_v4 = vsel %vm7584_vm7, %v4071_v41, %v4339_v21  ;;  %v6566_v49 = vld [vmem:[%s9801_s5 + $0x78] sm:$0xff]  ;;  %v4342_v41 = vld [vmem:[#allocation3 + $0x48] sm:$0xf] }
 0x4a3   : > { %v3965_v58 = vpack.c.bf16 %v3933_v22, %v3933_v22  ;;  %v3693_v17 = vadd.f32 %v8827_v50, %v3692_v23  ;;  %4338 = vst.msk [vmem:[#allocation3 + $0x40] sm:$0xf] %vm9924_vm9, %v4070_v27  ;;  %5604 = vmatpush.bf16.msrb.mxu0 %v6566_v49  ;;  %vm9931_vm9 = vmmov %vm9905_vm1 }
 0x4a4   : > { %v4197_v19 = vor.u32 %v4195_v37, %v4194_v38  ;;  %v3948_v42 = vmax.f32 %v3906_v54, 0.0  ;;  %4341 = vst [vmem:[#allocation3 + $0x44] sm:$0x1] %v4340_v4  ;;  %v3910_v54 = vpop.f32.mrf.mxu3 }
 0x4a5   : > { %v4073_v25 = vshrl.u32 %v3965_v58, 16  ;;  %v3782_v3 = vadd.f32 %v8752_v8, %v3693_v17  ;;  %v4076_v61 = vshll.u32 %v3965_v58, 16  ;;  %v4198_v17 = vrot.slane %v4194_v38, 4 }
 0x4a6   : > { %v4392_v56 = vsel %vm7554_vm10, %v4197_v19, %v4391_v59  ;;  %v3980_v23 = vpack.c.bf16 %v3948_v42, %v3948_v42  ;;  %v4395_v59 = vld [vmem:[#allocation3 + $0xa4] sm:$0x1] }
 0x4a7   : > { %4393 = vst [vmem:[#allocation3 + $0x9c] sm:$0xf] %v4392_v56  ;;  %v4075_v34 = vrot.slane %v4073_v25, 7  ;;  %v3871_v30 = vadd.f32 %v8729_v62, %v3782_v3  ;;  %v3819_v60 = vpop.f32.mrf.mxu2 }
 0x4a8   : > { %v4200_v13 = vshrl.u32 %v3980_v23, 16  ;;  %v3820_v8 = vadd.f32 %v3819_v60, %v3731_v35  ;;  %v4203_v21 = vshll.u32 %v3980_v23, 16 }
 0x4a9   : > { %v4078_v11 = vor.u32 %v4076_v61, %v4075_v34  ;;  %v3934_v28 = vmax.f32 %v3871_v30, 0.0  ;;  %v3695_v55 = vpop.f32.mrf.mxu1 }
 0x4aa   : > { %v4202_v22 = vrot.slane %v4200_v13, 7  ;;  %v3909_v37 = vadd.f32 %v3908_v0, %v3820_v8  ;;  %v3696_v58 = vadd.f32 %v8827_v50, %v3695_v55  ;;  %v3733_v0 = vadd.f32 %v8827_v50, %v8621_v12 }
 0x4ab   : > { %v4343_v27 = vsel %vm7554_vm10, %v4078_v11, %v4342_v41  ;;  %v3966_v4 = vpack.c.bf16 %v3934_v28, %v3934_v28  ;;  %v4079_v13 = vrot.slane %v4075_v34, 4  ;;  %v4346_v28 = vld [vmem:[#allocation3 + $0x50] sm:$0x1] }
 0x4ac   : > { %4344 = vst [vmem:[#allocation3 + $0x48] sm:$0xf] %v4343_v27  ;;  %v4205_v62 = vor.u32 %v4203_v21, %v4202_v22  ;;  %v4207_v19 = vrot.slane %v4202_v22, 4  ;;  %v3949_v42 = vmax.f32 %v3909_v37, 0.0  ;;  %v3785_v3 = vadd.f32 %v8757_v29, %v3696_v58  ;;  %v3913_v55 = vpop.f32.mrf.mxu3 }
 0x4ad   : > { %v4081_v25 = vshrl.u32 %v3966_v4, 16  ;;  %v4084_v23 = vshll.u32 %v3966_v4, 16 }
 0x4ae   : > { %v4206_v49 = vsel %vm6829_vm8, %v4198_v17, %v4205_v62  ;;  %v4396_v35 = vsel %vm7584_vm7, %v4207_v19, %v4395_v59  ;;  %v3981_v56 = vpack.c.bf16 %v3949_v42, %v3949_v42  ;;  %v3874_v61 = vadd.f32 %v8737_v18, %v3785_v3  ;;  %v4398_v17 = vld [vmem:[#allocation3 + $0xa8] sm:$0xf]  ;;  %v6557_v42 = vld [vmem:[%s9801_s5 + $0x30] sm:$0xff]  ;;  %v6568_v59 = vld [vmem:[%s9801_s5 + $0x88] sm:$0xff] }
 0x4af   : > { %4394 = vst.msk [vmem:[#allocation3 + $0xa0] sm:$0xf] %vm9925_vm11, %v4206_v49  ;;  %v4083_v38 = vrot.slane %v4081_v25, 7  ;;  %v3821_v30 = vpop.f32.mrf.mxu2  ;;  %v3736_v25 = vadd.f32 %v8827_v50, %v8637_v24  ;;  %5516 = vmatpush.bf16.msrb.mxu3 %v6557_v42  ;;  %5699 = vmatpush.bf16.msrb.mxu1 %v6568_v59  ;;  %vm9932_vm11 = vmmov %vm9905_vm1 }
 0x4b0   : > { %4397 = vst [vmem:[#allocation3 + $0xa4] sm:$0x1] %v4396_v35  ;;  %v4209_v60 = vshrl.u32 %v3981_v56, 16  ;;  %v3822_v29 = vadd.f32 %v3821_v30, %v3733_v0  ;;  %v3935_v11 = vmax.f32 %v3874_v61, 0.0  ;;  %v4212_v22 = vshll.u32 %v3981_v56, 16 }
 0x4b1   : > { %v4086_v8 = vor.u32 %v4084_v23, %v4083_v38  ;;  %v4088_v12 = vrot.slane %v4083_v38, 4  ;;  %v3697_v37 = vpop.f32.mrf.mxu1 }
 0x4b2   : > { %v4211_v41 = vrot.slane %v4209_v60, 7  ;;  %v3911_v21 = vadd.f32 %v3910_v54, %v3822_v29  ;;  %v3967_v4 = vpack.c.bf16 %v3935_v11, %v3935_v11  ;;  %v3698_v58 = vadd.f32 %v8827_v50, %v3697_v37  ;;  %v4349_v60 = vld [vmem:[#allocation3 + $0x54] sm:$0xf] }
 0x4b3   : > { %v4087_v27 = vsel %vm6829_vm8, %v4079_v13, %v4086_v8  ;;  %v4347_v18 = vsel %vm7584_vm7, %v4088_v12, %v4346_v28 }
 0x4b4   : > { %4345 = vst.msk [vmem:[#allocation3 + $0x4c] sm:$0xf] %vm9926_vm13, %v4087_v27  ;;  %v4214_v34 = vor.u32 %v4212_v22, %v4211_v41  ;;  %v3950_v62 = vmax.f32 %v3911_v21, 0.0  ;;  %v4090_v19 = vshrl.u32 %v3967_v4, 16  ;;  %v3787_v54 = vadd.f32 %v8765_v43, %v3698_v58  ;;  %v6565_v27 = vld [vmem:[%s9801_s5 + $0x70] sm:$0xff]  ;;  %vm9935_vm13 = vmmov %vm9905_vm1 }
 0x4b5   : > { %4348 = vst [vmem:[#allocation3 + $0x50] sm:$0x1] %v4347_v18  ;;  %v4093_v35 = vshll.u32 %v3967_v4, 16  ;;  %v4215_v22 = vrot.slane %v4211_v41, 4  ;;  %v3915_v18 = vpop.f32.mrf.mxu3  ;;  %v4402_v4 = vld [vmem:[#allocation3 + $0xb0] sm:$0x1]  ;;  %5605 = vmatpush.bf16.msrb.mxu0 %v6565_v27 }
 0x4b6   : > { %v4399_v3 = vsel %vm7554_vm10, %v4214_v34, %v4398_v17  ;;  %v3982_v0 = vpack.c.bf16 %v3950_v62, %v3950_v62  ;;  %v4092_v49 = vrot.slane %v4090_v19, 7  ;;  %v3876_v43 = vadd.f32 %v8749_v26, %v3787_v54 }
 0x4b7   : > { %4400 = vst [vmem:[#allocation3 + $0xa8] sm:$0xf] %v4399_v3  ;;  %v3824_v56 = vpop.f32.mrf.mxu2  ;;  %v3738_v34 = vadd.f32 %v8827_v50, %v8642_v46 }
 0x4b8   : > { %v4217_v38 = vshrl.u32 %v3982_v0, 16  ;;  %v3825_v23 = vadd.f32 %v3824_v56, %v3736_v25  ;;  %v4095_v61 = vor.u32 %v4093_v35, %v4092_v49  ;;  %v3936_v30 = vmax.f32 %v3876_v43, 0.0  ;;  %v4353_v43 = vld [vmem:[#allocation3 + $0x5c] sm:$0x1] }
 0x4b9   : > { %v4220_v13 = vshll.u32 %v3982_v0, 16  ;;  %v3700_v8 = vpop.f32.mrf.mxu1  ;;  %v4096_v3 = vrot.slane %v4092_v49, 4 }
 0x4ba   : > { %v4219_v29 = vrot.slane %v4217_v38, 7  ;;  %v3914_v24 = vadd.f32 %v3913_v55, %v3825_v23  ;;  %v4350_v12 = vsel %vm7554_vm10, %v4095_v61, %v4349_v60  ;;  %v3968_v11 = vpack.c.bf16 %v3936_v30, %v3936_v30 }
 0x4bb   : > { %v3701_v28 = vadd.f32 %v8827_v50, %v3700_v8  ;;  %4351 = vst [vmem:[#allocation3 + $0x54] sm:$0xf] %v4350_v12 }
 0x4bc   : > { %v4222_v26 = vor.u32 %v4220_v13, %v4219_v29  ;;  %v4224_v21 = vrot.slane %v4219_v29, 4  ;;  %v3951_v37 = vmax.f32 %v3914_v24, 0.0  ;;  %v4098_v58 = vshrl.u32 %v3968_v11, 16  ;;  %v4405_v24 = vld [vmem:[#allocation3 + $0xb4] sm:$0xf] }
 0x4bd   : > { %v3790_v55 = vadd.f32 %v8770_v14, %v3701_v28  ;;  %v4101_v54 = vshll.u32 %v3968_v11, 16  ;;  %v3918_v11 = vpop.f32.mrf.mxu3  ;;  %v3741_v28 = vadd.f32 %v8827_v50, %v8656_v44 }
 0x4be   : > { %v4223_v17 = vsel %vm6829_vm8, %v4215_v22, %v4222_v26  ;;  %v4403_v41 = vsel %vm7584_vm7, %v4224_v21, %v4402_v4  ;;  %v3983_v62 = vpack.c.bf16 %v3951_v37, %v3951_v37  ;;  %v4100_v19 = vrot.slane %v4098_v58, 7 }
 0x4bf   : > { %4401 = vst.msk [vmem:[#allocation3 + $0xac] sm:$0xf] %vm9927_vm14, %v4223_v17  ;;  %v3879_v42 = vadd.f32 %v8754_v7, %v3790_v55  ;;  %v3826_v59 = vpop.f32.mrf.mxu2  ;;  %v4356_v17 = vld [vmem:[#allocation3 + $0x60] sm:$0xf]  ;;  %vm9940_vm14 = vmmov %vm9905_vm1 }
 0x4c0   : > { %4404 = vst [vmem:[#allocation3 + $0xb0] sm:$0x1] %v4403_v41  ;;  %v4226_v14 = vshrl.u32 %v3983_v62, 16  ;;  %v3827_v25 = vadd.f32 %v3826_v59, %v3738_v34  ;;  %v4103_v46 = vor.u32 %v4101_v54, %v4100_v19  ;;  %v4105_v0 = vrot.slane %v4100_v19, 4 }
 0x4c1   : > { %v3937_v35 = vmax.f32 %v3879_v42, 0.0  ;;  %v4229_v38 = vshll.u32 %v3983_v62, 16  ;;  %v3702_v61 = vpop.f32.mrf.mxu1 }
 0x4c2   : > { %v4228_v56 = vrot.slane %v4226_v14, 7  ;;  %v3916_v23 = vadd.f32 %v3915_v18, %v3827_v25  ;;  %v4104_v30 = vsel %vm6829_vm8, %v4096_v3, %v4103_v46  ;;  %v4354_v60 = vsel %vm7584_vm7, %v4105_v0, %v4353_v43  ;;  %v6556_v3 = vld [vmem:[%s9801_s5 + $0x28] sm:$0xff]  ;;  %v4409_v46 = vld [vmem:[#allocation3 + $0xbc] sm:$0x1] }
 0x4c3   : > { %v3969_v7 = vpack.c.bf16 %v3937_v35, %v3937_v35  ;;  %v3703_v29 = vadd.f32 %v8827_v50, %v3702_v61  ;;  %4352 = vst.msk [vmem:[#allocation3 + $0x58] sm:$0xf] %vm9928_vm15, %v4104_v30  ;;  %v3743_v43 = vadd.f32 %v8827_v50, %v8660_v47  ;;  %5517 = vmatpush.bf16.msrb.mxu3 %v6556_v3  ;;  %vm9944_vm15 = vmmov %vm9905_vm1 }
 0x4c4   : > { %v4231_v49 = vor.u32 %v4229_v38, %v4228_v56  ;;  %v3952_v13 = vmax.f32 %v3916_v23, 0.0  ;;  %4355 = vst [vmem:[#allocation3 + $0x5c] sm:$0x1] %v4354_v60  ;;  %v4232_v59 = vrot.slane %v4228_v56, 4 }
 0x4c5   : > { %v4107_v8 = vshrl.u32 %v3969_v7, 16  ;;  %v3792_v12 = vadd.f32 %v8778_v57, %v3703_v29  ;;  %v4110_v37 = vshll.u32 %v3969_v7, 16  ;;  %v3920_v29 = vpop.f32.mrf.mxu3 }
 0x4c6   : > { %v4406_v22 = vsel %vm7554_vm10, %v4231_v49, %v4405_v24  ;;  %v3984_v26 = vpack.c.bf16 %v3952_v13, %v3952_v13  ;;  %v4421_v24 = vld [vmem:[#allocation3 + $0x8] sm:$0x1] }
 0x4c7   : > { %4407 = vst [vmem:[#allocation3 + $0xb4] sm:$0xf] %v4406_v22  ;;  %v4109_v21 = vrot.slane %v4107_v8, 7  ;;  %v3881_v27 = vadd.f32 %v8763_v32, %v3792_v12  ;;  %v3829_v18 = vpop.f32.mrf.mxu2  ;;  %v4360_v22 = vld [vmem:[#allocation3 + $0x68] sm:$0x1] }
 0x4c8   : > { %v4234_v4 = vshrl.u32 %v3984_v26, 16  ;;  %v3830_v58 = vadd.f32 %v3829_v18, %v3741_v28  ;;  %v4237_v41 = vshll.u32 %v3984_v26, 16  ;;  %v4569_v28 = vunpack.c.l.b16 %v4421_v24 }
 0x4c9   : > { %v4112_v55 = vor.u32 %v4110_v37, %v4109_v21  ;;  %v3938_v34 = vmax.f32 %v3881_v27, 0.0  ;;  %v3705_v62 = vpop.f32.mrf.mxu1  ;;  %v4113_v47 = vrot.slane %v4109_v21, 4 }
 0x4ca   : > { %v4236_v57 = vrot.slane %v4234_v4, 7  ;;  %v3919_v19 = vadd.f32 %v3918_v11, %v3830_v58  ;;  %v3706_v42 = vadd.f32 %v8827_v50, %v3705_v62 }
 0x4cb   : > { %v4357_v44 = vsel %vm7554_vm10, %v4112_v55, %v4356_v17  ;;  %v3970_v54 = vpack.c.bf16 %v3938_v34, %v3938_v34  ;;  %v4412_v34 = vld [vmem:[#allocation3 + $0xc0] sm:$0xf] }
 0x4cc   : > { %4358 = vst [vmem:[#allocation3 + $0x60] sm:$0xf] %v4357_v44  ;;  %v4239_v14 = vor.u32 %v4237_v41, %v4236_v57  ;;  %v4241_v32 = vrot.slane %v4236_v57, 4  ;;  %v3953_v25 = vmax.f32 %v3919_v19, 0.0  ;;  %v3795_v35 = vadd.f32 %v8786_v33, %v3706_v42  ;;  %v6564_v44 = vld [vmem:[%s9801_s5 + $0x68] sm:$0xff] }
 0x4cd   : > { %v4115_v0 = vshrl.u32 %v3970_v54, 16  ;;  %v4118_v30 = vshll.u32 %v3970_v54, 16  ;;  %v3666_v33 = vadd.f32 %v8827_v50, %v8774_v39  ;;  %v4585_v57 = vpack.c.b16 %v4569_v28, %v4569_v28  ;;  %5606 = vmatpush.bf16.msrb.mxu0 %v6564_v44 }
 0x4ce   : > { %v4240_v38 = vsel %vm6829_vm8, %v4232_v59, %v4239_v14  ;;  %v4410_v56 = vsel %vm7584_vm7, %v4241_v32, %v4409_v46  ;;  %v3985_v23 = vpack.c.bf16 %v3953_v25, %v3953_v25  ;;  %v3884_v60 = vadd.f32 %v8768_v52, %v3795_v35  ;;  %v8963_v52 = vld [vmem:[#allocation3] sm:$0xff] }
 0x4cf   : > { %4408 = vst.msk [vmem:[#allocation3 + $0xb8] sm:$0xf] %vm9905_vm1, %v4240_v38  ;;  %v4117_v61 = vrot.slane %v4115_v0, 7  ;;  %v3831_v7 = vpop.f32.mrf.mxu2  ;;  %v3755_v19 = vadd.f32 %v8669_v10, %v3666_v33  ;;  %v4602_v54 = vshrl.u32 %v8963_v52, 16  ;;  %v4604_v14 = vshll.u32 %v8963_v52, 16 }
 0x4d0   : > { %4411 = vst [vmem:[#allocation3 + $0xbc] sm:$0x1] %v4410_v56  ;;  %v4243_v49 = vshrl.u32 %v3985_v23, 16  ;;  %v3832_v13 = vadd.f32 %v3831_v7, %v3743_v43  ;;  %v3939_v11 = vmax.f32 %v3884_v60, 0.0  ;;  %v4246_v37 = vshll.u32 %v3985_v23, 16 }
 0x4d1   : > { %v4120_v8 = vor.u32 %v4118_v30, %v4117_v61  ;;  %v4122_v12 = vrot.slane %v4117_v61, 4  ;;  %v3707_v27 = vpop.f32.mrf.mxu1  ;;  %v4609_v32 = vshll.u32 %v4585_v57, 16  ;;  %v3668_v25 = vadd.f32 %v8827_v50, %v8782_v63  ;;  %v4363_v60 = vld [vmem:[#allocation3 + $0x6c] sm:$0xf] }
 0x4d2   : > { %v4245_v26 = vrot.slane %v4243_v49, 7  ;;  %v3921_v18 = vadd.f32 %v3920_v29, %v3832_v13  ;;  %v3971_v21 = vpack.c.bf16 %v3939_v11, %v3939_v11  ;;  %v3708_v58 = vadd.f32 %v8827_v50, %v3707_v27 }
 0x4d3   : > { %v4121_v4 = vsel %vm6829_vm8, %v4113_v47, %v4120_v8  ;;  %v4361_v39 = vsel %vm7584_vm7, %v4122_v12, %v4360_v22  ;;  %v4606_v38 = vrot.slane %v4604_v14, 1  ;;  %v4611_v30 = vrot.slane %v4609_v32, 1 }
 0x4d4   : > { %4359 = vst.msk [vmem:[#allocation3 + $0x64] sm:$0xf] %vm9929_vm6, %v4121_v4  ;;  %v4248_v55 = vor.u32 %v4246_v37, %v4245_v26  ;;  %v3954_v17 = vmax.f32 %v3921_v18, 0.0  ;;  %v4124_v41 = vshrl.u32 %v3971_v21, 16  ;;  %v3797_v62 = vadd.f32 %v8796_v1, %v3708_v58 }
 0x4d5   : > { %4362 = vst [vmem:[#allocation3 + $0x68] sm:$0x1] %v4361_v39  ;;  %v4127_v1 = vshll.u32 %v3971_v21, 16  ;;  %v4249_v0 = vrot.slane %v4245_v26, 4  ;;  %v4607_v63 = vor.u32 %v4606_v38, %v4602_v54  ;;  %v4825_v47 = vrot.slane %v8963_v52, 1 }
 0x4d6   : > { %v4413_v42 = vsel %vm7554_vm10, %v4248_v55, %v4412_v34  ;;  %v3986_v59 = vpack.c.bf16 %v3954_v17, %v3954_v17  ;;  %v4126_v3 = vrot.slane %v4124_v41, 7  ;;  %v3886_v10 = vadd.f32 %v8780_v2, %v3797_v62  ;;  %v4416_v26 = vld [vmem:[#allocation3 + $0xc8] sm:$0x1] }
 0x4d7   : > { %4414 = vst [vmem:[#allocation3 + $0xc0] sm:$0xf] %v4413_v42  ;;  %v3843_v46 = vpop.f32.mrf.mxu2  ;;  %v4826_v24 = vrot.slane %v4585_v57, 1  ;;  %v4612_v28 = vsel %vm1099_vm3, %v4607_v63, %v4611_v30  ;;  %v3757_v21 = vadd.f32 %v8675_v20, %v3668_v25  ;;  %v3671_v20 = vadd.f32 %v8827_v50, %v8792_v53  ;;  %v4367_v42 = vld [vmem:[#allocation3 + $0x74] sm:$0x1] }
 0x4d8   : > { %v4251_v35 = vshrl.u32 %v3986_v59, 16  ;;  %v3844_v43 = vadd.f32 %v3843_v46, %v3755_v19  ;;  %v4129_v56 = vor.u32 %v4127_v1, %v4126_v3  ;;  %v3940_v23 = vmax.f32 %v3886_v10, 0.0  ;;  %4793 = vrot.lane.b32.xlu2 %v4612_v28, %s6632_s19  ;;  %v4307_v1 = vld [vmem:[#allocation3 + $0xc] sm:$0xf] }
 0x4d9   : > { %v4254_v61 = vshll.u32 %v3986_v59, 16  ;;  %v3710_v33 = vpop.f32.mrf.mxu1  ;;  %v4827_v27 = vsel %vm1324_vm2, %v4825_v47, %v4826_v24  ;;  %v4130_v62 = vrot.slane %v4126_v3, 4  ;;  %v3760_v38 = vadd.f32 %v8684_v15, %v3671_v20  ;;  %v4370_v15 = vld [vmem:[#allocation3 + $0x78] sm:$0xf] }
 0x4da   : > { %v4253_v7 = vrot.slane %v4251_v35, 7  ;;  %v3923_v29 = vmax.f32 %v3844_v43, 0.0  ;;  %v4364_v2 = vsel %vm7554_vm10, %v4129_v56, %v4363_v60  ;;  %v3972_v49 = vpack.c.bf16 %v3940_v23, %v3940_v23  ;;  %4873 = vrot.lane.b32.xlu0 %v4827_v27, %s6636_s18  ;;  %v6555_v56 = vld [vmem:[%s9801_s5 + $0x20] sm:$0xff] }
 0x4db   : > { %v3711_v13 = vadd.f32 %v8827_v50, %v3710_v33  ;;  %4365 = vst [vmem:[#allocation3 + $0x6c] sm:$0xf] %v4364_v2  ;;  %5518 = vmatpush.bf16.msrb.mxu3 %v6555_v56 }
 0x4dc   : > { %v4256_v8 = vor.u32 %v4254_v61, %v4253_v7  ;;  %v4258_v12 = vrot.slane %v4253_v7, 4  ;;  %v3955_v11 = vpack.c.bf16 %v3923_v29, %v3923_v29  ;;  %v4132_v22 = vshrl.u32 %v3972_v49, 16 }
 0x4dd   : > { %v3800_v37 = vadd.f32 %v8804_v5, %v3711_v13  ;;  %v4135_v55 = vshll.u32 %v3972_v49, 16 }
 0x4de   : > { %v4257_v18 = vsel %vm6829_vm8, %v4249_v0, %v4256_v8  ;;  %v4417_v4 = vsel %vm7584_vm7, %v4258_v12, %v4416_v26  ;;  %v3988_v39 = vshrl.u32 %v3955_v11, 16  ;;  %v4134_v58 = vrot.slane %v4132_v22, 7 }
 0x4df   : > { %4415 = vst.msk [vmem:[#allocation3 + $0xc4] sm:$0xf] %vm9930_vm12, %v4257_v18  ;;  %v3889_v5 = vadd.f32 %v8788_v48, %v3800_v37  ;;  %v3845_v34 = vpop.f32.mrf.mxu2  ;;  %v3991_v57 = vshll.u32 %v3955_v11, 16  ;;  %v6567_v18 = vld [vmem:[%s9801_s5 + $0x80] sm:$0xff] }
 0x4e0   : > { %4418 = vst [vmem:[#allocation3 + $0xc8] sm:$0x1] %v4417_v4  ;;  %v3990_v17 = vrot.slane %v3988_v39, 7  ;;  %v3846_v41 = vadd.f32 %v3845_v34, %v3757_v21  ;;  %v4137_v19 = vor.u32 %v4135_v55, %v4134_v58  ;;  %v4139_v44 = vrot.slane %v4134_v58, 4  ;;  %v6563_v21 = vld [vmem:[%s9801_s5 + $0x60] sm:$0xff]  ;;  %5700 = vmatpush.bf16.msrb.mxu1 %v6567_v18 }
 0x4e1   : > { %v3941_v54 = vmax.f32 %v3889_v5, 0.0  ;;  %v3712_v32 = vpop.f32.mrf.mxu1  ;;  %v9933_v5 = vld [vmem:[#allocation42_spill] sm:$0xff]  ;;  %5607 = vmatpush.bf16.msrb.mxu0 %v6563_v21 }
 0x4e2   : > { %v3993_v59 = vor.u32 %v3991_v57, %v3990_v17  ;;  %v3924_v14 = vmax.f32 %v3846_v41, 0.0  ;;  %v4138_v25 = vsel %vm6829_vm8, %v4130_v62, %v4137_v19  ;;  %v4368_v48 = vsel %vm7584_vm7, %v4139_v44, %v4367_v42  ;;  %v4374_v42 = vld [vmem:[#allocation3 + $0x80] sm:$0x1] }
 0x4e3   : > { %v3973_v10 = vpack.c.bf16 %v3941_v54, %v3941_v54  ;;  %v3713_v3 = vadd.f32 %v8827_v50, %v3712_v32  ;;  %4366 = vst.msk [vmem:[#allocation3 + $0x70] sm:$0xf] %vm9931_vm9, %v4138_v25  ;;  %v3994_v2 = vrot.slane %v3990_v17, 4 }
 0x4e4   : > { %v4308_v46 = vsel %vm7554_vm10, %v3993_v59, %v4307_v1  ;;  %v3956_v53 = vpack.c.bf16 %v3924_v14, %v3924_v14  ;;  %4369 = vst [vmem:[#allocation3 + $0x74] sm:$0x1] %v4368_v48  ;;  %v4314_v1 = vld [vmem:[#allocation3 + $0x18] sm:$0xf] }
 0x4e5   : > { %v4141_v0 = vshrl.u32 %v3973_v10, 16  ;;  %v3802_v35 = vadd.f32 %v8814_v31, %v3713_v3  ;;  %4309 = vst [vmem:[#allocation3 + $0xc] sm:$0xf] %v4308_v46  ;;  %v4144_v61 = vshll.u32 %v3973_v10, 16  ;;  %v3673_v31 = vadd.f32 %v8827_v50, %v8798_v51 }
 0x4e6   : > { %v3996_v43 = vshrl.u32 %v3956_v53, 16  ;;  %v3999_v29 = vshll.u32 %v3956_v53, 16 }
 0x4e7   : > { %v4143_v23 = vrot.slane %v4141_v0, 7  ;;  %v3891_v30 = vadd.f32 %v8800_v16, %v3802_v35  ;;  %v3848_v60 = vpop.f32.mrf.mxu2  ;;  %v4311_v16 = vld [vmem:[#allocation3 + $0x14] sm:$0x1]  ;;  %v3762_v39 = vadd.f32 %v8692_v40, %v3673_v31  ;;  %v9934_v40 = vld [vmem:[#allocation41_spill] sm:$0xff] }
 0x4e8   : > { %v3998_v7 = vrot.slane %v3996_v43, 7  ;;  %v3849_v33 = vadd.f32 %v3848_v60, %v3760_v38  ;;  %v3676_v20 = vadd.f32 %v8827_v50, %v9934_v40  ;;  %v9936_v43 = vld [vmem:[#allocation46_spill] sm:$0xff]  ;;  %v9938_v60 = vld [vmem:[#allocation39_spill] sm:$0xff] }
 0x4e9   : > { %v4146_v63 = vor.u32 %v4144_v61, %v4143_v23  ;;  %v3942_v47 = vmax.f32 %v3891_v30, 0.0  ;;  %v3715_v8 = vpop.f32.mrf.mxu1  ;;  %v4147_v62 = vrot.slane %v4143_v23, 4  ;;  %v9937_v23 = vld [vmem:[#allocation43_spill] sm:$0xff] }
 0x4ea   : > { %v4001_v49 = vor.u32 %v3999_v29, %v3998_v7  ;;  %v4003_v13 = vrot.slane %v3998_v7, 4  ;;  %v3925_v24 = vmax.f32 %v3849_v33, 0.0  ;;  %v3716_v28 = vadd.f32 %v8827_v50, %v3715_v8  ;;  %v6554_v33 = vld [vmem:[%s9801_s5 + $0x18] sm:$0xff] }
 0x4eb   : > { %v4371_v12 = vsel %vm7554_vm10, %v4146_v63, %v4370_v15  ;;  %v3974_v11 = vpack.c.bf16 %v3942_v47, %v3942_v47  ;;  %v3678_v61 = vadd.f32 %v8827_v50, %v9937_v23  ;;  %v3765_v7 = vadd.f32 %v9938_v60, %v3676_v20  ;;  %v9939_v47 = vld [vmem:[#allocation44_spill] sm:$0xff]  ;;  %5519 = vmatpush.bf16.msrb.mxu3 %v6554_v33  ;;  %v4381_v23 = vld [vmem:[#allocation3 + $0x8c] sm:$0x1]  ;;  %v4321_v33 = vld [vmem:[#allocation3 + $0x24] sm:$0xf] }
 0x4ec   : > { %4372 = vst [vmem:[#allocation3 + $0x78] sm:$0xf] %v4371_v12  ;;  %v4002_v22 = vsel %vm6829_vm8, %v3994_v2, %v4001_v49  ;;  %v4312_v51 = vsel %vm7584_vm7, %v4003_v13, %v4311_v16  ;;  %v3957_v26 = vpack.c.bf16 %v3925_v24, %v3925_v24  ;;  %v3805_v27 = vadd.f32 %v8822_v36, %v3716_v28  ;;  %v6562_v13 = vld [vmem:[%s9801_s5 + $0x58] sm:$0xff]  ;;  %v9942_v20 = vld [vmem:[#allocation40_spill] sm:$0xff] }
 0x4ed   : > { %4310 = vst.msk [vmem:[#allocation3 + $0x10] sm:$0xf] %vm9932_vm11, %v4002_v22  ;;  %v4149_v37 = vshrl.u32 %v3974_v11, 16  ;;  %v4152_v55 = vshll.u32 %v3974_v11, 16  ;;  %5608 = vmatpush.bf16.msrb.mxu0 %v6562_v13 }
 0x4ee   : > { %4313 = vst [vmem:[#allocation3 + $0x14] sm:$0x1] %v4312_v51  ;;  %v4005_v4 = vshrl.u32 %v3957_v26, 16  ;;  %v3894_v34 = vadd.f32 %v9933_v5, %v3805_v27  ;;  %v4008_v36 = vshll.u32 %v3957_v26, 16  ;;  %v4377_v26 = vld [vmem:[#allocation3 + $0x84] sm:$0xf] }
 0x4ef   : > { %v4151_v58 = vrot.slane %v4149_v37, 7  ;;  %v3850_v17 = vpop.f32.mrf.mxu2 }
 0x4f0   : > { %v9034_v57 = vrot.slane %v4005_v4, 7  ;;  %v3851_v41 = vadd.f32 %v3850_v17, %v3762_v39  ;;  %v3943_v54 = vmax.f32 %v3894_v34, 0.0 }
 0x4f1   : > { %v4154_v19 = vor.u32 %v4152_v55, %v4151_v58  ;;  %v4156_v44 = vrot.slane %v4151_v58, 4  ;;  %v3717_v32 = vpop.f32.mrf.mxu1  ;;  %v4318_v58 = vld [vmem:[#allocation3 + $0x20] sm:$0x1] }
 0x4f2   : > { %v4010_v59 = vor.u32 %v4008_v36, %v9034_v57  ;;  %v3926_v14 = vmax.f32 %v3851_v41, 0.0  ;;  %v3975_v10 = vpack.c.bf16 %v3943_v54, %v3943_v54  ;;  %v3718_v3 = vadd.f32 %v8827_v50, %v3717_v32  ;;  %v9943_v32 = vld [vmem:[#allocation45_spill] sm:$0xff] }
 0x4f3   : > { %v4155_v25 = vsel %vm6829_vm8, %v4147_v62, %v4154_v19  ;;  %v4375_v48 = vsel %vm7584_vm7, %v4156_v44, %v4374_v42  ;;  %v4011_v11 = vrot.slane %v9034_v57, 4  ;;  %v9941_v19 = vld [vmem:[#allocation48_spill] sm:$0xff]  ;;  %v3767_v42 = vadd.f32 %v9942_v20, %v3678_v61 }
 0x4f4   : > { %4373 = vst.msk [vmem:[#allocation3 + $0x7c] sm:$0xf] %vm9935_vm13, %v4155_v25  ;;  %v4315_v46 = vsel %vm7554_vm10, %v4010_v59, %v4314_v1  ;;  %v3958_v53 = vpack.c.bf16 %v3926_v14, %v3926_v14  ;;  %v9047_v0 = vld [vmem:[#allocation3 + $0xc] sm:$0xff]  ;;  %v4158_v35 = vshrl.u32 %v3975_v10, 16  ;;  %v3807_v38 = vadd.f32 %v9936_v43, %v3718_v3 }
 0x4f5   : > { %4376 = vst [vmem:[#allocation3 + $0x80] sm:$0x1] %v4375_v48  ;;  %v4424_v56 = vld [vmem:[#allocation3 + $0x14] sm:$0x1]  ;;  %4910 = vrot.lane.b32.xlu1 %v9047_v0, %s6637_s20  ;;  %v4161_v63 = vshll.u32 %v3975_v10, 16  ;;  %v4616_v49 = vshll.u32 %v9047_v0, 16 }
 0x4f6   : > { %4316 = vst [vmem:[#allocation3 + $0x18] sm:$0xf] %v4315_v46  ;;  %v4013_v30 = vshrl.u32 %v3958_v53, 16  ;;  %v4570_v29 = vunpack.c.l.b16 %v4424_v56  ;;  %v4160_v31 = vrot.slane %v4158_v35, 7  ;;  %v3896_v2 = vadd.f32 %v9939_v47, %v3807_v38  ;;  %v6618_v47 = vld [vmem:[%s9800_s4] ss:$0 sm:$0xff] }
 0x4f7   : > { %v3853_v15 = vpop.f32.mrf.mxu2  ;;  %v4016_v8 = vshll.u32 %v3958_v53, 16  ;;  %v4828_v51 = vrot.slane %v9047_v0, 1  ;;  %v4618_v34 = vrot.slane %v4616_v49, 1 }
 0x4f8   : > { %v4015_v24 = vrot.slane %v4013_v30, 7  ;;  %v3854_v12 = vadd.f32 %v3853_v15, %v3765_v7  ;;  %v4586_v16 = vpack.c.b16 %v4570_v29, %v4570_v29  ;;  %v4163_v28 = vor.u32 %v4161_v63, %v4160_v31 }
 0x4f9   : > { %v3944_v22 = vmax.f32 %v3896_v2, 0.0  ;;  %v3720_v4 = vpop.f32.mrf.mxu1  ;;  %v4164_v35 = vrot.slane %v4160_v31, 4 }
 0x4fa   : > { %v4018_v37 = vor.u32 %v4016_v8, %v4015_v24  ;;  %v4020_v27 = vrot.slane %v4015_v24, 4  ;;  %v3927_v18 = vmax.f32 %v3854_v12, 0.0  ;;  %v4829_v39 = vrot.slane %v4586_v16, 1  ;;  %v9945_v8 = vld [vmem:[#allocation6_spill] sm:$0xff] }
 0x4fb   : > { %v4378_v21 = vsel %vm7554_vm10, %v4163_v28, %v4377_v26  ;;  %v3976_v55 = vpack.c.bf16 %v3944_v22, %v3944_v22  ;;  %v3721_v5 = vadd.f32 %v8827_v50, %v3720_v4  ;;  %v4614_v50 = vshrl.u32 %v9047_v0, 16  ;;  %v6553_v4 = vld [vmem:[%s9801_s5 + $0x10] sm:$0xff] }
 0x4fc   : > { %4379 = vst [vmem:[#allocation3 + $0x84] sm:$0xf] %v4378_v21  ;;  %v4019_v17 = vsel %vm6829_vm8, %v4011_v11, %v4018_v37  ;;  %v4319_v57 = vsel %vm7584_vm7, %v4020_v27, %v4318_v58  ;;  %v3959_v36 = vpack.c.bf16 %v3927_v18, %v3927_v18  ;;  %v9073_v41 = vsel %vm1324_vm2, %v4828_v51, %v4829_v39  ;;  %v9946_v37 = vld [vmem:[#allocation47_spill] sm:$0xff] }
 0x4fd   : > { %4317 = vst.msk [vmem:[#allocation3 + $0x1c] sm:$0xf] %vm9940_vm14, %v4019_v17  ;;  %v4166_v62 = vshrl.u32 %v3976_v55, 16  ;;  %v3810_v44 = vadd.f32 %v9941_v19, %v3721_v5  ;;  %4960 = vrot.lane.b32.xlu2 %v9073_v41, %s6632_s19  ;;  %v4621_v54 = vshll.u32 %v4586_v16, 16  ;;  %v4169_v14 = vshll.u32 %v3976_v55, 16  ;;  %5520 = vmatpush.bf16.msrb.mxu3 %v6553_v4 }
 0x4fe   : > { %4320 = vst [vmem:[#allocation3 + $0x20] sm:$0x1] %v4319_v57  ;;  %v4022_v40 = vshrl.u32 %v3959_v36, 16  ;;  %v4619_v1 = vor.u32 %v4618_v34, %v4614_v50  ;;  %v4025_v3 = vshll.u32 %v3959_v36, 16  ;;  %v4384_v36 = vld [vmem:[#allocation3 + $0x90] sm:$0xf] }
 0x4ff   : > { %v4168_v59 = vrot.slane %v4166_v62, 7  ;;  %v3899_v25 = vadd.f32 %v9943_v32, %v3810_v44  ;;  %v3855_v48 = vpop.f32.mrf.mxu2  ;;  %v4623_v53 = vrot.slane %v4621_v54, 1  ;;  %v4436_v4 = vld [vmem:[#allocation3 + $0x44] sm:$0x1] }
 0x500   : > { %v4024_v10 = vrot.slane %v4022_v40, 7  ;;  %v3856_v46 = vadd.f32 %v3855_v48, %v3767_v42  ;;  %v4325_v40 = vld [vmem:[#allocation3 + $0x2c] sm:$0x1] }
 0x501   : > { %v4171_v43 = vor.u32 %v4169_v14, %v4168_v59  ;;  %v4173_v38 = vrot.slane %v4168_v59, 4  ;;  %v3945_v56 = vmax.f32 %v3899_v25, 0.0  ;;  %v3722_v7 = vpop.f32.mrf.mxu1  ;;  %v9093_v49 = vsel %vm1099_vm3, %v4619_v1, %v4623_v53 }
 0x502   : > { %v4027_v30 = vor.u32 %v4025_v3, %v4024_v10  ;;  %v3928_v60 = vmax.f32 %v3856_v46, 0.0  ;;  %v3723_v31 = vadd.f32 %v6618_v47, %v3722_v7  ;;  %v4028_v11 = vrot.slane %v4024_v10, 4  ;;  %v6561_v3 = vld [vmem:[%s9801_s5 + $0x50] sm:$0xff] }
 0x503   : > { %v4172_v61 = vsel %vm6829_vm8, %v4164_v35, %v4171_v43  ;;  %v4382_v29 = vsel %vm7584_vm7, %v4173_v38, %v4381_v23  ;;  %v3977_v63 = vpack.c.bf16 %v3945_v56, %v3945_v56  ;;  %5609 = vmatpush.bf16.msrb.mxu0 %v6561_v3  ;;  %v4388_v43 = vld [vmem:[#allocation3 + $0x98] sm:$0x1] }
 0x504   : > { %4380 = vst.msk [vmem:[#allocation3 + $0x88] sm:$0xf] %vm9944_vm15, %v4172_v61  ;;  %v4322_v2 = vsel %vm7554_vm10, %v4027_v30, %v4321_v33  ;;  %v3960_v15 = vpack.c.bf16 %v3928_v60, %v3928_v60  ;;  %v9095_v13 = vld [vmem:[#allocation3 + $0x18] sm:$0xff]  ;;  %v3812_v12 = vadd.f32 %v9945_v8, %v3723_v31 }
 0x505   : > { %4383 = vst [vmem:[#allocation3 + $0x8c] sm:$0x1] %v4382_v29  ;;  %v4175_v24 = vshrl.u32 %v3977_v63, 16  ;;  %4795 = vrot.lane.b32.xlu2 %v9093_v49, %s6632_s19  ;;  %v4427_v16 = vld [vmem:[#allocation3 + $0x20] sm:$0x1]  ;;  %4997 = vrot.lane.b32.xlu0 %v9095_v13, %s6636_s18  ;;  %v4178_v26 = vshll.u32 %v3977_v63, 16 }
 0x506   : > { %4323 = vst [vmem:[#allocation3 + $0x24] sm:$0xf] %v4322_v2  ;;  %v4030_v28 = vshrl.u32 %v3960_v15, 16  ;;  %v4571_v22 = vunpack.c.l.b16 %v4427_v16  ;;  %v3901_v27 = vadd.f32 %v9946_v37, %v3812_v12  ;;  %v4628_v18 = vshll.u32 %v9095_v13, 16  ;;  %v4433_v47 = vld [vmem:[#allocation3 + $0x38] sm:$0x1] }
 0x507   : > { %v4177_v51 = vrot.slane %v4175_v24, 7  ;;  %v4033_v21 = vshll.u32 %v3960_v15, 16  ;;  %v4831_v55 = vrot.slane %v9095_v13, 1  ;;  %v4626_v17 = vshrl.u32 %v9095_v13, 16  ;;  %v9152_v24 = vld [vmem:[#allocation3 + $0x30] sm:$0xff] }
 0x508   : > { %v4032_v39 = vrot.slane %v4030_v28, 7  ;;  %v4587_v58 = vpack.c.b16 %v4571_v22, %v4571_v22  ;;  %v3946_v34 = vmax.f32 %v3901_v27, 0.0  ;;  %v4630_v57 = vrot.slane %v4628_v18, 1 }
 0x509   : > { %v4180_v5 = vor.u32 %v4178_v26, %v4177_v51  ;;  %v4181_v46 = vrot.slane %v4177_v51, 4  ;;  %v4573_v8 = vunpack.c.l.b16 %v4433_v47  ;;  %v4652_v16 = vshll.u32 %v9152_v24, 16 }
 0x50a   : > { %v4035_v62 = vor.u32 %v4033_v21, %v4032_v39  ;;  %v4037_v19 = vrot.slane %v4032_v39, 4  ;;  %v4832_v44 = vrot.slane %v4587_v58, 1  ;;  %v4633_v50 = vshll.u32 %v4587_v58, 16  ;;  %v6560_v21 = vld [vmem:[%s9801_s5 + $0x48] sm:$0xff] }
 0x50b   : > { %v4385_v54 = vsel %vm7554_vm10, %v4180_v5, %v4384_v36  ;;  %v3978_v20 = vpack.c.bf16 %v3946_v34, %v3946_v34  ;;  %v4631_v42 = vor.u32 %v4630_v57, %v4626_v17  ;;  %vm9947_vm10 = vmmov %vm9905_vm1  ;;  %v4589_v12 = vpack.c.b16 %v4573_v8, %v4573_v8  ;;  %5610 = vmatpush.bf16.msrb.mxu0 %v6560_v21 }
 0x50c   : > { %4386 = vst [vmem:[#allocation3 + $0x90] sm:$0xf] %v4385_v54  ;;  %v4036_v59 = vsel %vm6829_vm8, %v4028_v11, %v4035_v62  ;;  %v4326_v14 = vsel %vm7584_vm7, %v4037_v19, %v4325_v40  ;;  %v4833_v32 = vsel %vm1324_vm2, %v4831_v55, %v4832_v44  ;;  %v4635_v25 = vrot.slane %v4633_v50, 1  ;;  %v6552_v11 = vld [vmem:[%s9801_s5 + $0x8] sm:$0xff]  ;;  %v9178_v55 = vld [vmem:[#allocation3 + $0x3c] sm:$0xff] }
 0x50d   : > { %4324 = vst.msk [vmem:[#allocation3 + $0x28] sm:$0xf] %vm9905_vm1, %v4036_v59  ;;  %v4183_v48 = vshrl.u32 %v3978_v20, 16  ;;  %4962 = vrot.lane.b32.xlu2 %v4833_v32, %s6632_s19  ;;  %6457 = vmatmul.msk.bf16.vlgmr.msrb.gmra.mxu1 %vm1874_vm5, %v4833_v32  ;;  %v4186_v10 = vshll.u32 %v3978_v20, 16  ;;  %v4654_v28 = vrot.slane %v4652_v16, 1  ;;  %v4657_v22 = vshll.u32 %v4589_v12, 16 }
 0x50e   : > { %4327 = vst [vmem:[#allocation3 + $0x2c] sm:$0x1] %v4326_v14  ;;  %v9120_v45 = vsel %vm1099_vm3, %v4631_v42, %v4635_v25  ;;  %4875 = vrot.lane.b32.xlu0 %v9073_v41, %s6636_s18  ;;  %5521 = vmatpush.bf16.msrb.mxu3 %v6552_v11  ;;  %v4838_v51 = vrot.slane %v4589_v12, 1  ;;  %v4650_v26 = vshrl.u32 %v9152_v24, 16  ;;  %v4837_v37 = vrot.slane %v9152_v24, 1  ;;  %v9198_v59 = vld [vmem:[#allocation3 + $0x48] sm:$0xff] }
 0x50f   : > { %v4185_v1 = vrot.slane %v4183_v48, 7  ;;  %5044 = vrot.lane.b32.xlu1 %v9120_v45, %s6637_s20  ;;  %v4659_v18 = vrot.slane %v4657_v22, 1  ;;  %v4574_v5 = vunpack.c.l.b16 %v4436_v4  ;;  %v4664_v17 = vshll.u32 %v9178_v55, 16  ;;  %v4439_v40 = vld [vmem:[#allocation3 + $0x50] sm:$0x1]  ;;  %v9246_v22 = vld [vmem:[#allocation3 + $0x60] sm:$0xff] }
 0x510   : > { %v4655_v27 = vor.u32 %v4654_v28, %v4650_v26  ;;  %v4839_v39 = vsel %vm1324_vm2, %v4837_v37, %v4838_v51  ;;  %v4662_v19 = vshrl.u32 %v9178_v55, 16  ;;  %v4840_v44 = vrot.slane %v9178_v55, 1  ;;  %v4445_v16 = vld [vmem:[#allocation3 + $0x68] sm:$0x1] }
 0x511   : > { %v4188_v53 = vor.u32 %v4186_v10, %v4185_v1  ;;  %v4190_v35 = vrot.slane %v4185_v1, 4  ;;  %v4590_v34 = vpack.c.b16 %v4574_v5, %v4574_v5  ;;  %v4666_v57 = vrot.slane %v4664_v17, 1 }
 0x512   : > { %v9175_v58 = vsel %vm1099_vm3, %v4655_v27, %v4659_v18  ;;  %v4575_v14 = vunpack.c.l.b16 %v4439_v40  ;;  %v4676_v48 = vshll.u32 %v9198_v59, 16  ;;  %v4577_v51 = vunpack.c.l.b16 %v4445_v16 }
 0x513   : > { %v4189_v38 = vsel %vm6829_vm8, %v4181_v46, %v4188_v53  ;;  %v4389_v41 = vsel %vm7584_vm7, %v4190_v35, %v4388_v43  ;;  %v4669_v36 = vshll.u32 %v4590_v34, 16  ;;  %v4841_v62 = vrot.slane %v4590_v34, 1  ;;  %v6559_v53 = vld [vmem:[%s9801_s5 + $0x40] sm:$0xff] }
 0x514   : > { %4387 = vst.msk [vmem:[#allocation3 + $0x94] sm:$0xf] %vm9947_vm10, %v4189_v38  ;;  %v9134_v56 = vld [vmem:[#allocation3 + $0x24] sm:$0xff]  ;;  %v4667_v50 = vor.u32 %v4666_v57, %v4662_v19  ;;  %v4591_v25 = vpack.c.b16 %v4575_v14, %v4575_v14  ;;  %v4678_v1 = vrot.slane %v4676_v48, 1  ;;  %v4674_v46 = vshrl.u32 %v9198_v59, 16  ;;  %5611 = vmatpush.bf16.msrb.mxu0 %v6559_v53 }
 0x515   : > { %4390 = vst [vmem:[#allocation3 + $0x98] sm:$0x1] %v4389_v41  ;;  %4797 = vrot.lane.b32.xlu2 %v9120_v45, %s6632_s19  ;;  %v4430_v23 = vld [vmem:[#allocation3 + $0x2c] sm:$0x1]  ;;  %v4640_v60 = vshll.u32 %v9134_v56, 16  ;;  %v4638_v9 = vshrl.u32 %v9134_v56, 16  ;;  %v4842_v20 = vsel %vm1324_vm2, %v4840_v44, %v4841_v62  ;;  %v4593_v37 = vpack.c.b16 %v4577_v51, %v4577_v51 }
 0x516   : > { %4999 = vrot.lane.b32.xlu0 %v9134_v56, %s6636_s18  ;;  %v4572_v30 = vunpack.c.l.b16 %v4430_v23  ;;  %v4834_v61 = vrot.slane %v9134_v56, 1  ;;  %v4671_v54 = vrot.slane %v4669_v36, 1  ;;  %v4681_v10 = vshll.u32 %v4591_v25, 16  ;;  %v4442_v41 = vld [vmem:[#allocation3 + $0x5c] sm:$0x1] }
 0x517   : > { %4912 = vrot.lane.b32.xlu1 %v9095_v13, %s6637_s20  ;;  %v4642_v7 = vrot.slane %v4640_v60, 1  ;;  %v4844_v3 = vrot.slane %v4591_v25, 1  ;;  %v4843_v35 = vrot.slane %v9198_v59, 1  ;;  %v4679_v43 = vor.u32 %v4678_v1, %v4674_v46 }
 0x518   : > { %v4588_v6 = vpack.c.b16 %v4572_v30, %v4572_v30  ;;  %v9195_v42 = vsel %vm1099_vm3, %v4667_v50, %v4671_v54  ;;  %v4683_v38 = vrot.slane %v4681_v10, 1  ;;  %v4700_v27 = vshll.u32 %v9246_v22, 16  ;;  %v4448_v50 = vld [vmem:[#allocation3 + $0x74] sm:$0x1] }
 0x519   : > { %v4643_v33 = vor.u32 %v4642_v7, %v4638_v9  ;;  %v4845_v23 = vsel %vm1324_vm2, %v4843_v35, %v4844_v3  ;;  %v4576_v9 = vunpack.c.l.b16 %v4442_v41  ;;  %v4705_v5 = vshll.u32 %v4593_v37, 16 }
 0x51a   : > { %v4835_v29 = vrot.slane %v4588_v6, 1  ;;  %v4645_v63 = vshll.u32 %v4588_v6, 16  ;;  %v9221_v60 = vsel %vm1099_vm3, %v4679_v43, %v4683_v38  ;;  %v9224_v6 = vld [vmem:[#allocation3 + $0x54] sm:$0xff]  ;;  %v4702_v21 = vrot.slane %v4700_v27, 1 }
 0x51b   : > { %v4592_v7 = vpack.c.b16 %v4576_v9, %v4576_v9  ;;  %v4850_v57 = vrot.slane %v4593_v37, 1  ;;  %v4849_v62 = vrot.slane %v9246_v22, 1  ;;  %v4707_v44 = vrot.slane %v4705_v5, 1 }
 0x51c   : > { %v4836_v31 = vsel %vm1324_vm2, %v4834_v61, %v4835_v29  ;;  %v4647_v2 = vrot.slane %v4645_v63, 1  ;;  %v4688_v61 = vshll.u32 %v9224_v6, 16  ;;  %v4578_v14 = vunpack.c.l.b16 %v4448_v50 }
 0x51d   : > { %4964 = vrot.lane.b32.xlu2 %v4836_v31, %s6632_s19  ;;  %6458 = vmatmul.msk.bf16.gmra.mxu1 %vm1874_vm5, %v4836_v31  ;;  %v4847_v47 = vrot.slane %v4592_v7, 1  ;;  %v4851_v54 = vsel %vm1324_vm2, %v4849_v62, %v4850_v57  ;;  %vm5937_vm8 = vcmask 1042432   ;;  %vm5971_vm7 = vcmask 125952  }
 0x51e   : > { %v9149_v15 = vsel %vm1099_vm3, %v4643_v33, %v4647_v2  ;;  %4877 = vrot.lane.b32.xlu0 %v4833_v32, %s6636_s18  ;;  %v6551_v32 = vld [vmem:[%s9801_s5] sm:$0xff]  ;;  %v4690_v29 = vrot.slane %v4688_v61, 1  ;;  %v4693_v33 = vshll.u32 %v4592_v7, 16  ;;  %v4846_v2 = vrot.slane %v9224_v6, 1  ;;  %v9298_v7 = vld [vmem:[#allocation3 + $0x78] sm:$0xff] }
 0x51f   : > { %5046 = vrot.lane.b32.xlu1 %v9149_v15, %s6637_s20  ;;  %5522 = vmatpush.bf16.msrb.mxu3 %v6551_v32  ;;  %v4594_v25 = vpack.c.b16 %v4578_v14, %v4578_v14  ;;  %v4724_v16 = vshll.u32 %v9298_v7, 16  ;;  %v4855_v5 = vrot.slane %v9298_v7, 1 }
 0x520   : > { %v4695_v12 = vrot.slane %v4693_v33, 1  ;;  %v4848_v11 = vsel %vm1324_vm2, %v4846_v2, %v4847_v47 }
 0x521   : > { %v4717_v10 = vshll.u32 %v4594_v25, 16  ;;  %v4853_v53 = vrot.slane %v4594_v25, 1 }
 0x523   : > { %v4719_v41 = vrot.slane %v4717_v10, 1 }
 0x525   : > { %4799 = vrot.lane.b32.xlu2 %v9149_v15, %s6632_s19 }
 0x526   : > { %5001 = vrot.lane.b32.xlu0 %v9152_v24, %s6636_s18 }
 0x527   : > { %4914 = vrot.lane.b32.xlu1 %v9134_v56, %s6637_s20 }
 0x52d   : > { %4966 = vrot.lane.b32.xlu2 %v4839_v39, %s6632_s19  ;;  %6459 = vmatmul.msk.bf16.gmra.mxu1 %vm1874_vm5, %v4839_v39 }
 0x52e   : > { %4879 = vrot.lane.b32.xlu0 %v4836_v31, %s6636_s18  ;;  %v4686_v31 = vshrl.u32 %v9224_v6, 16 }
 0x52f   : > { %5048 = vrot.lane.b32.xlu1 %v9175_v58, %s6637_s20 }
 0x530   : > { %v4691_v8 = vor.u32 %v4690_v29, %v4686_v31 }
 0x532   : > { %v4794_v30 = vpop.permute.xlu2 %4793  ;;  %v9243_v28 = vsel %vm1099_vm3, %v4691_v8, %v4695_v12 }
 0x533   : > { %v5080_v18 = vsel %vm1874_vm5, %v8963_v52, %v4794_v30  ;;  %v4698_v52 = vshrl.u32 %v9246_v22, 16 }
 0x535   : > { %4801 = vrot.lane.b32.xlu2 %v9175_v58, %s6632_s19  ;;  %v4703_v19 = vor.u32 %v4702_v21, %v4698_v52  ;;  %v4454_v52 = vld [vmem:[#allocation3 + $0x8c] sm:$0x1] }
 0x536   : > { %5003 = vrot.lane.b32.xlu0 %v9178_v55, %s6636_s18  ;;  %v4580_v62 = vunpack.c.l.b16 %v4454_v52 }
 0x537   : > { %4916 = vrot.lane.b32.xlu1 %v9152_v24, %s6637_s20  ;;  %v9271_v40 = vsel %vm1099_vm3, %v4703_v19, %v4707_v44 }
 0x53d   : > { %4968 = vrot.lane.b32.xlu2 %v4842_v20, %s6632_s19  ;;  %6460 = vmatmul.msk.bf16.gmra.mxu1 %vm1874_vm5, %v4842_v20 }
 0x53e   : > { %4881 = vrot.lane.b32.xlu0 %v4839_v39, %s6636_s18 }
 0x53f   : > { %5050 = vrot.lane.b32.xlu1 %v9195_v42, %s6637_s20 }
 0x545   : > { %4803 = vrot.lane.b32.xlu2 %v9195_v42, %s6632_s19 }
 0x546   : > { %5005 = vrot.lane.b32.xlu0 %v9198_v59, %s6636_s18 }
 0x547   : > { %4918 = vrot.lane.b32.xlu1 %v9178_v55, %s6637_s20 }
 0x54c   : > { %v4874_v4 = vpop.permute.xlu0 %4873 }
 0x54d   : > { %4970 = vrot.lane.b32.xlu2 %v4845_v23, %s6632_s19  ;;  %6461 = vmatmul.msk.bf16.gmra.mxu1 %vm1874_vm5, %v4845_v23  ;;  %v5112_v39 = vsel %vm3250_vm4, %v5080_v18, %v4874_v4  ;;  %v4722_v18 = vshrl.u32 %v9298_v7, 16 }
 0x54e   : > { %4883 = vrot.lane.b32.xlu0 %v4842_v20, %s6636_s18  ;;  %v9274_v20 = vld [vmem:[#allocation3 + $0x6c] sm:$0xff] }
 0x54f   : > { %5052 = vrot.lane.b32.xlu1 %v9221_v60, %s6637_s20  ;;  %v4712_v48 = vshll.u32 %v9274_v20, 16  ;;  %v4710_v35 = vshrl.u32 %v9274_v20, 16  ;;  %v4852_v43 = vrot.slane %v9274_v20, 1 }
 0x551   : > { %v4714_v1 = vrot.slane %v4712_v48, 1  ;;  %v4854_v30 = vsel %vm1324_vm2, %v4852_v43, %v4853_v53  ;;  %v4596_v48 = vpack.c.b16 %v4580_v62, %v4580_v62 }
 0x553   : > { %v4715_v38 = vor.u32 %v4714_v1, %v4710_v35  ;;  %v4859_v35 = vrot.slane %v4596_v48, 1 }
 0x555   : > { %4805 = vrot.lane.b32.xlu2 %v9221_v60, %s6632_s19  ;;  %v9295_v9 = vsel %vm1099_vm3, %v4715_v38, %v4719_v41 }
 0x556   : > { %5007 = vrot.lane.b32.xlu0 %v9224_v6, %s6636_s18 }
 0x557   : > { %v9233_v63 = vpop.permute.xlu2 %4960  ;;  %4920 = vrot.lane.b32.xlu1 %v9198_v59, %s6637_s20 }
 0x558   : > { %v5193_v33 = vsel %vm1874_vm5, %v9093_v49, %v9233_v63 }
 0x55d   : > { %4972 = vrot.lane.b32.xlu2 %v4848_v11, %s6632_s19  ;;  %6462 = vmatmul.msk.bf16.gmra.mxu1 %vm1874_vm5, %v4848_v11 }
 0x55e   : > { %4885 = vrot.lane.b32.xlu0 %v4845_v23, %s6636_s18  ;;  %v4451_v23 = vld [vmem:[#allocation3 + $0x80] sm:$0x1] }
 0x55f   : > { %v9248_v26 = vpop.permute.xlu2 %4795  ;;  %5054 = vrot.lane.b32.xlu1 %v9243_v28, %s6637_s20  ;;  %v4579_v61 = vunpack.c.l.b16 %v4451_v23 }
 0x560   : > { %v5082_v49 = vsel %vm1874_vm5, %v9047_v0, %v9248_v26  ;;  %v9332_v26 = vld [vmem:[#allocation3 + $0x84] sm:$0xff] }
 0x561   : > { %v4595_v12 = vpack.c.b16 %v4579_v61, %v4579_v61  ;;  %v4736_v1 = vshll.u32 %v9332_v26, 16  ;;  %v4734_v43 = vshrl.u32 %v9332_v26, 16 }
 0x563   : > { %v4729_v51 = vshll.u32 %v4595_v12, 16  ;;  %v4856_v27 = vrot.slane %v4595_v12, 1  ;;  %v4738_v10 = vrot.slane %v4736_v1, 1 }
 0x565   : > { %4807 = vrot.lane.b32.xlu2 %v9243_v28, %s6632_s19  ;;  %v4731_v57 = vrot.slane %v4729_v51, 1  ;;  %v4739_v61 = vor.u32 %v4738_v10, %v4734_v43 }
 0x566   : > { %5009 = vrot.lane.b32.xlu0 %v9246_v22, %s6636_s18 }
 0x567   : > { %v9260_v34 = vpop.permute.xlu2 %4962  ;;  %4922 = vrot.lane.b32.xlu1 %v9224_v6, %s6637_s20  ;;  %v4911_v17 = vpop.permute.xlu1 %4910 }
 0x568   : > { %v5144_v36 = vsel %vm3283_vm0, %v5112_v39, %v4911_v17  ;;  %v5196_v44 = vsel %vm1874_vm5, %v9120_v45, %v9260_v34 }
 0x569   : > { %5523 = vmatmul.bf16.vlgmr.msrb.gmra.mxu3 %v5144_v36  ;;  %v4857_v36 = vsel %vm1324_vm2, %v4855_v5, %v4856_v27 }
 0x56d   : > { %4974 = vrot.lane.b32.xlu2 %v4851_v54, %s6632_s19  ;;  %6463 = vmatmul.msk.bf16.gmra.mxu1 %vm1874_vm5, %v4851_v54 }
 0x56e   : > { %4887 = vrot.lane.b32.xlu0 %v4848_v11, %s6636_s18  ;;  %v4726_v11 = vrot.slane %v4724_v16, 1 }
 0x56f   : > { %v9276_v32 = vpop.permute.xlu2 %4797  ;;  %5056 = vrot.lane.b32.xlu1 %v9271_v40, %s6637_s20 }
 0x570   : > { %v4727_v17 = vor.u32 %v4726_v11, %v4722_v18  ;;  %v5084_v45 = vsel %vm1874_vm5, %v9095_v13, %v9276_v32  ;;  %v9366_v32 = vld [vmem:[#allocation3 + $0x90] sm:$0xff] }
 0x571   : > { %v4748_v27 = vshll.u32 %v9366_v32, 16  ;;  %v4746_v5 = vshrl.u32 %v9366_v32, 16 }
 0x572   : > { %v9329_v0 = vsel %vm1099_vm3, %v4727_v17, %v4731_v57 }
 0x573   : > { %v4750_v18 = vrot.slane %v4748_v27, 1 }
 0x575   : > { %4809 = vrot.lane.b32.xlu2 %v9271_v40, %s6632_s19  ;;  %v4751_v62 = vor.u32 %v4750_v18, %v4746_v5 }
 0x576   : > { %5011 = vrot.lane.b32.xlu0 %v9274_v20, %s6636_s18 }
 0x577   : > { %v9285_v3 = vpop.permute.xlu2 %4964  ;;  %4924 = vrot.lane.b32.xlu1 %v9246_v22, %s6637_s20  ;;  %v4998_v46 = vpop.permute.xlu0 %4997 }
 0x578   : > { %v5240_v31 = vsel %vm3250_vm4, %v5193_v33, %v4998_v46  ;;  %v4741_v46 = vshll.u32 %v4596_v48, 16  ;;  %v5199_v12 = vsel %vm1874_vm5, %v9149_v15, %v9285_v3 }
 0x57a   : > { %v4743_v33 = vrot.slane %v4741_v46, 1 }
 0x57c   : > { %v9363_v13 = vsel %vm1099_vm3, %v4739_v61, %v4743_v33 }
 0x57d   : > { %4976 = vrot.lane.b32.xlu2 %v4854_v30, %s6632_s19  ;;  %6464 = vmatmul.msk.bf16.gmra.mxu1 %vm1874_vm5, %v4854_v30 }
 0x57e   : > { %4889 = vrot.lane.b32.xlu0 %v4851_v54, %s6636_s18 }
 0x57f   : > { %v9300_v29 = vpop.permute.xlu2 %4799  ;;  %5058 = vrot.lane.b32.xlu1 %v9295_v9, %s6637_s20 }
 0x580   : > { %v4876_v47 = vpop.permute.xlu0 %4875  ;;  %v5086_v15 = vsel %vm1874_vm5, %v9134_v56, %v9300_v29  ;;  %v9400_v29 = vld [vmem:[#allocation3 + $0x9c] sm:$0xff] }
 0x581   : > { %v5045_v2 = vpop.permute.xlu1 %5044  ;;  %v5114_v4 = vsel %vm3250_vm4, %v5082_v49, %v4876_v47  ;;  %v4457_v47 = vld [vmem:[#allocation3 + $0x98] sm:$0x1] }
 0x582   : > { %v5272_v8 = vsel %vm3283_vm0, %v5240_v31, %v5045_v2  ;;  %v4581_v2 = vunpack.c.l.b16 %v4457_v47 }
 0x583   : > { %5612 = vmatmul.bf16.vlgmr.msrb.gmra.mxu0 %v5272_v8 }
 0x585   : > { %4811 = vrot.lane.b32.xlu2 %v9295_v9, %s6632_s19 }
 0x586   : > { %5013 = vrot.lane.b32.xlu0 %v9298_v7, %s6636_s18 }
 0x587   : > { %v9314_v37 = vpop.permute.xlu2 %4966  ;;  %4926 = vrot.lane.b32.xlu1 %v9274_v20, %s6637_s20 }
 0x588   : > { %v5000_v63 = vpop.permute.xlu0 %4999  ;;  %v5202_v48 = vsel %vm1874_vm5, %v9175_v58, %v9314_v37 }
 0x589   : > { %v4913_v39 = vpop.permute.xlu1 %4912  ;;  %v5242_v54 = vsel %vm3250_vm4, %v5196_v44, %v5000_v63  ;;  %v4597_v63 = vpack.c.b16 %v4581_v2, %v4581_v2 }
 0x58a   : > { %v5147_v21 = vsel %vm3283_vm0, %v5114_v4, %v4913_v39 }
 0x58b   : > { %5528 = vmatmul.bf16.gmra.mxu3 %v5147_v21  ;;  %v4753_v4 = vshll.u32 %v4597_v63, 16  ;;  %v4862_v21 = vrot.slane %v4597_v63, 1 }
 0x58d   : > { %4978 = vrot.lane.b32.xlu2 %v4857_v36, %s6632_s19  ;;  %6465 = vmatmul.msk.bf16.gmra.mxu1 %vm1874_vm5, %v4857_v36  ;;  %v4755_v44 = vrot.slane %v4753_v4, 1 }
 0x58e   : > { %4891 = vrot.lane.b32.xlu0 %v4854_v30, %s6636_s18  ;;  %v4858_v30 = vrot.slane %v9332_v26, 1 }
 0x58f   : > { %v9334_v19 = vpop.permute.xlu2 %4801  ;;  %5060 = vrot.lane.b32.xlu1 %v9329_v0, %s6637_s20  ;;  %v9397_v56 = vsel %vm1099_vm3, %v4751_v62, %v4755_v44 }
 0x590   : > { %v4878_v50 = vpop.permute.xlu0 %4877  ;;  %v4860_v31 = vsel %vm1324_vm2, %v4858_v30, %v4859_v35  ;;  %v4760_v35 = vshll.u32 %v9400_v29, 16  ;;  %v5088_v58 = vsel %vm1874_vm5, %v9152_v24, %v9334_v19 }
 0x591   : > { %v5047_v14 = vpop.permute.xlu1 %5046  ;;  %v5116_v38 = vsel %vm3250_vm4, %v5084_v45, %v4878_v50  ;;  %v4460_v50 = vld [vmem:[#allocation3 + $0xa4] sm:$0x1] }
 0x592   : > { %v5275_v25 = vsel %vm3283_vm0, %v5242_v54, %v5047_v14  ;;  %v4582_v14 = vunpack.c.l.b16 %v4460_v50  ;;  %v4762_v43 = vrot.slane %v4760_v35, 1 }
 0x593   : > { %5617 = vmatmul.bf16.gmra.mxu0 %v5275_v25 }
 0x595   : > { %4813 = vrot.lane.b32.xlu2 %v9329_v0, %s6632_s19 }
 0x596   : > { %5015 = vrot.lane.b32.xlu0 %v9332_v26, %s6636_s18 }
 0x597   : > { %v9348_v53 = vpop.permute.xlu2 %4968  ;;  %4928 = vrot.lane.b32.xlu1 %v9298_v7, %s6637_s20 }
 0x598   : > { %v5002_v34 = vpop.permute.xlu0 %5001  ;;  %v5205_v63 = vsel %vm1874_vm5, %v9195_v42, %v9348_v53 }
 0x599   : > { %v4915_v41 = vpop.permute.xlu1 %4914  ;;  %v5244_v11 = vsel %vm3250_vm4, %v5199_v12, %v5002_v34  ;;  %v4598_v34 = vpack.c.b16 %v4582_v14, %v4582_v14 }
 0x59a   : > { %v5150_v23 = vsel %vm3283_vm0, %v5116_v38, %v4915_v41 }
 0x59b   : > { %5533 = vmatmul.bf16.gmra.mxu3 %v5150_v23  ;;  %v4765_v38 = vshll.u32 %v4598_v34, 16  ;;  %v4865_v41 = vrot.slane %v4598_v34, 1  ;;  %v4758_v23 = vshrl.u32 %v9400_v29, 16 }
 0x59d   : > { %4980 = vrot.lane.b32.xlu2 %v4860_v31, %s6632_s19  ;;  %6466 = vmatmul.msk.bf16.gmra.mxu1 %vm1874_vm5, %v4860_v31  ;;  %v4763_v2 = vor.u32 %v4762_v43, %v4758_v23  ;;  %v4767_v12 = vrot.slane %v4765_v38, 1 }
 0x59e   : > { %4893 = vrot.lane.b32.xlu0 %v4857_v36, %s6636_s18  ;;  %v4861_v36 = vrot.slane %v9366_v32, 1 }
 0x59f   : > { %v9368_v8 = vpop.permute.xlu2 %4803  ;;  %5062 = vrot.lane.b32.xlu1 %v9363_v13, %s6637_s20  ;;  %v9433_v19 = vsel %vm1099_vm3, %v4763_v2, %v4767_v12 }
 0x5a0   : > { %v4880_v16 = vpop.permute.xlu0 %4879  ;;  %v4863_v54 = vsel %vm1324_vm2, %v4861_v36, %v4862_v21 }
 0x5a1   : > { %v5049_v51 = vpop.permute.xlu1 %5048  ;;  %v5118_v17 = vsel %vm3250_vm4, %v5086_v15, %v4880_v16  ;;  %v9427_v16 = vpop.f32.mrf.mxu1 }
 0x5a2   : > { %v5278_v49 = vsel %vm3283_vm0, %v5244_v11, %v5049_v51  ;;  %v4463_v11 = vld [vmem:[#allocation3 + $0xb0] sm:$0x1]  ;;  %v9436_v51 = vld [vmem:[#allocation3 + $0xa8] sm:$0xff] }
 0x5a3   : > { %5622 = vmatmul.bf16.gmra.mxu0 %v5278_v49  ;;  %v4583_v49 = vunpack.c.l.b16 %v4463_v11  ;;  %v4772_v21 = vshll.u32 %v9436_v51, 16  ;;  %v4770_v62 = vshrl.u32 %v9436_v51, 16  ;;  %v4867_v14 = vrot.slane %v9436_v51, 1 }
 0x5a5   : > { %4815 = vrot.lane.b32.xlu2 %v9363_v13, %s6632_s19  ;;  %v4774_v42 = vrot.slane %v4772_v21, 1 }
 0x5a6   : > { %5017 = vrot.lane.b32.xlu0 %v9366_v32, %s6636_s18 }
 0x5a7   : > { %v9382_v39 = vpop.permute.xlu2 %4970  ;;  %4930 = vrot.lane.b32.xlu1 %v9332_v26, %s6637_s20 }
 0x5a8   : > { %v5004_v3 = vpop.permute.xlu0 %5003  ;;  %v5208_v43 = vsel %vm1874_vm5, %v9221_v60, %v9382_v39 }
 0x5a9   : > { %v4917_v57 = vpop.permute.xlu1 %4916  ;;  %v5246_v10 = vsel %vm3250_vm4, %v5202_v48, %v5004_v3  ;;  %v4599_v3 = vpack.c.b16 %v4583_v49, %v4583_v49  ;;  %v4775_v48 = vor.u32 %v4774_v42, %v4770_v62 }
 0x5aa   : > { %v5153_v52 = vsel %vm3283_vm0, %v5118_v17, %v4917_v57  ;;  %v9448_v17 = vpop.f32.mrf.mxu1  ;;  %v5090_v57 = vsel %vm1874_vm5, %v9178_v55, %v9368_v8  ;;  %v9472_v8 = vld [vmem:[#allocation3 + $0xb4] sm:$0xff] }
 0x5ab   : > { %5538 = vmatmul.bf16.gmra.mxu3 %v5153_v52  ;;  %v4777_v53 = vshll.u32 %v4599_v3, 16  ;;  %v4868_v36 = vrot.slane %v4599_v3, 1  ;;  %v4782_v12 = vshrl.u32 %v9472_v8, 16 }
 0x5ad   : > { %4982 = vrot.lane.b32.xlu2 %v4863_v54, %s6632_s19  ;;  %6467 = vmatmul.msk.bf16.gmra.mxu1 %vm1874_vm5, %v4863_v54 }
 0x5ae   : > { %4895 = vrot.lane.b32.xlu0 %v4860_v31, %s6636_s18  ;;  %v4864_v31 = vrot.slane %v9400_v29, 1 }
 0x5af   : > { %v9402_v25 = vpop.permute.xlu2 %4805  ;;  %5064 = vrot.lane.b32.xlu1 %v9397_v56, %s6637_s20 }
 0x5b0   : > { %v4882_v1 = vpop.permute.xlu0 %4881  ;;  %v4866_v24 = vsel %vm1324_vm2, %v4864_v31, %v4865_v41  ;;  %v5092_v60 = vsel %vm1874_vm5, %v9198_v59, %v9402_v25  ;;  %v6549_v25 = vld [vmem:[#allocation3 + $0xc0] sm:$0xff] }
 0x5b1   : > { %v5051_v46 = vpop.permute.xlu1 %5050  ;;  %v5120_v30 = vsel %vm3250_vm4, %v5088_v58, %v4882_v1  ;;  %v4779_v1 = vrot.slane %v4777_v53, 1 }
 0x5b2   : > { %v5281_v45 = vsel %vm3283_vm0, %v5246_v10, %v5051_v46  ;;  %v4466_v10 = vld [vmem:[#allocation3 + $0xbc] sm:$0x1]  ;;  %v4869_v46 = vsel %vm1324_vm2, %v4867_v14, %v4868_v36  ;;  %v9474_v35 = vpop.f32.mrf.mxu1 }
 0x5b3   : > { %5627 = vmatmul.bf16.gmra.mxu0 %v5281_v45  ;;  %v9469_v55 = vsel %vm1099_vm3, %v4775_v48, %v4779_v1  ;;  %v4584_v34 = vunpack.c.l.b16 %v4466_v10  ;;  %v4946_v10 = vshrl.u32 %v6549_v25, 16 }
 0x5b5   : > { %4817 = vrot.lane.b32.xlu2 %v9397_v56, %s6632_s19  ;;  %v4600_v23 = vpack.c.b16 %v4584_v34, %v4584_v34 }
 0x5b6   : > { %5019 = vrot.lane.b32.xlu0 %v9400_v29, %s6636_s18 }
 0x5b7   : > { %4932 = vrot.lane.b32.xlu1 %v9366_v32, %s6637_s20  ;;  %v9423_v61 = vpop.permute.xlu2 %4972  ;;  %v4871_v2 = vrot.slane %v4600_v23, 1 }
 0x5b8   : > { %v5006_v37 = vpop.permute.xlu0 %5005  ;;  %v5211_v42 = vsel %vm1874_vm5, %v9243_v28, %v9423_v61 }
 0x5b9   : > { %v4919_v33 = vpop.permute.xlu1 %4918  ;;  %v5248_v18 = vsel %vm3250_vm4, %v5205_v63, %v5006_v37 }
 0x5ba   : > { %v5156_v47 = vsel %vm3283_vm0, %v5120_v30, %v4919_v33  ;;  %v4784_v30 = vshll.u32 %v9472_v8, 16  ;;  %v9496_v11 = vpop.f32.mrf.mxu1 }
 0x5bb   : > { %5543 = vmatmul.bf16.gmra.mxu3 %v5156_v47  ;;  %v4789_v47 = vshll.u32 %v4600_v23, 16 }
 0x5bc   : > { %v4786_v33 = vrot.slane %v4784_v30, 1 }
 0x5bd   : > { %6468 = vmatmul.msk.bf16.gmra.mxu1 %vm1874_vm5, %v4866_v24  ;;  %4984 = vrot.lane.b32.xlu2 %v4866_v24, %s6632_s19 }
 0x5be   : > { %4897 = vrot.lane.b32.xlu0 %v4863_v54, %s6636_s18 }
 0x5bf   : > { %5066 = vrot.lane.b32.xlu1 %v9433_v19, %s6637_s20  ;;  %v9446_v5 = vpop.permute.xlu2 %4807 }
 0x5c0   : > { %v4884_v27 = vpop.permute.xlu0 %4883  ;;  %v5094_v61 = vsel %vm1874_vm5, %v9224_v6, %v9446_v5 }
 0x5c1   : > { %v5053_v4 = vpop.permute.xlu1 %5052  ;;  %v5122_v44 = vsel %vm3250_vm4, %v5090_v57, %v4884_v27  ;;  %v4870_v27 = vrot.slane %v9472_v8, 1 }
 0x5c2   : > { %v5284_v15 = vsel %vm3283_vm0, %v5248_v18, %v5053_v4  ;;  %v4787_v18 = vor.u32 %v4786_v33, %v4782_v12  ;;  %v4791_v4 = vrot.slane %v4789_v47, 1  ;;  %v9530_v33 = vld [vmem:[#allocation3 + $0xcc] sm:$0xff] }
 0x5c3   : > { %5632 = vmatmul.bf16.gmra.mxu0 %v5284_v15  ;;  %v4469_v15 = vld [vmem:[#allocation3 + $0xc8] sm:$0x1]  ;;  %v4872_v3 = vsel %vm1324_vm2, %v4870_v27, %v4871_v2  ;;  %v5035_v12 = vshll.u32 %v9530_v33, 16  ;;  %v5033_v27 = vshrl.u32 %v9530_v33, 16 }
 0x5c4   : > { %v9505_v59 = vsel %vm1099_vm3, %v4787_v18, %v4791_v4  ;;  %v4943_v21 = vunpack.c.l.b16 %v4469_v15 }
 0x5c5   : > { %4819 = vrot.lane.b32.xlu2 %v9433_v19, %s6632_s19  ;;  %v5037_v18 = vrot.slane %v5035_v12, 1 }
 0x5c6   : > { %5021 = vrot.lane.b32.xlu0 %v9436_v51, %s6636_s18 }
 0x5c7   : > { %4934 = vrot.lane.b32.xlu1 %v9400_v29, %s6637_s20  ;;  %v9464_v45 = vpop.permute.xlu2 %4974 }
 0x5c8   : > { %v5008_v52 = vpop.permute.xlu0 %5007 }
 0x5c9   : > { %v4921_v50 = vpop.permute.xlu1 %4920  ;;  %v5250_v58 = vsel %vm3250_vm4, %v5208_v43, %v5008_v52  ;;  %v4472_v43 = vld [vmem:[#allocation3 + $0xd4] sm:$0x1] }
 0x5ca   : > { %v5159_v54 = vsel %vm3283_vm0, %v5122_v44, %v4921_v50  ;;  %v4944_v44 = vpack.c.b16 %v4943_v21, %v4943_v21  ;;  %v4948_v50 = vshll.u32 %v6549_v25, 16  ;;  %v5030_v47 = vunpack.c.l.b16 %v4472_v43 }
 0x5cb   : > { %5548 = vmatmul.bf16.gmra.mxu3 %v5159_v54  ;;  %v9517_v54 = vpop.f32.mrf.mxu1 }
 0x5cc   : > { %v4950_v14 = vrot.slane %v4948_v50, 1  ;;  %v4953_v28 = vshll.u32 %v4944_v44, 16  ;;  %v4958_v1 = vrot.slane %v4944_v44, 1  ;;  %v9545_v2 = vpack.c.b16 %v5030_v47, %v5030_v47 }
 0x5cd   : > { %6469 = vmatmul.msk.bf16.gmra.mxu1 %vm1874_vm5, %v4869_v46  ;;  %4986 = vrot.lane.b32.xlu2 %v4869_v46, %s6632_s19 }
 0x5ce   : > { %4899 = vrot.lane.b32.xlu0 %v4866_v24, %s6636_s18  ;;  %v5040_v4 = vshll.u32 %v9545_v2, 16 }
 0x5cf   : > { %5068 = vrot.lane.b32.xlu1 %v9469_v55, %s6637_s20  ;;  %v9488_v31 = vpop.permute.xlu2 %4809 }
 0x5d0   : > { %v4886_v38 = vpop.permute.xlu0 %4885  ;;  %v5042_v21 = vrot.slane %v5040_v4, 1 }
 0x5d1   : > { %v5055_v37 = vpop.permute.xlu1 %5054  ;;  %v5124_v24 = vsel %vm3250_vm4, %v5092_v60, %v4886_v38  ;;  %v5214_v60 = vsel %vm1874_vm5, %v9271_v40, %v9464_v45  ;;  %v5096_v40 = vsel %vm1874_vm5, %v9246_v22, %v9488_v31 }
 0x5d2   : > { %v5287_v41 = vsel %vm3283_vm0, %v5250_v58, %v5055_v37  ;;  %v4957_v58 = vrot.slane %v6549_v25, 1  ;;  %v4951_v37 = vor.u32 %v4950_v14, %v4946_v10 }
 0x5d3   : > { %5637 = vmatmul.bf16.gmra.mxu0 %v5287_v41  ;;  %v4955_v41 = vrot.slane %v4953_v28, 1  ;;  %v9532_v6 = vpop.f32.mrf.mxu1 }
 0x5d4   : > { %v4959_v30 = vsel %vm1324_vm2, %v4957_v58, %v4958_v1 }
 0x5d5   : > { %4821 = vrot.lane.b32.xlu2 %v9469_v55, %s6632_s19  ;;  %v9537_v5 = vsel %vm1099_vm3, %v4951_v37, %v4955_v41 }
 0x5d6   : > { %5023 = vrot.lane.b32.xlu0 %v9472_v8, %s6636_s18 }
 0x5d7   : > { %4936 = vrot.lane.b32.xlu1 %v9436_v51, %s6637_s20  ;;  %v9513_v57 = vpop.permute.xlu2 %4976 }
 0x5d8   : > { %v5010_v39 = vpop.permute.xlu0 %5009  ;;  %v5217_v31 = vsel %vm1874_vm5, %v9295_v9, %v9513_v57 }
 0x5d9   : > { %v4923_v49 = vpop.permute.xlu1 %4922  ;;  %v5252_v52 = vsel %vm3250_vm4, %v5211_v42, %v5010_v39 }
 0x5da   : > { %v5162_v63 = vsel %vm3283_vm0, %v5124_v24, %v4923_v49 }
 0x5db   : > { %5553 = vmatmul.bf16.gmra.mxu3 %v5162_v63  ;;  %v9571_v28 = vpop.f32.mrf.mxu1 }
 0x5dd   : > { %6470 = vmatmul.msk.bf16.gmra.mxu1 %vm1874_vm5, %v4872_v3  ;;  %4988 = vrot.lane.b32.xlu2 %v4872_v3, %s6632_s19 }
 0x5de   : > { %4901 = vrot.lane.b32.xlu0 %v4869_v46, %s6636_s18 }
 0x5df   : > { %5070 = vrot.lane.b32.xlu1 %v9505_v59, %s6637_s20  ;;  %v4812_v23 = vpop.permute.xlu2 %4811 }
 0x5e0   : > { %v4888_v53 = vpop.permute.xlu0 %4887 }
 0x5e1   : > { %v5057_v36 = vpop.permute.xlu1 %5056  ;;  %v5126_v46 = vsel %vm3250_vm4, %v5094_v61, %v4888_v53 }
 0x5e2   : > { %v5290_v62 = vsel %vm3283_vm0, %v5252_v52, %v5057_v36  ;;  %v9563_v36 = vld [vmem:[%s9802_s6] ss:$0 sm:$0xff] }
 0x5e3   : > { %5642 = vmatmul.bf16.gmra.mxu0 %v5290_v62  ;;  %v9579_v41 = vpop.f32.mrf.mxu1 }
 0x5e5   : > { %4823 = vrot.lane.b32.xlu2 %v9505_v59, %s6632_s19 }
 0x5e6   : > { %5025 = vrot.lane.b32.xlu0 %v6549_v25, %s6636_s18 }
 0x5e7   : > { %4938 = vrot.lane.b32.xlu1 %v9472_v8, %s6637_s20  ;;  %v4979_v15 = vpop.permute.xlu2 %4978 }
 0x5e8   : > { %v5012_v48 = vpop.permute.xlu0 %5011 }
 0x5e9   : > { %v4925_v34 = vpop.permute.xlu1 %4924  ;;  %v5254_v24 = vsel %vm3250_vm4, %v5214_v60, %v5012_v48 }
 0x5ea   : > { %v5165_v38 = vsel %vm3283_vm0, %v5126_v46, %v4925_v34  ;;  %v5098_v34 = vsel %vm1874_vm5, %v9274_v20, %v4812_v23  ;;  %v5220_v20 = vsel %vm1874_vm5, %v9329_v0, %v4979_v15  ;;  %v9948_v23 = vld [vmem:[#allocation5_spill] sm:$0xff] }
 0x5eb   : > { %5558 = vmatmul.bf16.gmra.mxu3 %v5165_v38  ;;  %v9949_v15 = vld [vmem:[#allocation9_spill] sm:$0xff] }
 0x5ec   : > { %v5524_v62 = vpop.f32.mrf.mxu3 }
 0x5ed   : > { %6471 = vmatmul.msk.bf16.gmra.mxu1 %vm1874_vm5, %v4959_v30  ;;  %4990 = vrot.lane.b32.xlu2 %v4959_v30, %s6632_s19  ;;  %v5525_v22 = vadd.f32 %v9563_v36, %v5524_v62 }
 0x5ee   : > { %4903 = vrot.lane.b32.xlu0 %v4872_v3, %s6636_s18  ;;  %v5038_v3 = vor.u32 %v5037_v18, %v5033_v27 }
 0x5ef   : > { %5072 = vrot.lane.b32.xlu1 %v9537_v5, %s6637_s20  ;;  %v4814_v44 = vpop.permute.xlu2 %4813 }
 0x5f0   : > { %v4890_v39 = vpop.permute.xlu0 %4889 }
 0x5f1   : > { %v5059_v49 = vpop.permute.xlu1 %5058  ;;  %v5128_v42 = vsel %vm3250_vm4, %v5096_v40, %v4890_v39 }
 0x5f2   : > { %v5293_v63 = vsel %vm3283_vm0, %v5254_v24, %v5059_v49 }
 0x5f3   : > { %5647 = vmatmul.bf16.gmra.mxu0 %v5293_v63 }
 0x5f4   : > { %v5526_v46 = vpop.f32.mrf.mxu3 }
 0x5f5   : > { %v5527_v60 = vadd.f32 %v9563_v36, %v5526_v46 }
 0x5f6   : > { %5027 = vrot.lane.b32.xlu0 %v9530_v33, %s6636_s18 }
 0x5f7   : > { %4940 = vrot.lane.b32.xlu1 %v6549_v25, %s6637_s20  ;;  %v5043_v25 = vsel %vm1099_vm3, %v5038_v3, %v5042_v21  ;;  %v4981_v58 = vpop.permute.xlu2 %4980  ;;  %v9590_v21 = vpop.f32.mrf.mxu1  ;;  %vm9980_vm3 = vcmask 1041408  }
 0x5f8   : > { %v5014_v45 = vpop.permute.xlu0 %5013 }
 0x5f9   : > { %v4927_v53 = vpop.permute.xlu1 %4926  ;;  %v5256_v61 = vsel %vm3250_vm4, %v5217_v31, %v5014_v45 }
 0x5fa   : > { %v5168_v52 = vsel %vm3283_vm0, %v5128_v42, %v4927_v53 }
 0x5fb   : > { %5563 = vmatmul.bf16.gmra.mxu3 %v5168_v52 }
 0x5ff   : > { %5074 = vrot.lane.b32.xlu1 %v5043_v25, %s6637_s20  ;;  %v5100_v25 = vsel %vm1874_vm5, %v9298_v7, %v4814_v44  ;;  %v9951_v44 = vld [vmem:[#allocation10_spill] sm:$0xff] }
 0x600   : > { %v5613_v50 = vpop.f32.mrf.mxu0  ;;  %v4892_v14 = vpop.permute.xlu0 %4891 }
 0x601   : > { %v5614_v48 = vadd.f32 %v5613_v50, %v5525_v22  ;;  %v5061_v1 = vpop.permute.xlu1 %5060  ;;  %v5130_v9 = vsel %vm3250_vm4, %v5098_v34, %v4892_v14 }
 0x602   : > { %v5296_v10 = vsel %vm3283_vm0, %v5256_v61, %v5061_v1 }
 0x603   : > { %5652 = vmatmul.bf16.gmra.mxu0 %v5296_v10  ;;  %v5703_v30 = vadd.f32 %v9427_v16, %v5614_v48  ;;  %v4816_v16 = vpop.permute.xlu2 %4815 }
 0x605   : > { %v5782_v12 = vadd.f32 %v5703_v30, %v9948_v23 }
 0x607   : > { %v5814_v3 = vmax.f32 %v5782_v12, 0.0 }
 0x608   : > { %v5615_v43 = vpop.f32.mrf.mxu0  ;;  %v5016_v38 = vpop.permute.xlu0 %5015 }
 0x609   : > { %v4929_v57 = vpop.permute.xlu1 %4928  ;;  %v5616_v63 = vadd.f32 %v5615_v43, %v5527_v60  ;;  %v5258_v27 = vsel %vm3250_vm4, %v5220_v20, %v5016_v38  ;;  %v5846_v22 = vsel %vm1874_vm5, %v5814_v3, 0.0  ;;  %v5102_v3 = vsel %vm1874_vm5, %v9332_v26, %v4816_v16 }
 0x60a   : > { %v5171_v37 = vsel %vm3283_vm0, %v5130_v9, %v4929_v57  ;;  %v9604_v57 = vpop.f32.mrf.mxu1 }
 0x60b   : > { %5568 = vmatmul.bf16.gmra.mxu3 %v5171_v37  ;;  %v5705_v0 = vadd.f32 %v9448_v17, %v5616_v63  ;;  %v4983_v43 = vpop.permute.xlu2 %4982 }
 0x60e   : > { %v5529_v47 = vpop.f32.mrf.mxu3 }
 0x60f   : > { %v5530_v39 = vadd.f32 %v9563_v36, %v5529_v47  ;;  %v5223_v47 = vsel %vm1874_vm5, %v9363_v13, %v4981_v58 }
 0x610   : > { %v5618_v24 = vpop.f32.mrf.mxu0  ;;  %v4894_v49 = vpop.permute.xlu0 %4893 }
 0x611   : > { %v5619_v18 = vadd.f32 %v5618_v24, %v5530_v39  ;;  %v5063_v4 = vpop.permute.xlu1 %5062  ;;  %v5132_v48 = vsel %vm3250_vm4, %v5100_v25, %v4894_v49 }
 0x612   : > { %v5299_v40 = vsel %vm3283_vm0, %v5258_v27, %v5063_v4 }
 0x613   : > { %v5708_v45 = vadd.f32 %v9474_v35, %v5619_v18  ;;  %5657 = vmatmul.bf16.gmra.mxu0 %v5299_v40  ;;  %v9950_v35 = vld [vmem:[#allocation7_spill] sm:$0xff]  ;;  %v4818_v13 = vpop.permute.xlu2 %4817 }
 0x614   : > { %v5783_v14 = vadd.f32 %v5705_v0, %v9950_v35  ;;  %v9952_v18 = vld [vmem:[#allocation11_spill] sm:$0xff] }
 0x615   : > { %v5784_v42 = vadd.f32 %v5708_v45, %v9949_v15 }
 0x616   : > { %v5531_v53 = vpop.f32.mrf.mxu3  ;;  %v5815_v7 = vmax.f32 %v5783_v14, 0.0 }
 0x617   : > { %v5816_v52 = vmax.f32 %v5784_v42, 0.0  ;;  %v5532_v62 = vadd.f32 %v9563_v36, %v5531_v53  ;;  %v9618_v42 = vpop.f32.mrf.mxu1 }
 0x618   : > { %v5620_v31 = vpop.f32.mrf.mxu0  ;;  %v5018_v50 = vpop.permute.xlu0 %5017  ;;  %v5868_v20 = vsel %vm1874_vm5, %v5815_v7, 0.0 }
 0x619   : > { %v5847_v61 = vsel %vm1874_vm5, %v5816_v52, 0.0  ;;  %v5621_v17 = vadd.f32 %v5620_v31, %v5532_v62  ;;  %v4931_v1 = vpop.permute.xlu1 %4930  ;;  %v5260_v23 = vsel %vm3250_vm4, %v5223_v47, %v5018_v50  ;;  %v9953_v50 = vld [vmem:[#allocation12_spill] sm:$0xff] }
 0x61a   : > { %v5848_v10 = vadd.f32 %v5847_v61, %v5846_v22  ;;  %v5174_v46 = vsel %vm3283_vm0, %v5132_v48, %v4931_v1  ;;  %v5226_v61 = vsel %vm1874_vm5, %v9397_v56, %v4983_v43 }
 0x61b   : > { %v5710_v34 = vadd.f32 %v9496_v11, %v5621_v17  ;;  %5573 = vmatmul.bf16.gmra.mxu3 %v5174_v46  ;;  %v4985_v1 = vpop.permute.xlu2 %4984 }
 0x61d   : > { %v5785_v38 = vadd.f32 %v5710_v34, %v9951_v44 }
 0x61e   : > { %v5534_v9 = vpop.f32.mrf.mxu3 }
 0x61f   : > { %v5817_v37 = vmax.f32 %v5785_v38, 0.0  ;;  %v5535_v30 = vadd.f32 %v9563_v36, %v5534_v9  ;;  %v9631_v38 = vpop.f32.mrf.mxu1 }
 0x620   : > { %v5623_v60 = vpop.f32.mrf.mxu0  ;;  %v4896_v39 = vpop.permute.xlu0 %4895 }
 0x621   : > { %v5869_v11 = vsel %vm1874_vm5, %v5817_v37, 0.0  ;;  %v5624_v12 = vadd.f32 %v5623_v60, %v5535_v30  ;;  %v5065_v24 = vpop.permute.xlu1 %5064  ;;  %v5134_v52 = vsel %vm3250_vm4, %v5102_v3, %v4896_v39  ;;  %v9954_v37 = vld [vmem:[#allocation13_spill] sm:$0xff]  ;;  %v5104_v60 = vsel %vm1874_vm5, %v9366_v32, %v4818_v13 }
 0x622   : > { %v5870_v49 = vadd.f32 %v5869_v11, %v5868_v20  ;;  %v5302_v63 = vsel %vm3283_vm0, %v5260_v23, %v5065_v24 }
 0x623   : > { %v5713_v27 = vadd.f32 %v9517_v54, %v5624_v12  ;;  %5662 = vmatmul.bf16.gmra.mxu0 %v5302_v63  ;;  %v4820_v63 = vpop.permute.xlu2 %4819 }
 0x625   : > { %v5786_v4 = vadd.f32 %v5713_v27, %v9952_v18 }
 0x626   : > { %v5536_v40 = vpop.f32.mrf.mxu3 }
 0x627   : > { %v5818_v58 = vmax.f32 %v5786_v4, 0.0  ;;  %v5537_v45 = vadd.f32 %v9563_v36, %v5536_v40  ;;  %v9642_v18 = vpop.f32.mrf.mxu1  ;;  %v9955_v4 = vld [vmem:[#allocation14_spill] sm:$0xff] }
 0x628   : > { %v5625_v0 = vpop.f32.mrf.mxu0  ;;  %v5020_v15 = vpop.permute.xlu0 %5019 }
 0x629   : > { %v5849_v53 = vsel %vm1874_vm5, %v5818_v58, 0.0  ;;  %v5626_v54 = vadd.f32 %v5625_v0, %v5537_v45  ;;  %v4933_v62 = vpop.permute.xlu1 %4932  ;;  %v5229_v45 = vsel %vm1874_vm5, %v9433_v19, %v4985_v1 }
 0x62a   : > { %v5850_v25 = vadd.f32 %v5849_v53, %v5848_v10  ;;  %v5177_v22 = vsel %vm3283_vm0, %v5134_v52, %v4933_v62  ;;  %v5262_v10 = vsel %vm3250_vm4, %v5226_v61, %v5020_v15 }
 0x62b   : > { %v5715_v31 = vadd.f32 %v9532_v6, %v5626_v54  ;;  %5578 = vmatmul.bf16.gmra.mxu3 %v5177_v22  ;;  %v4987_v22 = vpop.permute.xlu2 %4986 }
 0x62d   : > { %v5787_v35 = vadd.f32 %v5715_v31, %v9953_v50  ;;  %v9956_v31 = vld [vmem:[#allocation15_spill] sm:$0xff] }
 0x62e   : > { %v5539_v14 = vpop.f32.mrf.mxu3 }
 0x62f   : > { %v5819_v26 = vmax.f32 %v5787_v35, 0.0  ;;  %v5540_v16 = vadd.f32 %v9563_v36, %v5539_v14  ;;  %v9653_v14 = vpop.f32.mrf.mxu1 }
 0x630   : > { %v5628_v48 = vpop.f32.mrf.mxu0  ;;  %v4898_v17 = vpop.permute.xlu0 %4897 }
 0x631   : > { %v5871_v46 = vsel %vm1874_vm5, %v5819_v26, 0.0  ;;  %v5629_v34 = vadd.f32 %v5628_v48, %v5540_v16  ;;  %v5067_v7 = vpop.permute.xlu1 %5066  ;;  %v5136_v23 = vsel %vm3250_vm4, %v5104_v60, %v4898_v17  ;;  %v5106_v16 = vsel %vm1874_vm5, %v9400_v29, %v4820_v63  ;;  %v9958_v63 = vld [vmem:[#allocation17_spill] sm:$0xff] }
 0x632   : > { %v5872_v6 = vadd.f32 %v5871_v46, %v5870_v49  ;;  %v5305_v44 = vsel %vm3283_vm0, %v5262_v10, %v5067_v7 }
 0x633   : > { %v5718_v9 = vadd.f32 %v9571_v28, %v5629_v34  ;;  %5667 = vmatmul.bf16.gmra.mxu0 %v5305_v44 }
 0x635   : > { %v5788_v30 = vadd.f32 %v5718_v9, %v9954_v37  ;;  %v4822_v37 = vpop.permute.xlu2 %4821 }
 0x636   : > { %v5541_v56 = vpop.f32.mrf.mxu3 }
 0x637   : > { %v5820_v43 = vmax.f32 %v5788_v30, 0.0  ;;  %v5542_v47 = vadd.f32 %v9563_v36, %v5541_v56  ;;  %v5232_v56 = vsel %vm1874_vm5, %v9469_v55, %v4987_v22 }
 0x638   : > { %v5630_v39 = vpop.f32.mrf.mxu0  ;;  %v5022_v20 = vpop.permute.xlu0 %5021 }
 0x639   : > { %v5851_v11 = vsel %vm1874_vm5, %v5820_v43, 0.0  ;;  %v5631_v12 = vadd.f32 %v5630_v39, %v5542_v47  ;;  %v4935_v24 = vpop.permute.xlu1 %4934  ;;  %v5264_v53 = vsel %vm3250_vm4, %v5229_v45, %v5022_v20 }
 0x63a   : > { %v5852_v49 = vadd.f32 %v5851_v11, %v5850_v25  ;;  %v5180_v28 = vsel %vm3283_vm0, %v5136_v23, %v4935_v24  ;;  %v5076_v24 = vrot.slane %v9530_v33, 1 }
 0x63b   : > { %v5720_v27 = vadd.f32 %v9579_v41, %v5631_v12  ;;  %5583 = vmatmul.bf16.gmra.mxu3 %v5180_v28 }
 0x63d   : > { %v5789_v40 = vadd.f32 %v5720_v27, %v9955_v4  ;;  %v4989_v33 = vpop.permute.xlu2 %4988 }
 0x63e   : > { %v5544_v32 = vpop.f32.mrf.mxu3 }
 0x63f   : > { %v5821_v13 = vmax.f32 %v5789_v40, 0.0  ;;  %v5545_v58 = vadd.f32 %v9563_v36, %v5544_v32 }
 0x640   : > { %v5633_v3 = vpop.f32.mrf.mxu0  ;;  %v4900_v0 = vpop.permute.xlu0 %4899 }
 0x641   : > { %v5873_v15 = vsel %vm1874_vm5, %v5821_v13, 0.0  ;;  %v5634_v52 = vadd.f32 %v5633_v3, %v5545_v58  ;;  %v5069_v41 = vpop.permute.xlu1 %5068  ;;  %v5138_v1 = vsel %vm3250_vm4, %v5106_v16, %v4900_v0  ;;  %v5108_v13 = vsel %vm1874_vm5, %v9436_v51, %v4822_v37 }
 0x642   : > { %v5874_v54 = vadd.f32 %v5873_v15, %v5872_v6  ;;  %v5308_v62 = vsel %vm3283_vm0, %v5264_v53, %v5069_v41  ;;  %v9957_v6 = vld [vmem:[#allocation16_spill] sm:$0xff] }
 0x643   : > { %v5723_v25 = vadd.f32 %v9590_v21, %v5634_v52  ;;  %5672 = vmatmul.bf16.gmra.mxu0 %v5308_v62 }
 0x645   : > { %v5790_v50 = vadd.f32 %v5723_v25, %v9956_v31  ;;  %v5235_v31 = vsel %vm1874_vm5, %v9505_v59, %v4989_v33 }
 0x646   : > { %v5546_v35 = vpop.f32.mrf.mxu3 }
 0x647   : > { %v5822_v19 = vmax.f32 %v5790_v50, 0.0  ;;  %v5547_v26 = vadd.f32 %v9563_v36, %v5546_v35 }
 0x648   : > { %v5635_v61 = vpop.f32.mrf.mxu0  ;;  %v5024_v48 = vpop.permute.xlu0 %5023 }
 0x649   : > { %v5853_v17 = vsel %vm1874_vm5, %v5822_v19, 0.0  ;;  %v5636_v21 = vadd.f32 %v5635_v61, %v5547_v26  ;;  %v4937_v46 = vpop.permute.xlu1 %4936  ;;  %v5266_v39 = vsel %vm3250_vm4, %v5232_v56, %v5024_v48  ;;  %v4824_v48 = vpop.permute.xlu2 %4823 }
 0x64a   : > { %v5854_v10 = vadd.f32 %v5853_v17, %v5852_v49  ;;  %v5183_v34 = vsel %vm3283_vm0, %v5138_v1, %v4937_v46  ;;  %v5077_v49 = vrot.slane %v9545_v2, 1 }
 0x64b   : > { %v5725_v7 = vadd.f32 %v9604_v57, %v5636_v21  ;;  %5588 = vmatmul.bf16.gmra.mxu3 %v5183_v34  ;;  %v9668_v57 = vpop.f32.mrf.mxu1  ;;  %v9960_v21 = vld [vmem:[#allocation19_spill] sm:$0xff] }
 0x64c   : > { %v5078_v55 = vsel %vm1324_vm2, %v5076_v24, %v5077_v49  ;;  %vm5934_vm2 = vcmask 1040384  }
 0x64d   : > { %v5791_v44 = vadd.f32 %v5725_v7, %v9957_v6  ;;  %6472 = vmatmul.msk.bf16.gmra.mxu1 %vm1874_vm5, %v5078_v55  ;;  %v5110_v6 = vsel %vm1874_vm5, %v9472_v8, %v4824_v48 }
 0x64e   : > { %v5549_v9 = vpop.f32.mrf.mxu3 }
 0x64f   : > { %v5823_v30 = vmax.f32 %v5791_v44, 0.0  ;;  %v5550_v29 = vadd.f32 %v9563_v36, %v5549_v9 }
 0x650   : > { %v5638_v43 = vpop.f32.mrf.mxu0  ;;  %v4902_v47 = vpop.permute.xlu0 %4901 }
 0x651   : > { %v5875_v60 = vsel %vm1874_vm5, %v5823_v30, 0.0  ;;  %v5639_v20 = vadd.f32 %v5638_v43, %v5550_v29  ;;  %v5071_v11 = vpop.permute.xlu1 %5070 }
 0x652   : > { %v5876_v23 = vadd.f32 %v5875_v60, %v5874_v54  ;;  %v5311_v12 = vsel %vm3283_vm0, %v5266_v39, %v5071_v11  ;;  %v9959_v54 = vld [vmem:[#allocation18_spill] sm:$0xff]  ;;  %v9961_v60 = vld [vmem:[#allocation20_spill] sm:$0xff] }
 0x653   : > { %v5728_v28 = vadd.f32 %v9618_v42, %v5639_v20  ;;  %5677 = vmatmul.bf16.gmra.mxu0 %v5311_v12  ;;  %v5140_v42 = vsel %vm3250_vm4, %v5108_v13, %v4902_v47  ;;  %v5739_v41 = vpop.f32.mrf.mxu1  ;;  %v4991_v47 = vpop.permute.xlu2 %4990 }
 0x654   : > { %v5238_v24 = vsel %vm1874_vm5, %v9537_v5, %v4991_v47 }
 0x655   : > { %v5792_v27 = vadd.f32 %v5728_v28, %v9958_v63 }
 0x656   : > { %v5551_v4 = vpop.f32.mrf.mxu3 }
 0x657   : > { %v5824_v40 = vmax.f32 %v5792_v27, 0.0  ;;  %v5552_v32 = vadd.f32 %v9563_v36, %v5551_v4 }
 0x658   : > { %v5640_v58 = vpop.f32.mrf.mxu0  ;;  %v5026_v15 = vpop.permute.xlu0 %5025 }
 0x659   : > { %v5855_v2 = vsel %vm1874_vm5, %v5824_v40, 0.0  ;;  %v5641_v45 = vadd.f32 %v5640_v58, %v5552_v32  ;;  %v4939_v3 = vpop.permute.xlu1 %4938  ;;  %v5268_v19 = vsel %vm3250_vm4, %v5235_v31, %v5026_v15  ;;  %v9962_v32 = vld [vmem:[#allocation21_spill] sm:$0xff] }
 0x65a   : > { %v5856_v0 = vadd.f32 %v5855_v2, %v5854_v10  ;;  %v5186_v53 = vsel %vm3283_vm0, %v5140_v42, %v4939_v3 }
 0x65b   : > { %v5730_v52 = vadd.f32 %v9631_v38, %v5641_v45  ;;  %5593 = vmatmul.bf16.gmra.mxu3 %v5186_v53  ;;  %v5742_v10 = vpop.f32.mrf.mxu1  ;;  %v9963_v53 = vld [vmem:[#allocation22_spill] sm:$0xff] }
 0x65d   : > { %v5793_v62 = vadd.f32 %v5730_v52, %v9959_v54 }
 0x65e   : > { %v5554_v25 = vpop.f32.mrf.mxu3 }
 0x65f   : > { %v5825_v51 = vmax.f32 %v5793_v62, 0.0  ;;  %v5555_v22 = vadd.f32 %v9563_v36, %v5554_v25 }
 0x660   : > { %v5643_v50 = vpop.f32.mrf.mxu0  ;;  %v4904_v1 = vpop.permute.xlu0 %4903 }
 0x661   : > { %v5877_v35 = vsel %vm1874_vm5, %v5825_v51, 0.0  ;;  %v5644_v26 = vadd.f32 %v5643_v50, %v5555_v22  ;;  %v5073_v16 = vpop.permute.xlu1 %5072  ;;  %v5142_v37 = vsel %vm3250_vm4, %v5110_v6, %v4904_v1  ;;  %v9964_v1 = vld [vmem:[#allocation23_spill] sm:$0xff]  ;;  %v9965_v6 = vld [vmem:[#allocation25_spill] sm:$0xff] }
 0x662   : > { %v5878_v61 = vadd.f32 %v5877_v35, %v5876_v23  ;;  %v5314_v38 = vsel %vm3283_vm0, %v5268_v19, %v5073_v16 }
 0x663   : > { %v5733_v17 = vadd.f32 %v9642_v18, %v5644_v26  ;;  %5682 = vmatmul.bf16.gmra.mxu0 %v5314_v38  ;;  %v5744_v12 = vpop.f32.mrf.mxu1 }
 0x665   : > { %v5794_v46 = vadd.f32 %v5733_v17, %v9960_v21 }
 0x666   : > { %v5556_v34 = vpop.f32.mrf.mxu3 }
 0x667   : > { %v5826_v59 = vmax.f32 %v5794_v46, 0.0  ;;  %v5557_v7 = vadd.f32 %v9563_v36, %v5556_v34 }
 0x668   : > { %v5645_v44 = vpop.f32.mrf.mxu0  ;;  %v5028_v20 = vpop.permute.xlu0 %5027 }
 0x669   : > { %v5857_v9 = vsel %vm1874_vm5, %v5826_v59, 0.0  ;;  %v5646_v30 = vadd.f32 %v5645_v44, %v5557_v7  ;;  %v4941_v29 = vpop.permute.xlu1 %4940  ;;  %v5270_v55 = vsel %vm3250_vm4, %v5238_v24, %v5028_v20  ;;  %vm5975_vm4 = vcmask 1043456  }
 0x66a   : > { %v5858_v18 = vadd.f32 %v5857_v9, %v5856_v0  ;;  %v5189_v56 = vsel %vm3283_vm0, %v5142_v37, %v4941_v29 }
 0x66b   : > { %v5735_v43 = vadd.f32 %v9653_v14, %v5646_v30  ;;  %5598 = vmatmul.bf16.gmra.mxu3 %v5189_v56  ;;  %v5747_v3 = vpop.f32.mrf.mxu1  ;;  %v9966_v56 = vld [vmem:[#allocation24_spill] sm:$0xff] }
 0x66d   : > { %v5795_v39 = vadd.f32 %v5735_v43, %v9961_v60 }
 0x66e   : > { %v5559_v11 = vpop.f32.mrf.mxu3 }
 0x66f   : > { %v5827_v23 = vmax.f32 %v5795_v39, 0.0  ;;  %v5560_v8 = vadd.f32 %v9563_v36, %v5559_v11 }
 0x670   : > { %v5648_v49 = vpop.f32.mrf.mxu0 }
 0x671   : > { %v5879_v28 = vsel %vm1874_vm5, %v5827_v23, 0.0  ;;  %v5649_v63 = vadd.f32 %v5648_v49, %v5560_v8  ;;  %v5075_v14 = vpop.permute.xlu1 %5074  ;;  %v9967_v8 = vld [vmem:[#allocation26_spill] sm:$0xff] }
 0x672   : > { %v5880_v27 = vadd.f32 %v5879_v28, %v5878_v61  ;;  %v5317_v4 = vsel %vm3283_vm0, %v5270_v55, %v5075_v14 }
 0x673   : > { %v5738_v40 = vadd.f32 %v9668_v57, %v5649_v63  ;;  %5687 = vmatmul.bf16.gmra.mxu0 %v5317_v4  ;;  %v5749_v50 = vpop.f32.mrf.mxu1 }
 0x675   : > { %v5796_v13 = vadd.f32 %v5738_v40, %v9962_v32 }
 0x676   : > { %v5561_v58 = vpop.f32.mrf.mxu3 }
 0x677   : > { %v5828_v33 = vmax.f32 %v5796_v13, 0.0  ;;  %v5562_v2 = vadd.f32 %v9563_v36, %v5561_v58 }
 0x678   : > { %v5650_v5 = vpop.f32.mrf.mxu0 }
 0x679   : > { %v5859_v42 = vsel %vm1874_vm5, %v5828_v33, 0.0  ;;  %v5651_v45 = vadd.f32 %v5650_v5, %v5562_v2  ;;  %v9968_v5 = vld [vmem:[#allocation27_spill] sm:$0xff] }
 0x67a   : > { %v5860_v0 = vadd.f32 %v5859_v42, %v5858_v18 }
 0x67b   : > { %v5740_v15 = vadd.f32 %v5739_v41, %v5651_v45  ;;  %v5752_v38 = vpop.f32.mrf.mxu1 }
 0x67c   : > { %v5861_v24 = vrot.slane %v5860_v0, 4 }
 0x67d   : > { %v5797_v52 = vadd.f32 %v5740_v15, %v9963_v53 }
 0x67e   : > { %v5564_v54 = vpop.f32.mrf.mxu3  ;;  %v5862_v13 = vadd.f32 %v5861_v24, %v5860_v0 }
 0x67f   : > { %v5829_v62 = vmax.f32 %v5797_v52, 0.0  ;;  %v5565_v57 = vadd.f32 %v9563_v36, %v5564_v54 }
 0x680   : > { %v5653_v25 = vpop.f32.mrf.mxu0  ;;  %v5863_v45 = vrot.slane %v5862_v13, 2 }
 0x681   : > { %v5881_v51 = vsel %vm1874_vm5, %v5829_v62, 0.0  ;;  %v5654_v22 = vadd.f32 %v5653_v25, %v5565_v57 }
 0x682   : > { %v5882_v31 = vadd.f32 %v5881_v51, %v5880_v27  ;;  %v5864_v25 = vadd.f32 %v5863_v45, %v5862_v13 }
 0x683   : > { %v5743_v61 = vadd.f32 %v5742_v10, %v5654_v22  ;;  %v5754_v29 = vpop.f32.mrf.mxu1 }
 0x684   : > { %v5883_v11 = vrot.slane %v5882_v31, 4 }
 0x685   : > { %v5798_v21 = vadd.f32 %v5743_v61, %v9964_v1 }
 0x686   : > { %v5566_v35 = vpop.f32.mrf.mxu3  ;;  %v5884_v63 = vadd.f32 %v5883_v11, %v5882_v31 }
 0x687   : > { %v5567_v19 = vadd.f32 %v9563_v36, %v5566_v35  ;;  %v5830_v59 = vmax.f32 %v5798_v21, 0.0 }
 0x688   : > { %v5655_v26 = vpop.f32.mrf.mxu0  ;;  %v5885_v2 = vrot.slane %v5884_v63, 2 }
 0x689   : > { %v5656_v16 = vadd.f32 %v5655_v26, %v5567_v19  ;;  %v5890_v10 = vsel %vm1874_vm5, %v5830_v59, 0.0  ;;  %v5865_v19 = vrot.slane %v5864_v25, 1 }
 0x68a   : > { %v5886_v52 = vadd.f32 %v5885_v2, %v5884_v63 }
 0x68b   : > { %v5745_v7 = vadd.f32 %v5744_v12, %v5656_v16  ;;  %v5757_v32 = vpop.f32.mrf.mxu1 }
 0x68c   : > { %v5887_v31 = vrot.slane %v5886_v52, 1 }
 0x68d   : > { %v5799_v43 = vadd.f32 %v5745_v7, %v9966_v56 }
 0x68e   : > { %v5569_v41 = vpop.f32.mrf.mxu3  ;;  %v5888_v61 = vadd.f32 %v5887_v31, %v5886_v52 }
 0x68f   : > { %v5570_v48 = vadd.f32 %v9563_v36, %v5569_v41  ;;  %v5831_v23 = vmax.f32 %v5799_v43, 0.0  ;;  %v5941_v43 = vld [vmem:[%s9803_s7 + $0x10] sm:$0xff] }
 0x690   : > { %v5658_v17 = vpop.f32.mrf.mxu0  ;;  %v5889_v1 = vmul.f32 0.015625, %v5888_v61  ;;  %v9973_v61 = vld [vmem:[#allocation35_spill] sm:$0xff] }
 0x691   : > { %v5659_v46 = vadd.f32 %v5658_v17, %v5570_v48  ;;  %v5912_v27 = vsel %vm1874_vm5, %v5831_v23, 0.0  ;;  %v5866_v48 = vadd.f32 %v5865_v19, %v5864_v25  ;;  %v5940_v19 = vld [vmem:[%s9803_s7 + $0x8] sm:$0xff] }
 0x693   : > { %v5748_v34 = vadd.f32 %v5747_v3, %v5659_v46  ;;  %v5759_v0 = vpop.f32.mrf.mxu1  ;;  %v5867_v46 = vmul.f32 0.015625, %v5866_v48 }
 0x695   : > { %v5800_v44 = vadd.f32 %v5748_v34, %v9965_v6  ;;  %v9735_v7 = vsel %vm5934_vm2, %v5867_v46, %v5889_v1  ;;  %v9974_v1 = vld [vmem:[#allocation30_spill] sm:$0xff] }
 0x696   : > { %v5571_v9 = vpop.f32.mrf.mxu3 }
 0x697   : > { %v5832_v37 = vmax.f32 %v5800_v44, 0.0  ;;  %v5572_v30 = vadd.f32 %v9563_v36, %v5571_v9 }
 0x698   : > { %v5660_v18 = vpop.f32.mrf.mxu0 }
 0x699   : > { %v5891_v47 = vsel %vm1874_vm5, %v5832_v37, 0.0  ;;  %v5661_v60 = vadd.f32 %v5660_v18, %v5572_v30  ;;  %v5942_v18 = vld [vmem:[%s9803_s7 + $0x18] sm:$0xff] }
 0x69a   : > { %v5892_v39 = vadd.f32 %v5891_v47, %v5890_v10  ;;  %5962 = vmatpush.msra.mxu2 %v5942_v18 }
 0x69b   : > { %v5750_v20 = vadd.f32 %v5749_v50, %v5661_v60  ;;  %v9969_v50 = vld [vmem:[#allocation28_spill] sm:$0xff]  ;;  %v5762_v21 = vpop.f32.mrf.mxu1 }
 0x69c   : > { %5963 = vmatpush.msra.mxu2 %v5941_v43 }
 0x69d   : > { %v5801_v12 = vadd.f32 %v5750_v20, %v9967_v8 }
 0x69e   : > { %v5574_v49 = vpop.f32.mrf.mxu3  ;;  %5964 = vmatpush.msra.mxu2 %v5940_v19 }
 0x69f   : > { %v5833_v28 = vmax.f32 %v5801_v12, 0.0  ;;  %v5575_v55 = vadd.f32 %v9563_v36, %v5574_v49 }
 0x6a0   : > { %v5663_v14 = vpop.f32.mrf.mxu0 }
 0x6a1   : > { %v5913_v4 = vsel %vm1874_vm5, %v5833_v28, 0.0  ;;  %v5664_v40 = vadd.f32 %v5663_v14, %v5575_v55 }
 0x6a2   : > { %v5914_v58 = vadd.f32 %v5913_v4, %v5912_v27 }
 0x6a3   : > { %v5753_v33 = vadd.f32 %v5752_v38, %v5664_v40  ;;  %v5764_v44 = vpop.f32.mrf.mxu1 }
 0x6a5   : > { %v5802_v42 = vadd.f32 %v5753_v33, %v9968_v5 }
 0x6a6   : > { %v5576_v3 = vpop.f32.mrf.mxu3 }
 0x6a7   : > { %v5834_v15 = vmax.f32 %v5802_v42, 0.0  ;;  %v5577_v53 = vadd.f32 %v9563_v36, %v5576_v3 }
 0x6a8   : > { %v5665_v54 = vpop.f32.mrf.mxu0 }
 0x6a9   : > { %v5893_v62 = vsel %vm1874_vm5, %v5834_v15, 0.0  ;;  %v5666_v57 = vadd.f32 %v5665_v54, %v5577_v53  ;;  %v9971_v15 = vld [vmem:[#allocation31_spill] sm:$0xff] }
 0x6aa   : > { %v9729_v51 = vadd.f32 %v5893_v62, %v5892_v39 }
 0x6ab   : > { %v5755_v22 = vadd.f32 %v5754_v29, %v5666_v57  ;;  %v5767_v29 = vpop.f32.mrf.mxu1 }
 0x6ad   : > { %v5803_v35 = vadd.f32 %v5755_v22, %v9969_v50  ;;  %v9972_v22 = vld [vmem:[#allocation33_spill] sm:$0xff] }
 0x6ae   : > { %v5579_v26 = vpop.f32.mrf.mxu3 }
 0x6af   : > { %v5835_v16 = vmax.f32 %v5803_v35, 0.0  ;;  %v5580_v20 = vadd.f32 %v9563_v36, %v5579_v26  ;;  %v5939_v26 = vld [vmem:[%s9803_s7] sm:$0xff] }
 0x6b0   : > { %v5668_v38 = vpop.f32.mrf.mxu0  ;;  %5965 = vmatpush.msra.mxu2 %v5939_v26 }
 0x6b1   : > { %v5915_v41 = vsel %vm1874_vm5, %v5835_v16, 0.0  ;;  %v5669_v8 = vadd.f32 %v5668_v38, %v5580_v20 }
 0x6b2   : > { %v9733_v17 = vadd.f32 %v5915_v41, %v5914_v58  ;;  %v9970_v58 = vld [vmem:[#allocation29_spill] sm:$0xff] }
 0x6b3   : > { %v5769_v47 = vpop.f32.mrf.mxu1  ;;  %v5758_v63 = vadd.f32 %v5757_v32, %v5669_v8 }
 0x6b5   : > { %v5804_v33 = vadd.f32 %v5758_v63, %v9970_v58 }
 0x6b6   : > { %v5581_v34 = vpop.f32.mrf.mxu3 }
 0x6b7   : > { %v5582_v14 = vadd.f32 %v9563_v36, %v5581_v34  ;;  %v5836_v57 = vmax.f32 %v5804_v33, 0.0 }
 0x6b8   : > { %v5670_v59 = vpop.f32.mrf.mxu0 }
 0x6b9   : > { %v5671_v5 = vadd.f32 %v5670_v59, %v5582_v14  ;;  %v5895_v48 = vsel %vm1874_vm5, %v5836_v57, 0.0 }
 0x6bb   : > { %v5772_v23 = vpop.f32.mrf.mxu1  ;;  %v5760_v25 = vadd.f32 %v5759_v0, %v5671_v5 }
 0x6be   : > { %v5584_v6 = vpop.f32.mrf.mxu3 }
 0x6bf   : > { %v5585_v11 = vadd.f32 %v9563_v36, %v5584_v6 }
 0x6c0   : > { %v5673_v9 = vpop.f32.mrf.mxu0 }
 0x6c1   : > { %v5674_v49 = vadd.f32 %v5673_v9, %v5585_v11 }
 0x6c3   : > { %v5763_v4 = vadd.f32 %v5762_v21, %v5674_v49  ;;  %v5774_v3 = vpop.f32.mrf.mxu1  ;;  %v5805_v21 = vadd.f32 %v5760_v25, %v9974_v1  ;;  %v9978_v49 = vld [vmem:[#allocation37_spill] sm:$0xff] }
 0x6c5   : > { %v5806_v53 = vadd.f32 %v5763_v4, %v9971_v15  ;;  %v5837_v43 = vmax.f32 %v5805_v21, 0.0 }
 0x6c6   : > { %v5586_v37 = vpop.f32.mrf.mxu3 }
 0x6c7   : > { %v5587_v40 = vadd.f32 %v9563_v36, %v5586_v37  ;;  %v5838_v35 = vmax.f32 %v5806_v53, 0.0  ;;  %v5917_v14 = vsel %vm1874_vm5, %v5837_v43, 0.0 }
 0x6c8   : > { %v5675_v30 = vpop.f32.mrf.mxu0 }
 0x6c9   : > { %v5676_v54 = vadd.f32 %v5675_v30, %v5587_v40  ;;  %v5897_v6 = vsel %vm1874_vm5, %v5838_v35, 0.0  ;;  %v9975_v30 = vld [vmem:[#allocation32_spill] sm:$0xff] }
 0x6cb   : > { %v5765_v16 = vadd.f32 %v5764_v44, %v5676_v54  ;;  %v5777_v9 = vpop.f32.mrf.mxu1 }
 0x6cd   : > { %v5807_v44 = vadd.f32 %v5765_v16, %v9975_v30 }
 0x6ce   : > { %v5589_v10 = vpop.f32.mrf.mxu3 }
 0x6cf   : > { %v5590_v24 = vadd.f32 %v9563_v36, %v5589_v10 }
 0x6d0   : > { %v5678_v56 = vpop.f32.mrf.mxu0 }
 0x6d1   : > { %v5679_v27 = vadd.f32 %v5678_v56, %v5590_v24  ;;  %v5896_v56 = vadd.f32 %v5895_v48, %v9729_v51 }
 0x6d3   : > { %v5768_v42 = vadd.f32 %v5767_v29, %v5679_v27  ;;  %v5898_v11 = vadd.f32 %v5897_v6, %v5896_v56  ;;  %v6604_v6 = vld [vmem:[%s9804_s8] ss:$0 sm:$0xff] }
 0x6d5   : > { %v5808_v31 = vadd.f32 %v5768_v42, %v9972_v22  ;;  %v5918_v42 = vadd.f32 %v5917_v14, %v9733_v17 }
 0x6d6   : > { %v5591_v60 = vpop.f32.mrf.mxu3 }
 0x6d7   : > { %v5592_v45 = vadd.f32 %v9563_v36, %v5591_v60  ;;  %v5840_v46 = vmax.f32 %v5808_v31, 0.0 }
 0x6d8   : > { %v5680_v39 = vpop.f32.mrf.mxu0 }
 0x6d9   : > { %v5681_v50 = vadd.f32 %v5680_v39, %v5592_v45  ;;  %v5899_v60 = vsel %vm1874_vm5, %v5840_v46, 0.0  ;;  %v9976_v39 = vld [vmem:[#allocation34_spill] sm:$0xff] }
 0x6db   : > { %v5770_v34 = vadd.f32 %v5769_v47, %v5681_v50 }
 0x6dd   : > { %v5809_v20 = vadd.f32 %v5770_v34, %v9976_v39 }
 0x6de   : > { %v5594_v12 = vpop.f32.mrf.mxu3 }
 0x6df   : > { %v5595_v55 = vadd.f32 %v9563_v36, %v5594_v12  ;;  %v9977_v12 = vld [vmem:[#allocation36_spill] sm:$0xff]  ;;  %v5841_v27 = vmax.f32 %v5809_v20, 0.0 }
 0x6e0   : > { %v5683_v28 = vpop.f32.mrf.mxu0 }
 0x6e1   : > { %v5684_v13 = vadd.f32 %v5683_v28, %v5595_v55  ;;  %v5900_v55 = vadd.f32 %v5899_v60, %v5898_v11  ;;  %v5921_v15 = vsel %vm1874_vm5, %v5841_v27, 0.0 }
 0x6e3   : > { %v5773_v32 = vadd.f32 %v5772_v23, %v5684_v13  ;;  %v5839_v23 = vmax.f32 %v5807_v44, 0.0 }
 0x6e5   : > { %v5810_v38 = vadd.f32 %v5773_v32, %v9973_v61  ;;  %v5919_v58 = vsel %vm1874_vm5, %v5839_v23, 0.0 }
 0x6e6   : > { %v5596_v2 = vpop.f32.mrf.mxu3 }
 0x6e7   : > { %v5597_v62 = vadd.f32 %v9563_v36, %v5596_v2  ;;  %v5842_v29 = vmax.f32 %v5810_v38, 0.0 }
 0x6e8   : > { %v5685_v52 = vpop.f32.mrf.mxu0 }
 0x6e9   : > { %v5686_v41 = vadd.f32 %v5685_v52, %v5597_v62  ;;  %v5901_v8 = vsel %vm1874_vm5, %v5842_v29, 0.0  ;;  %v5920_v52 = vadd.f32 %v5919_v58, %v5918_v42 }
 0x6ea   : > { %v5902_v40 = vadd.f32 %v5901_v8, %v5900_v55 }
 0x6eb   : > { %v5775_v18 = vadd.f32 %v5774_v3, %v5686_v41  ;;  %v5779_v3 = vpop.f32.mrf.mxu1  ;;  %v5922_v57 = vadd.f32 %v5921_v15, %v5920_v52 }
 0x6ed   : > { %v5811_v24 = vadd.f32 %v5775_v18, %v9977_v12 }
 0x6ee   : > { %v5599_v0 = vpop.f32.mrf.mxu3 }
 0x6ef   : > { %v5600_v59 = vadd.f32 %v9563_v36, %v5599_v0  ;;  %v5843_v33 = vmax.f32 %v5811_v24, 0.0 }
 0x6f0   : > { %v5688_v37 = vpop.f32.mrf.mxu0 }
 0x6f1   : > { %v5689_v10 = vadd.f32 %v5688_v37, %v5600_v59  ;;  %v5923_v32 = vsel %vm1874_vm5, %v5843_v33, 0.0 }
 0x6f2   : > { %v5924_v31 = vadd.f32 %v5923_v32, %v5922_v57 }
 0x6f3   : > { %v5778_v47 = vadd.f32 %v5777_v9, %v5689_v10 }
 0x6f5   : > { %v5812_v28 = vadd.f32 %v5778_v47, %v9978_v49 }
 0x6f6   : > { %v5601_v63 = vpop.f32.mrf.mxu3 }
 0x6f7   : > { %v5844_v51 = vmax.f32 %v5812_v28, 0.0  ;;  %v5602_v4 = vadd.f32 %v9563_v36, %v5601_v63  ;;  %v9979_v36 = vld [vmem:[#allocation38_spill] sm:$0xff] }
 0x6f8   : > { %v5690_v13 = vpop.f32.mrf.mxu0 }
 0x6f9   : > { %v5903_v2 = vsel %vm1874_vm5, %v5844_v51, 0.0  ;;  %v5691_v5 = vadd.f32 %v5690_v13, %v5602_v4 }
 0x6fa   : > { %v5904_v45 = vadd.f32 %v5903_v2, %v5902_v40 }
 0x6fb   : > { %v5780_v53 = vadd.f32 %v5779_v3, %v5691_v5 }
 0x6fc   : > { %v5905_v54 = vrot.slane %v5904_v45, 4 }
 0x6fd   : > { %v5813_v62 = vadd.f32 %v5780_v53, %v9979_v36 }
 0x6fe   : > { %v5906_v25 = vadd.f32 %v5905_v54, %v5904_v45 }
 0x6ff   : > { %v5845_v22 = vmax.f32 %v5813_v62, 0.0 }
 0x700   : > { %v5907_v50 = vrot.slane %v5906_v25, 2 }
 0x701   : > { %v5925_v35 = vsel %vm1874_vm5, %v5845_v22, 0.0 }
 0x702   : > { %v5908_v19 = vadd.f32 %v5907_v50, %v5906_v25  ;;  %v5926_v17 = vadd.f32 %v5925_v35, %v5924_v31 }
 0x704   : > { %v5909_v26 = vrot.slane %v5908_v19, 1  ;;  %v5927_v16 = vrot.slane %v5926_v17, 4 }
 0x706   : > { %v5910_v61 = vadd.f32 %v5909_v26, %v5908_v19  ;;  %v5928_v38 = vadd.f32 %v5927_v16, %v5926_v17 }
 0x708   : > { %v5911_v41 = vmul.f32 0.015625, %v5910_v61  ;;  %v5929_v48 = vrot.slane %v5928_v38, 2 }
 0x70a   : > { %v5930_v0 = vadd.f32 %v5929_v48, %v5928_v38  ;;  %v5936_v1 = vsel %vm9980_vm3, %v9735_v7, %v5911_v41 }
 0x70c   : > { %v5931_v21 = vrot.slane %v5930_v0, 1 }
 0x70e   : > { %v5932_v46 = vadd.f32 %v5931_v21, %v5930_v0 }
 0x710   : > { %v5933_v34 = vmul.f32 0.015625, %v5932_v46 }
 0x712   : > { %v5938_v59 = vsel %vm5937_vm8, %v5936_v1, %v5933_v34 }
 0x713   : > { %6473 = vmatmul.msk.f32.vlgmr.msra.gmra.mxu2 %vm1874_vm5, %v5938_v59 }
 0x796   : > { %v5967_v9 = vpop.f32.mrf.mxu2 }
 0x797   : > { %v5968_v37 = vadd.f32 %v6604_v6, %v5967_v9 }
 0x799   : > { %v5970_v30 = vmul.f32 %v5968_v37, %v5968_v37 }
 0x79b   : > { %v5972_v44 = vsel %vm5971_vm7, %v5970_v30, 0.0 }
 0x79c   : > { %5973 = vadd.xlane.f32.xlu2 %v5972_v44 }
 0x80f   : > { %v5974_v7 = vpop.xlane.xlu2 %5973 }
 0x810   : > { %v5976_v29 = vsel %vm5975_vm4, %v5974_v7, 0.0 }
 0x811   : > { %v5977_v18 = vrot.slane %v5976_v29, 4 }
 0x813   : > { %v5978_v10 = vadd.f32 %v5977_v18, %v5976_v29 }
 0x815   : > { %v5979_v56 = vrot.slane %v5978_v10, 2 }
 0x817   : > { %v5980_v43 = vadd.f32 %v5979_v56, %v5978_v10 }
 0x819   : > { %v5981_v60 = vrot.slane %v5980_v43, 1 }
 0x81b   : > { %v5982_v39 = vadd.f32 %v5981_v60, %v5980_v43 }
 0x81d   : > { %v5983_v20 = vmax.f32 %v5982_v39, 1e-24 }
 0x81f   : > { %6605 = vrsqrt.f32 %v5983_v20  ;;  %vm5990_vm0 = vweird.f32 %v5983_v20 }
 0x825   : > { %v6606_v47 = vpop.eup %6605 }
 0x826   : > { %v5985_v11 = vmul.f32 %v6606_v47, %v5983_v20  ;;  %vm5991_vm5 = vweird.f32 %v6606_v47 }
 0x827   : > { %vm5992_vm6 = vmor %vm5990_vm0, %vm5991_vm5 }
 0x828   : > { %v5986_v23 = vmul.f32 %v6606_v47, %v5985_v11 }
 0x82a   : > { %v5987_v8 = vmul.f32 0.5, %v5986_v23 }
 0x82c   : > { %v5988_v12 = vsub.f32 1.5, %v5987_v8 }
 0x82e   : > { %v5989_v24 = vmul.f32 %v6606_v47, %v5988_v12 }
 0x830   : > { %v5993_v49 = vsel %vm5992_vm6, %v6606_v47, %v5989_v24 }
 0x831   : > { %v5994_v28 = vmul.f32 %v5993_v49, %v5968_v37 }
 0x833   : > { %5995 = vst.msk [vmem:[%s330_s29] sm:$0xf] %vm5971_vm7, %v5994_v28 }
 0x834 PF: > { %s19_s30 = sadd.s32 1, %s6625_s30  }
 0x835   : > { %p16_p4 = scmp.ge.s32.totalorder %s19_s30, 4  }
 0x837   :  { %18 = sbr.rel (!%p16_p4) target bundleno = 1 (0x1), region = 88 }

</bundles_post_ra>
